<compile_context>
chip_gen: v5e
topology: v5e:2x2
jax: 0.10.0
libtpu: 0.0.40
codegen_flags: <defaults>
</compile_context>

<pallas_src>
import numpy as np
import jax
import jax.numpy as jnp
from jax import lax
from jax.experimental import pallas as pl
from jax.experimental.pallas import tpu as pltpu

# ----------------------------- small config (scaled-down LMBN_r) ---------------------
B = 2
IMG_H, IMG_W = 32, 16          # re-id style tall input
C_STEM = 64                    # stem width (resnet conv1 is 64)
C_BACK = 128                   # backbone output width (stands for 1024)
C_FEAT = 128                   # branch output width (stands for 2048)
N_CH = 2
CHS = C_FEAT // N_CH           # 2048 // n_ch analogue
FEATS = 64                     # args.feats
F_PAD = 128                    # lane-dense padded feature width of the head output slab

# geometry of the abbreviated trunk (3x3 convs, PyTorch-style padding=1)
H1, W1 = IMG_H // 2, IMG_W // 2      # 16, 8   stem out (stride 2)
H2, W2 = H1 // 2, W1 // 2            # 8, 4    stage out (stride 2)
H3, W3 = H2 // 2, W2 // 2            # 4, 2    conv4-global out (stride 2)
R1 = B * H1 * W1                     # 256
R2 = B * H2 * W2                     # 64
R3 = B * H3 * W3                     # 16
SLAB_ROWS = ((7 * B + 7) // 8) * 8   # 16 (7 features x B rows, padded to sublane mult)


def _fs(shape):
    """Full-array BlockSpec (block == whole array) for grid=(1,)."""
    zeros = (0,) * len(shape)
    return pl.BlockSpec(shape, lambda i, zeros=zeros: zeros)


# ----------------------------- host-side helpers (outside Pallas) --------------------
def _im2col(x, ksz, stride, pad):
    """(B,H,W,C) -> (B*Ho*Wo, ksz*ksz*C), feature order (dh, dw, c).  XLA glue, used
    only on the raw input (stem) and by the pure-JAX reference."""
    b, h, w, c = x.shape
    xp = jnp.pad(x, ((0, 0), (pad, pad), (pad, pad), (0, 0)))
    ho = (h + 2 * pad - ksz) // stride + 1
    wo = (w + 2 * pad - ksz) // stride + 1
    cols = []
    for dh in range(ksz):
        for dw in range(ksz):
            cols.append(lax.slice(
                xp, (0, dh, dw, 0),
                (b, dh + (ho - 1) * stride + 1, dw + (wo - 1) * stride + 1, c),
                (1, stride, stride, 1)))
    p = jnp.stack(cols, axis=3)                       # (B, Ho, Wo, k*k, C)
    return p.reshape(b * ho * wo, ksz * ksz * c)


def _gather_mats(bsz, h, w, ksz, stride, pad):
    """One-hot gather matrices S[k] (M_out, R_in): S[k] @ Xflat picks the input row of
    kernel tap k for every output position (zero rows where the tap is padding)."""
    ho = (h + 2 * pad - ksz) // stride + 1
    wo = (w + 2 * pad - ksz) // stride + 1
    s = np.zeros((ksz * ksz, bsz * ho * wo, bsz * h * w), np.float32)
    for b in range(bsz):
        for oh in range(ho):
            for ow in range(wo):
                m = (b * ho + oh) * wo + ow
                for dh in range(ksz):
                    for dw in range(ksz):
                        ih = oh * stride + dh - pad
                        iw = ow * stride + dw - pad
                        if 0 <= ih < h and 0 <= iw < w:
                            s[dh * ksz + dw, m, (b * h + ih) * w + iw] = 1.0
    return jnp.asarray(s, jnp.bfloat16)


# ----------------------------- the single fused Pallas kernel ------------------------
def _lmbn_fused_kernel(stem_p_ref, stem_w_ref, stem_b_ref,
                       s_stage_ref, stage_w_ref, stage_b_ref,
                       c3_w_ref, c3_b_ref,
                       s_c4g_ref, c4g_w_ref, c4g_b_ref,
                       s_c4pc_ref, c4p_w_ref, c4p_b_ref,
                       c4c_w_ref, c4c_b_ref,
                       dw1_ref, db1_ref, dw2_ref, db2_ref,
                       red_w_ref, red_b_ref, sh_w_ref, sh_b_ref,
                       ch_s_ref, ch_b_ref,
                       o_ref):
    f32, bf16 = jnp.float32, jnp.bfloat16

    def mm(a, w, b):
        return jnp.dot(a.astype(bf16), w, preferred_element_type=f32) + b

    def conv_s(x, s_ref, w_ref, b_ref, cout):
        # implicit 3x3 conv:  z = x @ W_all  (R_in, 9*cout), then sum of nine one-hot
        # row-gather matmuls; stride & SAME/pad-1 handled by the gather matrices.
        z = jnp.dot(x.astype(bf16), w_ref[...], preferred_element_type=f32)
        acc = None
        for k in range(9):
            zk = z[:, k * cout:(k + 1) * cout].astype(bf16)
            t = jnp.dot(s_ref[k], zk, preferred_element_type=f32)
            acc = t if acc is None else acc + t
        return jnp.maximum(acc + b_ref[...], 0.0)

    # ---- backbone (abbreviated resnet conv1..layer3[0]) -----------------------------
    x1 = jnp.maximum(mm(stem_p_ref[...], stem_w_ref[...], stem_b_ref[...]), 0.0)  # (R1,64)
    x2 = conv_s(x1, s_stage_ref, stage_w_ref, stage_b_ref, C_BACK)                # (R2,128)

    # ---- three per-branch conv3 (1x1, layer3[1:] stand-ins) fused along N -----------
    y3 = jnp.maximum(mm(x2, c3_w_ref[...], c3_b_ref[...]), 0.0)                   # (R2,384)
    glo3 = y3[:, 0:C_BACK]
    par3 = y3[:, C_BACK:2 * C_BACK]
    cha3 = y3[:, 2 * C_BACK:3 * C_BACK]

    # ---- conv4: global (stride 2) / partial & channel (stride 1, shared gathers) ----
    glo = conv_s(glo3, s_c4g_ref, c4g_w_ref, c4g_b_ref, C_FEAT)                   # (R3,128)
    par = conv_s(par3, s_c4pc_ref, c4p_w_ref, c4p_b_ref, C_FEAT)                  # (R2,128)
    cha = conv_s(cha3, s_c4pc_ref, c4c_w_ref, c4c_b_ref, C_FEAT)                  # (R2,128)

    # ---- BatchFeatureErase_Top bottleneck (BatchDropTop == identity at eval) --------
    mid = jnp.maximum(mm(glo, dw1_ref[...], db1_ref[...]), 0.0)                   # (R3,32)
    feat = jnp.maximum(mm(mid, dw2_ref[...], db2_ref[...]) + glo, 0.0)            # (R3,128)

    # ---- poolings (glo_drop == glo at eval) ------------------------------------------
    sp3, sp2 = H3 * W3, H2 * W2
    glo_p = jnp.max(feat.reshape(B, sp3, C_FEAT), axis=1)                         # (B,128)
    par3d = par.reshape(B, sp2, C_FEAT)
    g_par = jnp.max(par3d, axis=1)                                                # (B,128)
    p_top = jnp.mean(par3d[:, :sp2 // 2, :], axis=1)                              # (B,128)
    p_bot = jnp.mean(par3d[:, sp2 // 2:, :], axis=1)                              # (B,128)
    cha_p = jnp.max(cha.reshape(B, sp2, C_FEAT), axis=1)                          # (B,128)

    # ---- five shared BNNeck3 reductions (deepcopies) as one matmul ------------------
    pooled = jnp.concatenate([glo_p, glo_p, g_par, p_top, p_bot], axis=0)         # (5B,128)
    after = mm(pooled, red_w_ref[...], red_b_ref[...])                            # (5B,128)

    # ---- channel chunks -> shared 1x1 conv -> two channel BNNecks (row-stacked) -----
    c_stack = jnp.concatenate([cha_p[:, :CHS], cha_p[:, CHS:]], axis=0)           # (2B,64)
    ych = jnp.maximum(mm(c_stack, sh_w_ref[...], sh_b_ref[...]), 0.0)             # (2B,128)
    fch = ych * ch_s_ref[...] + ch_b_ref[...]                                     # (2B,128)

    rows = [after, fch]
    if SLAB_ROWS > 7 * B:
        rows.append(jnp.zeros((SLAB_ROWS - 7 * B, F_PAD), f32))
    o_ref[...] = jnp.concatenate(rows, axis=0)                                    # (16,128)
    # classifier score matmuls intentionally skipped (discarded on the eval path)


# ----------------------------- forward wrapper ---------------------------------------
def lmbn_r_forward(params, x_nchw):
    p = params
    x = jnp.transpose(x_nchw, (0, 2, 3, 1))                       # NCHW -> NHWC
    stem_p = _im2col(x, 3, 2, 1).astype(jnp.bfloat16)             # (R1, 27) raw-input patches

    ins = (stem_p, p["stem_w"], p["stem_b"],
           p["s_stage"], p["stage_w"], p["stage_b"],
           p["c3_w"], p["c3_b"],
           p["s_c4g"], p["c4g_w"], p["c4g_b"],
           p["s_c4pc"], p["c4p_w"], p["c4p_b"], p["c4c_w"], p["c4c_b"],
           p["drop_w1"], p["drop_b1"], p["drop_w2"], p["drop_b2"],
           p["red_w"], p["red_b"], p["sh_w"], p["sh_b"],
           p["ch_s"], p["ch_b"])

    slab = pl.pallas_call(
        _lmbn_fused_kernel,
        out_shape=jax.ShapeDtypeStruct((SLAB_ROWS, F_PAD), jnp.float32),
        grid=(1,),
        in_specs=[_fs(a.shape) for a in ins],
        out_specs=_fs((SLAB_ROWS, F_PAD)),
        compiler_params=pltpu.CompilerParams(dimension_semantics=("arbitrary",)),
    )(*ins)

    # slab rows: [f_glo, f_glo_drop, f_p0, f_p1, f_p2, f_c0, f_c1] x B, lanes padded.
    fea = slab[:7 * B, :FEATS].reshape(7, B, FEATS)
    return jnp.transpose(fea, (1, 2, 0))                          # (B, feats, 7)


# ----------------------------- deterministic parameter init --------------------------
def _kaiming(key, shape, fan_in):
    return jax.random.normal(key, shape, jnp.float32) * np.sqrt(2.0 / fan_in)


def _bn_sb(key, c):
    k1, k2 = jax.random.split(key)
    s = 1.0 + 0.1 * jax.random.normal(k1, (c,), jnp.float32)
    b = 0.1 * jax.random.normal(k2, (c,), jnp.float32)
    return s, b


def _conv_folded(key, ksz, cin, cout):
    k1, k2 = jax.random.split(key)
    w = _kaiming(k1, (ksz, ksz, cin, cout), ksz * ksz * cin)
    s, b = _bn_sb(k2, cout)
    return w * s, b                                   # eval-mode BN scale folded into W


def _sigma_fold(wf):
    # (k,k,cin,cout) -> (cin, 9*cout); column block k=(dh*3+dw) == w[dh,dw]
    k, _, cin, cout = wf.shape
    return jnp.transpose(wf, (2, 0, 1, 3)).reshape(cin, k * k * cout)


def _im2col_fold(wf):
    k, _, cin, cout = wf.shape
    return wf.reshape(k * k * cin, cout)


def init_params(key):
    ks = jax.random.split(key, 12)
    p = {}

    # implicit-GEMM one-hot gather matrices (model constants, from geometry only)
    p["s_stage"] = _gather_mats(B, H1, W1, 3, 2, 1)   # (9, R2, R1)
    p["s_c4g"] = _gather_mats(B, H2, W2, 3, 2, 1)     # (9, R3, R2)
    p["s_c4pc"] = _gather_mats(B, H2, W2, 3, 1, 1)    # (9, R2, R2)

    wf, b = _conv_folded(ks[0], 3, 3, C_STEM)
    p["stem_w"] = _im2col_fold(wf).astype(jnp.bfloat16)
    p["stem_b"] = b.reshape(1, -1)

    wf, b = _conv_folded(ks[1], 3, C_STEM, C_BACK)
    p["stage_w"] = _sigma_fold(wf).astype(jnp.bfloat16)
    p["stage_w_ref"] = _im2col_fold(wf).astype(jnp.bfloat16)
    p["stage_b"] = b.reshape(1, -1)

    c3w, c3b = [], []
    for i in range(3):                                # three per-branch conv3 stand-ins
        wf, b = _conv_folded(jax.random.fold_in(ks[2], i), 1, C_BACK, C_BACK)
        c3w.append(wf.reshape(C_BACK, C_BACK))
        c3b.append(b)
    p["c3_w"] = jnp.concatenate(c3w, axis=1).astype(jnp.bfloat16)   # (128, 384)
    p["c3_b"] = jnp.concatenate(c3b).reshape(1, -1)

    for name, k in (("c4g", ks[3]), ("c4p", ks[4]), ("c4c", ks[5])):
        wf, b = _conv_folded(k, 3, C_BACK, C_FEAT)
        p[name + "_w"] = _sigma_fold(wf).astype(jnp.bfloat16)        # (128, 1152)
        p[name + "_w_ref"] = _im2col_fold(wf).astype(jnp.bfloat16)   # (1152, 128)
        p[name + "_b"] = b.reshape(1, -1)

    # BatchFeatureErase_Top Bottleneck(2048,512) analogue (2 matmuls + residual)
    k1, k2 = jax.random.split(ks[6])
    w1 = _kaiming(k1, (C_FEAT, C_FEAT // 4), C_FEAT)
    s1, b1 = _bn_sb(jax.random.fold_in(k1, 1), C_FEAT // 4)
    w2 = _kaiming(k2, (C_FEAT // 4, C_FEAT), C_FEAT // 4)
    s2, b2 = _bn_sb(jax.random.fold_in(k2, 1), C_FEAT)
    p["drop_w1"], p["drop_b1"] = (w1 * s1).astype(jnp.bfloat16), b1.reshape(1, -1)
    p["drop_w2"], p["drop_b2"] = (w2 * s2).astype(jnp.bfloat16), b2.reshape(1, -1)

    # shared BNNeck3 reduction (reduction_0..3/_drop are deepcopies); lane-padded 64->128
    wr = _kaiming(ks[7], (C_FEAT, FEATS), C_FEAT)
    sr, br = _bn_sb(ks[8], FEATS)
    red_w = jnp.zeros((C_FEAT, F_PAD), jnp.float32).at[:, :FEATS].set(wr * sr)
    red_b = jnp.zeros((1, F_PAD), jnp.float32).at[0, :FEATS].set(br)
    p["red_w"], p["red_b"] = red_w.astype(jnp.bfloat16), red_b

    # shared channel 1x1 conv (+BN+ReLU); lane-padded 64->128
    wsh = _kaiming(ks[9], (CHS, FEATS), CHS)
    ssh, bsh = _bn_sb(jax.random.fold_in(ks[9], 1), FEATS)
    sh_w = jnp.zeros((CHS, F_PAD), jnp.float32).at[:, :FEATS].set(wsh * ssh)
    sh_b = jnp.zeros((1, F_PAD), jnp.float32).at[0, :FEATS].set(bsh)
    p["sh_w"], p["sh_b"] = sh_w.astype(jnp.bfloat16), sh_b

    # channel BNNeck BN affine params, one row per (chunk, batch) of the stacked layout
    s0, b0 = _bn_sb(ks[10], FEATS)
    s1c, b1c = _bn_sb(ks[11], FEATS)
    ch_s = jnp.zeros((2 * B, F_PAD), jnp.float32).at[:B, :FEATS].set(s0).at[B:, :FEATS].set(s1c)
    ch_b = jnp.zeros((2 * B, F_PAD), jnp.float32).at[:B, :FEATS].set(b0).at[B:, :FEATS].set(b1c)
    p["ch_s"], p["ch_b"] = ch_s, ch_b
    return p


# ----------------------------- pure-JAX (XLA) reference for self-check ---------------
def lmbn_r_reference(p, x_nchw):
    bf16 = jnp.bfloat16

    def mm(a, w, b):
        return jnp.dot(a.astype(bf16), w, preferred_element_type=jnp.float32) + b

    x = jnp.transpose(x_nchw, (0, 2, 3, 1))
    x1 = jnp.maximum(mm(_im2col(x, 3, 2, 1), p["stem_w"], p["stem_b"]), 0.0)
    x1 = x1.reshape(B, H1, W1, C_STEM)
    x2 = jnp.maximum(mm(_im2col(x1, 3, 2, 1), p["stage_w_ref"], p["stage_b"]), 0.0)
    y3 = jnp.maximum(mm(x2, p["c3_w"], p["c3_b"]), 0.0)
    glo3 = y3[:, :C_BACK].reshape(B, H2, W2, C_BACK)
    par3 = y3[:, C_BACK:2 * C_BACK].reshape(B, H2, W2, C_BACK)
    cha3 = y3[:, 2 * C_BACK:].reshape(B, H2, W2, C_BACK)
    glo = jnp.maximum(mm(_im2col(glo3, 3, 2, 1), p["c4g_w_ref"], p["c4g_b"]), 0.0)
    par = jnp.maximum(mm(_im2col(par3, 3, 1, 1), p["c4p_w_ref"], p["c4p_b"]), 0.0)
    cha = jnp.maximum(mm(_im2col(cha3, 3, 1, 1), p["c4c_w_ref"], p["c4c_b"]), 0.0)

    mid = jnp.maximum(mm(glo, p["drop_w1"], p["drop_b1"]), 0.0)
    feat = jnp.maximum(mm(mid, p["drop_w2"], p["drop_b2"]) + glo, 0.0)

    glo_p = jnp.max(feat.reshape(B, H3 * W3, C_FEAT), axis=1)
    par3d = par.reshape(B, H2 * W2, C_FEAT)
    g_par = jnp.max(par3d, axis=1)
    p_top = jnp.mean(par3d[:, :H2 * W2 // 2, :], axis=1)
    p_bot = jnp.mean(par3d[:, H2 * W2 // 2:, :], axis=1)
    cha_p = jnp.max(cha.reshape(B, H2 * W2, C_FEAT), axis=1)

    red_w, red_b = p["red_w"][:, :FEATS], p["red_b"][:, :FEATS]
    f_glo = mm(glo_p, red_w, red_b)
    f_p0 = mm(g_par, red_w, red_b)
    f_p1 = mm(p_top, red_w, red_b)
    f_p2 = mm(p_bot, red_w, red_b)
    sh_w, sh_b = p["sh_w"][:, :FEATS], p["sh_b"][:, :FEATS]
    c0 = jnp.maximum(mm(cha_p[:, :CHS], sh_w, sh_b), 0.0)
    c1 = jnp.maximum(mm(cha_p[:, CHS:], sh_w, sh_b), 0.0)
    f_c0 = c0 * p["ch_s"][0, :FEATS] + p["ch_b"][0, :FEATS]
    f_c1 = c1 * p["ch_s"][B, :FEATS] + p["ch_b"][B, :FEATS]
    # f_glo_drop == f_glo at eval (BatchDropTop identity; reduction_drop is a deepcopy)
    return jnp.stack([f_glo, f_glo, f_p0, f_p1, f_p2, f_c0, f_c1], axis=2)


if __name__ == "__main__":
    key = jax.random.PRNGKey(0)
    kx, kp = jax.random.split(key)
    x = jax.random.normal(kx, (B, 3, IMG_H, IMG_W), jnp.float32)   # NCHW like PyTorch
    params = init_params(kp)

    out = jax.block_until_ready(jax.jit(lmbn_r_forward)(params, x))
    assert out.shape == (B, FEATS, 7), out.shape
    assert bool(jnp.all(jnp.isfinite(out)))

    ref = jax.block_until_ready(jax.jit(lmbn_r_reference)(params, x))
    num = jnp.sqrt(jnp.sum((out - ref) ** 2))
    den = jnp.sqrt(jnp.sum(ref ** 2)) + 1e-6
    rel = float(num / den)
    assert rel < 0.1, f"relative error vs XLA reference too large: {rel}"
    print("KERNEL_OK")
</pallas_src>

<mosaic_0001>
module attributes {stable_mosaic.version = 11 : i64} {
  func.func @_lmbn_fused_kernel(%arg0: i32, %arg1: memref<256x27xbf16, #tpu.memory_space<vmem>>, %arg2: memref<27x64xbf16, #tpu.memory_space<vmem>>, %arg3: memref<1x64xf32, #tpu.memory_space<vmem>>, %arg4: memref<9x64x256xbf16, #tpu.memory_space<vmem>>, %arg5: memref<64x1152xbf16, #tpu.memory_space<vmem>>, %arg6: memref<1x128xf32, #tpu.memory_space<vmem>>, %arg7: memref<128x384xbf16, #tpu.memory_space<vmem>>, %arg8: memref<1x384xf32, #tpu.memory_space<vmem>>, %arg9: memref<9x16x64xbf16, #tpu.memory_space<vmem>>, %arg10: memref<128x1152xbf16, #tpu.memory_space<vmem>>, %arg11: memref<1x128xf32, #tpu.memory_space<vmem>>, %arg12: memref<9x64x64xbf16, #tpu.memory_space<vmem>>, %arg13: memref<128x1152xbf16, #tpu.memory_space<vmem>>, %arg14: memref<1x128xf32, #tpu.memory_space<vmem>>, %arg15: memref<128x1152xbf16, #tpu.memory_space<vmem>>, %arg16: memref<1x128xf32, #tpu.memory_space<vmem>>, %arg17: memref<128x32xbf16, #tpu.memory_space<vmem>>, %arg18: memref<1x32xf32, #tpu.memory_space<vmem>>, %arg19: memref<32x128xbf16, #tpu.memory_space<vmem>>, %arg20: memref<1x128xf32, #tpu.memory_space<vmem>>, %arg21: memref<128x128xbf16, #tpu.memory_space<vmem>>, %arg22: memref<1x128xf32, #tpu.memory_space<vmem>>, %arg23: memref<64x128xbf16, #tpu.memory_space<vmem>>, %arg24: memref<1x128xf32, #tpu.memory_space<vmem>>, %arg25: memref<4x128xf32, #tpu.memory_space<vmem>>, %arg26: memref<4x128xf32, #tpu.memory_space<vmem>>, %arg27: memref<16x128xf32, #tpu.memory_space<vmem>>) attributes {dimension_semantics = [#tpu.dimension_semantics<arbitrary>], iteration_bounds = array<i64: 1>, scalar_prefetch = 0 : i64, scratch_operands = 0 : i64, tpu.core_type = #tpu.core_type<tc>, window_params = [{pipeline_mode = #tpu.pipeline_mode<synchronous>, transform_indices = @transform_0, window_bounds = array<i64: 256, 27>}, {pipeline_mode = #tpu.pipeline_mode<synchronous>, transform_indices = @transform_1, window_bounds = array<i64: 27, 64>}, {pipeline_mode = #tpu.pipeline_mode<synchronous>, transform_indices = @transform_2, window_bounds = array<i64: 1, 64>}, {pipeline_mode = #tpu.pipeline_mode<synchronous>, transform_indices = @transform_3, window_bounds = array<i64: 9, 64, 256>}, {pipeline_mode = #tpu.pipeline_mode<synchronous>, transform_indices = @transform_4, window_bounds = array<i64: 64, 1152>}, {pipeline_mode = #tpu.pipeline_mode<synchronous>, transform_indices = @transform_5, window_bounds = array<i64: 1, 128>}, {pipeline_mode = #tpu.pipeline_mode<synchronous>, transform_indices = @transform_6, window_bounds = array<i64: 128, 384>}, {pipeline_mode = #tpu.pipeline_mode<synchronous>, transform_indices = @transform_7, window_bounds = array<i64: 1, 384>}, {pipeline_mode = #tpu.pipeline_mode<synchronous>, transform_indices = @transform_8, window_bounds = array<i64: 9, 16, 64>}, {pipeline_mode = #tpu.pipeline_mode<synchronous>, transform_indices = @transform_9, window_bounds = array<i64: 128, 1152>}, {pipeline_mode = #tpu.pipeline_mode<synchronous>, transform_indices = @transform_10, window_bounds = array<i64: 1, 128>}, {pipeline_mode = #tpu.pipeline_mode<synchronous>, transform_indices = @transform_11, window_bounds = array<i64: 9, 64, 64>}, {pipeline_mode = #tpu.pipeline_mode<synchronous>, transform_indices = @transform_12, window_bounds = array<i64: 128, 1152>}, {pipeline_mode = #tpu.pipeline_mode<synchronous>, transform_indices = @transform_13, window_bounds = array<i64: 1, 128>}, {pipeline_mode = #tpu.pipeline_mode<synchronous>, transform_indices = @transform_14, window_bounds = array<i64: 128, 1152>}, {pipeline_mode = #tpu.pipeline_mode<synchronous>, transform_indices = @transform_15, window_bounds = array<i64: 1, 128>}, {pipeline_mode = #tpu.pipeline_mode<synchronous>, transform_indices = @transform_16, window_bounds = array<i64: 128, 32>}, {pipeline_mode = #tpu.pipeline_mode<synchronous>, transform_indices = @transform_17, window_bounds = array<i64: 1, 32>}, {pipeline_mode = #tpu.pipeline_mode<synchronous>, transform_indices = @transform_18, window_bounds = array<i64: 32, 128>}, {pipeline_mode = #tpu.pipeline_mode<synchronous>, transform_indices = @transform_19, window_bounds = array<i64: 1, 128>}, {pipeline_mode = #tpu.pipeline_mode<synchronous>, transform_indices = @transform_20, window_bounds = array<i64: 128, 128>}, {pipeline_mode = #tpu.pipeline_mode<synchronous>, transform_indices = @transform_21, window_bounds = array<i64: 1, 128>}, {pipeline_mode = #tpu.pipeline_mode<synchronous>, transform_indices = @transform_22, window_bounds = array<i64: 64, 128>}, {pipeline_mode = #tpu.pipeline_mode<synchronous>, transform_indices = @transform_23, window_bounds = array<i64: 1, 128>}, {pipeline_mode = #tpu.pipeline_mode<synchronous>, transform_indices = @transform_24, window_bounds = array<i64: 4, 128>}, {pipeline_mode = #tpu.pipeline_mode<synchronous>, transform_indices = @transform_25, window_bounds = array<i64: 4, 128>}, {pipeline_mode = #tpu.pipeline_mode<synchronous>, transform_indices = @transform_26, window_bounds = array<i64: 16, 128>}]} {
    %c0 = arith.constant 0 : index
    %c0_0 = arith.constant 0 : index
    %0 = vector.load %arg1[%c0, %c0_0] : memref<256x27xbf16, #tpu.memory_space<vmem>>, vector<256x27xbf16>
    %c0_1 = arith.constant 0 : index
    %c0_2 = arith.constant 0 : index
    %1 = vector.load %arg2[%c0_1, %c0_2] : memref<27x64xbf16, #tpu.memory_space<vmem>>, vector<27x64xbf16>
    %c0_3 = arith.constant 0 : index
    %c0_4 = arith.constant 0 : index
    %2 = vector.load %arg3[%c0_3, %c0_4] : memref<1x64xf32, #tpu.memory_space<vmem>>, vector<1x64xf32>
    %cst = arith.constant dense<0.000000e+00> : vector<256x64xf32>
    %3 = tpu.matmul %0, %1, %cst {dimension_numbers = #tpu.dot_dimension_numbers<[1], [0], [0], [1], [0, 0, 1, 1], [], []>} : vector<256x27xbf16>, vector<27x64xbf16>, vector<256x64xf32> -> vector<256x64xf32>
    %4 = vector.broadcast %2 : vector<1x64xf32> to vector<256x64xf32>
    %5 = arith.addf %3, %4 : vector<256x64xf32>
    %cst_5 = arith.constant 0.000000e+00 : f32
    %6 = vector.broadcast %cst_5 : f32 to vector<256x64xf32>
    %7 = arith.maximumf %5, %6 : vector<256x64xf32>
    %8 = arith.truncf %7 : vector<256x64xf32> to vector<256x64xbf16>
    %c0_6 = arith.constant 0 : index
    %c0_7 = arith.constant 0 : index
    %9 = vector.load %arg5[%c0_6, %c0_7] : memref<64x1152xbf16, #tpu.memory_space<vmem>>, vector<64x1152xbf16>
    %cst_8 = arith.constant dense<0.000000e+00> : vector<256x1152xf32>
    %10 = tpu.matmul %8, %9, %cst_8 {dimension_numbers = #tpu.dot_dimension_numbers<[1], [0], [0], [1], [0, 0, 1, 1], [], []>} : vector<256x64xbf16>, vector<64x1152xbf16>, vector<256x1152xf32> -> vector<256x1152xf32>
    %11 = vector.extract_strided_slice %10 {offsets = [0, 0], sizes = [256, 128], strides = [1, 1]} : vector<256x1152xf32> to vector<256x128xf32>
    %12 = arith.truncf %11 : vector<256x128xf32> to vector<256x128xbf16>
    %c0_9 = arith.constant 0 : index
    %c0_10 = arith.constant 0 : index
    %c0_11 = arith.constant 0 : index
    %13 = vector.load %arg4[%c0_9, %c0_10, %c0_11] : memref<9x64x256xbf16, #tpu.memory_space<vmem>>, vector<1x64x256xbf16>
    %14 = vector.shape_cast %13 : vector<1x64x256xbf16> to vector<64x256xbf16>
    %cst_12 = arith.constant dense<0.000000e+00> : vector<64x128xf32>
    %15 = tpu.matmul %14, %12, %cst_12 {dimension_numbers = #tpu.dot_dimension_numbers<[1], [0], [0], [1], [0, 0, 1, 1], [], []>} : vector<64x256xbf16>, vector<256x128xbf16>, vector<64x128xf32> -> vector<64x128xf32>
    %16 = vector.extract_strided_slice %10 {offsets = [0, 128], sizes = [256, 128], strides = [1, 1]} : vector<256x1152xf32> to vector<256x128xf32>
    %17 = arith.truncf %16 : vector<256x128xf32> to vector<256x128xbf16>
    %c1 = arith.constant 1 : index
    %c0_13 = arith.constant 0 : index
    %c0_14 = arith.constant 0 : index
    %18 = vector.load %arg4[%c1, %c0_13, %c0_14] : memref<9x64x256xbf16, #tpu.memory_space<vmem>>, vector<1x64x256xbf16>
    %19 = vector.shape_cast %18 : vector<1x64x256xbf16> to vector<64x256xbf16>
    %cst_15 = arith.constant dense<0.000000e+00> : vector<64x128xf32>
    %20 = tpu.matmul %19, %17, %cst_15 {dimension_numbers = #tpu.dot_dimension_numbers<[1], [0], [0], [1], [0, 0, 1, 1], [], []>} : vector<64x256xbf16>, vector<256x128xbf16>, vector<64x128xf32> -> vector<64x128xf32>
    %21 = arith.addf %15, %20 : vector<64x128xf32>
    %22 = vector.extract_strided_slice %10 {offsets = [0, 256], sizes = [256, 128], strides = [1, 1]} : vector<256x1152xf32> to vector<256x128xf32>
    %23 = arith.truncf %22 : vector<256x128xf32> to vector<256x128xbf16>
    %c2 = arith.constant 2 : index
    %c0_16 = arith.constant 0 : index
    %c0_17 = arith.constant 0 : index
    %24 = vector.load %arg4[%c2, %c0_16, %c0_17] : memref<9x64x256xbf16, #tpu.memory_space<vmem>>, vector<1x64x256xbf16>
    %25 = vector.shape_cast %24 : vector<1x64x256xbf16> to vector<64x256xbf16>
    %cst_18 = arith.constant dense<0.000000e+00> : vector<64x128xf32>
    %26 = tpu.matmul %25, %23, %cst_18 {dimension_numbers = #tpu.dot_dimension_numbers<[1], [0], [0], [1], [0, 0, 1, 1], [], []>} : vector<64x256xbf16>, vector<256x128xbf16>, vector<64x128xf32> -> vector<64x128xf32>
    %27 = arith.addf %21, %26 : vector<64x128xf32>
    %28 = vector.extract_strided_slice %10 {offsets = [0, 384], sizes = [256, 128], strides = [1, 1]} : vector<256x1152xf32> to vector<256x128xf32>
    %29 = arith.truncf %28 : vector<256x128xf32> to vector<256x128xbf16>
    %c3 = arith.constant 3 : index
    %c0_19 = arith.constant 0 : index
    %c0_20 = arith.constant 0 : index
    %30 = vector.load %arg4[%c3, %c0_19, %c0_20] : memref<9x64x256xbf16, #tpu.memory_space<vmem>>, vector<1x64x256xbf16>
    %31 = vector.shape_cast %30 : vector<1x64x256xbf16> to vector<64x256xbf16>
    %cst_21 = arith.constant dense<0.000000e+00> : vector<64x128xf32>
    %32 = tpu.matmul %31, %29, %cst_21 {dimension_numbers = #tpu.dot_dimension_numbers<[1], [0], [0], [1], [0, 0, 1, 1], [], []>} : vector<64x256xbf16>, vector<256x128xbf16>, vector<64x128xf32> -> vector<64x128xf32>
    %33 = arith.addf %27, %32 : vector<64x128xf32>
    %34 = vector.extract_strided_slice %10 {offsets = [0, 512], sizes = [256, 128], strides = [1, 1]} : vector<256x1152xf32> to vector<256x128xf32>
    %35 = arith.truncf %34 : vector<256x128xf32> to vector<256x128xbf16>
    %c4 = arith.constant 4 : index
    %c0_22 = arith.constant 0 : index
    %c0_23 = arith.constant 0 : index
    %36 = vector.load %arg4[%c4, %c0_22, %c0_23] : memref<9x64x256xbf16, #tpu.memory_space<vmem>>, vector<1x64x256xbf16>
    %37 = vector.shape_cast %36 : vector<1x64x256xbf16> to vector<64x256xbf16>
    %cst_24 = arith.constant dense<0.000000e+00> : vector<64x128xf32>
    %38 = tpu.matmul %37, %35, %cst_24 {dimension_numbers = #tpu.dot_dimension_numbers<[1], [0], [0], [1], [0, 0, 1, 1], [], []>} : vector<64x256xbf16>, vector<256x128xbf16>, vector<64x128xf32> -> vector<64x128xf32>
    %39 = arith.addf %33, %38 : vector<64x128xf32>
    %40 = vector.extract_strided_slice %10 {offsets = [0, 640], sizes = [256, 128], strides = [1, 1]} : vector<256x1152xf32> to vector<256x128xf32>
    %41 = arith.truncf %40 : vector<256x128xf32> to vector<256x128xbf16>
    %c5 = arith.constant 5 : index
    %c0_25 = arith.constant 0 : index
    %c0_26 = arith.constant 0 : index
    %42 = vector.load %arg4[%c5, %c0_25, %c0_26] : memref<9x64x256xbf16, #tpu.memory_space<vmem>>, vector<1x64x256xbf16>
    %43 = vector.shape_cast %42 : vector<1x64x256xbf16> to vector<64x256xbf16>
    %cst_27 = arith.constant dense<0.000000e+00> : vector<64x128xf32>
    %44 = tpu.matmul %43, %41, %cst_27 {dimension_numbers = #tpu.dot_dimension_numbers<[1], [0], [0], [1], [0, 0, 1, 1], [], []>} : vector<64x256xbf16>, vector<256x128xbf16>, vector<64x128xf32> -> vector<64x128xf32>
    %45 = arith.addf %39, %44 : vector<64x128xf32>
    %46 = vector.extract_strided_slice %10 {offsets = [0, 768], sizes = [256, 128], strides = [1, 1]} : vector<256x1152xf32> to vector<256x128xf32>
    %47 = arith.truncf %46 : vector<256x128xf32> to vector<256x128xbf16>
    %c6 = arith.constant 6 : index
    %c0_28 = arith.constant 0 : index
    %c0_29 = arith.constant 0 : index
    %48 = vector.load %arg4[%c6, %c0_28, %c0_29] : memref<9x64x256xbf16, #tpu.memory_space<vmem>>, vector<1x64x256xbf16>
    %49 = vector.shape_cast %48 : vector<1x64x256xbf16> to vector<64x256xbf16>
    %cst_30 = arith.constant dense<0.000000e+00> : vector<64x128xf32>
    %50 = tpu.matmul %49, %47, %cst_30 {dimension_numbers = #tpu.dot_dimension_numbers<[1], [0], [0], [1], [0, 0, 1, 1], [], []>} : vector<64x256xbf16>, vector<256x128xbf16>, vector<64x128xf32> -> vector<64x128xf32>
    %51 = arith.addf %45, %50 : vector<64x128xf32>
    %52 = vector.extract_strided_slice %10 {offsets = [0, 896], sizes = [256, 128], strides = [1, 1]} : vector<256x1152xf32> to vector<256x128xf32>
    %53 = arith.truncf %52 : vector<256x128xf32> to vector<256x128xbf16>
    %c7 = arith.constant 7 : index
    %c0_31 = arith.constant 0 : index
    %c0_32 = arith.constant 0 : index
    %54 = vector.load %arg4[%c7, %c0_31, %c0_32] : memref<9x64x256xbf16, #tpu.memory_space<vmem>>, vector<1x64x256xbf16>
    %55 = vector.shape_cast %54 : vector<1x64x256xbf16> to vector<64x256xbf16>
    %cst_33 = arith.constant dense<0.000000e+00> : vector<64x128xf32>
    %56 = tpu.matmul %55, %53, %cst_33 {dimension_numbers = #tpu.dot_dimension_numbers<[1], [0], [0], [1], [0, 0, 1, 1], [], []>} : vector<64x256xbf16>, vector<256x128xbf16>, vector<64x128xf32> -> vector<64x128xf32>
    %57 = arith.addf %51, %56 : vector<64x128xf32>
    %58 = vector.extract_strided_slice %10 {offsets = [0, 1024], sizes = [256, 128], strides = [1, 1]} : vector<256x1152xf32> to vector<256x128xf32>
    %59 = arith.truncf %58 : vector<256x128xf32> to vector<256x128xbf16>
    %c8 = arith.constant 8 : index
    %c0_34 = arith.constant 0 : index
    %c0_35 = arith.constant 0 : index
    %60 = vector.load %arg4[%c8, %c0_34, %c0_35] : memref<9x64x256xbf16, #tpu.memory_space<vmem>>, vector<1x64x256xbf16>
    %61 = vector.shape_cast %60 : vector<1x64x256xbf16> to vector<64x256xbf16>
    %cst_36 = arith.constant dense<0.000000e+00> : vector<64x128xf32>
    %62 = tpu.matmul %61, %59, %cst_36 {dimension_numbers = #tpu.dot_dimension_numbers<[1], [0], [0], [1], [0, 0, 1, 1], [], []>} : vector<64x256xbf16>, vector<256x128xbf16>, vector<64x128xf32> -> vector<64x128xf32>
    %63 = arith.addf %57, %62 : vector<64x128xf32>
    %c0_37 = arith.constant 0 : index
    %c0_38 = arith.constant 0 : index
    %64 = vector.load %arg6[%c0_37, %c0_38] : memref<1x128xf32, #tpu.memory_space<vmem>>, vector<1x128xf32>
    %65 = vector.broadcast %64 : vector<1x128xf32> to vector<64x128xf32>
    %66 = arith.addf %63, %65 : vector<64x128xf32>
    %cst_39 = arith.constant 0.000000e+00 : f32
    %67 = vector.broadcast %cst_39 : f32 to vector<64x128xf32>
    %68 = arith.maximumf %66, %67 : vector<64x128xf32>
    %c0_40 = arith.constant 0 : index
    %c0_41 = arith.constant 0 : index
    %69 = vector.load %arg7[%c0_40, %c0_41] : memref<128x384xbf16, #tpu.memory_space<vmem>>, vector<128x384xbf16>
    %c0_42 = arith.constant 0 : index
    %c0_43 = arith.constant 0 : index
    %70 = vector.load %arg8[%c0_42, %c0_43] : memref<1x384xf32, #tpu.memory_space<vmem>>, vector<1x384xf32>
    %71 = arith.truncf %68 : vector<64x128xf32> to vector<64x128xbf16>
    %cst_44 = arith.constant dense<0.000000e+00> : vector<64x384xf32>
    %72 = tpu.matmul %71, %69, %cst_44 {dimension_numbers = #tpu.dot_dimension_numbers<[1], [0], [0], [1], [0, 0, 1, 1], [], []>} : vector<64x128xbf16>, vector<128x384xbf16>, vector<64x384xf32> -> vector<64x384xf32>
    %73 = vector.broadcast %70 : vector<1x384xf32> to vector<64x384xf32>
    %74 = arith.addf %72, %73 : vector<64x384xf32>
    %cst_45 = arith.constant 0.000000e+00 : f32
    %75 = vector.broadcast %cst_45 : f32 to vector<64x384xf32>
    %76 = arith.maximumf %74, %75 : vector<64x384xf32>
    %77 = vector.extract_strided_slice %76 {offsets = [0, 0], sizes = [64, 128], strides = [1, 1]} : vector<64x384xf32> to vector<64x128xf32>
    %78 = vector.extract_strided_slice %76 {offsets = [0, 128], sizes = [64, 128], strides = [1, 1]} : vector<64x384xf32> to vector<64x128xf32>
    %79 = vector.extract_strided_slice %76 {offsets = [0, 256], sizes = [64, 128], strides = [1, 1]} : vector<64x384xf32> to vector<64x128xf32>
    %80 = arith.truncf %77 : vector<64x128xf32> to vector<64x128xbf16>
    %c0_46 = arith.constant 0 : index
    %c0_47 = arith.constant 0 : index
    %81 = vector.load %arg10[%c0_46, %c0_47] : memref<128x1152xbf16, #tpu.memory_space<vmem>>, vector<128x1152xbf16>
    %cst_48 = arith.constant dense<0.000000e+00> : vector<64x1152xf32>
    %82 = tpu.matmul %80, %81, %cst_48 {dimension_numbers = #tpu.dot_dimension_numbers<[1], [0], [0], [1], [0, 0, 1, 1], [], []>} : vector<64x128xbf16>, vector<128x1152xbf16>, vector<64x1152xf32> -> vector<64x1152xf32>
    %83 = vector.extract_strided_slice %82 {offsets = [0, 0], sizes = [64, 128], strides = [1, 1]} : vector<64x1152xf32> to vector<64x128xf32>
    %84 = arith.truncf %83 : vector<64x128xf32> to vector<64x128xbf16>
    %c0_49 = arith.constant 0 : index
    %c0_50 = arith.constant 0 : index
    %c0_51 = arith.constant 0 : index
    %85 = vector.load %arg9[%c0_49, %c0_50, %c0_51] : memref<9x16x64xbf16, #tpu.memory_space<vmem>>, vector<1x16x64xbf16>
    %86 = vector.shape_cast %85 : vector<1x16x64xbf16> to vector<16x64xbf16>
    %cst_52 = arith.constant dense<0.000000e+00> : vector<16x128xf32>
    %87 = tpu.matmul %86, %84, %cst_52 {dimension_numbers = #tpu.dot_dimension_numbers<[1], [0], [0], [1], [0, 0, 1, 1], [], []>} : vector<16x64xbf16>, vector<64x128xbf16>, vector<16x128xf32> -> vector<16x128xf32>
    %88 = vector.extract_strided_slice %82 {offsets = [0, 128], sizes = [64, 128], strides = [1, 1]} : vector<64x1152xf32> to vector<64x128xf32>
    %89 = arith.truncf %88 : vector<64x128xf32> to vector<64x128xbf16>
    %c1_53 = arith.constant 1 : index
    %c0_54 = arith.constant 0 : index
    %c0_55 = arith.constant 0 : index
    %90 = vector.load %arg9[%c1_53, %c0_54, %c0_55] : memref<9x16x64xbf16, #tpu.memory_space<vmem>>, vector<1x16x64xbf16>
    %91 = vector.shape_cast %90 : vector<1x16x64xbf16> to vector<16x64xbf16>
    %cst_56 = arith.constant dense<0.000000e+00> : vector<16x128xf32>
    %92 = tpu.matmul %91, %89, %cst_56 {dimension_numbers = #tpu.dot_dimension_numbers<[1], [0], [0], [1], [0, 0, 1, 1], [], []>} : vector<16x64xbf16>, vector<64x128xbf16>, vector<16x128xf32> -> vector<16x128xf32>
    %93 = arith.addf %87, %92 : vector<16x128xf32>
    %94 = vector.extract_strided_slice %82 {offsets = [0, 256], sizes = [64, 128], strides = [1, 1]} : vector<64x1152xf32> to vector<64x128xf32>
    %95 = arith.truncf %94 : vector<64x128xf32> to vector<64x128xbf16>
    %c2_57 = arith.constant 2 : index
    %c0_58 = arith.constant 0 : index
    %c0_59 = arith.constant 0 : index
    %96 = vector.load %arg9[%c2_57, %c0_58, %c0_59] : memref<9x16x64xbf16, #tpu.memory_space<vmem>>, vector<1x16x64xbf16>
    %97 = vector.shape_cast %96 : vector<1x16x64xbf16> to vector<16x64xbf16>
    %cst_60 = arith.constant dense<0.000000e+00> : vector<16x128xf32>
    %98 = tpu.matmul %97, %95, %cst_60 {dimension_numbers = #tpu.dot_dimension_numbers<[1], [0], [0], [1], [0, 0, 1, 1], [], []>} : vector<16x64xbf16>, vector<64x128xbf16>, vector<16x128xf32> -> vector<16x128xf32>
    %99 = arith.addf %93, %98 : vector<16x128xf32>
    %100 = vector.extract_strided_slice %82 {offsets = [0, 384], sizes = [64, 128], strides = [1, 1]} : vector<64x1152xf32> to vector<64x128xf32>
    %101 = arith.truncf %100 : vector<64x128xf32> to vector<64x128xbf16>
    %c3_61 = arith.constant 3 : index
    %c0_62 = arith.constant 0 : index
    %c0_63 = arith.constant 0 : index
    %102 = vector.load %arg9[%c3_61, %c0_62, %c0_63] : memref<9x16x64xbf16, #tpu.memory_space<vmem>>, vector<1x16x64xbf16>
    %103 = vector.shape_cast %102 : vector<1x16x64xbf16> to vector<16x64xbf16>
    %cst_64 = arith.constant dense<0.000000e+00> : vector<16x128xf32>
    %104 = tpu.matmul %103, %101, %cst_64 {dimension_numbers = #tpu.dot_dimension_numbers<[1], [0], [0], [1], [0, 0, 1, 1], [], []>} : vector<16x64xbf16>, vector<64x128xbf16>, vector<16x128xf32> -> vector<16x128xf32>
    %105 = arith.addf %99, %104 : vector<16x128xf32>
    %106 = vector.extract_strided_slice %82 {offsets = [0, 512], sizes = [64, 128], strides = [1, 1]} : vector<64x1152xf32> to vector<64x128xf32>
    %107 = arith.truncf %106 : vector<64x128xf32> to vector<64x128xbf16>
    %c4_65 = arith.constant 4 : index
    %c0_66 = arith.constant 0 : index
    %c0_67 = arith.constant 0 : index
    %108 = vector.load %arg9[%c4_65, %c0_66, %c0_67] : memref<9x16x64xbf16, #tpu.memory_space<vmem>>, vector<1x16x64xbf16>
    %109 = vector.shape_cast %108 : vector<1x16x64xbf16> to vector<16x64xbf16>
    %cst_68 = arith.constant dense<0.000000e+00> : vector<16x128xf32>
    %110 = tpu.matmul %109, %107, %cst_68 {dimension_numbers = #tpu.dot_dimension_numbers<[1], [0], [0], [1], [0, 0, 1, 1], [], []>} : vector<16x64xbf16>, vector<64x128xbf16>, vector<16x128xf32> -> vector<16x128xf32>
    %111 = arith.addf %105, %110 : vector<16x128xf32>
    %112 = vector.extract_strided_slice %82 {offsets = [0, 640], sizes = [64, 128], strides = [1, 1]} : vector<64x1152xf32> to vector<64x128xf32>
    %113 = arith.truncf %112 : vector<64x128xf32> to vector<64x128xbf16>
    %c5_69 = arith.constant 5 : index
    %c0_70 = arith.constant 0 : index
    %c0_71 = arith.constant 0 : index
    %114 = vector.load %arg9[%c5_69, %c0_70, %c0_71] : memref<9x16x64xbf16, #tpu.memory_space<vmem>>, vector<1x16x64xbf16>
    %115 = vector.shape_cast %114 : vector<1x16x64xbf16> to vector<16x64xbf16>
    %cst_72 = arith.constant dense<0.000000e+00> : vector<16x128xf32>
    %116 = tpu.matmul %115, %113, %cst_72 {dimension_numbers = #tpu.dot_dimension_numbers<[1], [0], [0], [1], [0, 0, 1, 1], [], []>} : vector<16x64xbf16>, vector<64x128xbf16>, vector<16x128xf32> -> vector<16x128xf32>
    %117 = arith.addf %111, %116 : vector<16x128xf32>
    %118 = vector.extract_strided_slice %82 {offsets = [0, 768], sizes = [64, 128], strides = [1, 1]} : vector<64x1152xf32> to vector<64x128xf32>
    %119 = arith.truncf %118 : vector<64x128xf32> to vector<64x128xbf16>
    %c6_73 = arith.constant 6 : index
    %c0_74 = arith.constant 0 : index
    %c0_75 = arith.constant 0 : index
    %120 = vector.load %arg9[%c6_73, %c0_74, %c0_75] : memref<9x16x64xbf16, #tpu.memory_space<vmem>>, vector<1x16x64xbf16>
    %121 = vector.shape_cast %120 : vector<1x16x64xbf16> to vector<16x64xbf16>
    %cst_76 = arith.constant dense<0.000000e+00> : vector<16x128xf32>
    %122 = tpu.matmul %121, %119, %cst_76 {dimension_numbers = #tpu.dot_dimension_numbers<[1], [0], [0], [1], [0, 0, 1, 1], [], []>} : vector<16x64xbf16>, vector<64x128xbf16>, vector<16x128xf32> -> vector<16x128xf32>
    %123 = arith.addf %117, %122 : vector<16x128xf32>
    %124 = vector.extract_strided_slice %82 {offsets = [0, 896], sizes = [64, 128], strides = [1, 1]} : vector<64x1152xf32> to vector<64x128xf32>
    %125 = arith.truncf %124 : vector<64x128xf32> to vector<64x128xbf16>
    %c7_77 = arith.constant 7 : index
    %c0_78 = arith.constant 0 : index
    %c0_79 = arith.constant 0 : index
    %126 = vector.load %arg9[%c7_77, %c0_78, %c0_79] : memref<9x16x64xbf16, #tpu.memory_space<vmem>>, vector<1x16x64xbf16>
    %127 = vector.shape_cast %126 : vector<1x16x64xbf16> to vector<16x64xbf16>
    %cst_80 = arith.constant dense<0.000000e+00> : vector<16x128xf32>
    %128 = tpu.matmul %127, %125, %cst_80 {dimension_numbers = #tpu.dot_dimension_numbers<[1], [0], [0], [1], [0, 0, 1, 1], [], []>} : vector<16x64xbf16>, vector<64x128xbf16>, vector<16x128xf32> -> vector<16x128xf32>
    %129 = arith.addf %123, %128 : vector<16x128xf32>
    %130 = vector.extract_strided_slice %82 {offsets = [0, 1024], sizes = [64, 128], strides = [1, 1]} : vector<64x1152xf32> to vector<64x128xf32>
    %131 = arith.truncf %130 : vector<64x128xf32> to vector<64x128xbf16>
    %c8_81 = arith.constant 8 : index
    %c0_82 = arith.constant 0 : index
    %c0_83 = arith.constant 0 : index
    %132 = vector.load %arg9[%c8_81, %c0_82, %c0_83] : memref<9x16x64xbf16, #tpu.memory_space<vmem>>, vector<1x16x64xbf16>
    %133 = vector.shape_cast %132 : vector<1x16x64xbf16> to vector<16x64xbf16>
    %cst_84 = arith.constant dense<0.000000e+00> : vector<16x128xf32>
    %134 = tpu.matmul %133, %131, %cst_84 {dimension_numbers = #tpu.dot_dimension_numbers<[1], [0], [0], [1], [0, 0, 1, 1], [], []>} : vector<16x64xbf16>, vector<64x128xbf16>, vector<16x128xf32> -> vector<16x128xf32>
    %135 = arith.addf %129, %134 : vector<16x128xf32>
    %c0_85 = arith.constant 0 : index
    %c0_86 = arith.constant 0 : index
    %136 = vector.load %arg11[%c0_85, %c0_86] : memref<1x128xf32, #tpu.memory_space<vmem>>, vector<1x128xf32>
    %137 = vector.broadcast %136 : vector<1x128xf32> to vector<16x128xf32>
    %138 = arith.addf %135, %137 : vector<16x128xf32>
    %cst_87 = arith.constant 0.000000e+00 : f32
    %139 = vector.broadcast %cst_87 : f32 to vector<16x128xf32>
    %140 = arith.maximumf %138, %139 : vector<16x128xf32>
    %141 = arith.truncf %78 : vector<64x128xf32> to vector<64x128xbf16>
    %c0_88 = arith.constant 0 : index
    %c0_89 = arith.constant 0 : index
    %142 = vector.load %arg13[%c0_88, %c0_89] : memref<128x1152xbf16, #tpu.memory_space<vmem>>, vector<128x1152xbf16>
    %cst_90 = arith.constant dense<0.000000e+00> : vector<64x1152xf32>
    %143 = tpu.matmul %141, %142, %cst_90 {dimension_numbers = #tpu.dot_dimension_numbers<[1], [0], [0], [1], [0, 0, 1, 1], [], []>} : vector<64x128xbf16>, vector<128x1152xbf16>, vector<64x1152xf32> -> vector<64x1152xf32>
    %144 = vector.extract_strided_slice %143 {offsets = [0, 0], sizes = [64, 128], strides = [1, 1]} : vector<64x1152xf32> to vector<64x128xf32>
    %145 = arith.truncf %144 : vector<64x128xf32> to vector<64x128xbf16>
    %c0_91 = arith.constant 0 : index
    %c0_92 = arith.constant 0 : index
    %c0_93 = arith.constant 0 : index
    %146 = vector.load %arg12[%c0_91, %c0_92, %c0_93] : memref<9x64x64xbf16, #tpu.memory_space<vmem>>, vector<1x64x64xbf16>
    %147 = vector.shape_cast %146 : vector<1x64x64xbf16> to vector<64x64xbf16>
    %cst_94 = arith.constant dense<0.000000e+00> : vector<64x128xf32>
    %148 = tpu.matmul %147, %145, %cst_94 {dimension_numbers = #tpu.dot_dimension_numbers<[1], [0], [0], [1], [0, 0, 1, 1], [], []>} : vector<64x64xbf16>, vector<64x128xbf16>, vector<64x128xf32> -> vector<64x128xf32>
    %149 = vector.extract_strided_slice %143 {offsets = [0, 128], sizes = [64, 128], strides = [1, 1]} : vector<64x1152xf32> to vector<64x128xf32>
    %150 = arith.truncf %149 : vector<64x128xf32> to vector<64x128xbf16>
    %c1_95 = arith.constant 1 : index
    %c0_96 = arith.constant 0 : index
    %c0_97 = arith.constant 0 : index
    %151 = vector.load %arg12[%c1_95, %c0_96, %c0_97] : memref<9x64x64xbf16, #tpu.memory_space<vmem>>, vector<1x64x64xbf16>
    %152 = vector.shape_cast %151 : vector<1x64x64xbf16> to vector<64x64xbf16>
    %cst_98 = arith.constant dense<0.000000e+00> : vector<64x128xf32>
    %153 = tpu.matmul %152, %150, %cst_98 {dimension_numbers = #tpu.dot_dimension_numbers<[1], [0], [0], [1], [0, 0, 1, 1], [], []>} : vector<64x64xbf16>, vector<64x128xbf16>, vector<64x128xf32> -> vector<64x128xf32>
    %154 = arith.addf %148, %153 : vector<64x128xf32>
    %155 = vector.extract_strided_slice %143 {offsets = [0, 256], sizes = [64, 128], strides = [1, 1]} : vector<64x1152xf32> to vector<64x128xf32>
    %156 = arith.truncf %155 : vector<64x128xf32> to vector<64x128xbf16>
    %c2_99 = arith.constant 2 : index
    %c0_100 = arith.constant 0 : index
    %c0_101 = arith.constant 0 : index
    %157 = vector.load %arg12[%c2_99, %c0_100, %c0_101] : memref<9x64x64xbf16, #tpu.memory_space<vmem>>, vector<1x64x64xbf16>
    %158 = vector.shape_cast %157 : vector<1x64x64xbf16> to vector<64x64xbf16>
    %cst_102 = arith.constant dense<0.000000e+00> : vector<64x128xf32>
    %159 = tpu.matmul %158, %156, %cst_102 {dimension_numbers = #tpu.dot_dimension_numbers<[1], [0], [0], [1], [0, 0, 1, 1], [], []>} : vector<64x64xbf16>, vector<64x128xbf16>, vector<64x128xf32> -> vector<64x128xf32>
    %160 = arith.addf %154, %159 : vector<64x128xf32>
    %161 = vector.extract_strided_slice %143 {offsets = [0, 384], sizes = [64, 128], strides = [1, 1]} : vector<64x1152xf32> to vector<64x128xf32>
    %162 = arith.truncf %161 : vector<64x128xf32> to vector<64x128xbf16>
    %c3_103 = arith.constant 3 : index
    %c0_104 = arith.constant 0 : index
    %c0_105 = arith.constant 0 : index
    %163 = vector.load %arg12[%c3_103, %c0_104, %c0_105] : memref<9x64x64xbf16, #tpu.memory_space<vmem>>, vector<1x64x64xbf16>
    %164 = vector.shape_cast %163 : vector<1x64x64xbf16> to vector<64x64xbf16>
    %cst_106 = arith.constant dense<0.000000e+00> : vector<64x128xf32>
    %165 = tpu.matmul %164, %162, %cst_106 {dimension_numbers = #tpu.dot_dimension_numbers<[1], [0], [0], [1], [0, 0, 1, 1], [], []>} : vector<64x64xbf16>, vector<64x128xbf16>, vector<64x128xf32> -> vector<64x128xf32>
    %166 = arith.addf %160, %165 : vector<64x128xf32>
    %167 = vector.extract_strided_slice %143 {offsets = [0, 512], sizes = [64, 128], strides = [1, 1]} : vector<64x1152xf32> to vector<64x128xf32>
    %168 = arith.truncf %167 : vector<64x128xf32> to vector<64x128xbf16>
    %c4_107 = arith.constant 4 : index
    %c0_108 = arith.constant 0 : index
    %c0_109 = arith.constant 0 : index
    %169 = vector.load %arg12[%c4_107, %c0_108, %c0_109] : memref<9x64x64xbf16, #tpu.memory_space<vmem>>, vector<1x64x64xbf16>
    %170 = vector.shape_cast %169 : vector<1x64x64xbf16> to vector<64x64xbf16>
    %cst_110 = arith.constant dense<0.000000e+00> : vector<64x128xf32>
    %171 = tpu.matmul %170, %168, %cst_110 {dimension_numbers = #tpu.dot_dimension_numbers<[1], [0], [0], [1], [0, 0, 1, 1], [], []>} : vector<64x64xbf16>, vector<64x128xbf16>, vector<64x128xf32> -> vector<64x128xf32>
    %172 = arith.addf %166, %171 : vector<64x128xf32>
    %173 = vector.extract_strided_slice %143 {offsets = [0, 640], sizes = [64, 128], strides = [1, 1]} : vector<64x1152xf32> to vector<64x128xf32>
    %174 = arith.truncf %173 : vector<64x128xf32> to vector<64x128xbf16>
    %c5_111 = arith.constant 5 : index
    %c0_112 = arith.constant 0 : index
    %c0_113 = arith.constant 0 : index
    %175 = vector.load %arg12[%c5_111, %c0_112, %c0_113] : memref<9x64x64xbf16, #tpu.memory_space<vmem>>, vector<1x64x64xbf16>
    %176 = vector.shape_cast %175 : vector<1x64x64xbf16> to vector<64x64xbf16>
    %cst_114 = arith.constant dense<0.000000e+00> : vector<64x128xf32>
    %177 = tpu.matmul %176, %174, %cst_114 {dimension_numbers = #tpu.dot_dimension_numbers<[1], [0], [0], [1], [0, 0, 1, 1], [], []>} : vector<64x64xbf16>, vector<64x128xbf16>, vector<64x128xf32> -> vector<64x128xf32>
    %178 = arith.addf %172, %177 : vector<64x128xf32>
    %179 = vector.extract_strided_slice %143 {offsets = [0, 768], sizes = [64, 128], strides = [1, 1]} : vector<64x1152xf32> to vector<64x128xf32>
    %180 = arith.truncf %179 : vector<64x128xf32> to vector<64x128xbf16>
    %c6_115 = arith.constant 6 : index
    %c0_116 = arith.constant 0 : index
    %c0_117 = arith.constant 0 : index
    %181 = vector.load %arg12[%c6_115, %c0_116, %c0_117] : memref<9x64x64xbf16, #tpu.memory_space<vmem>>, vector<1x64x64xbf16>
    %182 = vector.shape_cast %181 : vector<1x64x64xbf16> to vector<64x64xbf16>
    %cst_118 = arith.constant dense<0.000000e+00> : vector<64x128xf32>
    %183 = tpu.matmul %182, %180, %cst_118 {dimension_numbers = #tpu.dot_dimension_numbers<[1], [0], [0], [1], [0, 0, 1, 1], [], []>} : vector<64x64xbf16>, vector<64x128xbf16>, vector<64x128xf32> -> vector<64x128xf32>
    %184 = arith.addf %178, %183 : vector<64x128xf32>
    %185 = vector.extract_strided_slice %143 {offsets = [0, 896], sizes = [64, 128], strides = [1, 1]} : vector<64x1152xf32> to vector<64x128xf32>
    %186 = arith.truncf %185 : vector<64x128xf32> to vector<64x128xbf16>
    %c7_119 = arith.constant 7 : index
    %c0_120 = arith.constant 0 : index
    %c0_121 = arith.constant 0 : index
    %187 = vector.load %arg12[%c7_119, %c0_120, %c0_121] : memref<9x64x64xbf16, #tpu.memory_space<vmem>>, vector<1x64x64xbf16>
    %188 = vector.shape_cast %187 : vector<1x64x64xbf16> to vector<64x64xbf16>
    %cst_122 = arith.constant dense<0.000000e+00> : vector<64x128xf32>
    %189 = tpu.matmul %188, %186, %cst_122 {dimension_numbers = #tpu.dot_dimension_numbers<[1], [0], [0], [1], [0, 0, 1, 1], [], []>} : vector<64x64xbf16>, vector<64x128xbf16>, vector<64x128xf32> -> vector<64x128xf32>
    %190 = arith.addf %184, %189 : vector<64x128xf32>
    %191 = vector.extract_strided_slice %143 {offsets = [0, 1024], sizes = [64, 128], strides = [1, 1]} : vector<64x1152xf32> to vector<64x128xf32>
    %192 = arith.truncf %191 : vector<64x128xf32> to vector<64x128xbf16>
    %c8_123 = arith.constant 8 : index
    %c0_124 = arith.constant 0 : index
    %c0_125 = arith.constant 0 : index
    %193 = vector.load %arg12[%c8_123, %c0_124, %c0_125] : memref<9x64x64xbf16, #tpu.memory_space<vmem>>, vector<1x64x64xbf16>
    %194 = vector.shape_cast %193 : vector<1x64x64xbf16> to vector<64x64xbf16>
    %cst_126 = arith.constant dense<0.000000e+00> : vector<64x128xf32>
    %195 = tpu.matmul %194, %192, %cst_126 {dimension_numbers = #tpu.dot_dimension_numbers<[1], [0], [0], [1], [0, 0, 1, 1], [], []>} : vector<64x64xbf16>, vector<64x128xbf16>, vector<64x128xf32> -> vector<64x128xf32>
    %196 = arith.addf %190, %195 : vector<64x128xf32>
    %c0_127 = arith.constant 0 : index
    %c0_128 = arith.constant 0 : index
    %197 = vector.load %arg14[%c0_127, %c0_128] : memref<1x128xf32, #tpu.memory_space<vmem>>, vector<1x128xf32>
    %198 = vector.broadcast %197 : vector<1x128xf32> to vector<64x128xf32>
    %199 = arith.addf %196, %198 : vector<64x128xf32>
    %cst_129 = arith.constant 0.000000e+00 : f32
    %200 = vector.broadcast %cst_129 : f32 to vector<64x128xf32>
    %201 = arith.maximumf %199, %200 : vector<64x128xf32>
    %202 = arith.truncf %79 : vector<64x128xf32> to vector<64x128xbf16>
    %c0_130 = arith.constant 0 : index
    %c0_131 = arith.constant 0 : index
    %203 = vector.load %arg15[%c0_130, %c0_131] : memref<128x1152xbf16, #tpu.memory_space<vmem>>, vector<128x1152xbf16>
    %cst_132 = arith.constant dense<0.000000e+00> : vector<64x1152xf32>
    %204 = tpu.matmul %202, %203, %cst_132 {dimension_numbers = #tpu.dot_dimension_numbers<[1], [0], [0], [1], [0, 0, 1, 1], [], []>} : vector<64x128xbf16>, vector<128x1152xbf16>, vector<64x1152xf32> -> vector<64x1152xf32>
    %205 = vector.extract_strided_slice %204 {offsets = [0, 0], sizes = [64, 128], strides = [1, 1]} : vector<64x1152xf32> to vector<64x128xf32>
    %206 = arith.truncf %205 : vector<64x128xf32> to vector<64x128xbf16>
    %c0_133 = arith.constant 0 : index
    %c0_134 = arith.constant 0 : index
    %c0_135 = arith.constant 0 : index
    %207 = vector.load %arg12[%c0_133, %c0_134, %c0_135] : memref<9x64x64xbf16, #tpu.memory_space<vmem>>, vector<1x64x64xbf16>
    %208 = vector.shape_cast %207 : vector<1x64x64xbf16> to vector<64x64xbf16>
    %cst_136 = arith.constant dense<0.000000e+00> : vector<64x128xf32>
    %209 = tpu.matmul %208, %206, %cst_136 {dimension_numbers = #tpu.dot_dimension_numbers<[1], [0], [0], [1], [0, 0, 1, 1], [], []>} : vector<64x64xbf16>, vector<64x128xbf16>, vector<64x128xf32> -> vector<64x128xf32>
    %210 = vector.extract_strided_slice %204 {offsets = [0, 128], sizes = [64, 128], strides = [1, 1]} : vector<64x1152xf32> to vector<64x128xf32>
    %211 = arith.truncf %210 : vector<64x128xf32> to vector<64x128xbf16>
    %c1_137 = arith.constant 1 : index
    %c0_138 = arith.constant 0 : index
    %c0_139 = arith.constant 0 : index
    %212 = vector.load %arg12[%c1_137, %c0_138, %c0_139] : memref<9x64x64xbf16, #tpu.memory_space<vmem>>, vector<1x64x64xbf16>
    %213 = vector.shape_cast %212 : vector<1x64x64xbf16> to vector<64x64xbf16>
    %cst_140 = arith.constant dense<0.000000e+00> : vector<64x128xf32>
    %214 = tpu.matmul %213, %211, %cst_140 {dimension_numbers = #tpu.dot_dimension_numbers<[1], [0], [0], [1], [0, 0, 1, 1], [], []>} : vector<64x64xbf16>, vector<64x128xbf16>, vector<64x128xf32> -> vector<64x128xf32>
    %215 = arith.addf %209, %214 : vector<64x128xf32>
    %216 = vector.extract_strided_slice %204 {offsets = [0, 256], sizes = [64, 128], strides = [1, 1]} : vector<64x1152xf32> to vector<64x128xf32>
    %217 = arith.truncf %216 : vector<64x128xf32> to vector<64x128xbf16>
    %c2_141 = arith.constant 2 : index
    %c0_142 = arith.constant 0 : index
    %c0_143 = arith.constant 0 : index
    %218 = vector.load %arg12[%c2_141, %c0_142, %c0_143] : memref<9x64x64xbf16, #tpu.memory_space<vmem>>, vector<1x64x64xbf16>
    %219 = vector.shape_cast %218 : vector<1x64x64xbf16> to vector<64x64xbf16>
    %cst_144 = arith.constant dense<0.000000e+00> : vector<64x128xf32>
    %220 = tpu.matmul %219, %217, %cst_144 {dimension_numbers = #tpu.dot_dimension_numbers<[1], [0], [0], [1], [0, 0, 1, 1], [], []>} : vector<64x64xbf16>, vector<64x128xbf16>, vector<64x128xf32> -> vector<64x128xf32>
    %221 = arith.addf %215, %220 : vector<64x128xf32>
    %222 = vector.extract_strided_slice %204 {offsets = [0, 384], sizes = [64, 128], strides = [1, 1]} : vector<64x1152xf32> to vector<64x128xf32>
    %223 = arith.truncf %222 : vector<64x128xf32> to vector<64x128xbf16>
    %c3_145 = arith.constant 3 : index
    %c0_146 = arith.constant 0 : index
    %c0_147 = arith.constant 0 : index
    %224 = vector.load %arg12[%c3_145, %c0_146, %c0_147] : memref<9x64x64xbf16, #tpu.memory_space<vmem>>, vector<1x64x64xbf16>
    %225 = vector.shape_cast %224 : vector<1x64x64xbf16> to vector<64x64xbf16>
    %cst_148 = arith.constant dense<0.000000e+00> : vector<64x128xf32>
    %226 = tpu.matmul %225, %223, %cst_148 {dimension_numbers = #tpu.dot_dimension_numbers<[1], [0], [0], [1], [0, 0, 1, 1], [], []>} : vector<64x64xbf16>, vector<64x128xbf16>, vector<64x128xf32> -> vector<64x128xf32>
    %227 = arith.addf %221, %226 : vector<64x128xf32>
    %228 = vector.extract_strided_slice %204 {offsets = [0, 512], sizes = [64, 128], strides = [1, 1]} : vector<64x1152xf32> to vector<64x128xf32>
    %229 = arith.truncf %228 : vector<64x128xf32> to vector<64x128xbf16>
    %c4_149 = arith.constant 4 : index
    %c0_150 = arith.constant 0 : index
    %c0_151 = arith.constant 0 : index
    %230 = vector.load %arg12[%c4_149, %c0_150, %c0_151] : memref<9x64x64xbf16, #tpu.memory_space<vmem>>, vector<1x64x64xbf16>
    %231 = vector.shape_cast %230 : vector<1x64x64xbf16> to vector<64x64xbf16>
    %cst_152 = arith.constant dense<0.000000e+00> : vector<64x128xf32>
    %232 = tpu.matmul %231, %229, %cst_152 {dimension_numbers = #tpu.dot_dimension_numbers<[1], [0], [0], [1], [0, 0, 1, 1], [], []>} : vector<64x64xbf16>, vector<64x128xbf16>, vector<64x128xf32> -> vector<64x128xf32>
    %233 = arith.addf %227, %232 : vector<64x128xf32>
    %234 = vector.extract_strided_slice %204 {offsets = [0, 640], sizes = [64, 128], strides = [1, 1]} : vector<64x1152xf32> to vector<64x128xf32>
    %235 = arith.truncf %234 : vector<64x128xf32> to vector<64x128xbf16>
    %c5_153 = arith.constant 5 : index
    %c0_154 = arith.constant 0 : index
    %c0_155 = arith.constant 0 : index
    %236 = vector.load %arg12[%c5_153, %c0_154, %c0_155] : memref<9x64x64xbf16, #tpu.memory_space<vmem>>, vector<1x64x64xbf16>
    %237 = vector.shape_cast %236 : vector<1x64x64xbf16> to vector<64x64xbf16>
    %cst_156 = arith.constant dense<0.000000e+00> : vector<64x128xf32>
    %238 = tpu.matmul %237, %235, %cst_156 {dimension_numbers = #tpu.dot_dimension_numbers<[1], [0], [0], [1], [0, 0, 1, 1], [], []>} : vector<64x64xbf16>, vector<64x128xbf16>, vector<64x128xf32> -> vector<64x128xf32>
    %239 = arith.addf %233, %238 : vector<64x128xf32>
    %240 = vector.extract_strided_slice %204 {offsets = [0, 768], sizes = [64, 128], strides = [1, 1]} : vector<64x1152xf32> to vector<64x128xf32>
    %241 = arith.truncf %240 : vector<64x128xf32> to vector<64x128xbf16>
    %c6_157 = arith.constant 6 : index
    %c0_158 = arith.constant 0 : index
    %c0_159 = arith.constant 0 : index
    %242 = vector.load %arg12[%c6_157, %c0_158, %c0_159] : memref<9x64x64xbf16, #tpu.memory_space<vmem>>, vector<1x64x64xbf16>
    %243 = vector.shape_cast %242 : vector<1x64x64xbf16> to vector<64x64xbf16>
    %cst_160 = arith.constant dense<0.000000e+00> : vector<64x128xf32>
    %244 = tpu.matmul %243, %241, %cst_160 {dimension_numbers = #tpu.dot_dimension_numbers<[1], [0], [0], [1], [0, 0, 1, 1], [], []>} : vector<64x64xbf16>, vector<64x128xbf16>, vector<64x128xf32> -> vector<64x128xf32>
    %245 = arith.addf %239, %244 : vector<64x128xf32>
    %246 = vector.extract_strided_slice %204 {offsets = [0, 896], sizes = [64, 128], strides = [1, 1]} : vector<64x1152xf32> to vector<64x128xf32>
    %247 = arith.truncf %246 : vector<64x128xf32> to vector<64x128xbf16>
    %c7_161 = arith.constant 7 : index
    %c0_162 = arith.constant 0 : index
    %c0_163 = arith.constant 0 : index
    %248 = vector.load %arg12[%c7_161, %c0_162, %c0_163] : memref<9x64x64xbf16, #tpu.memory_space<vmem>>, vector<1x64x64xbf16>
    %249 = vector.shape_cast %248 : vector<1x64x64xbf16> to vector<64x64xbf16>
    %cst_164 = arith.constant dense<0.000000e+00> : vector<64x128xf32>
    %250 = tpu.matmul %249, %247, %cst_164 {dimension_numbers = #tpu.dot_dimension_numbers<[1], [0], [0], [1], [0, 0, 1, 1], [], []>} : vector<64x64xbf16>, vector<64x128xbf16>, vector<64x128xf32> -> vector<64x128xf32>
    %251 = arith.addf %245, %250 : vector<64x128xf32>
    %252 = vector.extract_strided_slice %204 {offsets = [0, 1024], sizes = [64, 128], strides = [1, 1]} : vector<64x1152xf32> to vector<64x128xf32>
    %253 = arith.truncf %252 : vector<64x128xf32> to vector<64x128xbf16>
    %c8_165 = arith.constant 8 : index
    %c0_166 = arith.constant 0 : index
    %c0_167 = arith.constant 0 : index
    %254 = vector.load %arg12[%c8_165, %c0_166, %c0_167] : memref<9x64x64xbf16, #tpu.memory_space<vmem>>, vector<1x64x64xbf16>
    %255 = vector.shape_cast %254 : vector<1x64x64xbf16> to vector<64x64xbf16>
    %cst_168 = arith.constant dense<0.000000e+00> : vector<64x128xf32>
    %256 = tpu.matmul %255, %253, %cst_168 {dimension_numbers = #tpu.dot_dimension_numbers<[1], [0], [0], [1], [0, 0, 1, 1], [], []>} : vector<64x64xbf16>, vector<64x128xbf16>, vector<64x128xf32> -> vector<64x128xf32>
    %257 = arith.addf %251, %256 : vector<64x128xf32>
    %c0_169 = arith.constant 0 : index
    %c0_170 = arith.constant 0 : index
    %258 = vector.load %arg16[%c0_169, %c0_170] : memref<1x128xf32, #tpu.memory_space<vmem>>, vector<1x128xf32>
    %259 = vector.broadcast %258 : vector<1x128xf32> to vector<64x128xf32>
    %260 = arith.addf %257, %259 : vector<64x128xf32>
    %cst_171 = arith.constant 0.000000e+00 : f32
    %261 = vector.broadcast %cst_171 : f32 to vector<64x128xf32>
    %262 = arith.maximumf %260, %261 : vector<64x128xf32>
    %c0_172 = arith.constant 0 : index
    %c0_173 = arith.constant 0 : index
    %263 = vector.load %arg17[%c0_172, %c0_173] : memref<128x32xbf16, #tpu.memory_space<vmem>>, vector<128x32xbf16>
    %c0_174 = arith.constant 0 : index
    %c0_175 = arith.constant 0 : index
    %264 = vector.load %arg18[%c0_174, %c0_175] : memref<1x32xf32, #tpu.memory_space<vmem>>, vector<1x32xf32>
    %265 = arith.truncf %140 : vector<16x128xf32> to vector<16x128xbf16>
    %cst_176 = arith.constant dense<0.000000e+00> : vector<16x32xf32>
    %266 = tpu.matmul %265, %263, %cst_176 {dimension_numbers = #tpu.dot_dimension_numbers<[1], [0], [0], [1], [0, 0, 1, 1], [], []>} : vector<16x128xbf16>, vector<128x32xbf16>, vector<16x32xf32> -> vector<16x32xf32>
    %267 = vector.broadcast %264 : vector<1x32xf32> to vector<16x32xf32>
    %268 = arith.addf %266, %267 : vector<16x32xf32>
    %cst_177 = arith.constant 0.000000e+00 : f32
    %269 = vector.broadcast %cst_177 : f32 to vector<16x32xf32>
    %270 = arith.maximumf %268, %269 : vector<16x32xf32>
    %c0_178 = arith.constant 0 : index
    %c0_179 = arith.constant 0 : index
    %271 = vector.load %arg19[%c0_178, %c0_179] : memref<32x128xbf16, #tpu.memory_space<vmem>>, vector<32x128xbf16>
    %c0_180 = arith.constant 0 : index
    %c0_181 = arith.constant 0 : index
    %272 = vector.load %arg20[%c0_180, %c0_181] : memref<1x128xf32, #tpu.memory_space<vmem>>, vector<1x128xf32>
    %273 = arith.truncf %270 : vector<16x32xf32> to vector<16x32xbf16>
    %cst_182 = arith.constant dense<0.000000e+00> : vector<16x128xf32>
    %274 = tpu.matmul %273, %271, %cst_182 {dimension_numbers = #tpu.dot_dimension_numbers<[1], [0], [0], [1], [0, 0, 1, 1], [], []>} : vector<16x32xbf16>, vector<32x128xbf16>, vector<16x128xf32> -> vector<16x128xf32>
    %275 = vector.broadcast %272 : vector<1x128xf32> to vector<16x128xf32>
    %276 = arith.addf %274, %275 : vector<16x128xf32>
    %277 = arith.addf %276, %140 : vector<16x128xf32>
    %cst_183 = arith.constant 0.000000e+00 : f32
    %278 = vector.broadcast %cst_183 : f32 to vector<16x128xf32>
    %279 = arith.maximumf %277, %278 : vector<16x128xf32>
    %280 = vector.shape_cast %279 : vector<16x128xf32> to vector<2x8x128xf32>
    %cst_184 = arith.constant dense<0xFF800000> : vector<2x128xf32>
    %281 = vector.multi_reduction <maximumf>, %280, %cst_184 [1] : vector<2x8x128xf32> to vector<2x128xf32>
    %282 = vector.shape_cast %201 : vector<64x128xf32> to vector<2x32x128xf32>
    %cst_185 = arith.constant dense<0xFF800000> : vector<2x128xf32>
    %283 = vector.multi_reduction <maximumf>, %282, %cst_185 [1] : vector<2x32x128xf32> to vector<2x128xf32>
    %284 = vector.extract_strided_slice %282 {offsets = [0, 0, 0], sizes = [2, 16, 128], strides = [1, 1, 1]} : vector<2x32x128xf32> to vector<2x16x128xf32>
    %cst_186 = arith.constant dense<0.000000e+00> : vector<2x128xf32>
    %285 = vector.multi_reduction <add>, %284, %cst_186 [1] : vector<2x16x128xf32> to vector<2x128xf32>
    %cst_187 = arith.constant 1.600000e+01 : f32
    %286 = vector.broadcast %cst_187 : f32 to vector<2x128xf32>
    %287 = arith.divf %285, %286 : vector<2x128xf32>
    %288 = vector.extract_strided_slice %282 {offsets = [0, 16, 0], sizes = [2, 16, 128], strides = [1, 1, 1]} : vector<2x32x128xf32> to vector<2x16x128xf32>
    %cst_188 = arith.constant dense<0.000000e+00> : vector<2x128xf32>
    %289 = vector.multi_reduction <add>, %288, %cst_188 [1] : vector<2x16x128xf32> to vector<2x128xf32>
    %cst_189 = arith.constant 1.600000e+01 : f32
    %290 = vector.broadcast %cst_189 : f32 to vector<2x128xf32>
    %291 = arith.divf %289, %290 : vector<2x128xf32>
    %292 = vector.shape_cast %262 : vector<64x128xf32> to vector<2x32x128xf32>
    %cst_190 = arith.constant dense<0xFF800000> : vector<2x128xf32>
    %293 = vector.multi_reduction <maximumf>, %292, %cst_190 [1] : vector<2x32x128xf32> to vector<2x128xf32>
    %294 = tpu.concatenate %281, %281, %283, %287, %291 in 0 : vector<2x128xf32>, vector<2x128xf32>, vector<2x128xf32>, vector<2x128xf32>, vector<2x128xf32> -> vector<10x128xf32>
    %c0_191 = arith.constant 0 : index
    %c0_192 = arith.constant 0 : index
    %295 = vector.load %arg21[%c0_191, %c0_192] : memref<128x128xbf16, #tpu.memory_space<vmem>>, vector<128x128xbf16>
    %c0_193 = arith.constant 0 : index
    %c0_194 = arith.constant 0 : index
    %296 = vector.load %arg22[%c0_193, %c0_194] : memref<1x128xf32, #tpu.memory_space<vmem>>, vector<1x128xf32>
    %297 = arith.truncf %294 : vector<10x128xf32> to vector<10x128xbf16>
    %cst_195 = arith.constant dense<0.000000e+00> : vector<10x128xf32>
    %298 = tpu.matmul %297, %295, %cst_195 {dimension_numbers = #tpu.dot_dimension_numbers<[1], [0], [0], [1], [0, 0, 1, 1], [], []>} : vector<10x128xbf16>, vector<128x128xbf16>, vector<10x128xf32> -> vector<10x128xf32>
    %299 = vector.broadcast %296 : vector<1x128xf32> to vector<10x128xf32>
    %300 = arith.addf %298, %299 : vector<10x128xf32>
    %301 = vector.extract_strided_slice %293 {offsets = [0, 0], sizes = [2, 64], strides = [1, 1]} : vector<2x128xf32> to vector<2x64xf32>
    %302 = vector.extract_strided_slice %293 {offsets = [0, 64], sizes = [2, 64], strides = [1, 1]} : vector<2x128xf32> to vector<2x64xf32>
    %303 = tpu.concatenate %301, %302 in 0 : vector<2x64xf32>, vector<2x64xf32> -> vector<4x64xf32>
    %c0_196 = arith.constant 0 : index
    %c0_197 = arith.constant 0 : index
    %304 = vector.load %arg23[%c0_196, %c0_197] : memref<64x128xbf16, #tpu.memory_space<vmem>>, vector<64x128xbf16>
    %c0_198 = arith.constant 0 : index
    %c0_199 = arith.constant 0 : index
    %305 = vector.load %arg24[%c0_198, %c0_199] : memref<1x128xf32, #tpu.memory_space<vmem>>, vector<1x128xf32>
    %306 = arith.truncf %303 : vector<4x64xf32> to vector<4x64xbf16>
    %cst_200 = arith.constant dense<0.000000e+00> : vector<4x128xf32>
    %307 = tpu.matmul %306, %304, %cst_200 {dimension_numbers = #tpu.dot_dimension_numbers<[1], [0], [0], [1], [0, 0, 1, 1], [], []>} : vector<4x64xbf16>, vector<64x128xbf16>, vector<4x128xf32> -> vector<4x128xf32>
    %308 = vector.broadcast %305 : vector<1x128xf32> to vector<4x128xf32>
    %309 = arith.addf %307, %308 : vector<4x128xf32>
    %cst_201 = arith.constant 0.000000e+00 : f32
    %310 = vector.broadcast %cst_201 : f32 to vector<4x128xf32>
    %311 = arith.maximumf %309, %310 : vector<4x128xf32>
    %c0_202 = arith.constant 0 : index
    %c0_203 = arith.constant 0 : index
    %312 = vector.load %arg25[%c0_202, %c0_203] : memref<4x128xf32, #tpu.memory_space<vmem>>, vector<4x128xf32>
    %313 = arith.mulf %311, %312 : vector<4x128xf32>
    %c0_204 = arith.constant 0 : index
    %c0_205 = arith.constant 0 : index
    %314 = vector.load %arg26[%c0_204, %c0_205] : memref<4x128xf32, #tpu.memory_space<vmem>>, vector<4x128xf32>
    %315 = arith.addf %313, %314 : vector<4x128xf32>
    %cst_206 = arith.constant 0.000000e+00 : f32
    %316 = vector.broadcast %cst_206 : f32 to vector<2x128xf32>
    %317 = tpu.concatenate %300, %315, %316 in 0 : vector<10x128xf32>, vector<4x128xf32>, vector<2x128xf32> -> vector<16x128xf32>
    %c0_207 = arith.constant 0 : index
    %c0_208 = arith.constant 0 : index
    %318 = vector.load %arg27[%c0_207, %c0_208] : memref<16x128xf32, #tpu.memory_space<vmem>>, vector<16x128xf32>
    tpu.vector_store %arg27[%c0_207, %c0_208], %317 {strides = array<i32>} : memref<16x128xf32, #tpu.memory_space<vmem>>, vector<16x128xf32>,
    return
  }
  func.func @transform_0(%arg0: i32) -> (i32, i32) {
    %c0_i32 = arith.constant 0 : i32
    %c0_i32_0 = arith.constant 0 : i32
    %c0_i32_1 = arith.constant 0 : i32
    return %c0_i32, %c0_i32_0 : i32, i32
  }
  func.func @transform_1(%arg0: i32) -> (i32, i32) {
    %c0_i32 = arith.constant 0 : i32
    %c0_i32_0 = arith.constant 0 : i32
    %c0_i32_1 = arith.constant 0 : i32
    return %c0_i32, %c0_i32_0 : i32, i32
  }
  func.func @transform_2(%arg0: i32) -> (i32, i32) {
    %c0_i32 = arith.constant 0 : i32
    %c0_i32_0 = arith.constant 0 : i32
    %c0_i32_1 = arith.constant 0 : i32
    return %c0_i32, %c0_i32_0 : i32, i32
  }
  func.func @transform_3(%arg0: i32) -> (i32, i32, i32) {
    %c0_i32 = arith.constant 0 : i32
    %c0_i32_0 = arith.constant 0 : i32
    %c0_i32_1 = arith.constant 0 : i32
    %c0_i32_2 = arith.constant 0 : i32
    return %c0_i32, %c0_i32_0, %c0_i32_1 : i32, i32, i32
  }
  func.func @transform_4(%arg0: i32) -> (i32, i32) {
    %c0_i32 = arith.constant 0 : i32
    %c0_i32_0 = arith.constant 0 : i32
    %c0_i32_1 = arith.constant 0 : i32
    return %c0_i32, %c0_i32_0 : i32, i32
  }
  func.func @transform_5(%arg0: i32) -> (i32, i32) {
    %c0_i32 = arith.constant 0 : i32
    %c0_i32_0 = arith.constant 0 : i32
    %c0_i32_1 = arith.constant 0 : i32
    return %c0_i32, %c0_i32_0 : i32, i32
  }
  func.func @transform_6(%arg0: i32) -> (i32, i32) {
    %c0_i32 = arith.constant 0 : i32
    %c0_i32_0 = arith.constant 0 : i32
    %c0_i32_1 = arith.constant 0 : i32
    return %c0_i32, %c0_i32_0 : i32, i32
  }
  func.func @transform_7(%arg0: i32) -> (i32, i32) {
    %c0_i32 = arith.constant 0 : i32
    %c0_i32_0 = arith.constant 0 : i32
    %c0_i32_1 = arith.constant 0 : i32
    return %c0_i32, %c0_i32_0 : i32, i32
  }
  func.func @transform_8(%arg0: i32) -> (i32, i32, i32) {
    %c0_i32 = arith.constant 0 : i32
    %c0_i32_0 = arith.constant 0 : i32
    %c0_i32_1 = arith.constant 0 : i32
    %c0_i32_2 = arith.constant 0 : i32
    return %c0_i32, %c0_i32_0, %c0_i32_1 : i32, i32, i32
  }
  func.func @transform_9(%arg0: i32) -> (i32, i32) {
    %c0_i32 = arith.constant 0 : i32
    %c0_i32_0 = arith.constant 0 : i32
    %c0_i32_1 = arith.constant 0 : i32
    return %c0_i32, %c0_i32_0 : i32, i32
  }
  func.func @transform_10(%arg0: i32) -> (i32, i32) {
    %c0_i32 = arith.constant 0 : i32
    %c0_i32_0 = arith.constant 0 : i32
    %c0_i32_1 = arith.constant 0 : i32
    return %c0_i32, %c0_i32_0 : i32, i32
  }
  func.func @transform_11(%arg0: i32) -> (i32, i32, i32) {
    %c0_i32 = arith.constant 0 : i32
    %c0_i32_0 = arith.constant 0 : i32
    %c0_i32_1 = arith.constant 0 : i32
    %c0_i32_2 = arith.constant 0 : i32
    return %c0_i32, %c0_i32_0, %c0_i32_1 : i32, i32, i32
  }
  func.func @transform_12(%arg0: i32) -> (i32, i32) {
    %c0_i32 = arith.constant 0 : i32
    %c0_i32_0 = arith.constant 0 : i32
    %c0_i32_1 = arith.constant 0 : i32
    return %c0_i32, %c0_i32_0 : i32, i32
  }
  func.func @transform_13(%arg0: i32) -> (i32, i32) {
    %c0_i32 = arith.constant 0 : i32
    %c0_i32_0 = arith.constant 0 : i32
    %c0_i32_1 = arith.constant 0 : i32
    return %c0_i32, %c0_i32_0 : i32, i32
  }
  func.func @transform_14(%arg0: i32) -> (i32, i32) {
    %c0_i32 = arith.constant 0 : i32
    %c0_i32_0 = arith.constant 0 : i32
    %c0_i32_1 = arith.constant 0 : i32
    return %c0_i32, %c0_i32_0 : i32, i32
  }
  func.func @transform_15(%arg0: i32) -> (i32, i32) {
    %c0_i32 = arith.constant 0 : i32
    %c0_i32_0 = arith.constant 0 : i32
    %c0_i32_1 = arith.constant 0 : i32
    return %c0_i32, %c0_i32_0 : i32, i32
  }
  func.func @transform_16(%arg0: i32) -> (i32, i32) {
    %c0_i32 = arith.constant 0 : i32
    %c0_i32_0 = arith.constant 0 : i32
    %c0_i32_1 = arith.constant 0 : i32
    return %c0_i32, %c0_i32_0 : i32, i32
  }
  func.func @transform_17(%arg0: i32) -> (i32, i32) {
    %c0_i32 = arith.constant 0 : i32
    %c0_i32_0 = arith.constant 0 : i32
    %c0_i32_1 = arith.constant 0 : i32
    return %c0_i32, %c0_i32_0 : i32, i32
  }
  func.func @transform_18(%arg0: i32) -> (i32, i32) {
    %c0_i32 = arith.constant 0 : i32
    %c0_i32_0 = arith.constant 0 : i32
    %c0_i32_1 = arith.constant 0 : i32
    return %c0_i32, %c0_i32_0 : i32, i32
  }
  func.func @transform_19(%arg0: i32) -> (i32, i32) {
    %c0_i32 = arith.constant 0 : i32
    %c0_i32_0 = arith.constant 0 : i32
    %c0_i32_1 = arith.constant 0 : i32
    return %c0_i32, %c0_i32_0 : i32, i32
  }
  func.func @transform_20(%arg0: i32) -> (i32, i32) {
    %c0_i32 = arith.constant 0 : i32
    %c0_i32_0 = arith.constant 0 : i32
    %c0_i32_1 = arith.constant 0 : i32
    return %c0_i32, %c0_i32_0 : i32, i32
  }
  func.func @transform_21(%arg0: i32) -> (i32, i32) {
    %c0_i32 = arith.constant 0 : i32
    %c0_i32_0 = arith.constant 0 : i32
    %c0_i32_1 = arith.constant 0 : i32
    return %c0_i32, %c0_i32_0 : i32, i32
  }
  func.func @transform_22(%arg0: i32) -> (i32, i32) {
    %c0_i32 = arith.constant 0 : i32
    %c0_i32_0 = arith.constant 0 : i32
    %c0_i32_1 = arith.constant 0 : i32
    return %c0_i32, %c0_i32_0 : i32, i32
  }
  func.func @transform_23(%arg0: i32) -> (i32, i32) {
    %c0_i32 = arith.constant 0 : i32
    %c0_i32_0 = arith.constant 0 : i32
    %c0_i32_1 = arith.constant 0 : i32
    return %c0_i32, %c0_i32_0 : i32, i32
  }
  func.func @transform_24(%arg0: i32) -> (i32, i32) {
    %c0_i32 = arith.constant 0 : i32
    %c0_i32_0 = arith.constant 0 : i32
    %c0_i32_1 = arith.constant 0 : i32
    return %c0_i32, %c0_i32_0 : i32, i32
  }
  func.func @transform_25(%arg0: i32) -> (i32, i32) {
    %c0_i32 = arith.constant 0 : i32
    %c0_i32_0 = arith.constant 0 : i32
    %c0_i32_1 = arith.constant 0 : i32
    return %c0_i32, %c0_i32_0 : i32, i32
  }
  func.func @transform_26(%arg0: i32) -> (i32, i32) {
    %c0_i32 = arith.constant 0 : i32
    %c0_i32_0 = arith.constant 0 : i32
    %c0_i32_1 = arith.constant 0 : i32
    return %c0_i32, %c0_i32_0 : i32, i32
  }
}

</mosaic_0001>

<bundles_post_ra>
// kernel: lmbn_r_forward.1
= control target key start
LH: loop header
LB: loop body
LE: loop exit
PB: predicated region body
PF: predicated region fallthrough
CT: control target
= control target key end

     0   :  { %s13989_s0 = inlined_call_operand.vmem [shape: bf16[256,27], index: 0, kind: input, shape index: {}]   ;;  %s13990_s1 = inlined_call_operand.hbm [shape: bf16[27,64], index: 1, kind: input, shape index: {}]   ;;  %s13991_s2 = inlined_call_operand.vmem [shape: f32[1,64], index: 2, kind: input, shape index: {}]   ;;  %s13992_s3 = inlined_call_operand.vmem [shape: bf16[9,64,256], index: 3, kind: input, shape index: {}]   ;;  %s13993_s4 = inlined_call_operand.vmem [shape: bf16[64,1152], index: 4, kind: input, shape index: {}]   ;;  %s13994_s5 = inlined_call_operand.vmem [shape: f32[1,128], index: 5, kind: input, shape index: {}]   ;;  %s13995_s6 = inlined_call_operand.vmem [shape: bf16[128,384], index: 6, kind: input, shape index: {}]   ;;  %s13996_s7 = inlined_call_operand.vmem [shape: f32[1,384], index: 7, kind: input, shape index: {}]   ;;  %s13997_s8 = inlined_call_operand.vmem [shape: bf16[9,16,64], index: 8, kind: input, shape index: {}]   ;;  %s13998_s9 = inlined_call_operand.vmem [shape: bf16[128,1152], index: 9, kind: input, shape index: {}]   ;;  %s13999_s10 = inlined_call_operand.vmem [shape: f32[1,128], index: 10, kind: input, shape index: {}]   ;;  %s14000_s11 = inlined_call_operand.hbm [shape: bf16[9,64,64], index: 11, kind: input, shape index: {}]   ;;  %s14001_s12 = inlined_call_operand.vmem [shape: bf16[128,1152], index: 12, kind: input, shape index: {}]   ;;  %s14002_s13 = inlined_call_operand.vmem [shape: f32[1,128], index: 13, kind: input, shape index: {}]   ;;  %s14003_s14 = inlined_call_operand.hbm [shape: bf16[128,1152], index: 14, kind: input, shape index: {}]   ;;  %s14004_s15 = inlined_call_operand.vmem [shape: f32[1,128], index: 15, kind: input, shape index: {}]   ;;  %s14005_s16 = inlined_call_operand.vmem [shape: bf16[128,32], index: 16, kind: input, shape index: {}]   ;;  %s14006_s17 = inlined_call_operand.vmem [shape: f32[1,32], index: 17, kind: input, shape index: {}]   ;;  %s14007_s18 = inlined_call_operand.hbm [shape: bf16[32,128], index: 18, kind: input, shape index: {}]   ;;  %s14008_s19 = inlined_call_operand.vmem [shape: f32[1,128], index: 19, kind: input, shape index: {}]   ;;  %s14009_s20 = inlined_call_operand.vmem [shape: bf16[128,128], index: 20, kind: input, shape index: {}]   ;;  %s14010_s21 = inlined_call_operand.vmem [shape: f32[1,128], index: 21, kind: input, shape index: {}]   ;;  %s14011_s22 = inlined_call_operand.hbm [shape: bf16[64,128], index: 22, kind: input, shape index: {}]   ;;  %s14012_s23 = inlined_call_operand.vmem [shape: f32[1,128], index: 23, kind: input, shape index: {}]   ;;  %s14013_s24 = inlined_call_operand.vmem [shape: f32[4,128], index: 24, kind: input, shape index: {}]   ;;  %s14014_s25 = inlined_call_operand.vmem [shape: f32[4,128], index: 25, kind: input, shape index: {}]   ;;  %s14015_s26 = inlined_call_operand.vmem [shape: f32[16,128], index: 26, kind: output, shape index: {}]  }
   0x1   :  { %14107 = sst [smem:[#allocation90_spill]] %s13989_s0 }
   0x2   :  { %14108 = sst [smem:[#allocation91_spill]] %s13990_s1 }
   0x3   :  { %14109 = sst [smem:[#allocation92_spill]] %s13991_s2 }
   0x4   :  { %14110 = sst [smem:[#allocation93_spill]] %s13992_s3 }
   0x5   :  { %14111 = sst [smem:[#allocation94_spill]] %s13993_s4 }
   0x6   :  { %14112 = sst [smem:[#allocation95_spill]] %s13994_s5 }
   0x7   :  { %14113 = sst [smem:[#allocation96_spill]] %s13995_s6 }
   0x8   :  { %14114 = sst [smem:[#allocation97_spill]] %s13996_s7 }
   0x9   :  { %14115 = sst [smem:[#allocation98_spill]] %s13997_s8 }
   0xa   :  { %14116 = sst [smem:[#allocation99_spill]] %s13998_s9 }
   0xb   :  { %14117 = sst [smem:[#allocation100_spill]] %s13999_s10 }
   0xc   :  { %31 = vsyncpa [#allocation3], 0 }
   0xd   :  { %32 = vsyncpa [#allocation5], 0 }
   0xe   :  { %33 = vsyncpa [#allocation8], 0  ;;  %s71_s7 = sshll.u32 %s14000_s11, 4  ;;  %s9639_s28 = smov [#allocation4]   ;;  %s72_s7 = int_to_ptr.hbm [resolvable:$true] %s71_s7 }
   0xf   :  { %s73_s8 = sshll.u32 %s9639_s28, 4  ;;  %s107_s0 = sshll.u32 %s14007_s18, 4  ;;  %s74_s8 = int_to_ptr.vmem [resolvable:$true] %s73_s8  ;;  %s108_s0 = int_to_ptr.hbm [resolvable:$true] %s107_s0 }
  0x10   :  { %s9640_s9 = smov 64   ;;  %s9641_s30 = smov 4  }
  0x11   :  { %79 = dma.hbm_to_vmem [thread:$0]  %s72_s7, 4608, %s74_s8, [#allocation5], %s9640_s9, %s9640_s9, %s9641_s30  }
  0x12   :  { %s9642_s2 = smov [#allocation7]   ;;  %s14118_s11 = sld [smem:[#allocation91_spill]] }
  0x13   :  { %s109_s5 = sshll.u32 %s9642_s2, 4  ;;  %s88_s3 = sshll.u32 %s14003_s14, 4  ;;  %s110_s5 = int_to_ptr.vmem [resolvable:$true] %s109_s5  ;;  %s89_s3 = int_to_ptr.hbm [resolvable:$true] %s88_s3 }
  0x14   :  { %115 = dma.hbm_to_vmem [thread:$0]  %s108_s0, 256, %s110_s5, [#allocation8], %s9640_s9, %s9640_s9, %s9641_s30  }
  0x15   :  { %s9643_s28 = smov [#allocation2]   ;;  %s9644_s7 = smov [#allocation6]  }
  0x16   :  { %s42_s4 = sshll.u32 %s9643_s28, 4  ;;  %s90_s8 = sshll.u32 %s9644_s7, 4  ;;  %s43_s4 = int_to_ptr.vmem [resolvable:$true] %s42_s4  ;;  %s91_s8 = int_to_ptr.vmem [resolvable:$true] %s90_s8 }
  0x17   :  { %s9645_s29 = smov 576   ;;  %s9646_s2 = smov 36  }
  0x18   :  { %s40_s1 = sshll.u32 %s14118_s11, 4  ;;  %s126_s5 = sshll.u32 %s14011_s22, 4  ;;  %s41_s1 = int_to_ptr.hbm [resolvable:$true] %s40_s1  ;;  %s127_s5 = int_to_ptr.hbm [resolvable:$true] %s126_s5 }
  0x19   :  { %48 = dma.hbm_to_vmem [thread:$0]  %s41_s1, 256, %s43_s4, [#allocation3], %s9640_s9, %s9640_s9, %s9641_s30  }
  0x1a   :  { %96 = dma.hbm_to_vmem [thread:$0]  %s89_s3, 9216, %s91_s8, [#allocation5], %s9645_s29, %s9645_s29, %s9646_s2  }
  0x1b   :  { %s9647_s14 = smov [#allocation9]  }
  0x1c   :  { %s128_s6 = sshll.u32 %s9647_s14, 4  ;;  %s129_s6 = int_to_ptr.vmem [resolvable:$true] %s128_s6 }
  0x1d   :  { %134 = dma.hbm_to_vmem [thread:$0]  %s127_s5, 512, %s129_s6, [#allocation8], %s9640_s9, %s9640_s9, %s9641_s30  }
  0x1e   :  { %9633 = dma.done.wait [#allocation3], 256  }
  0x1f   :  { %9634 = vsyncadd [#allocation3], 4294967040 }
  0x20   :  { %9635 = dma.done.wait [#allocation5], 13824  }
  0x21   :  { %9636 = vsyncadd [#allocation5], 4294953472 }
  0x22   :  { %9637 = dma.done.wait [#allocation8], 768  }
  0x23   :  { %9638 = vsyncadd [#allocation8], 4294966528  ;;  %vm342_vm0 = vcmask 1044480   ;;  %vm343_vm1 = vcmask 1045504   ;;  %v9648_v0 = vmov 65535   ;;  %v9037_v7 = vld [vmem:[#allocation2] sm:$0xff] }
  0x24   :  { %v344_v1 = vsel %vm342_vm0, 4294967295, %v9648_v0  ;;  %v7036_v2 = vld [vmem:[#allocation2 + $0x8] sm:$0xf]  ;;  %v9038_v3 = vld [vmem:[#allocation2 + $0x8] sm:$0x30]  ;;  %s14119_s11 = sld [smem:[#allocation90_spill]] }
  0x25   :  { %v345_v4 = vsel %vm343_vm1, %v344_v1, 0  ;;  %v7037_v5 = vor.u32 %v9038_v3, %v7036_v2  ;;  %vm293_vm2 = vcmask 220160   ;;  %s14120_s5 = sld [smem:[#allocation94_spill]]  ;;  %vm710_vm3 = vcmask 523264  }
  0x26   :  { %s14121_s27 = sld [smem:[#allocation92_spill]]  ;;  %vm6790_vm5 = vcmask 1047559   ;;  %vm6777_vm6 = vcmask 1041409   ;;  %vm6785_vm7 = vcmask 1045509   ;;  %vm6666_vm8 = vcmask 261120  }
  0x27   :  { %v347_v6 = vand.u32 %v7037_v5, %v345_v4  ;;  %s14218_s6 = sld [smem:[#allocation93_spill]]  ;;  %vm6780_vm9 = vcmask 1043459   ;;  %vm6797_vm10 = vcmask 1041408   ;;  %vm6799_vm11 = vcmask 1043456  }
  0x28   :  { %s14389_s14 = sld [smem:[#allocation96_spill]] }
  0x29   :  { %355 = vmatpush.bf16.msra.mxu0 %v347_v6  ;;  %s14390_s7 = sld [smem:[#allocation95_spill]] }
  0x2a   :  { %v9021_v8 = vld [vmem:[%s14119_s11] sm:$0xff]  ;;  %v9022_v9 = vld [vmem:[%s14119_s11 + $0x8] sm:$0xff]  ;;  %v9023_v10 = vld [vmem:[%s14119_s11 + $0x10] sm:$0xff]  ;;  %s14391_s2 = sld [smem:[#allocation99_spill]] }
  0x2b   :  { %v9024_v11 = vld [vmem:[%s14119_s11 + $0x18] sm:$0xff]  ;;  %v9025_v12 = vld [vmem:[%s14119_s11 + $0x20] sm:$0xff]  ;;  %v9026_v13 = vld [vmem:[%s14119_s11 + $0x28] sm:$0xff]  ;;  %s14392_s3 = sld [smem:[#allocation97_spill]] }
  0x2c   :  { %v7164_v14 = vld [vmem:[%s14120_s5 + $0xd8] sm:$0xf]  ;;  %v9070_v15 = vld [vmem:[%s14120_s5 + $0xf8] sm:$0xf0]  ;;  %v7166_v18 = vld [vmem:[%s14120_s5 + $0xfc] sm:$0xf0] }
  0x2d   :  { %356 = vmatpush.bf16.msra.mxu0 %v9037_v7  ;;  %v9066_v16 = vld [vmem:[%s14120_s5 + $0xdc] sm:$0xf]  ;;  %v7165_v17 = vor.u32 %v9070_v15, %v7164_v14  ;;  %v7172_v19 = vld [vmem:[%s14120_s5 + $0xe0] sm:$0xf]  ;;  %v9071_v20 = vld [vmem:[%s14120_s5 + $0x100] sm:$0xf0] }
  0x2e   :  { %v9027_v21 = vld [vmem:[%s14119_s11 + $0x30] sm:$0xff]  ;;  %v7169_v22 = vor.u32 %v9066_v16, %v7166_v18  ;;  %v7173_v23 = vor.u32 %v9071_v20, %v7172_v19  ;;  %v7130_v28 = vld [vmem:[%s14120_s5 + $0xb4] sm:$0xf0]  ;;  %v9062_v31 = vld [vmem:[%s14120_s5 + $0xb8] sm:$0xf0]  ;;  %s14393_s4 = sld [smem:[#allocation98_spill]] }
  0x2f   :  { %763 = vmatpush.bf16.msra.mxu1 %v7165_v17  ;;  %v7128_v24 = vld [vmem:[%s14120_s5 + $0x90] sm:$0xf]  ;;  %v9061_v25 = vld [vmem:[%s14120_s5 + $0xb0] sm:$0xf0]  ;;  %v7136_v29 = vld [vmem:[%s14120_s5 + $0x98] sm:$0xf] }
  0x30   :  { %7038 = vmatmul.msk.bf16.vlgmr.msra.gmra.mxu0 %vm293_vm2, %v9021_v8  ;;  %852 = vmatpush.bf16.msra.mxu2 %v7169_v22  ;;  %v7129_v26 = vor.u32 %v9061_v25, %v7128_v24  ;;  %v9057_v27 = vld [vmem:[%s14120_s5 + $0x94] sm:$0xf]  ;;  %v7137_v32 = vor.u32 %v9062_v31, %v7136_v29  ;;  %v7092_v33 = vld [vmem:[%s14120_s5 + $0x48] sm:$0xf]  ;;  %v9052_v34 = vld [vmem:[%s14120_s5 + $0x68] sm:$0xf0] }
  0x31   :  { %941 = vmatpush.bf16.msra.mxu3 %v7173_v23  ;;  %v7133_v30 = vor.u32 %v9057_v27, %v7130_v28  ;;  %v9048_v35 = vld [vmem:[%s14120_s5 + $0x4c] sm:$0xf]  ;;  %v7093_v36 = vor.u32 %v9052_v34, %v7092_v33  ;;  %v7094_v37 = vld [vmem:[%s14120_s5 + $0x6c] sm:$0xf0]  ;;  %v9053_v39 = vld [vmem:[%s14120_s5 + $0x70] sm:$0xf0] }
  0x32   :  { %v7100_v38 = vld [vmem:[%s14120_s5 + $0x50] sm:$0xf]  ;;  %v7097_v40 = vor.u32 %v9048_v35, %v7094_v37  ;;  %v7056_v42 = vld [vmem:[%s14120_s5] sm:$0xf]  ;;  %v9043_v43 = vld [vmem:[%s14120_s5 + $0x20] sm:$0xf0] }
  0x33   :  { %764 = vmatpush.bf16.msra.mxu1 %v7129_v26  ;;  %v7101_v41 = vor.u32 %v9053_v39, %v7100_v38  ;;  %v9039_v44 = vld [vmem:[%s14120_s5 + $0x4] sm:$0xf]  ;;  %v7057_v45 = vor.u32 %v9043_v43, %v7056_v42  ;;  %v7058_v46 = vld [vmem:[%s14120_s5 + $0x24] sm:$0xf0]  ;;  %v9044_v48 = vld [vmem:[%s14120_s5 + $0x28] sm:$0xf0] }
  0x34   :  { %853 = vmatpush.bf16.msra.mxu2 %v7133_v30  ;;  %v7064_v47 = vld [vmem:[%s14120_s5 + $0x8] sm:$0xf]  ;;  %v7061_v49 = vor.u32 %v9039_v44, %v7058_v46  ;;  %v9028_v51 = vld [vmem:[%s14119_s11 + $0x38] sm:$0xff]  ;;  %v9029_v52 = vld [vmem:[%s14119_s11 + $0x40] sm:$0xff]  ;;  %s14394_s22 = sld [smem:[#allocation100_spill]] }
  0x35   :  { %942 = vmatpush.bf16.msra.mxu3 %v7137_v32  ;;  %v7065_v50 = vor.u32 %v9044_v48, %v7064_v47  ;;  %v9923_v54 = vld [vmem:[%s14121_s27] ss:$0 sm:$0xff]  ;;  %v9030_v61 = vld [vmem:[%s14119_s11 + $0x48] sm:$0xff]  ;;  %v9031_v5 = vld [vmem:[%s14119_s11 + $0x50] sm:$0xff] }
  0x36   :  { %v9067_v29 = vld [vmem:[%s14120_s5 + $0xe4] sm:$0xf]  ;;  %v7174_v30 = vld [vmem:[%s14120_s5 + $0x104] sm:$0xf0]  ;;  %v9072_v35 = vld [vmem:[%s14120_s5 + $0x108] sm:$0xf0] }
  0x37   :  { %765 = vmatpush.bf16.msra.mxu1 %v7093_v36  ;;  %v7177_v31 = vor.u32 %v9067_v29, %v7174_v30  ;;  %v9034_v32 = vld [vmem:[%s14119_s11 + $0x68] sm:$0xff]  ;;  %v9058_v37 = vld [vmem:[%s14120_s5 + $0x9c] sm:$0xf]  ;;  %v7138_v38 = vld [vmem:[%s14120_s5 + $0xbc] sm:$0xf0] }
  0x38   :  { %854 = vmatpush.bf16.msra.mxu2 %v7097_v40  ;;  %v7180_v34 = vld [vmem:[%s14120_s5 + $0xe8] sm:$0xf]  ;;  %v7141_v40 = vor.u32 %v9058_v37, %v7138_v38  ;;  %v9049_v43 = vld [vmem:[%s14120_s5 + $0x54] sm:$0xf]  ;;  %v7102_v44 = vld [vmem:[%s14120_s5 + $0x74] sm:$0xf0] }
  0x39   :  { %943 = vmatpush.bf16.msra.mxu3 %v7101_v41  ;;  %1030 = vmatpush.bf16.msrb.mxu0 %v7177_v31  ;;  %v7181_v36 = vor.u32 %v9072_v35, %v7180_v34  ;;  %v7105_v47 = vor.u32 %v9049_v43, %v7102_v44  ;;  %v9068_v38 = vld [vmem:[%s14120_s5 + $0xec] sm:$0xf] }
  0x3b   :  { %766 = vmatpush.bf16.msra.mxu1 %v7057_v45 }
  0x3c   :  { %855 = vmatpush.bf16.msra.mxu2 %v7061_v49  ;;  %v9040_v49 = vld [vmem:[%s14120_s5 + $0xc] sm:$0xf] }
  0x3d   :  { %944 = vmatpush.bf16.msra.mxu3 %v7065_v50  ;;  %1031 = vmatpush.bf16.msrb.mxu0 %v7141_v40  ;;  %v7066_v50 = vld [vmem:[%s14120_s5 + $0x2c] sm:$0xf0] }
  0x3e   :  { %v7188_v40 = vld [vmem:[%s14120_s5 + $0xf0] sm:$0xf] }
  0x3f   :  { %1119 = vmatpush.bf16.msrb.mxu1 %v7181_v36 }
  0x40   :  { %7039 = vmatmul.msk.bf16.gmra.mxu0 %vm293_vm2, %v9022_v9 }
  0x41   :  { %1032 = vmatpush.bf16.msrb.mxu0 %v7105_v47 }
  0x50   :  { %7040 = vmatmul.msk.bf16.gmra.mxu0 %vm293_vm2, %v9023_v10 }
  0x60   :  { %7041 = vmatmul.msk.bf16.gmra.mxu0 %vm293_vm2, %v9024_v11 }
  0x70   :  { %7042 = vmatmul.msk.bf16.gmra.mxu0 %vm293_vm2, %v9025_v12 }
  0x80   :  { %7043 = vmatmul.msk.bf16.gmra.mxu0 %vm293_vm2, %v9026_v13  ;;  %v9032_v13 = vld [vmem:[%s14119_s11 + $0x58] sm:$0xff] }
  0x90   :  { %7044 = vmatmul.msk.bf16.gmra.mxu0 %vm293_vm2, %v9027_v21  ;;  %v9033_v21 = vld [vmem:[%s14119_s11 + $0x60] sm:$0xff] }
  0xa0   :  { %7045 = vmatmul.msk.bf16.gmra.mxu0 %vm293_vm2, %v9028_v51  ;;  %v9035_v51 = vld [vmem:[%s14119_s11 + $0x70] sm:$0xff] }
  0xad   :  { %v358_v53 = vpop.f32.mrf.mxu0 }
  0xae   :  { %v359_v55 = vadd.f32 %v9923_v54, %v358_v53 }
  0xb0   :  { %7046 = vmatmul.msk.bf16.gmra.mxu0 %vm293_vm2, %v9029_v52  ;;  %v438_v58 = vmax.f32 %v359_v55, 0.0  ;;  %v7069_v52 = vor.u32 %v9040_v49, %v7066_v50 }
  0xb2   :  { %1033 = vmatpush.bf16.msrb.mxu0 %v7069_v52 }
  0xb5   :  { %v360_v56 = vpop.f32.mrf.mxu0 }
  0xb6   :  { %v361_v57 = vadd.f32 %v9923_v54, %v360_v56 }
  0xb8   :  { %v439_v59 = vmax.f32 %v361_v57, 0.0 }
  0xba   :  { %v9928_v60 = vpack.c.bf16 %v439_v59, %v438_v58 }
  0xbc   :  { %7198 = vmatmul.msk.bf16.vlgmr.msra.gmra.mxu1 %vm710_vm3, %v9928_v60  ;;  %7214 = vmatmul.msk.bf16.vlgmr.msra.gmra.mxu2 %vm710_vm3, %v9928_v60 }
  0xbd   :  { %7230 = vmatmul.msk.bf16.vlgmr.msra.gmra.mxu3 %vm710_vm3, %v9928_v60  ;;  %v363_v62 = vpop.f32.mrf.mxu0 }
  0xbe   :  { %v364_v63 = vadd.f32 %v9923_v54, %v363_v62  ;;  %v9036_v62 = vld [vmem:[%s14119_s11 + $0x78] sm:$0xff] }
  0xc0   :  { %7047 = vmatmul.msk.bf16.gmra.mxu0 %vm293_vm2, %v9030_v61  ;;  %v440_v2 = vmax.f32 %v364_v63, 0.0 }
  0xc5   :  { %v365_v0 = vpop.f32.mrf.mxu0 }
  0xc6   :  { %v366_v1 = vadd.f32 %v9923_v54, %v365_v0 }
  0xc8   :  { %v441_v3 = vmax.f32 %v366_v1, 0.0 }
  0xca   :  { %v9942_v4 = vpack.c.bf16 %v441_v3, %v440_v2 }
  0xcc   :  { %7199 = vmatmul.msk.bf16.gmra.mxu1 %vm710_vm3, %v9942_v4  ;;  %7215 = vmatmul.msk.bf16.gmra.mxu2 %vm710_vm3, %v9942_v4 }
  0xcd   :  { %7231 = vmatmul.msk.bf16.gmra.mxu3 %vm710_vm3, %v9942_v4  ;;  %v368_v6 = vpop.f32.mrf.mxu0 }
  0xce   :  { %v369_v7 = vadd.f32 %v9923_v54, %v368_v6 }
  0xd0   :  { %7048 = vmatmul.msk.bf16.gmra.mxu0 %vm293_vm2, %v9031_v5  ;;  %v442_v10 = vmax.f32 %v369_v7, 0.0 }
  0xd5   :  { %v370_v8 = vpop.f32.mrf.mxu0 }
  0xd6   :  { %v371_v9 = vadd.f32 %v9923_v54, %v370_v8 }
  0xd8   :  { %v443_v11 = vmax.f32 %v371_v9, 0.0 }
  0xda   :  { %v9956_v12 = vpack.c.bf16 %v443_v11, %v442_v10 }
  0xdc   :  { %7200 = vmatmul.msk.bf16.gmra.mxu1 %vm710_vm3, %v9956_v12  ;;  %7216 = vmatmul.msk.bf16.gmra.mxu2 %vm710_vm3, %v9956_v12 }
  0xdd   :  { %7232 = vmatmul.msk.bf16.gmra.mxu3 %vm710_vm3, %v9956_v12  ;;  %v373_v14 = vpop.f32.mrf.mxu0 }
  0xde   :  { %v374_v15 = vadd.f32 %v9923_v54, %v373_v14 }
  0xe0   :  { %7049 = vmatmul.msk.bf16.gmra.mxu0 %vm293_vm2, %v9032_v13  ;;  %v444_v18 = vmax.f32 %v374_v15, 0.0 }
  0xe5   :  { %v375_v16 = vpop.f32.mrf.mxu0 }
  0xe6   :  { %v376_v17 = vadd.f32 %v9923_v54, %v375_v16 }
  0xe8   :  { %v445_v19 = vmax.f32 %v376_v17, 0.0 }
  0xea   :  { %v9970_v20 = vpack.c.bf16 %v445_v19, %v444_v18  ;;  %v7144_v19 = vld [vmem:[%s14120_s5 + $0xa0] sm:$0xf] }
  0xec   :  { %7201 = vmatmul.msk.bf16.gmra.mxu1 %vm710_vm3, %v9970_v20  ;;  %7217 = vmatmul.msk.bf16.gmra.mxu2 %vm710_vm3, %v9970_v20 }
  0xed   :  { %7233 = vmatmul.msk.bf16.gmra.mxu3 %vm710_vm3, %v9970_v20  ;;  %v378_v22 = vpop.f32.mrf.mxu0 }
  0xee   :  { %v379_v23 = vadd.f32 %v9923_v54, %v378_v22 }
  0xf0   :  { %7050 = vmatmul.msk.bf16.gmra.mxu0 %vm293_vm2, %v9033_v21  ;;  %v446_v26 = vmax.f32 %v379_v23, 0.0  ;;  %v9063_v21 = vld [vmem:[%s14120_s5 + $0xc0] sm:$0xf0] }
  0xf1   :  { %v7145_v23 = vor.u32 %v9063_v21, %v7144_v19 }
  0xf3   :  { %1120 = vmatpush.bf16.msrb.mxu1 %v7145_v23 }
  0xf5   :  { %v380_v24 = vpop.f32.mrf.mxu0 }
  0xf6   :  { %v381_v25 = vadd.f32 %v9923_v54, %v380_v24 }
  0xf8   :  { %v447_v27 = vmax.f32 %v381_v25, 0.0 }
  0xfa   :  { %v9984_v28 = vpack.c.bf16 %v447_v27, %v446_v26 }
  0xfc   :  { %7202 = vmatmul.msk.bf16.gmra.mxu1 %vm710_vm3, %v9984_v28  ;;  %7218 = vmatmul.msk.bf16.gmra.mxu2 %vm710_vm3, %v9984_v28 }
  0xfd   :  { %7234 = vmatmul.msk.bf16.gmra.mxu3 %vm710_vm3, %v9984_v28  ;;  %v383_v33 = vpop.f32.mrf.mxu0 }
  0xfe   :  { %v384_v39 = vadd.f32 %v9923_v54, %v383_v33 }
 0x100   :  { %7051 = vmatmul.msk.bf16.gmra.mxu0 %vm293_vm2, %v9034_v32  ;;  %v448_v45 = vmax.f32 %v384_v39, 0.0  ;;  %v7182_v39 = vld [vmem:[%s14120_s5 + $0x10c] sm:$0xf0] }
 0x101   :  { %v7072_v32 = vld [vmem:[%s14120_s5 + $0x10] sm:$0xf] }
 0x105   :  { %v385_v41 = vpop.f32.mrf.mxu0 }
 0x106   :  { %v386_v42 = vadd.f32 %v9923_v54, %v385_v41  ;;  %v7185_v41 = vor.u32 %v9068_v38, %v7182_v39 }
 0x108   :  { %v449_v46 = vmax.f32 %v386_v42, 0.0  ;;  %v9073_v42 = vld [vmem:[%s14120_s5 + $0x110] sm:$0xf0]  ;;  %1208 = vmatpush.bf16.msrb.mxu2 %v7185_v41 }
 0x109   :  { %v7189_v44 = vor.u32 %v9073_v42, %v7188_v40 }
 0x10a   :  { %v10022_v48 = vpack.c.bf16 %v449_v46, %v448_v45 }
 0x10b   :  { %1297 = vmatpush.bf16.msrb.mxu3 %v7189_v44 }
 0x10c   :  { %14122 = vst [vmem:[#allocation13_spill] sm:$0xff] %v10022_v48  ;;  %7203 = vmatmul.msk.bf16.gmra.mxu1 %vm710_vm3, %v10022_v48  ;;  %7219 = vmatmul.msk.bf16.gmra.mxu2 %vm710_vm3, %v10022_v48 }
 0x10d   :  { %7235 = vmatmul.msk.bf16.gmra.mxu3 %vm710_vm3, %v10022_v48  ;;  %v388_v53 = vpop.f32.mrf.mxu0 }
 0x10e   :  { %v389_v55 = vadd.f32 %v9923_v54, %v388_v53 }
 0x110   :  { %7052 = vmatmul.msk.bf16.gmra.mxu0 %vm293_vm2, %v9035_v51  ;;  %v450_v58 = vmax.f32 %v389_v55, 0.0 }
 0x115   :  { %v390_v56 = vpop.f32.mrf.mxu0 }
 0x116   :  { %v391_v57 = vadd.f32 %v9923_v54, %v390_v56 }
 0x118   :  { %v451_v59 = vmax.f32 %v391_v57, 0.0 }
 0x11a   :  { %v10042_v61 = vpack.c.bf16 %v451_v59, %v450_v58 }
 0x11c   :  { %14123 = vst [vmem:[#allocation14_spill] sm:$0xff] %v10042_v61  ;;  %7204 = vmatmul.msk.bf16.gmra.mxu1 %vm710_vm3, %v10042_v61  ;;  %7220 = vmatmul.msk.bf16.gmra.mxu2 %vm710_vm3, %v10042_v61 }
 0x11d   :  { %7236 = vmatmul.msk.bf16.gmra.mxu3 %vm710_vm3, %v10042_v61  ;;  %v393_v63 = vpop.f32.mrf.mxu0 }
 0x11e   :  { %v394_v0 = vadd.f32 %v9923_v54, %v393_v63 }
 0x120   :  { %7053 = vmatmul.msk.bf16.gmra.mxu0 %vm293_vm2, %v9036_v62  ;;  %v452_v3 = vmax.f32 %v394_v0, 0.0 }
 0x125   :  { %v395_v1 = vpop.f32.mrf.mxu0 }
 0x126   :  { %v396_v2 = vadd.f32 %v9923_v54, %v395_v1 }
 0x128   :  { %v453_v5 = vmax.f32 %v396_v2, 0.0 }
 0x12a   :  { %v10056_v6 = vpack.c.bf16 %v453_v5, %v452_v3 }
 0x12c   :  { %14124 = vst [vmem:[#allocation15_spill] sm:$0xff] %v10056_v6  ;;  %7205 = vmatmul.msk.bf16.gmra.mxu1 %vm710_vm3, %v10056_v6  ;;  %7221 = vmatmul.msk.bf16.gmra.mxu2 %vm710_vm3, %v10056_v6 }
 0x12d   :  { %7237 = vmatmul.msk.bf16.gmra.mxu3 %vm710_vm3, %v10056_v6  ;;  %v398_v7 = vpop.f32.mrf.mxu0 }
 0x12e   :  { %v399_v8 = vadd.f32 %v9923_v54, %v398_v7 }
 0x130   :  { %7246 = vmatmul.msk.bf16.vlgmr.msrb.gmra.mxu0 %vm710_vm3, %v9928_v60  ;;  %v454_v11 = vmax.f32 %v399_v8, 0.0 }
 0x135   :  { %v400_v9 = vpop.f32.mrf.mxu0 }
 0x136   :  { %v401_v10 = vadd.f32 %v9923_v54, %v400_v9 }
 0x138   :  { %v455_v13 = vmax.f32 %v401_v10, 0.0 }
 0x139   :  { %v10068_v14 = vpop.f32.mrf.mxu1 }
 0x13a   :  { %v10070_v15 = vpack.c.bf16 %v455_v13, %v454_v11 }
 0x13c   :  { %14125 = vst [vmem:[#allocation16_spill] sm:$0xff] %v10070_v15  ;;  %7206 = vmatmul.msk.bf16.gmra.mxu1 %vm710_vm3, %v10070_v15  ;;  %7222 = vmatmul.msk.bf16.gmra.mxu2 %vm710_vm3, %v10070_v15 }
 0x13d   :  { %7238 = vmatmul.msk.bf16.gmra.mxu3 %vm710_vm3, %v10070_v15  ;;  %v403_v16 = vpop.f32.mrf.mxu0 }
 0x13e   :  { %v404_v25 = vadd.f32 %v9923_v54, %v403_v16 }
 0x13f   :  { %v10078_v17 = vpop.f32.mrf.mxu2 }
 0x140   :  { %v10080_v18 = vpop.f32.mrf.mxu3  ;;  %7247 = vmatmul.msk.bf16.gmra.mxu0 %vm710_vm3, %v9942_v4  ;;  %v456_v30 = vmax.f32 %v404_v25, 0.0 }
 0x141   :  { %14126 = vst [vmem:[#allocation17_spill] sm:$0xff] %v10080_v18  ;;  %v10090_v22 = vpop.f32.mrf.mxu1 }
 0x145   :  { %v405_v26 = vpop.f32.mrf.mxu0 }
 0x146   :  { %v406_v27 = vadd.f32 %v9923_v54, %v405_v26 }
 0x147   :  { %v10096_v29 = vpop.f32.mrf.mxu2 }
 0x148   :  { %v457_v31 = vmax.f32 %v406_v27, 0.0  ;;  %v10100_v33 = vpop.f32.mrf.mxu3 }
 0x149   :  { %14127 = vst [vmem:[#allocation18_spill] sm:$0xff] %v10100_v33  ;;  %v10104_v35 = vpop.f32.mrf.mxu1 }
 0x14a   :  { %v10106_v36 = vpack.c.bf16 %v457_v31, %v456_v30 }
 0x14c   :  { %7207 = vmatmul.msk.bf16.gmra.mxu1 %vm710_vm3, %v10106_v36  ;;  %7223 = vmatmul.msk.bf16.gmra.mxu2 %vm710_vm3, %v10106_v36 }
 0x14d   :  { %7239 = vmatmul.msk.bf16.gmra.mxu3 %vm710_vm3, %v10106_v36  ;;  %v408_v37 = vpop.f32.mrf.mxu0 }
 0x14e   :  { %v409_v49 = vadd.f32 %v9923_v54, %v408_v37 }
 0x14f   :  { %v10126_v43 = vpop.f32.mrf.mxu2 }
 0x150   :  { %v10128_v45 = vpop.f32.mrf.mxu3  ;;  %7248 = vmatmul.msk.bf16.gmra.mxu0 %vm710_vm3, %v9956_v12  ;;  %v458_v53 = vmax.f32 %v409_v49, 0.0 }
 0x151   :  { %14128 = vst [vmem:[#allocation19_spill] sm:$0xff] %v10128_v45  ;;  %v10132_v46 = vpop.f32.mrf.mxu1 }
 0x155   :  { %v410_v50 = vpop.f32.mrf.mxu0 }
 0x156   :  { %v411_v51 = vadd.f32 %v9923_v54, %v410_v50 }
 0x157   :  { %v10138_v52 = vpop.f32.mrf.mxu2 }
 0x158   :  { %v459_v55 = vmax.f32 %v411_v51, 0.0  ;;  %v10142_v57 = vpop.f32.mrf.mxu3 }
 0x159   :  { %14129 = vst [vmem:[#allocation20_spill] sm:$0xff] %v10142_v57  ;;  %v10146_v59 = vpop.f32.mrf.mxu1 }
 0x15a   :  { %v10148_v62 = vpack.c.bf16 %v459_v55, %v458_v53 }
 0x15c   :  { %7208 = vmatmul.msk.bf16.gmra.mxu1 %vm710_vm3, %v10148_v62  ;;  %7224 = vmatmul.msk.bf16.gmra.mxu2 %vm710_vm3, %v10148_v62 }
 0x15d   :  { %7240 = vmatmul.msk.bf16.gmra.mxu3 %vm710_vm3, %v10148_v62  ;;  %v413_v63 = vpop.f32.mrf.mxu0 }
 0x15e   :  { %v414_v5 = vadd.f32 %v9923_v54, %v413_v63 }
 0x15f   :  { %v10156_v0 = vpop.f32.mrf.mxu2 }
 0x160   :  { %v10158_v1 = vpop.f32.mrf.mxu3  ;;  %7249 = vmatmul.msk.bf16.gmra.mxu0 %vm710_vm3, %v9970_v20  ;;  %v460_v10 = vmax.f32 %v414_v5, 0.0 }
 0x161   :  { %14130 = vst [vmem:[#allocation21_spill] sm:$0xff] %v10158_v1  ;;  %v10162_v2 = vpop.f32.mrf.mxu1 }
 0x165   :  { %v415_v7 = vpop.f32.mrf.mxu0 }
 0x166   :  { %v416_v8 = vadd.f32 %v9923_v54, %v415_v7  ;;  %v7108_v7 = vld [vmem:[%s14120_s5 + $0x58] sm:$0xf] }
 0x167   :  { %v10168_v9 = vpop.f32.mrf.mxu2 }
 0x168   :  { %v461_v11 = vmax.f32 %v416_v8, 0.0  ;;  %v10172_v16 = vpop.f32.mrf.mxu3  ;;  %v9054_v8 = vld [vmem:[%s14120_s5 + $0x78] sm:$0xf0] }
 0x169   :  { %14131 = vst [vmem:[#allocation22_spill] sm:$0xff] %v10172_v16  ;;  %v10176_v21 = vpop.f32.mrf.mxu1 }
 0x16a   :  { %v10178_v23 = vpack.c.bf16 %v461_v11, %v460_v10  ;;  %v7109_v11 = vor.u32 %v9054_v8, %v7108_v7  ;;  %v9059_v8 = vld [vmem:[%s14120_s5 + $0xa4] sm:$0xf] }
 0x16c   :  { %7209 = vmatmul.msk.bf16.gmra.mxu1 %vm710_vm3, %v10178_v23  ;;  %7225 = vmatmul.msk.bf16.gmra.mxu2 %vm710_vm3, %v10178_v23 }
 0x16d   :  { %7241 = vmatmul.msk.bf16.gmra.mxu3 %vm710_vm3, %v10178_v23  ;;  %v418_v25 = vpop.f32.mrf.mxu0  ;;  %1121 = vmatpush.bf16.msrb.mxu1 %v7109_v11  ;;  %v7146_v11 = vld [vmem:[%s14120_s5 + $0xc4] sm:$0xf0] }
 0x16e   :  { %v419_v37 = vadd.f32 %v9923_v54, %v418_v25 }
 0x16f   :  { %v10186_v26 = vpop.f32.mrf.mxu2 }
 0x170   :  { %v10188_v27 = vpop.f32.mrf.mxu3  ;;  %7250 = vmatmul.msk.bf16.gmra.mxu0 %vm710_vm3, %v9984_v28  ;;  %v462_v41 = vmax.f32 %v419_v37, 0.0 }
 0x171   :  { %14132 = vst [vmem:[#allocation23_spill] sm:$0xff] %v10188_v27  ;;  %v10192_v30 = vpop.f32.mrf.mxu1 }
 0x175   :  { %v420_v38 = vpop.f32.mrf.mxu0 }
 0x176   :  { %v421_v39 = vadd.f32 %v9923_v54, %v420_v38 }
 0x177   :  { %v10198_v40 = vpop.f32.mrf.mxu2 }
 0x178   :  { %v463_v42 = vmax.f32 %v421_v39, 0.0  ;;  %v10202_v49 = vpop.f32.mrf.mxu3 }
 0x179   :  { %14133 = vst [vmem:[#allocation24_spill] sm:$0xff] %v10202_v49  ;;  %v10206_v51 = vpop.f32.mrf.mxu1 }
 0x17a   :  { %v10208_v53 = vpack.c.bf16 %v463_v42, %v462_v41 }
 0x17c   :  { %14134 = vst [vmem:[#allocation25_spill] sm:$0xff] %v10208_v53  ;;  %7210 = vmatmul.msk.bf16.gmra.mxu1 %vm710_vm3, %v10208_v53  ;;  %7226 = vmatmul.msk.bf16.gmra.mxu2 %vm710_vm3, %v10208_v53 }
 0x17d   :  { %7242 = vmatmul.msk.bf16.gmra.mxu3 %vm710_vm3, %v10208_v53  ;;  %v423_v55 = vpop.f32.mrf.mxu0 }
 0x17e   :  { %v424_v37 = vadd.f32 %v9923_v54, %v423_v55 }
 0x17f   :  { %v10216_v63 = vpop.f32.mrf.mxu2 }
 0x180   :  { %v10218_v5 = vpop.f32.mrf.mxu3  ;;  %7251 = vmatmul.msk.bf16.gmra.mxu0 %vm710_vm3, %v10022_v48  ;;  %v464_v42 = vmax.f32 %v424_v37, 0.0  ;;  %v7149_v37 = vor.u32 %v9059_v8, %v7146_v11  ;;  %v9050_v8 = vld [vmem:[%s14120_s5 + $0x5c] sm:$0xf]  ;;  %v7110_v11 = vld [vmem:[%s14120_s5 + $0x7c] sm:$0xf0] }
 0x181   :  { %14135 = vst [vmem:[#allocation26_spill] sm:$0xff] %v10218_v5  ;;  %v10228_v10 = vpop.f32.mrf.mxu1 }
 0x182   :  { %1209 = vmatpush.bf16.msrb.mxu2 %v7149_v37 }
 0x185   :  { %v425_v38 = vpop.f32.mrf.mxu0 }
 0x186   :  { %v426_v39 = vadd.f32 %v9923_v54, %v425_v38  ;;  %v9064_v38 = vld [vmem:[%s14120_s5 + $0xc8] sm:$0xf0] }
 0x187   :  { %v10234_v41 = vpop.f32.mrf.mxu2 }
 0x188   :  { %v465_v34 = vmax.f32 %v426_v39, 0.0  ;;  %v10236_v58 = vpop.f32.mrf.mxu3 }
 0x189   :  { %14136 = vst [vmem:[#allocation27_spill] sm:$0xff] %v10236_v58  ;;  %v10240_v50 = vpop.f32.mrf.mxu1 }
 0x18a   :  { %v10242_v7 = vpack.c.bf16 %v465_v34, %v464_v42  ;;  %v7152_v34 = vld [vmem:[%s14120_s5 + $0xa8] sm:$0xf] }
 0x18b   :  { %v7153_v42 = vor.u32 %v9064_v38, %v7152_v34  ;;  %v7116_v34 = vld [vmem:[%s14120_s5 + $0x60] sm:$0xf]  ;;  %v7113_v38 = vor.u32 %v9050_v8, %v7110_v11  ;;  %v9041_v8 = vld [vmem:[%s14120_s5 + $0x14] sm:$0xf] }
 0x18c   :  { %14137 = vst [vmem:[#allocation28_spill] sm:$0xff] %v10242_v7  ;;  %7211 = vmatmul.msk.bf16.gmra.mxu1 %vm710_vm3, %v10242_v7  ;;  %7227 = vmatmul.msk.bf16.gmra.mxu2 %vm710_vm3, %v10242_v7 }
 0x18d   :  { %7243 = vmatmul.msk.bf16.gmra.mxu3 %vm710_vm3, %v10242_v7  ;;  %v428_v55 = vpop.f32.mrf.mxu0  ;;  %1210 = vmatpush.bf16.msrb.mxu2 %v7113_v38  ;;  %v7080_v38 = vld [vmem:[%s14120_s5 + $0x18] sm:$0xf] }
 0x18e   :  { %1298 = vmatpush.bf16.msrb.mxu3 %v7153_v42  ;;  %v429_v37 = vadd.f32 %v9923_v54, %v428_v55  ;;  %v9055_v42 = vld [vmem:[%s14120_s5 + $0x80] sm:$0xf0]  ;;  %v9045_v55 = vld [vmem:[%s14120_s5 + $0x30] sm:$0xf0] }
 0x18f   :  { %v10262_v39 = vpop.f32.mrf.mxu2  ;;  %v7117_v31 = vor.u32 %v9055_v42, %v7116_v34 }
 0x190   :  { %v10264_v19 = vpop.f32.mrf.mxu3  ;;  %7252 = vmatmul.msk.bf16.gmra.mxu0 %vm710_vm3, %v10042_v61  ;;  %v466_v11 = vmax.f32 %v429_v37, 0.0 }
 0x191   :  { %14138 = vst [vmem:[#allocation29_spill] sm:$0xff] %v10264_v19  ;;  %v10268_v24 = vpop.f32.mrf.mxu1 }
 0x192   :  { %1299 = vmatpush.bf16.msrb.mxu3 %v7117_v31  ;;  %v7074_v31 = vld [vmem:[%s14120_s5 + $0x34] sm:$0xf0] }
 0x193   :  { %v7077_v44 = vor.u32 %v9041_v8, %v7074_v31 }
 0x195   :  { %v430_v3 = vpop.f32.mrf.mxu0  ;;  %1211 = vmatpush.bf16.msrb.mxu2 %v7077_v44 }
 0x196   :  { %v431_v25 = vadd.f32 %v9923_v54, %v430_v3  ;;  %v7073_v3 = vor.u32 %v9045_v55, %v7072_v32 }
 0x197   :  { %v10286_v47 = vpop.f32.mrf.mxu2 }
 0x198   :  { %v467_v34 = vmax.f32 %v431_v25, 0.0  ;;  %v10297_v42 = vpop.f32.mrf.mxu3  ;;  %v9046_v25 = vld [vmem:[%s14120_s5 + $0x38] sm:$0xf0]  ;;  %1122 = vmatpush.bf16.msrb.mxu1 %v7073_v3 }
 0x199   :  { %14139 = vst [vmem:[#allocation30_spill] sm:$0xff] %v10297_v42  ;;  %v10307_v13 = vpop.f32.mrf.mxu1  ;;  %v7081_v32 = vor.u32 %v9046_v25, %v7080_v38 }
 0x19a   :  { %v10312_v37 = vpack.c.bf16 %v467_v34, %v466_v11 }
 0x19b   :  { %1300 = vmatpush.bf16.msrb.mxu3 %v7081_v32 }
 0x19c   :  { %14140 = vst [vmem:[#allocation31_spill] sm:$0xff] %v10312_v37  ;;  %7212 = vmatmul.msk.bf16.gmra.mxu1 %vm710_vm3, %v10312_v37  ;;  %7228 = vmatmul.msk.bf16.gmra.mxu2 %vm710_vm3, %v10312_v37 }
 0x19d   :  { %7244 = vmatmul.msk.bf16.gmra.mxu3 %vm710_vm3, %v10312_v37  ;;  %v433_v55 = vpop.f32.mrf.mxu0 }
 0x19e   :  { %v434_v44 = vadd.f32 %v9923_v54, %v433_v55 }
 0x19f   :  { %v887_v8 = vpop.f32.mrf.mxu2 }
 0x1a0   :  { %v10320_v31 = vpop.f32.mrf.mxu3  ;;  %7253 = vmatmul.msk.bf16.gmra.mxu0 %vm710_vm3, %v10056_v6  ;;  %v468_v25 = vmax.f32 %v434_v44, 0.0 }
 0x1a1   :  { %v10324_v11 = vpop.f32.mrf.mxu1 }
 0x1a5   :  { %v435_v34 = vpop.f32.mrf.mxu0 }
 0x1a6   :  { %v436_v3 = vadd.f32 %v9923_v54, %v435_v34 }
 0x1a7   :  { %v889_v38 = vpop.f32.mrf.mxu2 }
 0x1a8   :  { %v469_v56 = vmax.f32 %v436_v3, 0.0  ;;  %v10328_v18 = vpop.f32.mrf.mxu3  ;;  %v1590_v27 = vpack.c.bf16 %v889_v38, %v887_v8 }
 0x1a9   :  { %v803_v33 = vpop.f32.mrf.mxu1 }
 0x1aa   :  { %v10332_v45 = vpack.c.bf16 %v469_v56, %v468_v25 }
 0x1ac   :  { %14141 = vst [vmem:[#allocation32_spill] sm:$0xff] %v10332_v45  ;;  %7213 = vmatmul.msk.bf16.gmra.mxu1 %vm710_vm3, %v10332_v45  ;;  %7229 = vmatmul.msk.bf16.gmra.mxu2 %vm710_vm3, %v10332_v45 }
 0x1ad   :  { %7245 = vmatmul.msk.bf16.gmra.mxu3 %vm710_vm3, %v10332_v45  ;;  %v10340_v54 = vpop.f32.mrf.mxu0 }
 0x1ae   :  { %14142 = vst [vmem:[#allocation33_spill] sm:$0xff] %v10340_v54 }
 0x1af   :  { %v892_v55 = vpop.f32.mrf.mxu2 }
 0x1b0   :  { %v10342_v44 = vpop.f32.mrf.mxu3  ;;  %7254 = vmatmul.msk.bf16.gmra.mxu0 %vm710_vm3, %v10070_v15 }
 0x1b1   :  { %v805_v34 = vpop.f32.mrf.mxu1 }
 0x1b5   :  { %v10346_v56 = vpop.f32.mrf.mxu0 }
 0x1b6   :  { %14143 = vst [vmem:[#allocation34_spill] sm:$0xff] %v10346_v56 }
 0x1b7   :  { %v894_v25 = vpop.f32.mrf.mxu2 }
 0x1b8   :  { %v1591_v32 = vpack.c.bf16 %v894_v25, %v892_v55  ;;  %v10350_v57 = vpop.f32.mrf.mxu3  ;;  %v1589_v25 = vpack.c.bf16 %v10286_v47, %v10262_v39  ;;  %v1567_v39 = vpack.c.bf16 %v805_v34, %v803_v33  ;;  %v1566_v33 = vpack.c.bf16 %v10324_v11, %v10307_v13 }
 0x1b9   :  { %v10354_v16 = vpop.f32.mrf.mxu1  ;;  %v14157_v13 = vpack.c.bf16 %v10268_v24, %v10240_v50 }
 0x1ba   :  { %1649 = vmatpush.bf16.msra.mxu2 %v1591_v32  ;;  %v1588_v32 = vpack.c.bf16 %v10234_v41, %v10216_v63  ;;  %v14148_v63 = vpack.c.bf16 %v10198_v40, %v10186_v26 }
 0x1bc   :  { %7262 = vmatmul.msk.bf16.vlgmr.msrb.gmra.mxu1 %vm710_vm3, %v9928_v60  ;;  %7278 = vmatmul.msk.bf16.vlgmr.msrb.gmra.mxu2 %vm710_vm3, %v9928_v60 }
 0x1bd   :  { %7294 = vmatmul.msk.bf16.vlgmr.msrb.gmra.mxu3 %vm710_vm3, %v9928_v60  ;;  %v10362_v3 = vpop.f32.mrf.mxu0 }
 0x1be   :  { %14144 = vst [vmem:[#allocation35_spill] sm:$0xff] %v10362_v3  ;;  %1650 = vmatpush.bf16.msra.mxu2 %v1590_v27 }
 0x1bf   :  { %v10364_v55 = vpop.f32.mrf.mxu2 }
 0x1c0   :  { %v10368_v1 = vpop.f32.mrf.mxu3  ;;  %7255 = vmatmul.msk.bf16.gmra.mxu0 %vm710_vm3, %v10106_v36 }
 0x1c1   :  { %14145 = vst [vmem:[#allocation36_spill] sm:$0xff] %v10368_v1  ;;  %v10372_v8 = vpop.f32.mrf.mxu1 }
 0x1c2   :  { %1651 = vmatpush.bf16.msra.mxu2 %v1589_v25 }
 0x1c5   :  { %v10378_v27 = vpop.f32.mrf.mxu0 }
 0x1c6   :  { %14146 = vst [vmem:[#allocation37_spill] sm:$0xff] %v10378_v27  ;;  %1652 = vmatpush.bf16.msra.mxu2 %v1588_v32  ;;  %v14150_v32 = vpack.c.bf16 %v10168_v9, %v10156_v0  ;;  %v14154_v9 = vpack.c.bf16 %v10096_v29, %v10078_v17 }
 0x1c7   :  { %v10382_v47 = vpop.f32.mrf.mxu2 }
 0x1c8   :  { %v10386_v56 = vpop.f32.mrf.mxu3 }
 0x1c9   :  { %14147 = vst [vmem:[#allocation38_spill] sm:$0xff] %v10386_v56  ;;  %v10390_v25 = vpop.f32.mrf.mxu1 }
 0x1ca   :  { %1653 = vmatpush.bf16.msra.mxu2 %v14148_v63  ;;  %v14152_v63 = vpack.c.bf16 %v10138_v52, %v10126_v43 }
 0x1cc   :  { %7263 = vmatmul.msk.bf16.gmra.mxu1 %vm710_vm3, %v9942_v4  ;;  %7279 = vmatmul.msk.bf16.gmra.mxu2 %vm710_vm3, %v9942_v4 }
 0x1cd   :  { %7295 = vmatmul.msk.bf16.gmra.mxu3 %vm710_vm3, %v9942_v4  ;;  %v10401_v41 = vpop.f32.mrf.mxu0 }
 0x1ce   :  { %14149 = vst [vmem:[#allocation39_spill] sm:$0xff] %v10401_v41  ;;  %1654 = vmatpush.bf16.msra.mxu2 %v14150_v32  ;;  %v9060_v41 = vld [vmem:[%s14120_s5 + $0xac] sm:$0xf] }
 0x1cf   :  { %v10406_v54 = vpop.f32.mrf.mxu2 }
 0x1d0   :  { %v10408_v38 = vpop.f32.mrf.mxu3  ;;  %7256 = vmatmul.msk.bf16.gmra.mxu0 %vm710_vm3, %v10148_v62 }
 0x1d1   :  { %14151 = vst [vmem:[#allocation40_spill] sm:$0xff] %v10408_v38  ;;  %v10412_v26 = vpop.f32.mrf.mxu1 }
 0x1d2   :  { %1655 = vmatpush.bf16.msra.mxu2 %v14152_v63  ;;  %v14159_v63 = vpack.c.bf16 %v10228_v10, %v10206_v51 }
 0x1d5   :  { %v10419_v3 = vpop.f32.mrf.mxu0 }
 0x1d6   :  { %14153 = vst [vmem:[#allocation41_spill] sm:$0xff] %v10419_v3  ;;  %1656 = vmatpush.bf16.msra.mxu2 %v14154_v9 }
 0x1d7   :  { %v10426_v32 = vpop.f32.mrf.mxu2 }
 0x1d8   :  { %v10430_v27 = vpop.f32.mrf.mxu3 }
 0x1d9   :  { %14155 = vst [vmem:[#allocation42_spill] sm:$0xff] %v10430_v27  ;;  %v10436_v52 = vpop.f32.mrf.mxu1 }
 0x1da   :  { %1747 = vmatpush.bf16.msrb.mxu2 %v1567_v39 }
 0x1dc   :  { %7264 = vmatmul.msk.bf16.gmra.mxu1 %vm710_vm3, %v9956_v12  ;;  %7280 = vmatmul.msk.bf16.gmra.mxu2 %vm710_vm3, %v9956_v12 }
 0x1dd   :  { %7296 = vmatmul.msk.bf16.gmra.mxu3 %vm710_vm3, %v9956_v12  ;;  %v10444_v17 = vpop.f32.mrf.mxu0 }
 0x1de   :  { %1748 = vmatpush.bf16.msrb.mxu2 %v1566_v33  ;;  %14156 = vst [vmem:[#allocation43_spill] sm:$0xff] %v10444_v17  ;;  %v14161_v33 = vpack.c.bf16 %v10192_v30, %v10176_v21  ;;  %v7082_v17 = vld [vmem:[%s14120_s5 + $0x3c] sm:$0xf0] }
 0x1df   :  { %v10446_v29 = vpop.f32.mrf.mxu2 }
 0x1e0   :  { %v10451_v11 = vpop.f32.mrf.mxu3  ;;  %7257 = vmatmul.msk.bf16.gmra.mxu0 %vm710_vm3, %v10178_v23 }
 0x1e1   :  { %14158 = vst [vmem:[#allocation44_spill] sm:$0xff] %v10451_v11  ;;  %v10455_v34 = vpop.f32.mrf.mxu1 }
 0x1e2   :  { %1749 = vmatpush.bf16.msrb.mxu2 %v14157_v13 }
 0x1e5   :  { %v10462_v9 = vpop.f32.mrf.mxu0 }
 0x1e6   :  { %1750 = vmatpush.bf16.msrb.mxu2 %v14159_v63  ;;  %14160 = vst [vmem:[#allocation45_spill] sm:$0xff] %v10462_v9  ;;  %v14163_v63 = vpack.c.bf16 %v10162_v2, %v10146_v59  ;;  %v7118_v9 = vld [vmem:[%s14120_s5 + $0x84] sm:$0xf0] }
 0x1e7   :  { %v10466_v50 = vpop.f32.mrf.mxu2 }
 0x1e8   :  { %v10473_v0 = vpop.f32.mrf.mxu3 }
 0x1e9   :  { %14162 = vst [vmem:[#allocation46_spill] sm:$0xff] %v10473_v0  ;;  %v10477_v10 = vpop.f32.mrf.mxu1 }
 0x1ea   :  { %1751 = vmatpush.bf16.msrb.mxu2 %v14161_v33  ;;  %v14165_v33 = vpack.c.bf16 %v10132_v46, %v10104_v35  ;;  %v9069_v46 = vld [vmem:[%s14120_s5 + $0xf4] sm:$0xf] }
 0x1ec   :  { %7265 = vmatmul.msk.bf16.gmra.mxu1 %vm710_vm3, %v9970_v20  ;;  %7281 = vmatmul.msk.bf16.gmra.mxu2 %vm710_vm3, %v9970_v20 }
 0x1ed   :  { %7297 = vmatmul.msk.bf16.gmra.mxu3 %vm710_vm3, %v9970_v20  ;;  %v10488_v21 = vpop.f32.mrf.mxu0 }
 0x1ee   :  { %1752 = vmatpush.bf16.msrb.mxu2 %v14163_v63  ;;  %14164 = vst [vmem:[#allocation47_spill] sm:$0xff] %v10488_v21  ;;  %v14167_v63 = vpack.c.bf16 %v10090_v22, %v10068_v14  ;;  %v9051_v14 = vld [vmem:[%s14120_s5 + $0x64] sm:$0xf] }
 0x1ef   :  { %v10490_v30 = vpop.f32.mrf.mxu2 }
 0x1f0   :  { %v10495_v24 = vpop.f32.mrf.mxu3  ;;  %7258 = vmatmul.msk.bf16.gmra.mxu0 %vm710_vm3, %v10208_v53 }
 0x1f1   :  { %14166 = vst [vmem:[#allocation48_spill] sm:$0xff] %v10495_v24  ;;  %v10499_v59 = vpop.f32.mrf.mxu1 }
 0x1f2   :  { %1753 = vmatpush.bf16.msrb.mxu2 %v14165_v33  ;;  %v7190_v33 = vld [vmem:[%s14120_s5 + $0x114] sm:$0xf0] }
 0x1f3   :  { %v7193_v39 = vor.u32 %v9069_v46, %v7190_v33  ;;  %v7196_v33 = vld [vmem:[%s14120_s5 + $0xf8] sm:$0xf] }
 0x1f5   :  { %v10506_v43 = vpop.f32.mrf.mxu0  ;;  %1386 = vmatpush.bf16.msra.mxu0 %v7193_v39 }
 0x1f6   :  { %1754 = vmatpush.bf16.msrb.mxu2 %v14167_v63  ;;  %14168 = vst [vmem:[#allocation49_spill] sm:$0xff] %v10506_v43  ;;  %v9074_v63 = vld [vmem:[%s14120_s5 + $0x118] sm:$0xf0]  ;;  %v7121_v43 = vor.u32 %v9051_v14, %v7118_v9 }
 0x1f7   :  { %v10516_v51 = vpop.f32.mrf.mxu2  ;;  %v7197_v39 = vor.u32 %v9074_v63, %v7196_v33  ;;  %v7154_v63 = vld [vmem:[%s14120_s5 + $0xcc] sm:$0xf0] }
 0x1f8   :  { %v10520_v22 = vpop.f32.mrf.mxu3  ;;  %v7157_v33 = vor.u32 %v9060_v41, %v7154_v63 }
 0x1f9   :  { %14169 = vst [vmem:[#allocation50_spill] sm:$0xff] %v10520_v22  ;;  %v10524_v35 = vpop.f32.mrf.mxu1  ;;  %1475 = vmatpush.bf16.msra.mxu1 %v7197_v39 }
 0x1fa   :  { %1387 = vmatpush.bf16.msra.mxu0 %v7157_v33  ;;  %v9042_v33 = vld [vmem:[%s14120_s5 + $0x1c] sm:$0xf] }
 0x1fb   :  { %v7085_v9 = vor.u32 %v9042_v33, %v7082_v17 }
 0x1fc   :  { %7266 = vmatmul.msk.bf16.gmra.mxu1 %vm710_vm3, %v9984_v28  ;;  %7282 = vmatmul.msk.bf16.gmra.mxu2 %vm710_vm3, %v9984_v28 }
 0x1fd   :  { %7298 = vmatmul.msk.bf16.gmra.mxu3 %vm710_vm3, %v9984_v28  ;;  %v10532_v46 = vpop.f32.mrf.mxu0 }
 0x1fe   :  { %14170 = vst [vmem:[#allocation51_spill] sm:$0xff] %v10532_v46  ;;  %1388 = vmatpush.bf16.msra.mxu0 %v7121_v43 }
 0x1ff   :  { %v10540_v2 = vpop.f32.mrf.mxu2 }
 0x200   :  { %v10542_v40 = vpop.f32.mrf.mxu3  ;;  %7259 = vmatmul.msk.bf16.gmra.mxu0 %vm710_vm3, %v10242_v7 }
 0x201   :  { %14171 = vst [vmem:[#allocation52_spill] sm:$0xff] %v10542_v40  ;;  %v10546_v13 = vpop.f32.mrf.mxu1 }
 0x202   :  { %1389 = vmatpush.bf16.msra.mxu0 %v7085_v9 }
 0x205   :  { %v10556_v3 = vpop.f32.mrf.mxu0 }
 0x206   :  { %14172 = vst [vmem:[#allocation53_spill] sm:$0xff] %v10556_v3 }
 0x207   :  { %v10560_v39 = vpop.f32.mrf.mxu2 }
 0x208   :  { %v10568_v21 = vpop.f32.mrf.mxu3  ;;  %v1596_v42 = vpack.c.bf16 %v10560_v39, %v10540_v2  ;;  %v14186_v2 = vpack.c.bf16 %v10516_v51, %v10490_v30  ;;  %v14188_v39 = vpack.c.bf16 %v10466_v50, %v10446_v29  ;;  %v14192_v50 = vpack.c.bf16 %v10382_v47, %v10364_v55 }
 0x209   :  { %14173 = vst [vmem:[#allocation54_spill] sm:$0xff] %v10568_v21  ;;  %v10572_v63 = vpop.f32.mrf.mxu1 }
 0x20c   :  { %7267 = vmatmul.msk.bf16.gmra.mxu1 %vm710_vm3, %v10022_v48  ;;  %7283 = vmatmul.msk.bf16.gmra.mxu2 %vm710_vm3, %v10022_v48 }
 0x20d   :  { %7299 = vmatmul.msk.bf16.gmra.mxu3 %vm710_vm3, %v10022_v48  ;;  %v10586_v14 = vpop.f32.mrf.mxu0 }
 0x20e   :  { %14174 = vst [vmem:[#allocation55_spill] sm:$0xff] %v10586_v14 }
 0x20f   :  { %v922_v43 = vpop.f32.mrf.mxu2 }
 0x210   :  { %v10588_v41 = vpop.f32.mrf.mxu3  ;;  %7260 = vmatmul.msk.bf16.gmra.mxu0 %vm710_vm3, %v10312_v37 }
 0x211   :  { %14175 = vst [vmem:[#allocation56_spill] sm:$0xff] %v10588_v41  ;;  %v10592_v46 = vpop.f32.mrf.mxu1 }
 0x215   :  { %v10596_v1 = vpop.f32.mrf.mxu0 }
 0x216   :  { %14176 = vst [vmem:[#allocation57_spill] sm:$0xff] %v10596_v1 }
 0x217   :  { %v924_v33 = vpop.f32.mrf.mxu2 }
 0x218   :  { %v10600_v56 = vpop.f32.mrf.mxu3 }
 0x219   :  { %14177 = vst [vmem:[#allocation58_spill] sm:$0xff] %v10600_v56  ;;  %v10604_v38 = vpop.f32.mrf.mxu1 }
 0x21c   :  { %7268 = vmatmul.msk.bf16.gmra.mxu1 %vm710_vm3, %v10042_v61  ;;  %7284 = vmatmul.msk.bf16.gmra.mxu2 %vm710_vm3, %v10042_v61 }
 0x21d   :  { %7300 = vmatmul.msk.bf16.gmra.mxu3 %vm710_vm3, %v10042_v61  ;;  %v10612_v3 = vpop.f32.mrf.mxu0 }
 0x21e   :  { %14178 = vst [vmem:[#allocation59_spill] sm:$0xff] %v10612_v3 }
 0x21f   :  { %v927_v17 = vpop.f32.mrf.mxu2 }
 0x220   :  { %v10614_v14 = vpop.f32.mrf.mxu3  ;;  %7261 = vmatmul.msk.bf16.gmra.mxu0 %vm710_vm3, %v10332_v45 }
 0x221   :  { %v10618_v9 = vpop.f32.mrf.mxu1 }
 0x225   :  { %v10620_v1 = vpop.f32.mrf.mxu0 }
 0x226   :  { %14179 = vst [vmem:[#allocation60_spill] sm:$0xff] %v10620_v1 }
 0x227   :  { %v929_v11 = vpop.f32.mrf.mxu2 }
 0x228   :  { %v10624_v0 = vpop.f32.mrf.mxu3  ;;  %v1598_v19 = vpack.c.bf16 %v929_v11, %v927_v17  ;;  %v1597_v17 = vpack.c.bf16 %v924_v33, %v922_v43 }
 0x229   :  { %v843_v22 = vpop.f32.mrf.mxu1 }
 0x22c   :  { %7269 = vmatmul.msk.bf16.gmra.mxu1 %vm710_vm3, %v10056_v6  ;;  %7285 = vmatmul.msk.bf16.gmra.mxu2 %vm710_vm3, %v10056_v6 }
 0x22d   :  { %7301 = vmatmul.msk.bf16.gmra.mxu3 %vm710_vm3, %v10056_v6  ;;  %v10634_v49 = vpop.f32.mrf.mxu0 }
 0x22e   :  { %14180 = vst [vmem:[#allocation61_spill] sm:$0xff] %v10634_v49 }
 0x22f   :  { %v932_v40 = vpop.f32.mrf.mxu2 }
 0x230   :  { %v10636_v27 = vpop.f32.mrf.mxu3  ;;  %7310 = vmatmul.msk.bf16.vlgmr.msra.gmra.mxu0 %vm710_vm3, %v9928_v60 }
 0x231   :  { %v845_v3 = vpop.f32.mrf.mxu1 }
 0x235   :  { %v10640_v24 = vpop.f32.mrf.mxu0 }
 0x236   :  { %14181 = vst [vmem:[#allocation62_spill] sm:$0xff] %v10640_v24 }
 0x237   :  { %v934_v21 = vpop.f32.mrf.mxu2 }
 0x238   :  { %v1599_v5 = vpack.c.bf16 %v934_v21, %v932_v40  ;;  %v10644_v58 = vpop.f32.mrf.mxu3  ;;  %v7160_v40 = vld [vmem:[%s14120_s5 + $0xb0] sm:$0xf] }
 0x239   :  { %v10648_v56 = vpop.f32.mrf.mxu1 }
 0x23a   :  { %1678 = vmatpush.bf16.msra.mxu3 %v1599_v5  ;;  %v9065_v5 = vld [vmem:[%s14120_s5 + $0xd0] sm:$0xf0] }
 0x23b   :  { %v7161_v11 = vor.u32 %v9065_v5, %v7160_v40 }
 0x23c   :  { %7270 = vmatmul.msk.bf16.gmra.mxu1 %vm710_vm3, %v10070_v15  ;;  %7286 = vmatmul.msk.bf16.gmra.mxu2 %vm710_vm3, %v10070_v15 }
 0x23d   :  { %7302 = vmatmul.msk.bf16.gmra.mxu3 %vm710_vm3, %v10070_v15  ;;  %v10656_v1 = vpop.f32.mrf.mxu0  ;;  %1476 = vmatpush.bf16.msra.mxu1 %v7161_v11  ;;  %v1575_v11 = vpack.c.bf16 %v845_v3, %v843_v22 }
 0x23e   :  { %14182 = vst [vmem:[#allocation63_spill] sm:$0xff] %v10656_v1  ;;  %1679 = vmatpush.bf16.msra.mxu3 %v1598_v19 }
 0x23f   :  { %v10664_v21 = vpop.f32.mrf.mxu2 }
 0x240   :  { %14183 = vst [vmem:[#allocation64_spill] sm:$0xff] %v10664_v21  ;;  %v10666_v41 = vpop.f32.mrf.mxu3  ;;  %7311 = vmatmul.msk.bf16.gmra.mxu0 %vm710_vm3, %v9942_v4 }
 0x241   :  { %v10670_v49 = vpop.f32.mrf.mxu1 }
 0x242   :  { %1680 = vmatpush.bf16.msra.mxu3 %v1597_v17 }
 0x245   :  { %v10676_v19 = vpop.f32.mrf.mxu0 }
 0x246   :  { %14184 = vst [vmem:[#allocation65_spill] sm:$0xff] %v10676_v19  ;;  %1681 = vmatpush.bf16.msra.mxu3 %v1596_v42 }
 0x247   :  { %v10680_v33 = vpop.f32.mrf.mxu2 }
 0x248   :  { %14185 = vst [vmem:[#allocation66_spill] sm:$0xff] %v10680_v33  ;;  %v10684_v5 = vpop.f32.mrf.mxu3 }
 0x249   :  { %v10688_v17 = vpop.f32.mrf.mxu1 }
 0x24a   :  { %1682 = vmatpush.bf16.msra.mxu3 %v14186_v2  ;;  %v14190_v2 = vpack.c.bf16 %v10426_v32, %v10406_v54  ;;  %v1574_v54 = vpack.c.bf16 %v10618_v9, %v10604_v38  ;;  %v14196_v38 = vpack.c.bf16 %v10592_v46, %v10572_v63 }
 0x24c   :  { %7271 = vmatmul.msk.bf16.gmra.mxu1 %vm710_vm3, %v10106_v36  ;;  %7287 = vmatmul.msk.bf16.gmra.mxu2 %vm710_vm3, %v10106_v36 }
 0x24d   :  { %7303 = vmatmul.msk.bf16.gmra.mxu3 %vm710_vm3, %v10106_v36  ;;  %v10699_v42 = vpop.f32.mrf.mxu0 }
 0x24e   :  { %14187 = vst [vmem:[#allocation67_spill] sm:$0xff] %v10699_v42  ;;  %1683 = vmatpush.bf16.msra.mxu3 %v14188_v39 }
 0x24f   :  { %v10704_v40 = vpop.f32.mrf.mxu2 }
 0x250   :  { %14189 = vst [vmem:[#allocation68_spill] sm:$0xff] %v10704_v40  ;;  %v10706_v43 = vpop.f32.mrf.mxu3  ;;  %7312 = vmatmul.msk.bf16.gmra.mxu0 %vm710_vm3, %v9956_v12 }
 0x251   :  { %v10710_v51 = vpop.f32.mrf.mxu1 }
 0x252   :  { %1684 = vmatpush.bf16.msra.mxu3 %v14190_v2  ;;  %v14197_v2 = vpack.c.bf16 %v10546_v13, %v10524_v35 }
 0x255   :  { %v10717_v24 = vpop.f32.mrf.mxu0 }
 0x256   :  { %14191 = vst [vmem:[#allocation69_spill] sm:$0xff] %v10717_v24  ;;  %1685 = vmatpush.bf16.msra.mxu3 %v14192_v50 }
 0x257   :  { %v10724_v39 = vpop.f32.mrf.mxu2 }
 0x258   :  { %14193 = vst [vmem:[#allocation70_spill] sm:$0xff] %v10724_v39  ;;  %v10728_v21 = vpop.f32.mrf.mxu3 }
 0x259   :  { %v10734_v32 = vpop.f32.mrf.mxu1 }
 0x25a   :  { %1776 = vmatpush.bf16.msrb.mxu3 %v1575_v11 }
 0x25c   :  { %7272 = vmatmul.msk.bf16.gmra.mxu1 %vm710_vm3, %v10148_v62  ;;  %7288 = vmatmul.msk.bf16.gmra.mxu2 %vm710_vm3, %v10148_v62 }
 0x25d   :  { %7304 = vmatmul.msk.bf16.gmra.mxu3 %vm710_vm3, %v10148_v62  ;;  %v10742_v55 = vpop.f32.mrf.mxu0 }
 0x25e   :  { %1777 = vmatpush.bf16.msrb.mxu3 %v1574_v54  ;;  %14194 = vst [vmem:[#allocation71_spill] sm:$0xff] %v10742_v55  ;;  %v14200_v54 = vpack.c.bf16 %v10499_v59, %v10477_v10 }
 0x25f   :  { %v10744_v47 = vpop.f32.mrf.mxu2 }
 0x260   :  { %14195 = vst [vmem:[#allocation72_spill] sm:$0xff] %v10744_v47  ;;  %v10749_v22 = vpop.f32.mrf.mxu3  ;;  %7313 = vmatmul.msk.bf16.gmra.mxu0 %vm710_vm3, %v9970_v20 }
 0x261   :  { %v10753_v9 = vpop.f32.mrf.mxu1 }
 0x262   :  { %1778 = vmatpush.bf16.msrb.mxu3 %v14196_v38 }
 0x265   :  { %v10760_v50 = vpop.f32.mrf.mxu0 }
 0x266   :  { %1779 = vmatpush.bf16.msrb.mxu3 %v14197_v2  ;;  %14198 = vst [vmem:[#allocation73_spill] sm:$0xff] %v10760_v50  ;;  %v14201_v2 = vpack.c.bf16 %v10455_v34, %v10436_v52 }
 0x267   :  { %v10764_v63 = vpop.f32.mrf.mxu2 }
 0x268   :  { %14199 = vst [vmem:[#allocation74_spill] sm:$0xff] %v10764_v63  ;;  %v10771_v30 = vpop.f32.mrf.mxu3 }
 0x269   :  { %v10775_v35 = vpop.f32.mrf.mxu1 }
 0x26a   :  { %1780 = vmatpush.bf16.msrb.mxu3 %v14200_v54  ;;  %v14204_v54 = vpack.c.bf16 %v10412_v26, %v10390_v25 }
 0x26c   :  { %7273 = vmatmul.msk.bf16.gmra.mxu1 %vm710_vm3, %v10178_v23  ;;  %7289 = vmatmul.msk.bf16.gmra.mxu2 %vm710_vm3, %v10178_v23 }
 0x26d   :  { %7305 = vmatmul.msk.bf16.gmra.mxu3 %vm710_vm3, %v10178_v23  ;;  %v10786_v10 = vpop.f32.mrf.mxu0 }
 0x26e   :  { %1781 = vmatpush.bf16.msrb.mxu3 %v14201_v2  ;;  %14202 = vst [vmem:[#allocation75_spill] sm:$0xff] %v10786_v10  ;;  %v14205_v2 = vpack.c.bf16 %v10372_v8, %v10354_v16  ;;  %v7124_v8 = vld [vmem:[%s14120_s5 + $0x68] sm:$0xf] }
 0x26f   :  { %v10788_v59 = vpop.f32.mrf.mxu2 }
 0x270   :  { %14203 = vst [vmem:[#allocation76_spill] sm:$0xff] %v10788_v59  ;;  %v10793_v38 = vpop.f32.mrf.mxu3  ;;  %7314 = vmatmul.msk.bf16.gmra.mxu0 %vm710_vm3, %v9984_v28 }
 0x271   :  { %v10797_v52 = vpop.f32.mrf.mxu1 }
 0x272   :  { %1782 = vmatpush.bf16.msrb.mxu3 %v14204_v54 }
 0x275   :  { %v10804_v29 = vpop.f32.mrf.mxu0 }
 0x276   :  { %1783 = vmatpush.bf16.msrb.mxu3 %v14205_v2  ;;  %14206 = vst [vmem:[#allocation77_spill] sm:$0xff] %v10804_v29  ;;  %v9056_v2 = vld [vmem:[%s14120_s5 + $0x88] sm:$0xf0] }
 0x277   :  { %v10808_v26 = vpop.f32.mrf.mxu2  ;;  %v7125_v54 = vor.u32 %v9056_v2, %v7124_v8 }
 0x278   :  { %14207 = vst [vmem:[#allocation78_spill] sm:$0xff] %v10808_v26  ;;  %v10812_v46 = vpop.f32.mrf.mxu3 }
 0x279   :  { %v10816_v13 = vpop.f32.mrf.mxu1  ;;  %1477 = vmatpush.bf16.msra.mxu1 %v7125_v54 }
 0x27c   :  { %7274 = vmatmul.msk.bf16.gmra.mxu1 %vm710_vm3, %v10208_v53  ;;  %7290 = vmatmul.msk.bf16.gmra.mxu2 %vm710_vm3, %v10208_v53 }
 0x27d   :  { %7306 = vmatmul.msk.bf16.gmra.mxu3 %vm710_vm3, %v10208_v53  ;;  %v10824_v16 = vpop.f32.mrf.mxu0 }
 0x27e   :  { %14208 = vst [vmem:[#allocation79_spill] sm:$0xff] %v10824_v16 }
 0x27f   :  { %v10832_v25 = vpop.f32.mrf.mxu2 }
 0x280   :  { %14209 = vst [vmem:[#allocation80_spill] sm:$0xff] %v10832_v25  ;;  %v10834_v3 = vpop.f32.mrf.mxu3  ;;  %7315 = vmatmul.msk.bf16.gmra.mxu0 %vm710_vm3, %v10022_v48  ;;  %v7088_v25 = vld [vmem:[%s14120_s5 + $0x20] sm:$0xf] }
 0x281   :  { %v10838_v11 = vpop.f32.mrf.mxu1  ;;  %v7352_v48 = vld [vmem:[%s14218_s6 + $0x40] sm:$0xf] }
 0x285   :  { %v10840_v34 = vpop.f32.mrf.mxu0 }
 0x286   :  { %14210 = vst [vmem:[#allocation81_spill] sm:$0xff] %v10840_v34 }
 0x287   :  { %v10844_v40 = vpop.f32.mrf.mxu2 }
 0x288   :  { %14211 = vst [vmem:[#allocation82_spill] sm:$0xff] %v10844_v40  ;;  %v10848_v2 = vpop.f32.mrf.mxu3  ;;  %v9047_v40 = vld [vmem:[%s14120_s5 + $0x40] sm:$0xf0] }
 0x289   :  { %v10850_v39 = vpop.f32.mrf.mxu1  ;;  %v7089_v19 = vor.u32 %v9047_v40, %v7088_v25 }
 0x28b   :  { %1478 = vmatpush.bf16.msra.mxu1 %v7089_v19 }
 0x28c   :  { %7275 = vmatmul.msk.bf16.gmra.mxu1 %vm710_vm3, %v10242_v7  ;;  %7291 = vmatmul.msk.bf16.gmra.mxu2 %vm710_vm3, %v10242_v7 }
 0x28d   :  { %7307 = vmatmul.msk.bf16.gmra.mxu3 %vm710_vm3, %v10242_v7  ;;  %v10858_v54 = vpop.f32.mrf.mxu0 }
 0x28f   :  { %v10860_v33 = vpop.f32.mrf.mxu2 }
 0x290   :  { %14212 = vst [vmem:[#allocation83_spill] sm:$0xff] %v10860_v33  ;;  %v10862_v47 = vpop.f32.mrf.mxu3  ;;  %7316 = vmatmul.msk.bf16.gmra.mxu0 %vm710_vm3, %v10042_v61 }
 0x291   :  { %v1151_v8 = vpop.f32.mrf.mxu1 }
 0x292   :  { %v2072_v29 = vpack.c.bf16 %v1151_v8, %v10850_v39  ;;  %v9085_v8 = vld [vmem:[%s14218_s6 + $0x54] sm:$0xf] }
 0x295   :  { %v10866_v63 = vpop.f32.mrf.mxu0 }
 0x297   :  { %v10870_v26 = vpop.f32.mrf.mxu2 }
 0x298   :  { %14213 = vst [vmem:[#allocation84_spill] sm:$0xff] %v10870_v26  ;;  %v10880_v61 = vpop.f32.mrf.mxu3 }
 0x299   :  { %v1154_v42 = vpop.f32.mrf.mxu1 }
 0x29c   :  { %7276 = vmatmul.msk.bf16.gmra.mxu1 %vm710_vm3, %v10312_v37  ;;  %7292 = vmatmul.msk.bf16.gmra.mxu2 %vm710_vm3, %v10312_v37 }
 0x29d   :  { %7308 = vmatmul.msk.bf16.gmra.mxu3 %vm710_vm3, %v10312_v37  ;;  %v10888_v59 = vpop.f32.mrf.mxu0 }
 0x29f   :  { %v10890_v24 = vpop.f32.mrf.mxu2 }
 0x2a0   :  { %14214 = vst [vmem:[#allocation85_spill] sm:$0xff] %v10890_v24  ;;  %v10892_v55 = vpop.f32.mrf.mxu3  ;;  %7317 = vmatmul.msk.bf16.gmra.mxu0 %vm710_vm3, %v10056_v6 }
 0x2a1   :  { %v1156_v40 = vpop.f32.mrf.mxu1 }
 0x2a2   :  { %v2073_v10 = vpack.c.bf16 %v1156_v40, %v1154_v42 }
 0x2a5   :  { %v10896_v19 = vpop.f32.mrf.mxu0 }
 0x2a7   :  { %v10900_v1 = vpop.f32.mrf.mxu2 }
 0x2a8   :  { %14215 = vst [vmem:[#allocation86_spill] sm:$0xff] %v10900_v1  ;;  %v10904_v26 = vpop.f32.mrf.mxu3 }
 0x2a9   :  { %v1159_v37 = vpop.f32.mrf.mxu1 }
 0x2ac   :  { %7277 = vmatmul.msk.bf16.gmra.mxu1 %vm710_vm3, %v10332_v45  ;;  %7293 = vmatmul.msk.bf16.gmra.mxu2 %vm710_vm3, %v10332_v45 }
 0x2ad   :  { %7309 = vmatmul.msk.bf16.gmra.mxu3 %vm710_vm3, %v10332_v45  ;;  %v10912_v6 = vpop.f32.mrf.mxu0  ;;  %v9084_v45 = vld [vmem:[%s14218_s6 + $0x44] sm:$0xf0] }
 0x2ae   :  { %14216 = vst [vmem:[#allocation87_spill] sm:$0xff] %v10912_v6  ;;  %v7353_v34 = vor.u32 %v9084_v45, %v7352_v48  ;;  %v14219_v6 = vpack.c.bf16 %v10350_v57, %v10342_v44  ;;  %v14223_v57 = vpack.c.bf16 %v10624_v0, %v10614_v14  ;;  %v14224_v44 = vld [vmem:[#allocation30_spill] sm:$0xff]  ;;  %v14229_v14 = vld [vmem:[#allocation56_spill] sm:$0xff] }
 0x2af   :  { %v10914_v25 = vpop.f32.mrf.mxu2  ;;  %v14228_v0 = vld [vmem:[#allocation58_spill] sm:$0xff] }
 0x2b0   :  { %v10916_v50 = vpop.f32.mrf.mxu3  ;;  %7318 = vmatmul.msk.bf16.gmra.mxu0 %vm710_vm3, %v10070_v15  ;;  %v9083_v15 = vld [vmem:[%s14218_s6 + $0x44] sm:$0xf] }
 0x2b1   :  { %v1161_v33 = vpop.f32.mrf.mxu1 }
 0x2b2   :  { %v2074_v24 = vpack.c.bf16 %v1161_v33, %v1159_v37  ;;  %v7354_v37 = vld [vmem:[%s14218_s6 + $0x48] sm:$0xf0] }
 0x2b3   :  { %v7357_v40 = vor.u32 %v9083_v15, %v7354_v37  ;;  %v2071_v15 = vpack.c.bf16 %v10838_v11, %v10816_v13  ;;  %v14230_v11 = vpack.c.bf16 %v14228_v0, %v14229_v14  ;;  %v14231_v13 = vpack.c.bf16 %v10797_v52, %v10775_v35  ;;  %v7362_v37 = vld [vmem:[%s14218_s6 + $0x58] sm:$0xf0]  ;;  %v14235_v0 = vld [vmem:[#allocation54_spill] sm:$0xff] }
 0x2b4   :  { %2132 = vmatpush.bf16.msrb.mxu0 %v2074_v24  ;;  %v14236_v14 = vld [vmem:[#allocation52_spill] sm:$0xff] }
 0x2b5   :  { %v10920_v1 = vpop.f32.mrf.mxu0  ;;  %v14275_v52 = vld [vmem:[#allocation60_spill] sm:$0xff] }
 0x2b6   :  { %14217 = vst [vmem:[#allocation88_spill] sm:$0xff] %v10920_v1 }
 0x2b7   :  { %v10936_v24 = vpop.f32.mrf.mxu2 }
 0x2b8   :  { %v1339_v16 = vpop.f32.mrf.mxu3  ;;  %2133 = vmatpush.bf16.msrb.mxu0 %v2073_v10  ;;  %v14221_v10 = vpack.c.bf16 %v10644_v58, %v10636_v27  ;;  %v14225_v27 = vld [vmem:[#allocation29_spill] sm:$0xff] }
 0x2b9   :  { %v10940_v42 = vpop.f32.mrf.mxu1 }
 0x2bc   :  { %7326 = vmatmul.msk.bf16.vlgmr.msra.gmra.mxu1 %vm710_vm3, %v9928_v60  ;;  %1657 = vmatmul.bf16.vlgmr.msra.gmra.mxu2 %v7353_v34  ;;  %v14222_v60 = vpack.c.bf16 %v10328_v18, %v10320_v31  ;;  %v7360_v18 = vld [vmem:[%s14218_s6 + $0x50] sm:$0xf]  ;;  %v9086_v31 = vld [vmem:[%s14218_s6 + $0x54] sm:$0xf0] }
 0x2bd   :  { %1686 = vmatmul.bf16.vlgmr.msra.gmra.mxu3 %v7357_v40  ;;  %1870 = vmatpush.bf16.msra.mxu2 %v14219_v6  ;;  %v10948_v1 = vpop.f32.mrf.mxu0  ;;  %v7361_v35 = vor.u32 %v9086_v31, %v7360_v18  ;;  %v14239_v18 = vld [vmem:[#allocation24_spill] sm:$0xff]  ;;  %v14240_v31 = vld [vmem:[#allocation23_spill] sm:$0xff] }
 0x2be   :  { %14220 = vst [vmem:[#allocation89_spill] sm:$0xff] %v10948_v1  ;;  %1899 = vmatpush.bf16.msra.mxu3 %v14221_v10  ;;  %2134 = vmatpush.bf16.msrb.mxu0 %v2072_v29  ;;  %v14226_v29 = vpack.c.bf16 %v14224_v44, %v14225_v27  ;;  %v14320_v1 = vld [vmem:[#allocation33_spill] sm:$0xff] }
 0x2bf   :  { %v10953_v48 = vpop.f32.mrf.mxu2 }
 0x2c0   :  { %v10957_v45 = vpop.f32.mrf.mxu3  ;;  %7319 = vmatmul.msk.bf16.gmra.mxu0 %vm710_vm3, %v10106_v36 }
 0x2c1   :  { %1871 = vmatpush.bf16.msra.mxu2 %v14222_v60  ;;  %v10964_v6 = vpop.f32.mrf.mxu1  ;;  %v14232_v60 = vld [vmem:[#allocation27_spill] sm:$0xff] }
 0x2c2   :  { %1900 = vmatpush.bf16.msra.mxu3 %v14223_v57  ;;  %2135 = vmatpush.bf16.msrb.mxu0 %v2071_v15  ;;  %v14233_v57 = vld [vmem:[#allocation26_spill] sm:$0xff] }
 0x2c3   :  { %v14234_v44 = vpack.c.bf16 %v14232_v60, %v14233_v57  ;;  %v14241_v60 = vpack.c.bf16 %v14239_v18, %v14240_v31  ;;  %v14251_v18 = vld [vmem:[#allocation44_spill] sm:$0xff] }
 0x2c5   :  { %1872 = vmatpush.bf16.msra.mxu2 %v14226_v29  ;;  %v10974_v39 = vpop.f32.mrf.mxu0  ;;  %v7365_v29 = vor.u32 %v9085_v8, %v7362_v37  ;;  %v14243_v8 = vld [vmem:[#allocation50_spill] sm:$0xff]  ;;  %v14244_v37 = vld [vmem:[#allocation48_spill] sm:$0xff] }
 0x2c6   :  { %14227 = vst [vmem:[#allocation30_spill] sm:$0xff] %v10974_v39  ;;  %1901 = vmatpush.bf16.msra.mxu3 %v14230_v11  ;;  %2136 = vmatpush.bf16.msrb.mxu0 %v14231_v13  ;;  %v14237_v11 = vpack.c.bf16 %v14235_v0, %v14236_v14  ;;  %v14238_v13 = vpack.c.bf16 %v10753_v9, %v10734_v32 }
 0x2c7   :  { %v10996_v40 = vpop.f32.mrf.mxu2  ;;  %v14246_v0 = vpack.c.bf16 %v10710_v51, %v10688_v17  ;;  %v14253_v17 = vpack.c.bf16 %v10670_v49, %v10648_v56  ;;  %v9088_v49 = vld [vmem:[%s14218_s6 + $0x64] sm:$0xf0]  ;;  %v14297_v51 = vld [vmem:[#allocation13_spill] sm:$0xff] }
 0x2c8   :  { %v11000_v15 = vpop.f32.mrf.mxu3  ;;  %v14258_v56 = vld [vmem:[#allocation42_spill] sm:$0xff] }
 0x2c9   :  { %1873 = vmatpush.bf16.msra.mxu2 %v14234_v44  ;;  %v11007_v27 = vpop.f32.mrf.mxu1  ;;  %v14245_v44 = vpack.c.bf16 %v14243_v8, %v14244_v37 }
 0x2ca   :  { %1902 = vmatpush.bf16.msra.mxu3 %v14237_v11  ;;  %2137 = vmatpush.bf16.msrb.mxu0 %v14238_v13  ;;  %v14250_v13 = vld [vmem:[#allocation46_spill] sm:$0xff] }
 0x2cb   :  { %v14252_v31 = vpack.c.bf16 %v14250_v13, %v14251_v18 }
 0x2cc   :  { %7327 = vmatmul.msk.bf16.gmra.mxu1 %vm710_vm3, %v9942_v4  ;;  %1662 = vmatmul.bf16.gmra.mxu2 %v7361_v35  ;;  %v2336_v4 = vpack.c.bf16 %v1339_v16, %v10916_v50  ;;  %v14247_v35 = vld [vmem:[#allocation22_spill] sm:$0xff]  ;;  %v2335_v50 = vpack.c.bf16 %v10904_v26, %v10892_v55  ;;  %v14254_v16 = vld [vmem:[#allocation20_spill] sm:$0xff]  ;;  %v9087_v26 = vld [vmem:[%s14218_s6 + $0x64] sm:$0xf] }
 0x2cd   :  { %1691 = vmatmul.bf16.gmra.mxu3 %v7365_v29  ;;  %1874 = vmatpush.bf16.msra.mxu2 %v14241_v60  ;;  %v11020_v57 = vpop.f32.mrf.mxu0  ;;  %v14248_v29 = vld [vmem:[#allocation21_spill] sm:$0xff]  ;;  %v14255_v60 = vld [vmem:[#allocation19_spill] sm:$0xff] }
 0x2ce   :  { %14242 = vst [vmem:[#allocation29_spill] sm:$0xff] %v11020_v57  ;;  %1903 = vmatpush.bf16.msra.mxu3 %v14245_v44  ;;  %2138 = vmatpush.bf16.msrb.mxu0 %v14246_v0  ;;  %v14249_v14 = vpack.c.bf16 %v14247_v35, %v14248_v29  ;;  %v14256_v8 = vpack.c.bf16 %v14254_v16, %v14255_v60  ;;  %v7368_v44 = vld [vmem:[%s14218_s6 + $0x60] sm:$0xf]  ;;  %v14259_v0 = vld [vmem:[#allocation40_spill] sm:$0xff]  ;;  %v7370_v35 = vld [vmem:[%s14218_s6 + $0x68] sm:$0xf0] }
 0x2cf   :  { %v11028_v32 = vpop.f32.mrf.mxu2  ;;  %v7369_v18 = vor.u32 %v9088_v49, %v7368_v44  ;;  %v14261_v16 = vld [vmem:[#allocation18_spill] sm:$0xff]  ;;  %v14262_v60 = vld [vmem:[#allocation17_spill] sm:$0xff] }
 0x2d0   :  { %v11030_v9 = vpop.f32.mrf.mxu3  ;;  %7320 = vmatmul.msk.bf16.gmra.mxu0 %vm710_vm3, %v10148_v62 }
 0x2d1   :  { %1875 = vmatpush.bf16.msra.mxu2 %v14249_v14  ;;  %v11038_v11 = vpop.f32.mrf.mxu1  ;;  %v14292_v14 = vld [vmem:[#allocation47_spill] sm:$0xff] }
 0x2d2   :  { %1904 = vmatpush.bf16.msra.mxu3 %v14252_v31  ;;  %2139 = vmatpush.bf16.msrb.mxu0 %v14253_v17  ;;  %v2334_v31 = vpack.c.bf16 %v10880_v61, %v10862_v47  ;;  %v2333_v61 = vpack.c.bf16 %v10848_v2, %v10834_v3  ;;  %v7376_v2 = vld [vmem:[%s14218_s6 + $0x70] sm:$0xf] }
 0x2d3   :  { %v14276_v17 = vld [vmem:[#allocation59_spill] sm:$0xff] }
 0x2d5   :  { %1876 = vmatpush.bf16.msra.mxu2 %v14256_v8  ;;  %v11053_v37 = vpop.f32.mrf.mxu0  ;;  %v14263_v8 = vpack.c.bf16 %v14261_v16, %v14262_v60 }
 0x2d6   :  { %2394 = vmatpush.bf16.msra.mxu0 %v2336_v4  ;;  %14257 = vst [vmem:[#allocation58_spill] sm:$0xff] %v11053_v37  ;;  %v14260_v4 = vpack.c.bf16 %v14258_v56, %v14259_v0  ;;  %v14264_v0 = vld [vmem:[#allocation38_spill] sm:$0xff] }
 0x2d7   :  { %v11072_v29 = vpop.f32.mrf.mxu2 }
 0x2d8   :  { %1905 = vmatpush.bf16.msra.mxu3 %v14260_v4  ;;  %v11076_v13 = vpop.f32.mrf.mxu3  ;;  %v14265_v4 = vld [vmem:[#allocation36_spill] sm:$0xff] }
 0x2d9   :  { %1877 = vmatpush.bf16.msra.mxu2 %v14263_v8  ;;  %v11085_v56 = vpop.f32.mrf.mxu1  ;;  %v14266_v34 = vpack.c.bf16 %v14264_v0, %v14265_v4  ;;  %v14277_v0 = vpack.c.bf16 %v14275_v52, %v14276_v17  ;;  %v14283_v52 = vpack.c.bf16 %v10866_v63, %v10858_v54  ;;  %v14284_v17 = vld [vmem:[#allocation53_spill] sm:$0xff]  ;;  %v9077_v63 = vld [vmem:[%s14218_s6 + $0x14] sm:$0xf]  ;;  %v7394_v54 = vld [vmem:[%s14218_s6 + $0x18] sm:$0xf0] }
 0x2da   :  { %2395 = vmatpush.bf16.msra.mxu0 %v2335_v50  ;;  %v7373_v50 = vor.u32 %v9087_v26, %v7370_v35  ;;  %v14268_v26 = vpack.c.bf16 %v10812_v46, %v10793_v38  ;;  %v9090_v35 = vld [vmem:[%s14218_s6 + $0x74] sm:$0xf0]  ;;  %v7378_v46 = vld [vmem:[%s14218_s6 + $0x78] sm:$0xf0]  ;;  %v14270_v38 = vpack.c.bf16 %v10771_v30, %v10749_v22  ;;  %v14273_v22 = vpack.c.bf16 %v10684_v5, %v10666_v41  ;;  %v9076_v41 = vld [vmem:[%s14218_s6 + $0x4] sm:$0xf0] }
 0x2db   :  { %v9075_v5 = vld [vmem:[%s14218_s6 + $0x4] sm:$0xf] }
 0x2dc   :  { %1906 = vmatpush.bf16.msra.mxu3 %v14266_v34  ;;  %7328 = vmatmul.msk.bf16.gmra.mxu1 %vm710_vm3, %v9956_v12  ;;  %v14298_v12 = vld [vmem:[#allocation45_spill] sm:$0xff] }
 0x2dd   :  { %1667 = vmatmul.bf16.gmra.mxu2 %v7369_v18  ;;  %1696 = vmatmul.bf16.gmra.mxu3 %v7373_v50  ;;  %v11094_v47 = vpop.f32.mrf.mxu0  ;;  %v7377_v50 = vor.u32 %v9090_v35, %v7376_v2 }
 0x2de   :  { %2396 = vmatpush.bf16.msra.mxu0 %v2334_v31  ;;  %14267 = vst [vmem:[#allocation56_spill] sm:$0xff] %v11094_v47  ;;  %v9089_v31 = vld [vmem:[%s14218_s6 + $0x74] sm:$0xf]  ;;  %v14325_v47 = vld [vmem:[#allocation14_spill] sm:$0xff] }
 0x2df   :  { %v11096_v44 = vpop.f32.mrf.mxu2 }
 0x2e0   :  { %v11098_v49 = vpop.f32.mrf.mxu3  ;;  %7321 = vmatmul.msk.bf16.gmra.mxu0 %vm710_vm3, %v10178_v23 }
 0x2e1   :  { %v11102_v34 = vpop.f32.mrf.mxu1 }
 0x2e2   :  { %2397 = vmatpush.bf16.msra.mxu0 %v2333_v61  ;;  %v7381_v61 = vor.u32 %v9089_v31, %v7378_v46  ;;  %v7384_v31 = vld [vmem:[%s14218_s6] sm:$0xf]  ;;  %v7386_v46 = vld [vmem:[%s14218_s6 + $0x8] sm:$0xf0] }
 0x2e3   :  { %v7389_v18 = vor.u32 %v9075_v5, %v7386_v46  ;;  %v14281_v5 = vld [vmem:[#allocation55_spill] sm:$0xff] }
 0x2e5   :  { %v11109_v3 = vpop.f32.mrf.mxu0 }
 0x2e6   :  { %2398 = vmatpush.bf16.msra.mxu0 %v14268_v26  ;;  %14269 = vst [vmem:[#allocation27_spill] sm:$0xff] %v11109_v3  ;;  %v14271_v26 = vpack.c.bf16 %v10728_v21, %v10706_v43 }
 0x2e7   :  { %v11128_v16 = vpop.f32.mrf.mxu2 }
 0x2e8   :  { %v11132_v8 = vpop.f32.mrf.mxu3 }
 0x2e9   :  { %v11136_v4 = vpop.f32.mrf.mxu1 }
 0x2ea   :  { %2399 = vmatpush.bf16.msra.mxu0 %v14270_v38 }
 0x2ec   :  { %7329 = vmatmul.msk.bf16.gmra.mxu1 %vm710_vm3, %v9970_v20  ;;  %v14299_v20 = vld [vmem:[#allocation43_spill] sm:$0xff] }
 0x2ed   :  { %1672 = vmatmul.bf16.gmra.mxu2 %v7377_v50  ;;  %1701 = vmatmul.bf16.gmra.mxu3 %v7381_v61  ;;  %v11143_v30 = vpop.f32.mrf.mxu0  ;;  %v14300_v33 = vpack.c.bf16 %v14298_v12, %v14299_v20  ;;  %v14309_v12 = vld [vmem:[#allocation69_spill] sm:$0xff] }
 0x2ee   :  { %2400 = vmatpush.bf16.msra.mxu0 %v14271_v26  ;;  %14272 = vst [vmem:[#allocation26_spill] sm:$0xff] %v11143_v30  ;;  %v7385_v26 = vor.u32 %v9076_v41, %v7384_v31  ;;  %v14279_v31 = vpack.c.bf16 %v10896_v19, %v10888_v59  ;;  %v14285_v59 = vld [vmem:[#allocation51_spill] sm:$0xff] }
 0x2ef   :  { %v11148_v2 = vpop.f32.mrf.mxu2  ;;  %v14286_v19 = vpack.c.bf16 %v14284_v17, %v14285_v59 }
 0x2f0   :  { %v11150_v35 = vpop.f32.mrf.mxu3  ;;  %7322 = vmatmul.msk.bf16.gmra.mxu0 %vm710_vm3, %v10208_v53  ;;  %v14330_v53 = vld [vmem:[#allocation16_spill] sm:$0xff] }
 0x2f1   :  { %v11154_v21 = vpop.f32.mrf.mxu1 }
 0x2f2   :  { %2401 = vmatpush.bf16.msra.mxu0 %v14273_v22 }
 0x2f5   :  { %v11158_v43 = vpop.f32.mrf.mxu0 }
 0x2f6   :  { %14274 = vst [vmem:[#allocation54_spill] sm:$0xff] %v11158_v43 }
 0x2f7   :  { %v11172_v38 = vpop.f32.mrf.mxu2 }
 0x2f8   :  { %v11176_v61 = vpop.f32.mrf.mxu3 }
 0x2f9   :  { %v11180_v55 = vpop.f32.mrf.mxu1 }
 0x2fc   :  { %7330 = vmatmul.msk.bf16.gmra.mxu1 %vm710_vm3, %v9984_v28  ;;  %v14280_v28 = vld [vmem:[#allocation57_spill] sm:$0xff] }
 0x2fd   :  { %1755 = vmatmul.bf16.vlgmr.msrb.gmra.mxu2 %v7385_v26  ;;  %1784 = vmatmul.bf16.vlgmr.msrb.gmra.mxu3 %v7389_v18  ;;  %v11187_v10 = vpop.f32.mrf.mxu0  ;;  %v14282_v18 = vpack.c.bf16 %v14280_v28, %v14281_v5  ;;  %v7392_v26 = vld [vmem:[%s14218_s6 + $0x10] sm:$0xf]  ;;  %v14288_v28 = vld [vmem:[#allocation81_spill] sm:$0xff] }
 0x2fe   :  { %2001 = vmatpush.bf16.msrb.mxu2 %v14277_v0  ;;  %14278 = vst [vmem:[#allocation52_spill] sm:$0xff] %v11187_v10  ;;  %2030 = vmatpush.bf16.msrb.mxu3 %v14279_v31  ;;  %v9078_v31 = vld [vmem:[%s14218_s6 + $0x14] sm:$0xf0]  ;;  %v14289_v5 = vld [vmem:[#allocation79_spill] sm:$0xff] }
 0x2ff   :  { %v11192_v41 = vpop.f32.mrf.mxu2  ;;  %v7393_v59 = vor.u32 %v9078_v31, %v7392_v26 }
 0x300   :  { %v11194_v22 = vpop.f32.mrf.mxu3  ;;  %7323 = vmatmul.msk.bf16.gmra.mxu0 %vm710_vm3, %v10242_v7 }
 0x301   :  { %v11201_v46 = vpop.f32.mrf.mxu1 }
 0x302   :  { %2002 = vmatpush.bf16.msrb.mxu2 %v14282_v18  ;;  %2031 = vmatpush.bf16.msrb.mxu3 %v14283_v52  ;;  %v14290_v18 = vpack.c.bf16 %v14288_v28, %v14289_v5  ;;  %v7397_v28 = vor.u32 %v9077_v63, %v7394_v54  ;;  %v14294_v5 = vld [vmem:[#allocation77_spill] sm:$0xff] }
 0x305   :  { %v11209_v0 = vpop.f32.mrf.mxu0 }
 0x306   :  { %2003 = vmatpush.bf16.msrb.mxu2 %v14286_v19  ;;  %14287 = vst [vmem:[#allocation24_spill] sm:$0xff] %v11209_v0  ;;  %2032 = vmatpush.bf16.msrb.mxu3 %v14290_v18  ;;  %v14291_v19 = vld [vmem:[#allocation49_spill] sm:$0xff]  ;;  %v14295_v18 = vld [vmem:[#allocation75_spill] sm:$0xff] }
 0x307   :  { %v11226_v52 = vpop.f32.mrf.mxu2  ;;  %v14293_v60 = vpack.c.bf16 %v14291_v19, %v14292_v14  ;;  %v14296_v50 = vpack.c.bf16 %v14294_v5, %v14295_v18  ;;  %v14302_v14 = vld [vmem:[#allocation73_spill] sm:$0xff]  ;;  %v14313_v18 = vld [vmem:[#allocation35_spill] sm:$0xff] }
 0x308   :  { %v11228_v17 = vpop.f32.mrf.mxu3  ;;  %v14312_v5 = vld [vmem:[#allocation37_spill] sm:$0xff] }
 0x309   :  { %v11233_v58 = vpop.f32.mrf.mxu1 }
 0x30a   :  { %2004 = vmatpush.bf16.msrb.mxu2 %v14293_v60  ;;  %2033 = vmatpush.bf16.msrb.mxu3 %v14296_v50  ;;  %v14303_v60 = vld [vmem:[#allocation71_spill] sm:$0xff] }
 0x30b   :  { %v14304_v31 = vpack.c.bf16 %v14302_v14, %v14303_v60  ;;  %v14305_v50 = vld [vmem:[#allocation31_spill] sm:$0xff]  ;;  %v14314_v14 = vpack.c.bf16 %v14312_v5, %v14313_v18 }
 0x30c   :  { %7331 = vmatmul.msk.bf16.gmra.mxu1 %vm710_vm3, %v14297_v51  ;;  %v14306_v51 = vld [vmem:[#allocation41_spill] sm:$0xff] }
 0x30d   :  { %1760 = vmatmul.bf16.gmra.mxu2 %v7393_v59  ;;  %1789 = vmatmul.bf16.gmra.mxu3 %v7397_v28  ;;  %v11243_v26 = vpop.f32.mrf.mxu0  ;;  %v14307_v59 = vld [vmem:[#allocation39_spill] sm:$0xff] }
 0x30e   :  { %2005 = vmatpush.bf16.msrb.mxu2 %v14300_v33  ;;  %14301 = vst [vmem:[#allocation23_spill] sm:$0xff] %v11243_v26  ;;  %2034 = vmatpush.bf16.msrb.mxu3 %v14304_v31  ;;  %v14308_v19 = vpack.c.bf16 %v14306_v51, %v14307_v59  ;;  %v14310_v33 = vld [vmem:[#allocation67_spill] sm:$0xff]  ;;  %v7400_v31 = vld [vmem:[%s14218_s6 + $0x20] sm:$0xf]  ;;  %v9080_v51 = vld [vmem:[%s14218_s6 + $0x24] sm:$0xf0] }
 0x30f   :  { %v11248_v63 = vpop.f32.mrf.mxu2  ;;  %v14311_v20 = vpack.c.bf16 %v14309_v12, %v14310_v33  ;;  %v14316_v59 = vld [vmem:[#allocation65_spill] sm:$0xff]  ;;  %v7402_v33 = vld [vmem:[%s14218_s6 + $0x28] sm:$0xf0]  ;;  %v7401_v18 = vor.u32 %v9080_v51, %v7400_v31  ;;  %v14326_v31 = vld [vmem:[#allocation32_spill] sm:$0xff] }
 0x310   :  { %v11250_v54 = vpop.f32.mrf.mxu3  ;;  %7324 = vmatmul.msk.bf16.gmra.mxu0 %vm710_vm3, %v14305_v50  ;;  %v9079_v12 = vld [vmem:[%s14218_s6 + $0x24] sm:$0xf]  ;;  %v9081_v51 = vld [vmem:[%s14218_s6 + $0x34] sm:$0xf] }
 0x311   :  { %v1191_v28 = vpop.f32.mrf.mxu1 }
 0x312   :  { %2006 = vmatpush.bf16.msrb.mxu2 %v14308_v19  ;;  %2035 = vmatpush.bf16.msrb.mxu3 %v14311_v20  ;;  %v14317_v19 = vld [vmem:[#allocation63_spill] sm:$0xff] }
 0x313   :  { %v14318_v50 = vpack.c.bf16 %v14316_v59, %v14317_v19  ;;  %v7405_v59 = vor.u32 %v9079_v12, %v7402_v33  ;;  %v14323_v19 = vld [vmem:[#allocation61_spill] sm:$0xff]  ;;  %v7410_v12 = vld [vmem:[%s14218_s6 + $0x38] sm:$0xf0] }
 0x315   :  { %v11263_v60 = vpop.f32.mrf.mxu0 }
 0x316   :  { %2007 = vmatpush.bf16.msrb.mxu2 %v14314_v14  ;;  %14315 = vst [vmem:[#allocation50_spill] sm:$0xff] %v11263_v60  ;;  %2036 = vmatpush.bf16.msrb.mxu3 %v14318_v50  ;;  %v14319_v14 = vld [vmem:[#allocation34_spill] sm:$0xff] }
 0x317   :  { %v11280_v20 = vpop.f32.mrf.mxu2  ;;  %v14321_v39 = vpack.c.bf16 %v14319_v14, %v14320_v1  ;;  %v14322_v50 = vld [vmem:[#allocation62_spill] sm:$0xff] }
 0x318   :  { %v11282_v5 = vpop.f32.mrf.mxu3  ;;  %v14324_v37 = vpack.c.bf16 %v14322_v50, %v14323_v19  ;;  %v7413_v50 = vor.u32 %v9081_v51, %v7410_v12  ;;  %v14327_v19 = vld [vmem:[#allocation15_spill] sm:$0xff]  ;;  %v9091_v12 = vld [vmem:[%s14218_s6 + $0x84] sm:$0xf] }
 0x319   :  { %v1194_v57 = vpop.f32.mrf.mxu1 }
 0x31a   :  { %2008 = vmatpush.bf16.msrb.mxu2 %v14321_v39  ;;  %2037 = vmatpush.bf16.msrb.mxu3 %v14324_v37  ;;  %v7408_v37 = vld [vmem:[%s14218_s6 + $0x30] sm:$0xf] }
 0x31c   :  { %7332 = vmatmul.msk.bf16.gmra.mxu1 %vm710_vm3, %v14325_v47  ;;  %v9082_v47 = vld [vmem:[%s14218_s6 + $0x34] sm:$0xf0] }
 0x31d   :  { %1765 = vmatmul.bf16.gmra.mxu2 %v7401_v18  ;;  %1794 = vmatmul.bf16.gmra.mxu3 %v7405_v59  ;;  %v11292_v3 = vpop.f32.mrf.mxu0  ;;  %v7409_v14 = vor.u32 %v9082_v47, %v7408_v37  ;;  %v7424_v37 = vld [vmem:[%s14218_s6 + $0x80] sm:$0xf]  ;;  %v9092_v47 = vld [vmem:[%s14218_s6 + $0x84] sm:$0xf0] }
 0x31f   :  { %v1283_v7 = vpop.f32.mrf.mxu2 }
 0x320   :  { %v11294_v43 = vpop.f32.mrf.mxu3  ;;  %7325 = vmatmul.msk.bf16.gmra.mxu0 %vm710_vm3, %v14326_v31 }
 0x321   :  { %v1196_v1 = vpop.f32.mrf.mxu1 }
 0x322   :  { %v2081_v51 = vpack.c.bf16 %v1196_v1, %v1194_v57  ;;  %v14331_v1 = vpack.c.bf16 %v10936_v24, %v10914_v25  ;;  %v2211_v24 = vpack.c.bf16 %v11280_v20, %v11248_v63  ;;  %v2210_v20 = vpack.c.bf16 %v11226_v52, %v11192_v41 }
 0x323   :  { %v14343_v41 = vpack.c.bf16 %v11038_v11, %v11007_v27  ;;  %v14348_v27 = vpack.c.bf16 %v10964_v6, %v10940_v42  ;;  %v7440_v42 = vld [vmem:[%s14218_s6 + $0xa0] sm:$0xf]  ;;  %v9096_v6 = vld [vmem:[%s14218_s6 + $0xa4] sm:$0xf0] }
 0x325   :  { %v11298_v39 = vpop.f32.mrf.mxu0 }
 0x327   :  { %v1285_v33 = vpop.f32.mrf.mxu2 }
 0x328   :  { %v11312_v18 = vpop.f32.mrf.mxu3 }
 0x329   :  { %v1199_v59 = vpop.f32.mrf.mxu1 }
 0x32c   :  { %7333 = vmatmul.msk.bf16.gmra.mxu1 %vm710_vm3, %v14327_v19 }
 0x32d   :  { %1770 = vmatmul.bf16.gmra.mxu2 %v7409_v14  ;;  %1799 = vmatmul.bf16.gmra.mxu3 %v7413_v50  ;;  %v11316_v31 = vpop.f32.mrf.mxu0 }
 0x32e   :  { %14328 = vst [vmem:[#allocation48_spill] sm:$0xff] %v11316_v31 }
 0x32f   :  { %v1288_v30 = vpop.f32.mrf.mxu2 }
 0x330   :  { %v11318_v0 = vpop.f32.mrf.mxu3 }
 0x331   :  { %v1201_v10 = vpop.f32.mrf.mxu1 }
 0x332   :  { %v2082_v60 = vpack.c.bf16 %v1201_v10, %v1199_v59  ;;  %v7426_v10 = vld [vmem:[%s14218_s6 + $0x88] sm:$0xf0]  ;;  %v7425_v59 = vor.u32 %v9092_v47, %v7424_v37  ;;  %v2079_v37 = vpack.c.bf16 %v11201_v46, %v11180_v55  ;;  %v7432_v46 = vld [vmem:[%s14218_s6 + $0x90] sm:$0xf] }
 0x333   :  { %v7429_v19 = vor.u32 %v9091_v12, %v7426_v10  ;;  %v14337_v10 = vld [vmem:[#allocation83_spill] sm:$0xff] }
 0x334   :  { %2161 = vmatpush.bf16.msrb.mxu1 %v2082_v60 }
 0x335   :  { %v11320_v26 = vpop.f32.mrf.mxu0 }
 0x336   :  { %14329 = vst [vmem:[#allocation22_spill] sm:$0xff] %v11320_v26  ;;  %v2080_v26 = vpack.c.bf16 %v1191_v28, %v11233_v58  ;;  %v14332_v28 = vld [vmem:[#allocation86_spill] sm:$0xff] }
 0x337   :  { %v1290_v60 = vpop.f32.mrf.mxu2 }
 0x338   :  { %v1379_v14 = vpop.f32.mrf.mxu3  ;;  %2162 = vmatpush.bf16.msrb.mxu1 %v2081_v51  ;;  %v2213_v31 = vpack.c.bf16 %v1290_v60, %v1288_v30  ;;  %v2212_v51 = vpack.c.bf16 %v1285_v33, %v1283_v7  ;;  %v14335_v7 = vpack.c.bf16 %v11154_v21, %v11136_v4  ;;  %v14336_v33 = vld [vmem:[#allocation84_spill] sm:$0xff]  ;;  %v9093_v4 = vld [vmem:[%s14218_s6 + $0x94] sm:$0xf] }
 0x339   :  { %v11334_v50 = vpop.f32.mrf.mxu1  ;;  %v14338_v60 = vpack.c.bf16 %v14336_v33, %v14337_v10  ;;  %v7434_v21 = vld [vmem:[%s14218_s6 + $0x98] sm:$0xf0]  ;;  %v14349_v33 = vld [vmem:[#allocation74_spill] sm:$0xff] }
 0x33a   :  { %v14350_v10 = vld [vmem:[#allocation72_spill] sm:$0xff] }
 0x33c   :  { %7334 = vmatmul.msk.bf16.gmra.mxu1 %vm710_vm3, %v14330_v53 }
 0x33d   :  { %1878 = vmatmul.bf16.vlgmr.msra.gmra.mxu2 %v7425_v59  ;;  %1907 = vmatmul.bf16.vlgmr.msra.gmra.mxu3 %v7429_v19  ;;  %v11339_v57 = vpop.f32.mrf.mxu0 }
 0x33e   :  { %2163 = vmatpush.bf16.msrb.mxu1 %v2080_v26  ;;  %2263 = vmatpush.bf16.msra.mxu2 %v14331_v1  ;;  %v14333_v26 = vld [vmem:[#allocation85_spill] sm:$0xff] }
 0x33f   :  { %2292 = vmatpush.bf16.msra.mxu3 %v2213_v31  ;;  %v1658_v47 = vpop.f32.mrf.mxu2  ;;  %v14334_v12 = vpack.c.bf16 %v14332_v28, %v14333_v26  ;;  %v9094_v31 = vld [vmem:[%s14218_s6 + $0x94] sm:$0xf0] }
 0x340   :  { %v1687_v58 = vpop.f32.mrf.mxu3  ;;  %v7433_v19 = vor.u32 %v9094_v31, %v7432_v46  ;;  %v14341_v28 = vld [vmem:[#allocation80_spill] sm:$0xff] }
 0x341   :  { %v11346_v30 = vadd.f32 %v1687_v58, %v1658_v47  ;;  %v11348_v53 = vpop.f32.mrf.mxu1  ;;  %v14340_v58 = vld [vmem:[#allocation82_spill] sm:$0xff] }
 0x342   :  { %2164 = vmatpush.bf16.msrb.mxu1 %v2079_v37  ;;  %2264 = vmatpush.bf16.msra.mxu2 %v14334_v12  ;;  %v2591_v25 = vpack.c.bf16 %v11348_v53, %v11334_v50  ;;  %v14339_v37 = vpack.c.bf16 %v11102_v34, %v11085_v56  ;;  %v14342_v26 = vpack.c.bf16 %v14340_v58, %v14341_v28  ;;  %v14344_v56 = vld [vmem:[#allocation78_spill] sm:$0xff]  ;;  %v14345_v34 = vld [vmem:[#allocation76_spill] sm:$0xff]  ;;  %v7560_v50 = vld [vmem:[%s14218_s6 + $0x160] sm:$0xf] }
 0x343   :  { %2293 = vmatpush.bf16.msra.mxu3 %v2212_v51  ;;  %v7437_v51 = vor.u32 %v9093_v4, %v7434_v21  ;;  %v14346_v12 = vpack.c.bf16 %v14344_v56, %v14345_v34  ;;  %v14353_v4 = vld [vmem:[#allocation70_spill] sm:$0xff]  ;;  %v14356_v21 = vpack.c.bf16 %v11072_v29, %v11028_v32  ;;  %v14358_v58 = vld [vmem:[#allocation64_spill] sm:$0xff] }
 0x344   :  { %v14357_v29 = vld [vmem:[#allocation66_spill] sm:$0xff] }
 0x345   :  { %v11360_v55 = vpop.f32.mrf.mxu0  ;;  %v14359_v28 = vpack.c.bf16 %v14357_v29, %v14358_v58  ;;  %v14367_v29 = vld [vmem:[#allocation50_spill] sm:$0xff] }
 0x346   :  { %2165 = vmatpush.bf16.msrb.mxu1 %v14335_v7  ;;  %2265 = vmatpush.bf16.msra.mxu2 %v14338_v60  ;;  %v14351_v60 = vpack.c.bf16 %v14349_v33, %v14350_v10  ;;  %v9120_v53 = vld [vmem:[%s14218_s6 + $0x164] sm:$0xf0] }
 0x347   :  { %2294 = vmatpush.bf16.msra.mxu3 %v2211_v24  ;;  %v1660_v63 = vpop.f32.mrf.mxu2  ;;  %v14347_v24 = vpack.c.bf16 %v11172_v38, %v11148_v2  ;;  %v14352_v2 = vpack.c.bf16 %v11128_v16, %v11096_v44  ;;  %v14354_v44 = vld [vmem:[#allocation68_spill] sm:$0xff] }
 0x348   :  { %v1689_v59 = vpop.f32.mrf.mxu3  ;;  %v14355_v16 = vpack.c.bf16 %v14353_v4, %v14354_v44  ;;  %v7466_v4 = vld [vmem:[%s14218_s6 + $0xc8] sm:$0xf0] }
 0x349   :  { %v11379_v1 = vadd.f32 %v1689_v59, %v1660_v63  ;;  %v11384_v47 = vpop.f32.mrf.mxu1  ;;  %v7441_v59 = vor.u32 %v9096_v6, %v7440_v42 }
 0x34a   :  { %2166 = vmatpush.bf16.msrb.mxu1 %v14339_v37  ;;  %2266 = vmatpush.bf16.msra.mxu2 %v14342_v26  ;;  %v14360_v26 = vpack.c.bf16 %v10996_v40, %v10953_v48 }
 0x34b   :  { %2295 = vmatpush.bf16.msra.mxu3 %v2210_v20 }
 0x34c   :  { %7335 = vmatmul.msk.bf16.gmra.mxu1 %vm710_vm3, %v10106_v36  ;;  %v2344_v36 = vpack.c.bf16 %v1379_v14, %v11318_v0  ;;  %v2343_v0 = vpack.c.bf16 %v11312_v18, %v11294_v43  ;;  %v9095_v43 = vld [vmem:[%s14218_s6 + $0xa4] sm:$0xf]  ;;  %v7442_v18 = vld [vmem:[%s14218_s6 + $0xa8] sm:$0xf0] }
 0x34d   :  { %1883 = vmatmul.bf16.gmra.mxu2 %v7433_v19  ;;  %1912 = vmatmul.bf16.gmra.mxu3 %v7437_v51  ;;  %v11394_v52 = vpop.f32.mrf.mxu0  ;;  %v2342_v19 = vpack.c.bf16 %v11282_v5, %v11250_v54  ;;  %v7445_v32 = vor.u32 %v9095_v43, %v7442_v18  ;;  %v2341_v54 = vpack.c.bf16 %v11228_v17, %v11194_v22  ;;  %v7448_v22 = vld [vmem:[%s14218_s6 + $0xb0] sm:$0xf]  ;;  %v9098_v17 = vld [vmem:[%s14218_s6 + $0xb4] sm:$0xf0] }
 0x34e   :  { %2167 = vmatpush.bf16.msrb.mxu1 %v14343_v41  ;;  %2267 = vmatpush.bf16.msra.mxu2 %v14346_v12 }
 0x34f   :  { %2296 = vmatpush.bf16.msra.mxu3 %v14347_v24  ;;  %v1663_v7 = vpop.f32.mrf.mxu2  ;;  %v9097_v24 = vld [vmem:[%s14218_s6 + $0xb4] sm:$0xf] }
 0x350   :  { %v1692_v46 = vpop.f32.mrf.mxu3 }
 0x351   :  { %v11403_v31 = vadd.f32 %v1692_v46, %v1663_v7  ;;  %v11408_v11 = vpop.f32.mrf.mxu1  ;;  %v7450_v7 = vld [vmem:[%s14218_s6 + $0xb8] sm:$0xf0] }
 0x352   :  { %2168 = vmatpush.bf16.msrb.mxu1 %v14348_v27  ;;  %2268 = vmatpush.bf16.msra.mxu2 %v14351_v60  ;;  %v2592_v38 = vpack.c.bf16 %v11408_v11, %v11384_v47  ;;  %v7453_v10 = vor.u32 %v9097_v24, %v7450_v7  ;;  %v14363_v60 = vpack.c.bf16 %v11076_v13, %v11030_v9  ;;  %v9101_v24 = vld [vmem:[%s14218_s6 + $0xd4] sm:$0xf]  ;;  %v7474_v7 = vld [vmem:[%s14218_s6 + $0xd8] sm:$0xf0]  ;;  %v9111_v47 = vld [vmem:[%s14218_s6 + $0x124] sm:$0xf] }
 0x353   :  { %2297 = vmatpush.bf16.msra.mxu3 %v14352_v2  ;;  %v7522_v11 = vld [vmem:[%s14218_s6 + $0x128] sm:$0xf0] }
 0x355   :  { %v11420_v14 = vpop.f32.mrf.mxu0 }
 0x356   :  { %2423 = vmatpush.bf16.msra.mxu1 %v2344_v36  ;;  %2269 = vmatpush.bf16.msra.mxu2 %v14355_v16  ;;  %v7449_v36 = vor.u32 %v9098_v17, %v7448_v22  ;;  %v7472_v17 = vld [vmem:[%s14218_s6 + $0xd0] sm:$0xf] }
 0x357   :  { %2298 = vmatpush.bf16.msra.mxu3 %v14356_v21  ;;  %v1665_v63 = vpop.f32.mrf.mxu2 }
 0x358   :  { %v1694_v20 = vpop.f32.mrf.mxu3 }
 0x359   :  { %v11442_v37 = vadd.f32 %v1694_v20, %v1665_v63  ;;  %v11444_v51 = vpop.f32.mrf.mxu1  ;;  %v2467_v20 = vpack.c.bf16 %v11298_v39, %v11292_v3  ;;  %v14368_v3 = vld [vmem:[#allocation52_spill] sm:$0xff] }
 0x35a   :  { %2424 = vmatpush.bf16.msra.mxu1 %v2343_v0  ;;  %2270 = vmatpush.bf16.msra.mxu2 %v14359_v28  ;;  %v14369_v39 = vld [vmem:[#allocation24_spill] sm:$0xff] }
 0x35b   :  { %2299 = vmatpush.bf16.msra.mxu3 %v14360_v26 }
 0x35c   :  { %7336 = vmatmul.msk.bf16.gmra.mxu1 %vm710_vm3, %v10148_v62  ;;  %v14361_v62 = vpack.c.bf16 %v11176_v61, %v11150_v35  ;;  %v14362_v35 = vpack.c.bf16 %v11132_v8, %v11098_v49  ;;  %v14364_v49 = vpack.c.bf16 %v11000_v15, %v10957_v45  ;;  %v9100_v45 = vld [vmem:[%s14218_s6 + $0xc4] sm:$0xf0]  ;;  %v9099_v15 = vld [vmem:[%s14218_s6 + $0xc4] sm:$0xf] }
 0x35d   :  { %1888 = vmatmul.bf16.gmra.mxu2 %v7441_v59  ;;  %1917 = vmatmul.bf16.gmra.mxu3 %v7445_v32  ;;  %v11456_v5 = vpop.f32.mrf.mxu0  ;;  %v7469_v63 = vor.u32 %v9099_v15, %v7466_v4  ;;  %v14365_v59 = vld [vmem:[#allocation25_spill] sm:$0xff]  ;;  %v14366_v32 = vld [vmem:[#allocation23_spill] sm:$0xff]  ;;  %v14374_v4 = vld [vmem:[#allocation56_spill] sm:$0xff] }
 0x35e   :  { %2425 = vmatpush.bf16.msra.mxu1 %v2342_v19  ;;  %v2466_v58 = vpack.c.bf16 %v14367_v29, %v14366_v32  ;;  %v14373_v15 = vld [vmem:[#allocation27_spill] sm:$0xff] }
 0x360   :  { %v1668_v41 = vpop.f32.mrf.mxu2  ;;  %v1697_v56 = vpop.f32.mrf.mxu3 }
 0x361   :  { %v11458_v34 = vadd.f32 %v1697_v56, %v1668_v41  ;;  %v11460_v12 = vpop.f32.mrf.mxu1 }
 0x362   :  { %2426 = vmatpush.bf16.msra.mxu1 %v2341_v54  ;;  %v2593_v48 = vpack.c.bf16 %v11460_v12, %v11444_v51 }
 0x365   :  { %v11467_v40 = vpop.f32.mrf.mxu0 }
 0x366   :  { %2427 = vmatpush.bf16.msra.mxu1 %v14361_v62  ;;  %v2465_v62 = vpack.c.bf16 %v14369_v39, %v14368_v3  ;;  %v14379_v3 = vld [vmem:[#allocation30_spill] sm:$0xff] }
 0x368   :  { %v1670_v61 = vpop.f32.mrf.mxu2  ;;  %v1699_v46 = vpop.f32.mrf.mxu3 }
 0x369   :  { %v11484_v27 = vadd.f32 %v1699_v46, %v1670_v61  ;;  %v11486_v33 = vpop.f32.mrf.mxu1  ;;  %v14371_v61 = vld [vmem:[#allocation54_spill] sm:$0xff] }
 0x36a   :  { %2428 = vmatpush.bf16.msra.mxu1 %v14362_v35  ;;  %v14370_v35 = vld [vmem:[#allocation26_spill] sm:$0xff] }
 0x36b   :  { %v2464_v46 = vpack.c.bf16 %v14371_v61, %v14370_v35 }
 0x36c   :  { %7337 = vmatmul.msk.bf16.gmra.mxu1 %vm710_vm3, %v10178_v23  ;;  %v7464_v23 = vld [vmem:[%s14218_s6 + $0xc0] sm:$0xf] }
 0x36d   :  { %1893 = vmatmul.bf16.gmra.mxu2 %v7449_v36  ;;  %1922 = vmatmul.bf16.gmra.mxu3 %v7453_v10  ;;  %v11493_v2 = vpop.f32.mrf.mxu0  ;;  %v7465_v21 = vor.u32 %v9100_v45, %v7464_v23  ;;  %v14372_v45 = vld [vmem:[#allocation28_spill] sm:$0xff] }
 0x36e   :  { %2429 = vmatpush.bf16.msra.mxu1 %v14363_v60 }
 0x370   :  { %v1673_v8 = vpop.f32.mrf.mxu2  ;;  %v1702_v0 = vpop.f32.mrf.mxu3 }
 0x371   :  { %v11498_v42 = vadd.f32 %v1702_v0, %v1673_v8  ;;  %v11500_v6 = vpop.f32.mrf.mxu1  ;;  %v7477_v0 = vor.u32 %v9101_v24, %v7474_v7  ;;  %v9103_v24 = vld [vmem:[%s14218_s6 + $0xe4] sm:$0xf]  ;;  %v7482_v7 = vld [vmem:[%s14218_s6 + $0xe8] sm:$0xf0] }
 0x372   :  { %2430 = vmatpush.bf16.msra.mxu1 %v14364_v49  ;;  %v2594_v9 = vpack.c.bf16 %v11500_v6, %v11486_v33  ;;  %v7554_v33 = vld [vmem:[%s14218_s6 + $0x158] sm:$0xf0] }
 0x375   :  { %v11504_v13 = vpop.f32.mrf.mxu0 }
 0x378   :  { %v1675_v44 = vpop.f32.mrf.mxu2  ;;  %v1704_v16 = vpop.f32.mrf.mxu3 }
 0x379   :  { %v11518_v43 = vadd.f32 %v1704_v16, %v1675_v44  ;;  %v11520_v18 = vpop.f32.mrf.mxu1  ;;  %v14375_v44 = vpack.c.bf16 %v14373_v15, %v14374_v4  ;;  %v14385_v4 = vld [vmem:[#allocation31_spill] sm:$0xff] }
 0x37c   :  { %7338 = vmatmul.msk.bf16.gmra.mxu1 %vm710_vm3, %v14365_v59  ;;  %v14377_v59 = vld [vmem:[#allocation29_spill] sm:$0xff] }
 0x37d   :  { %2009 = vmatmul.bf16.vlgmr.msrb.gmra.mxu2 %v7465_v21  ;;  %2038 = vmatmul.bf16.vlgmr.msrb.gmra.mxu3 %v7469_v63  ;;  %v11526_v19 = vpop.f32.mrf.mxu0 }
 0x37e   :  { %2525 = vmatpush.bf16.msrb.mxu2 %v2467_v20  ;;  %v14376_v20 = vld [vmem:[#allocation58_spill] sm:$0xff] }
 0x37f   :  { %v14378_v32 = vpack.c.bf16 %v14376_v20, %v14377_v59 }
 0x380   :  { %v1756_v28 = vpop.f32.mrf.mxu2  ;;  %v1785_v54 = vpop.f32.mrf.mxu3 }
 0x381   :  { %v1757_v26 = vadd.f32 %v1756_v28, %v11346_v30  ;;  %v11531_v41 = vpop.f32.mrf.mxu1  ;;  %v9102_v30 = vld [vmem:[%s14218_s6 + $0xd4] sm:$0xf0]  ;;  %v7504_v28 = vld [vmem:[%s14218_s6 + $0x100] sm:$0xf] }
 0x382   :  { %2526 = vmatpush.bf16.msrb.mxu2 %v2466_v58  ;;  %v7473_v49 = vor.u32 %v9102_v30, %v7472_v17  ;;  %v7480_v17 = vld [vmem:[%s14218_s6 + $0xe0] sm:$0xf]  ;;  %v9104_v30 = vld [vmem:[%s14218_s6 + $0xe4] sm:$0xf0] }
 0x383   :  { %v11533_v56 = vadd.f32 %v1785_v54, %v1757_v26  ;;  %v9108_v26 = vld [vmem:[%s14218_s6 + $0x104] sm:$0xf0] }
 0x384   :  { %v7505_v54 = vor.u32 %v9108_v26, %v7504_v28  ;;  %v9106_v28 = vld [vmem:[%s14218_s6 + $0xf4] sm:$0xf0] }
 0x385   :  { %v11537_v22 = vpop.f32.mrf.mxu0 }
 0x386   :  { %2527 = vmatpush.bf16.msrb.mxu2 %v2465_v62  ;;  %2140 = vmatmul.bf16.vlgmr.msrb.gmra.mxu0 %v7505_v54  ;;  %v9105_v54 = vld [vmem:[%s14218_s6 + $0xf4] sm:$0xf] }
 0x388   :  { %v1758_v36 = vpop.f32.mrf.mxu2  ;;  %v1787_v60 = vpop.f32.mrf.mxu3 }
 0x389   :  { %v1759_v10 = vadd.f32 %v1758_v36, %v11379_v1  ;;  %v11554_v8 = vpop.f32.mrf.mxu1  ;;  %v7481_v36 = vor.u32 %v9104_v30, %v7480_v17 }
 0x38a   :  { %2528 = vmatpush.bf16.msrb.mxu2 %v2464_v46 }
 0x38b   :  { %v11556_v23 = vadd.f32 %v1787_v60, %v1759_v10  ;;  %v14382_v10 = vld [vmem:[#allocation88_spill] sm:$0xff]  ;;  %v14383_v60 = vld [vmem:[#allocation87_spill] sm:$0xff] }
 0x38c   :  { %7339 = vmatmul.msk.bf16.gmra.mxu1 %vm710_vm3, %v14372_v45  ;;  %v7485_v45 = vor.u32 %v9103_v24, %v7482_v7 }
 0x38d   :  { %2014 = vmatmul.bf16.gmra.mxu2 %v7473_v49  ;;  %2043 = vmatmul.bf16.gmra.mxu3 %v7477_v0  ;;  %v1461_v16 = vpop.f32.mrf.mxu0  ;;  %v14384_v49 = vpack.c.bf16 %v14382_v10, %v14383_v60  ;;  %v2473_v60 = vpack.c.bf16 %v11537_v22, %v11526_v19  ;;  %v7506_v19 = vld [vmem:[%s14218_s6 + $0x108] sm:$0xf0]  ;;  %v9116_v22 = vld [vmem:[%s14218_s6 + $0x144] sm:$0xf0] }
 0x38e   :  { %2529 = vmatpush.bf16.msrb.mxu2 %v14375_v44 }
 0x390   :  { %v1761_v21 = vpop.f32.mrf.mxu2  ;;  %v1790_v63 = vpop.f32.mrf.mxu3 }
 0x391   :  { %v1762_v1 = vadd.f32 %v1761_v21, %v11403_v31  ;;  %v11567_v29 = vpop.f32.mrf.mxu1  ;;  %v14380_v31 = vld [vmem:[#allocation89_spill] sm:$0xff] }
 0x392   :  { %2530 = vmatpush.bf16.msrb.mxu2 %v14378_v32  ;;  %v14381_v39 = vpack.c.bf16 %v14379_v3, %v14380_v31  ;;  %v7488_v32 = vld [vmem:[%s14218_s6 + $0xf0] sm:$0xf] }
 0x393   :  { %v11569_v58 = vadd.f32 %v1790_v63, %v1762_v1  ;;  %v7489_v17 = vor.u32 %v9106_v28, %v7488_v32 }
 0x395   :  { %v1463_v62 = vpop.f32.mrf.mxu0 }
 0x396   :  { %2531 = vmatpush.bf16.msrb.mxu2 %v14381_v39 }
 0x398   :  { %v1763_v35 = vpop.f32.mrf.mxu2  ;;  %v1792_v46 = vpop.f32.mrf.mxu3 }
 0x399   :  { %v1764_v61 = vadd.f32 %v1763_v35, %v11442_v37  ;;  %v1510_v0 = vpop.f32.mrf.mxu1  ;;  %v7512_v35 = vld [vmem:[%s14218_s6 + $0x110] sm:$0xf] }
 0x39a   :  { %2532 = vmatpush.bf16.msrb.mxu2 %v14384_v49 }
 0x39b   :  { %v11596_v15 = vadd.f32 %v1792_v46, %v1764_v61  ;;  %v9110_v61 = vld [vmem:[%s14218_s6 + $0x114] sm:$0xf0]  ;;  %v2474_v46 = vpack.c.bf16 %v1463_v62, %v1461_v16  ;;  %v2472_v62 = vpack.c.bf16 %v11504_v13, %v11493_v2  ;;  %v9115_v2 = vld [vmem:[%s14218_s6 + $0x144] sm:$0xf]  ;;  %v7546_v13 = vld [vmem:[%s14218_s6 + $0x148] sm:$0xf0] }
 0x39c   :  { %7340 = vmatmul.msk.bf16.gmra.mxu1 %vm710_vm3, %v14385_v4 }
 0x39d   :  { %2019 = vmatmul.bf16.gmra.mxu2 %v7481_v36  ;;  %2048 = vmatmul.bf16.gmra.mxu3 %v7485_v45  ;;  %v1466_v44 = vpop.f32.mrf.mxu0  ;;  %v14386_v36 = vld [vmem:[#allocation32_spill] sm:$0xff] }
 0x3a0   :  { %v1766_v21 = vpop.f32.mrf.mxu2  ;;  %v1795_v37 = vpop.f32.mrf.mxu3 }
 0x3a1   :  { %v1767_v1 = vadd.f32 %v1766_v21, %v11458_v34  ;;  %v1512_v63 = vpop.f32.mrf.mxu1  ;;  %v7490_v34 = vld [vmem:[%s14218_s6 + $0xf8] sm:$0xf0]  ;;  %v9107_v21 = vld [vmem:[%s14218_s6 + $0x104] sm:$0xf] }
 0x3a2   :  { %v7493_v24 = vor.u32 %v9105_v54, %v7490_v34 }
 0x3a3   :  { %v11601_v20 = vadd.f32 %v1795_v37, %v1767_v1  ;;  %v2597_v1 = vpack.c.bf16 %v1512_v63, %v1510_v0  ;;  %v7549_v63 = vor.u32 %v9115_v2, %v7546_v13 }
 0x3a5   :  { %v1468_v59 = vpop.f32.mrf.mxu0 }
 0x3a6   :  { %v2475_v26 = vpack.c.bf16 %v1468_v59, %v1466_v44  ;;  %v2471_v59 = vpack.c.bf16 %v11467_v40, %v11456_v5  ;;  %v9112_v5 = vld [vmem:[%s14218_s6 + $0x124] sm:$0xf0]  ;;  %v2470_v40 = vpack.c.bf16 %v11420_v14, %v11394_v52 }
 0x3a8   :  { %v1768_v3 = vpop.f32.mrf.mxu2  ;;  %v1797_v39 = vpop.f32.mrf.mxu3  ;;  %2554 = vmatpush.bf16.msrb.mxu3 %v2475_v26  ;;  %v7509_v26 = vor.u32 %v9107_v21, %v7506_v19 }
 0x3a9   :  { %v1769_v31 = vadd.f32 %v1768_v3, %v11484_v27  ;;  %v1515_v30 = vpop.f32.mrf.mxu1  ;;  %v7513_v27 = vor.u32 %v9110_v61, %v7512_v35  ;;  %v2596_v3 = vpack.c.bf16 %v11567_v29, %v11554_v8  ;;  %v2595_v8 = vpack.c.bf16 %v11531_v41, %v11520_v18  ;;  %v14387_v35 = vld [vmem:[#allocation48_spill] sm:$0xff]  ;;  %v14388_v61 = vld [vmem:[#allocation22_spill] sm:$0xff]  ;;  %v9109_v18 = vld [vmem:[%s14218_s6 + $0x114] sm:$0xf] }
 0x3aa   :  { %v9118_v41 = vld [vmem:[%s14218_s6 + $0x154] sm:$0xf0] }
 0x3ab   :  { %v11616_v7 = vadd.f32 %v1797_v39, %v1769_v31  ;;  %2145 = vmatmul.bf16.gmra.mxu0 %v7513_v27  ;;  %v7520_v31 = vld [vmem:[%s14218_s6 + $0x120] sm:$0xf]  ;;  %v2469_v39 = vpack.c.bf16 %v11360_v55, %v11339_v57  ;;  %v7514_v57 = vld [vmem:[%s14218_s6 + $0x118] sm:$0xf0]  ;;  %v7552_v55 = vld [vmem:[%s14218_s6 + $0x150] sm:$0xf] }
 0x3ac   :  { %7341 = vmatmul.msk.bf16.gmra.mxu1 %vm710_vm3, %v14386_v36  ;;  %2555 = vmatpush.bf16.msrb.mxu3 %v2474_v46  ;;  %v2468_v46 = vpack.c.bf16 %v14388_v61, %v14387_v35  ;;  %v7517_v36 = vor.u32 %v9109_v18, %v7514_v57  ;;  %v7553_v27 = vor.u32 %v9118_v41, %v7552_v55  ;;  %v7592_v41 = vld [vmem:[%s14218_s6 + $0x190] sm:$0xf] }
 0x3ad   :  { %2024 = vmatmul.bf16.gmra.mxu2 %v7489_v17  ;;  %2053 = vmatmul.bf16.gmra.mxu3 %v7493_v24 }
 0x3b0   :  { %v1771_v10 = vpop.f32.mrf.mxu2  ;;  %v1800_v45 = vpop.f32.mrf.mxu3  ;;  %2556 = vmatpush.bf16.msrb.mxu3 %v2473_v60 }
 0x3b1   :  { %v1772_v49 = vadd.f32 %v1771_v10, %v11498_v42  ;;  %v1517_v4 = vpop.f32.mrf.mxu1  ;;  %v7544_v42 = vld [vmem:[%s14218_s6 + $0x140] sm:$0xf] }
 0x3b2   :  { %v2598_v16 = vpack.c.bf16 %v1517_v4, %v1515_v30  ;;  %v7545_v54 = vor.u32 %v9116_v22, %v7544_v42  ;;  %v7528_v4 = vld [vmem:[%s14218_s6 + $0x130] sm:$0xf]  ;;  %v7525_v22 = vor.u32 %v9111_v47, %v7522_v11 }
 0x3b3   :  { %v11629_v44 = vadd.f32 %v1800_v45, %v1772_v49 }
 0x3b4   :  { %2656 = vmatpush.bf16.msrb.mxu0 %v2598_v16  ;;  %2557 = vmatpush.bf16.msrb.mxu3 %v2472_v62  ;;  %v9114_v16 = vld [vmem:[%s14218_s6 + $0x134] sm:$0xf0] }
 0x3b5   :  { %v7529_v62 = vor.u32 %v9114_v16, %v7528_v4  ;;  %v7586_v4 = vld [vmem:[%s14218_s6 + $0x188] sm:$0xf0]  ;;  %v7624_v16 = vld [vmem:[%s14218_s6 + $0x1c0] sm:$0xf] }
 0x3b8   :  { %v1773_v37 = vpop.f32.mrf.mxu2  ;;  %v1802_v28 = vpop.f32.mrf.mxu3  ;;  %2657 = vmatpush.bf16.msrb.mxu0 %v2597_v1  ;;  %2558 = vmatpush.bf16.msrb.mxu3 %v2471_v59  ;;  %v7561_v1 = vor.u32 %v9120_v53, %v7560_v50 }
 0x3b9   :  { %v1774_v32 = vadd.f32 %v1773_v37, %v11518_v43  ;;  %v11654_v0 = vpop.f32.mrf.mxu1  ;;  %v7521_v43 = vor.u32 %v9112_v5, %v7520_v31 }
 0x3bb   :  { %v11656_v34 = vadd.f32 %v1802_v28, %v1774_v32  ;;  %2150 = vmatmul.bf16.gmra.mxu0 %v7521_v43  ;;  %v7584_v32 = vld [vmem:[%s14218_s6 + $0x180] sm:$0xf]  ;;  %v9124_v28 = vld [vmem:[%s14218_s6 + $0x184] sm:$0xf0]  ;;  %v7530_v43 = vld [vmem:[%s14218_s6 + $0x138] sm:$0xf0] }
 0x3bc   :  { %2169 = vmatmul.bf16.vlgmr.msrb.gmra.mxu1 %v7509_v26  ;;  %2658 = vmatpush.bf16.msrb.mxu0 %v2596_v3  ;;  %v7585_v26 = vor.u32 %v9124_v28, %v7584_v32  ;;  %v9125_v28 = vld [vmem:[%s14218_s6 + $0x194] sm:$0xf] }
 0x3bd   :  { %2271 = vmatmul.bf16.vlgmr.msra.gmra.mxu2 %v7545_v54  ;;  %2300 = vmatmul.bf16.vlgmr.msra.gmra.mxu3 %v7549_v63 }
 0x3be   :  { %2559 = vmatpush.bf16.msrb.mxu3 %v2470_v40  ;;  %v9113_v40 = vld [vmem:[%s14218_s6 + $0x134] sm:$0xf] }
 0x3bf   :  { %v7533_v35 = vor.u32 %v9113_v40, %v7530_v43 }
 0x3c0   :  { %v1879_v29 = vpop.f32.mrf.mxu2  ;;  %v1908_v17 = vpop.f32.mrf.mxu3  ;;  %2659 = vmatpush.bf16.msrb.mxu0 %v2595_v8  ;;  %v7568_v8 = vld [vmem:[%s14218_s6 + $0x170] sm:$0xf] }
 0x3c1   :  { %v1909_v30 = vadd.f32 %v1908_v17, %v1879_v29  ;;  %v11672_v24 = vpop.f32.mrf.mxu1  ;;  %v9122_v29 = vld [vmem:[%s14218_s6 + $0x174] sm:$0xf0] }
 0x3c2   :  { %2560 = vmatpush.bf16.msrb.mxu3 %v2469_v39  ;;  %v2599_v52 = vpack.c.bf16 %v11672_v24, %v11654_v0  ;;  %v7570_v39 = vld [vmem:[%s14218_s6 + $0x178] sm:$0xf0]  ;;  %v7569_v61 = vor.u32 %v9122_v29, %v7568_v8  ;;  %v9146_v0 = vld [vmem:[%s14218_s6 + $0x234] sm:$0xf0] }
 0x3c3   :  { %v11677_v14 = vadd.f32 %v1909_v30, %v11533_v56  ;;  %v9117_v56 = vld [vmem:[%s14218_s6 + $0x154] sm:$0xf] }
 0x3c4   :  { %2660 = vmatpush.bf16.msrb.mxu0 %v2594_v9  ;;  %v7557_v49 = vor.u32 %v9117_v56, %v7554_v33  ;;  %v9126_v56 = vld [vmem:[%s14218_s6 + $0x194] sm:$0xf0] }
 0x3c5   :  { %v7593_v33 = vor.u32 %v9126_v56, %v7592_v41 }
 0x3c6   :  { %2561 = vmatpush.bf16.msrb.mxu3 %v2468_v46 }
 0x3c8   :  { %v1881_v6 = vpop.f32.mrf.mxu2  ;;  %v1910_v9 = vpop.f32.mrf.mxu3  ;;  %2661 = vmatpush.bf16.msrb.mxu0 %v2593_v48 }
 0x3c9   :  { %v1911_v10 = vadd.f32 %v1910_v9, %v1881_v6  ;;  %v11705_v60 = vpop.f32.mrf.mxu1 }
 0x3cb   :  { %v11708_v45 = vadd.f32 %v1911_v10, %v11556_v23  ;;  %2155 = vmatmul.bf16.gmra.mxu0 %v7529_v62  ;;  %v9132_v62 = vld [vmem:[%s14218_s6 + $0x1c4] sm:$0xf0] }
 0x3cc   :  { %2174 = vmatmul.bf16.gmra.mxu1 %v7517_v36  ;;  %2662 = vmatpush.bf16.msrb.mxu0 %v2592_v38  ;;  %v7562_v38 = vld [vmem:[%s14218_s6 + $0x168] sm:$0xf0]  ;;  %v7625_v11 = vor.u32 %v9132_v62, %v7624_v16 }
 0x3cd   :  { %2276 = vmatmul.bf16.gmra.mxu2 %v7553_v27  ;;  %2305 = vmatmul.bf16.gmra.mxu3 %v7557_v49  ;;  %v9123_v49 = vld [vmem:[%s14218_s6 + $0x184] sm:$0xf] }
 0x3ce   :  { %v7589_v47 = vor.u32 %v9123_v49, %v7586_v4  ;;  %v7642_v49 = vld [vmem:[%s14218_s6 + $0x1e8] sm:$0xf0] }
 0x3d0   :  { %v1884_v51 = vpop.f32.mrf.mxu2  ;;  %v1913_v12 = vpop.f32.mrf.mxu3  ;;  %2663 = vmatpush.bf16.msrb.mxu0 %v2591_v25  ;;  %v9119_v25 = vld [vmem:[%s14218_s6 + $0x164] sm:$0xf] }
 0x3d1   :  { %v1914_v48 = vadd.f32 %v1913_v12, %v1884_v51  ;;  %v11722_v23 = vpop.f32.mrf.mxu1  ;;  %v7565_v37 = vor.u32 %v9119_v25, %v7562_v38  ;;  %v7626_v51 = vld [vmem:[%s14218_s6 + $0x1c8] sm:$0xf0] }
 0x3d2   :  { %v2600_v21 = vpack.c.bf16 %v11722_v23, %v11705_v60 }
 0x3d3   :  { %v11727_v19 = vadd.f32 %v1914_v48, %v11569_v58 }
 0x3d8   :  { %v1886_v58 = vpop.f32.mrf.mxu2  ;;  %v1915_v42 = vpop.f32.mrf.mxu3 }
 0x3d9   :  { %v1916_v2 = vadd.f32 %v1915_v42, %v1886_v58  ;;  %v11747_v13 = vpop.f32.mrf.mxu1  ;;  %v7600_v58 = vld [vmem:[%s14218_s6 + $0x1a0] sm:$0xf]  ;;  %v9128_v42 = vld [vmem:[%s14218_s6 + $0x1a4] sm:$0xf0] }
 0x3db   :  { %v11750_v59 = vadd.f32 %v1916_v2, %v11596_v15  ;;  %2402 = vmatmul.bf16.vlgmr.msra.gmra.mxu0 %v7585_v26  ;;  %v7594_v26 = vld [vmem:[%s14218_s6 + $0x198] sm:$0xf0] }
 0x3dc   :  { %2179 = vmatmul.bf16.gmra.mxu1 %v7525_v22  ;;  %v7601_v22 = vor.u32 %v9128_v42, %v7600_v58  ;;  %v7597_v8 = vor.u32 %v9125_v28, %v7594_v26  ;;  %v9129_v42 = vld [vmem:[%s14218_s6 + $0x1b4] sm:$0xf]  ;;  %v7650_v28 = vld [vmem:[%s14218_s6 + $0x1f8] sm:$0xf0] }
 0x3dd   :  { %2281 = vmatmul.bf16.gmra.mxu2 %v7561_v1  ;;  %2310 = vmatmul.bf16.gmra.mxu3 %v7565_v37 }
 0x3e0   :  { %v1889_v54 = vpop.f32.mrf.mxu2  ;;  %v1918_v63 = vpop.f32.mrf.mxu3 }
 0x3e1   :  { %v1919_v3 = vadd.f32 %v1918_v63, %v1889_v54  ;;  %v11758_v31 = vpop.f32.mrf.mxu1  ;;  %v7632_v54 = vld [vmem:[%s14218_s6 + $0x1d0] sm:$0xf]  ;;  %v9134_v63 = vld [vmem:[%s14218_s6 + $0x1d4] sm:$0xf0] }
 0x3e2   :  { %v2601_v15 = vpack.c.bf16 %v11758_v31, %v11747_v13  ;;  %v7633_v29 = vor.u32 %v9134_v63, %v7632_v54  ;;  %v9139_v13 = vld [vmem:[%s14218_s6 + $0x204] sm:$0xf]  ;;  %v7666_v31 = vld [vmem:[%s14218_s6 + $0x208] sm:$0xf0] }
 0x3e3   :  { %v11763_v5 = vadd.f32 %v1919_v3, %v11601_v20  ;;  %v9121_v20 = vld [vmem:[%s14218_s6 + $0x174] sm:$0xf]  ;;  %v7634_v3 = vld [vmem:[%s14218_s6 + $0x1d8] sm:$0xf0] }
 0x3e4   :  { %v7573_v57 = vor.u32 %v9121_v20, %v7570_v39 }
 0x3e8   :  { %v1891_v17 = vpop.f32.mrf.mxu2  ;;  %v1920_v30 = vpop.f32.mrf.mxu3 }
 0x3e9   :  { %v1921_v46 = vadd.f32 %v1920_v30, %v1891_v17  ;;  %v11783_v18 = vpop.f32.mrf.mxu1  ;;  %v7608_v17 = vld [vmem:[%s14218_s6 + $0x1b0] sm:$0xf]  ;;  %v9130_v30 = vld [vmem:[%s14218_s6 + $0x1b4] sm:$0xf0] }
 0x3eb   :  { %v11786_v55 = vadd.f32 %v1921_v46, %v11616_v7  ;;  %2407 = vmatmul.bf16.gmra.mxu0 %v7593_v33  ;;  %v9127_v33 = vld [vmem:[%s14218_s6 + $0x1a4] sm:$0xf] }
 0x3ec   :  { %2184 = vmatmul.bf16.gmra.mxu1 %v7533_v35  ;;  %v7609_v35 = vor.u32 %v9130_v30, %v7608_v17 }
 0x3ed   :  { %2286 = vmatmul.bf16.gmra.mxu2 %v7569_v61  ;;  %2315 = vmatmul.bf16.gmra.mxu3 %v7573_v57 }
 0x3f0   :  { %v1894_v6 = vpop.f32.mrf.mxu2  ;;  %v1923_v9 = vpop.f32.mrf.mxu3 }
 0x3f1   :  { %v1924_v36 = vadd.f32 %v1923_v9, %v1894_v6  ;;  %v11794_v27 = vpop.f32.mrf.mxu1  ;;  %v7602_v6 = vld [vmem:[%s14218_s6 + $0x1a8] sm:$0xf0]  ;;  %v7640_v9 = vld [vmem:[%s14218_s6 + $0x1e0] sm:$0xf] }
 0x3f2   :  { %v2602_v7 = vpack.c.bf16 %v11794_v27, %v11783_v18  ;;  %v7605_v62 = vor.u32 %v9127_v33, %v7602_v6 }
 0x3f3   :  { %v11799_v10 = vadd.f32 %v1924_v36, %v11629_v44  ;;  %v9131_v44 = vld [vmem:[%s14218_s6 + $0x1c4] sm:$0xf]  ;;  %v9136_v36 = vld [vmem:[%s14218_s6 + $0x1e4] sm:$0xf0] }
 0x3f4   :  { %v7629_v25 = vor.u32 %v9131_v44, %v7626_v51  ;;  %v7641_v44 = vor.u32 %v9136_v36, %v7640_v9 }
 0x3f8   :  { %v1896_v12 = vpop.f32.mrf.mxu2  ;;  %v1925_v48 = vpop.f32.mrf.mxu3 }
 0x3f9   :  { %v1926_v50 = vadd.f32 %v1925_v48, %v1896_v12  ;;  %v11819_v53 = vpop.f32.mrf.mxu1 }
 0x3fb   :  { %v11822_v38 = vadd.f32 %v1926_v50, %v11656_v34  ;;  %2412 = vmatmul.bf16.gmra.mxu0 %v7601_v22  ;;  %v7610_v22 = vld [vmem:[%s14218_s6 + $0x1b8] sm:$0xf0] }
 0x3fc   :  { %2431 = vmatmul.bf16.vlgmr.msra.gmra.mxu1 %v7589_v47  ;;  %v7613_v63 = vor.u32 %v9129_v42, %v7610_v22 }
 0x3fd   :  { %2533 = vmatmul.bf16.vlgmr.msrb.gmra.mxu2 %v7625_v11  ;;  %2562 = vmatmul.bf16.vlgmr.msrb.gmra.mxu3 %v7629_v25 }
 0x400   :  { %v2010_v1 = vpop.f32.mrf.mxu2  ;;  %v2039_v2 = vpop.f32.mrf.mxu3 }
 0x401   :  { %v2040_v37 = vadd.f32 %v2039_v2, %v2010_v1  ;;  %v11830_v32 = vpop.f32.mrf.mxu1  ;;  %v7648_v1 = vld [vmem:[%s14218_s6 + $0x1f0] sm:$0xf]  ;;  %v9138_v2 = vld [vmem:[%s14218_s6 + $0x1f4] sm:$0xf0] }
 0x403   :  { %v11833_v34 = vadd.f32 %v2040_v37, %v11677_v14  ;;  %v9133_v14 = vld [vmem:[%s14218_s6 + $0x1d4] sm:$0xf]  ;;  %v2141_v48 = vpop.f32.mrf.mxu0 }
 0x404   :  { %v7637_v39 = vor.u32 %v9133_v14, %v7634_v3  ;;  %v7649_v14 = vor.u32 %v9138_v2, %v7648_v1  ;;  %v7680_v2 = vld [vmem:[%s14218_s6 + $0x220] sm:$0xf] }
 0x408   :  { %v11853_v40 = vpop.f32.mrf.mxu2  ;;  %v11855_v43 = vpop.f32.mrf.mxu3 }
 0x409   :  { %v11857_v20 = vpop.f32.mrf.mxu1 }
 0x40b   :  { %2417 = vmatmul.bf16.gmra.mxu0 %v7609_v35  ;;  %v11907_v37 = vpop.f32.mrf.mxu0 }
 0x40c   :  { %2436 = vmatmul.bf16.gmra.mxu1 %v7597_v8 }
 0x40d   :  { %2538 = vmatmul.bf16.gmra.mxu2 %v7633_v29  ;;  %2567 = vmatmul.bf16.gmra.mxu3 %v7637_v39  ;;  %v7664_v29 = vld [vmem:[%s14218_s6 + $0x200] sm:$0xf]  ;;  %v9140_v39 = vld [vmem:[%s14218_s6 + $0x204] sm:$0xf0] }
 0x40e   :  { %v7665_v17 = vor.u32 %v9140_v39, %v7664_v29  ;;  %v7688_v39 = vld [vmem:[%s14218_s6 + $0x230] sm:$0xf] }
 0x40f   :  { %v7689_v24 = vor.u32 %v9146_v0, %v7688_v39 }
 0x410   :  { %v2015_v61 = vpop.f32.mrf.mxu2  ;;  %v2044_v46 = vpop.f32.mrf.mxu3 }
 0x411   :  { %v2045_v57 = vadd.f32 %v2044_v46, %v2015_v61  ;;  %v11865_v41 = vpop.f32.mrf.mxu1 }
 0x413   :  { %v11868_v56 = vadd.f32 %v2045_v57, %v11727_v19  ;;  %v9135_v19 = vld [vmem:[%s14218_s6 + $0x1e4] sm:$0xf] }
 0x414   :  { %v7645_v12 = vor.u32 %v9135_v19, %v7642_v49 }
 0x418   :  { %v11888_v4 = vpop.f32.mrf.mxu2  ;;  %v11890_v16 = vpop.f32.mrf.mxu3 }
 0x419   :  { %v1550_v51 = vpop.f32.mrf.mxu1 }
 0x41b   :  { %2664 = vmatmul.bf16.vlgmr.msrb.gmra.mxu0 %v7665_v17  ;;  %v9141_v17 = vld [vmem:[%s14218_s6 + $0x214] sm:$0xf] }
 0x41c   :  { %2441 = vmatmul.bf16.gmra.mxu1 %v7605_v62 }
 0x41d   :  { %2543 = vmatmul.bf16.gmra.mxu2 %v7641_v44  ;;  %2572 = vmatmul.bf16.gmra.mxu3 %v7645_v12  ;;  %v2604_v44 = vpack.c.bf16 %v11865_v41, %v11857_v20 }
 0x420   :  { %v2020_v47 = vpop.f32.mrf.mxu2  ;;  %v2049_v11 = vpop.f32.mrf.mxu3 }
 0x421   :  { %v2050_v50 = vadd.f32 %v2049_v11, %v2020_v47  ;;  %v1552_v25 = vpop.f32.mrf.mxu1  ;;  %v7672_v47 = vld [vmem:[%s14218_s6 + $0x210] sm:$0xf] }
 0x422   :  { %v2605_v9 = vpack.c.bf16 %v1552_v25, %v1550_v51 }
 0x423   :  { %v11893_v58 = vadd.f32 %v2050_v50, %v11763_v5  ;;  %v9137_v5 = vld [vmem:[%s14218_s6 + $0x1f4] sm:$0xf]  ;;  %v2603_v50 = vpack.c.bf16 %v11830_v32, %v11819_v53 }
 0x424   :  { %v7653_v8 = vor.u32 %v9137_v5, %v7650_v28  ;;  %v9144_v5 = vld [vmem:[%s14218_s6 + $0x224] sm:$0xf0]  ;;  %v7669_v28 = vor.u32 %v9139_v13, %v7666_v31  ;;  %v7690_v13 = vld [vmem:[%s14218_s6 + $0x238] sm:$0xf0] }
 0x425   :  { %v7681_v18 = vor.u32 %v9144_v5, %v7680_v2 }
 0x428   :  { %v11915_v26 = vpop.f32.mrf.mxu2  ;;  %v11917_v54 = vpop.f32.mrf.mxu3 }
 0x429   :  { %v1555_v3 = vpop.f32.mrf.mxu1  ;;  %v2146_v35 = vpop.f32.mrf.mxu0 }
 0x42c   :  { %2446 = vmatmul.bf16.gmra.mxu1 %v7613_v63 }
 0x42d   :  { %2548 = vmatmul.bf16.gmra.mxu2 %v7649_v14  ;;  %2577 = vmatmul.bf16.gmra.mxu3 %v7653_v8 }
 0x430   :  { %v2025_v30 = vpop.f32.mrf.mxu2  ;;  %v2054_v61 = vpop.f32.mrf.mxu3 }
 0x431   :  { %v2055_v46 = vadd.f32 %v2054_v61, %v2025_v30  ;;  %v1557_v57 = vpop.f32.mrf.mxu1  ;;  %v11932_v62 = vpop.f32.mrf.mxu0  ;;  %v7674_v30 = vld [vmem:[%s14218_s6 + $0x218] sm:$0xf0] }
 0x432   :  { %v2606_v33 = vpack.c.bf16 %v1557_v57, %v1555_v3  ;;  %v7677_v61 = vor.u32 %v9141_v17, %v7674_v30  ;;  %v9168_v17 = vld [vmem:[%s14389_s14 + $0xac] sm:$0xf] }
 0x433   :  { %v11926_v6 = vadd.f32 %v2055_v46, %v11799_v10  ;;  %v9142_v10 = vld [vmem:[%s14218_s6 + $0x214] sm:$0xf0] }
 0x434   :  { %2685 = vmatpush.bf16.msrb.mxu1 %v2606_v33  ;;  %v7673_v51 = vor.u32 %v9142_v10, %v7672_v47 }
 0x436   :  { %2669 = vmatmul.bf16.gmra.mxu0 %v7673_v51 }
 0x438   :  { %v11928_v36 = vpop.f32.mrf.mxu2  ;;  %v11930_v19 = vpop.f32.mrf.mxu3  ;;  %2686 = vmatpush.bf16.msrb.mxu1 %v2605_v9 }
 0x439   :  { %v2170_v49 = vpop.f32.mrf.mxu1  ;;  %v2151_v22 = vpop.f32.mrf.mxu0 }
 0x43a   :  { %v2171_v12 = vadd.f32 %v2170_v49, %v2141_v48 }
 0x43c   :  { %v2190_v11 = vadd.f32 %v2171_v12, %v11833_v34  ;;  %2687 = vmatpush.bf16.msrb.mxu1 %v2604_v44 }
 0x440   :  { %v2272_v25 = vpop.f32.mrf.mxu2  ;;  %v2301_v42 = vpop.f32.mrf.mxu3  ;;  %2688 = vmatpush.bf16.msrb.mxu1 %v2603_v50  ;;  %v7682_v50 = vld [vmem:[%s14218_s6 + $0x228] sm:$0xf0] }
 0x441   :  { %v2302_v20 = vadd.f32 %v2301_v42, %v2272_v25  ;;  %v11945_v41 = vpop.f32.mrf.mxu1 }
 0x443   :  { %v11947_v48 = vadd.f32 %v2302_v20, %v2190_v11  ;;  %v9143_v11 = vld [vmem:[%s14218_s6 + $0x224] sm:$0xf] }
 0x444   :  { %2689 = vmatpush.bf16.msrb.mxu1 %v2602_v7  ;;  %v7685_v42 = vor.u32 %v9143_v11, %v7682_v50  ;;  %v7770_v50 = vld [vmem:[%s14389_s14 + $0x9c] sm:$0xf0] }
 0x446   :  { %2674 = vmatmul.bf16.gmra.mxu0 %v7681_v18 }
 0x448   :  { %v11952_v1 = vpop.f32.mrf.mxu2  ;;  %v11954_v34 = vpop.f32.mrf.mxu3  ;;  %2690 = vmatpush.bf16.msrb.mxu1 %v2601_v15 }
 0x449   :  { %v2175_v53 = vpop.f32.mrf.mxu1  ;;  %v11975_v15 = vpop.f32.mrf.mxu0 }
 0x44a   :  { %v2176_v32 = vadd.f32 %v2175_v53, %v2146_v35 }
 0x44c   :  { %v2192_v27 = vadd.f32 %v2176_v32, %v11868_v56  ;;  %2691 = vmatpush.bf16.msrb.mxu1 %v2600_v21 }
 0x450   :  { %v2277_v7 = vpop.f32.mrf.mxu2  ;;  %v2306_v63 = vpop.f32.mrf.mxu3  ;;  %2692 = vmatpush.bf16.msrb.mxu1 %v2599_v52 }
 0x451   :  { %v2307_v60 = vadd.f32 %v2306_v63, %v2277_v7  ;;  %v11980_v23 = vpop.f32.mrf.mxu1  ;;  %v2156_v14 = vpop.f32.mrf.mxu0 }
 0x453   :  { %v2323_v21 = vadd.f32 %v2307_v60, %v2192_v27  ;;  %2693 = vmatmul.bf16.vlgmr.msrb.gmra.mxu1 %v7669_v28  ;;  %v9145_v27 = vld [vmem:[%s14218_s6 + $0x234] sm:$0xf] }
 0x454   :  { %v7693_v31 = vor.u32 %v9145_v27, %v7690_v13  ;;  %v9162_v27 = vld [vmem:[%s14389_s14 + $0x7c] sm:$0xf]  ;;  %v7758_v13 = vld [vmem:[%s14389_s14 + $0x84] sm:$0xf0] }
 0x456   :  { %2679 = vmatmul.bf16.gmra.mxu0 %v7689_v24  ;;  %v7780_v24 = vld [vmem:[%s14389_s14 + $0xa8] sm:$0xf] }
 0x458   :  { %v11982_v56 = vpop.f32.mrf.mxu2  ;;  %v11984_v3 = vpop.f32.mrf.mxu3 }
 0x459   :  { %v2180_v8 = vpop.f32.mrf.mxu1  ;;  %v12001_v9 = vpop.f32.mrf.mxu0 }
 0x45a   :  { %v2181_v29 = vadd.f32 %v2180_v8, %v2151_v22 }
 0x45c   :  { %v2194_v52 = vadd.f32 %v2181_v29, %v11893_v58 }
 0x460   :  { %v2282_v35 = vpop.f32.mrf.mxu2  ;;  %v2311_v46 = vpop.f32.mrf.mxu3 }
 0x461   :  { %v2312_v57 = vadd.f32 %v2311_v46, %v2282_v35  ;;  %v11999_v33 = vpop.f32.mrf.mxu1  ;;  %v2403_v10 = vpop.f32.mrf.mxu0  ;;  %v7782_v35 = vld [vmem:[%s14389_s14 + $0xb4] sm:$0xf0]  ;;  %v9170_v46 = vld [vmem:[%s14389_s14 + $0xb8] sm:$0xf0] }
 0x463   :  { %v2325_v49 = vadd.f32 %v2312_v57, %v2194_v52  ;;  %2698 = vmatmul.bf16.gmra.mxu1 %v7677_v61  ;;  %v9169_v52 = vld [vmem:[%s14389_s14 + $0xb0] sm:$0xf0]  ;;  %v7788_v61 = vld [vmem:[%s14389_s14 + $0xb0] sm:$0xf] }
 0x468   :  { %v12003_v58 = vpop.f32.mrf.mxu2  ;;  %v12005_v44 = vpop.f32.mrf.mxu3 }
 0x469   :  { %v2185_v12 = vpop.f32.mrf.mxu1  ;;  %v12016_v2 = vpop.f32.mrf.mxu0 }
 0x46a   :  { %v2186_v47 = vadd.f32 %v2185_v12, %v2156_v14  ;;  %v7785_v12 = vor.u32 %v9168_v17, %v7782_v35  ;;  %v9160_v35 = vld [vmem:[%s14389_s14 + $0x68] sm:$0xf0] }
 0x46c   :  { %v2196_v51 = vadd.f32 %v2186_v47, %v11926_v6  ;;  %v7789_v47 = vor.u32 %v9170_v46, %v7788_v61  ;;  %2943 = vmatpush.bf16.msra.mxu3 %v7785_v12  ;;  %v9159_v61 = vld [vmem:[%s14389_s14 + $0x64] sm:$0xf]  ;;  %v7746_v12 = vld [vmem:[%s14389_s14 + $0x6c] sm:$0xf0] }
 0x46e   :  { %2972 = vmatpush.bf16.msra.mxu0 %v7789_v47  ;;  %v9161_v47 = vld [vmem:[%s14389_s14 + $0x70] sm:$0xf0] }
 0x470   :  { %v2287_v25 = vpop.f32.mrf.mxu2  ;;  %v2316_v20 = vpop.f32.mrf.mxu3 }
 0x471   :  { %v2317_v22 = vadd.f32 %v2316_v20, %v2287_v25  ;;  %v12014_v53 = vpop.f32.mrf.mxu1  ;;  %v2408_v7 = vpop.f32.mrf.mxu0  ;;  %v7776_v25 = vld [vmem:[%s14389_s14 + $0x98] sm:$0xf] }
 0x473   :  { %v2327_v32 = vadd.f32 %v2317_v22, %v2196_v51  ;;  %2703 = vmatmul.bf16.gmra.mxu1 %v7685_v42  ;;  %v9165_v51 = vld [vmem:[%s14389_s14 + $0x94] sm:$0xf]  ;;  %v9167_v42 = vld [vmem:[%s14389_s14 + $0xa0] sm:$0xf0] }
 0x474   :  { %v7773_v20 = vor.u32 %v9165_v51, %v7770_v50  ;;  %v7777_v22 = vor.u32 %v9167_v42, %v7776_v25  ;;  %v7732_v50 = vld [vmem:[%s14389_s14 + $0x48] sm:$0xf]  ;;  %v9157_v25 = vld [vmem:[%s14389_s14 + $0x50] sm:$0xf0] }
 0x475   :  { %v7733_v42 = vor.u32 %v9157_v25, %v7732_v50  ;;  %v7716_v50 = vld [vmem:[%s14389_s14 + $0x20] sm:$0xf]  ;;  %v9152_v25 = vld [vmem:[%s14389_s14 + $0x28] sm:$0xf0] }
 0x476   :  { %2944 = vmatpush.bf16.msra.mxu3 %v7773_v20  ;;  %2973 = vmatpush.bf16.msra.mxu0 %v7777_v22  ;;  %v9156_v20 = vld [vmem:[%s14389_s14 + $0x4c] sm:$0xf]  ;;  %v7734_v22 = vld [vmem:[%s14389_s14 + $0x54] sm:$0xf0] }
 0x479   :  { %v2432_v5 = vpop.f32.mrf.mxu1  ;;  %v12029_v60 = vpop.f32.mrf.mxu0 }
 0x47a   :  { %v2433_v6 = vadd.f32 %v2432_v5, %v2403_v10  ;;  %v9166_v10 = vld [vmem:[%s14389_s14 + $0x98] sm:$0xf0]  ;;  %v7756_v5 = vld [vmem:[%s14389_s14 + $0x78] sm:$0xf] }
 0x47c   :  { %v12019_v18 = vadd.f32 %v2433_v6, %v11947_v48  ;;  %v9163_v6 = vld [vmem:[%s14389_s14 + $0x80] sm:$0xf0] }
 0x481   :  { %v12027_v28 = vpop.f32.mrf.mxu1  ;;  %v2413_v29 = vpop.f32.mrf.mxu0 }
 0x483   :  { %2708 = vmatmul.bf16.gmra.mxu1 %v7693_v31  ;;  %v7764_v31 = vld [vmem:[%s14389_s14 + $0x80] sm:$0xf] }
 0x489   :  { %v2437_v63 = vpop.f32.mrf.mxu1  ;;  %v12055_v57 = vpop.f32.mrf.mxu0 }
 0x48a   :  { %v2438_v14 = vadd.f32 %v2437_v63, %v2408_v7  ;;  %v9164_v7 = vld [vmem:[%s14389_s14 + $0x88] sm:$0xf0] }
 0x48c   :  { %v12031_v8 = vadd.f32 %v2438_v14, %v2323_v21  ;;  %v7781_v21 = vor.u32 %v9169_v52, %v7780_v24  ;;  %v7757_v14 = vor.u32 %v9163_v6, %v7756_v5  ;;  %v7740_v5 = vld [vmem:[%s14389_s14 + $0x50] sm:$0xf]  ;;  %v7737_v6 = vor.u32 %v9156_v20, %v7734_v22  ;;  %v7696_v22 = vld [vmem:[%s14389_s14] sm:$0xf] }
 0x48d   :  { %v7717_v20 = vor.u32 %v9152_v25, %v7716_v50  ;;  %v2304_v25 = vadd.f32 %v11954_v34, %v11952_v1 }
 0x48e   :  { %2914 = vmatpush.bf16.msra.mxu2 %v7781_v21  ;;  %v7744_v21 = vld [vmem:[%s14389_s14 + $0x60] sm:$0xf] }
 0x48f   :  { %v7745_v46 = vor.u32 %v9160_v35, %v7744_v21 }
 0x491   :  { %v12033_v48 = vpop.f32.mrf.mxu1 }
 0x499   :  { %v2442_v39 = vpop.f32.mrf.mxu1 }
 0x49a   :  { %v2443_v0 = vadd.f32 %v2442_v39, %v2413_v29  ;;  %v7761_v29 = vor.u32 %v9162_v27, %v7758_v13  ;;  %v7765_v39 = vor.u32 %v9164_v7, %v7764_v31  ;;  %v9158_v27 = vld [vmem:[%s14389_s14 + $0x58] sm:$0xf0]  ;;  %v7720_v31 = vld [vmem:[%s14389_s14 + $0x30] sm:$0xf] }
 0x49b   :  { %v7741_v13 = vor.u32 %v9158_v27, %v7740_v5  ;;  %v9154_v7 = vld [vmem:[%s14389_s14 + $0x38] sm:$0xf0]  ;;  %v9148_v5 = vld [vmem:[%s14389_s14 + $0x8] sm:$0xf0] }
 0x49c   :  { %v12044_v30 = vadd.f32 %v2443_v0, %v2325_v49  ;;  %v7768_v49 = vld [vmem:[%s14389_s14 + $0x90] sm:$0xf]  ;;  %v2418_v0 = vpop.f32.mrf.mxu0  ;;  %2945 = vmatpush.bf16.msra.mxu3 %v7761_v29  ;;  %2974 = vmatpush.bf16.msra.mxu0 %v7765_v39  ;;  %v7721_v29 = vor.u32 %v9154_v7, %v7720_v31  ;;  %v7722_v39 = vld [vmem:[%s14389_s14 + $0x3c] sm:$0xf0]  ;;  %v7697_v27 = vor.u32 %v9148_v5, %v7696_v22  ;;  %v7704_v31 = vld [vmem:[%s14389_s14 + $0x8] sm:$0xf] }
 0x49d   :  { %v7769_v11 = vor.u32 %v9166_v10, %v7768_v49  ;;  %v12115_v49 = vpop.f32.mrf.mxu2  ;;  %v7749_v10 = vor.u32 %v9159_v61, %v7746_v12  ;;  %v9151_v12 = vld [vmem:[%s14389_s14 + $0x20] sm:$0xf0]  ;;  %v9149_v7 = vld [vmem:[%s14389_s14 + $0x10] sm:$0xf0]  ;;  %v2435_v22 = vadd.f32 %v12027_v28, %v12016_v2 }
 0x49f   :  { %2915 = vmatpush.bf16.msra.mxu2 %v7769_v11  ;;  %v12117_v11 = vpop.f32.mrf.mxu3 }
 0x4a0   :  { %2946 = vmatpush.bf16.msra.mxu3 %v7749_v10 }
 0x4a1   :  { %v12093_v63 = vpop.f32.mrf.mxu1 }
 0x4a3   :  { %2916 = vmatpush.bf16.msra.mxu2 %v7757_v14  ;;  %v9153_v14 = vld [vmem:[%s14389_s14 + $0x34] sm:$0xf] }
 0x4a4   :  { %2947 = vmatpush.bf16.msra.mxu3 %v7737_v6  ;;  %v12155_v35 = vpop.f32.mrf.mxu0  ;;  %v9147_v6 = vld [vmem:[%s14389_s14 + $0x4] sm:$0xf] }
 0x4a5   :  { %v2534_v61 = vpop.f32.mrf.mxu2 }
 0x4a7   :  { %2917 = vmatpush.bf16.msra.mxu2 %v7745_v46  ;;  %v7708_v46 = vld [vmem:[%s14389_s14 + $0x18] sm:$0xf] }
 0x4a8   :  { %v7709_v10 = vor.u32 %v9151_v12, %v7708_v46  ;;  %v2042_v46 = vadd.f32 %v11855_v43, %v11853_v40  ;;  %v2173_v12 = vadd.f32 %v11945_v41, %v11907_v37 }
 0x4a9   :  { %v2447_v24 = vpop.f32.mrf.mxu1 }
 0x4aa   :  { %v2448_v52 = vadd.f32 %v2447_v24, %v2418_v0  ;;  %v7728_v0 = vld [vmem:[%s14389_s14 + $0x38] sm:$0xf]  ;;  %v9155_v24 = vld [vmem:[%s14389_s14 + $0x40] sm:$0xf0]  ;;  %v2060_v50 = vadd.f32 %v2042_v46, %v11708_v45  ;;  %v12208_v45 = vld [vmem:[%s14390_s7] ss:$0 sm:$0xff] }
 0x4ab   :  { %2918 = vmatpush.bf16.msra.mxu2 %v7733_v42  ;;  %v7729_v21 = vor.u32 %v9155_v24, %v7728_v0 }
 0x4ac   :  { %v12095_v17 = vadd.f32 %v2448_v52, %v2327_v32  ;;  %v7752_v32 = vld [vmem:[%s14389_s14 + $0x68] sm:$0xf]  ;;  %v7725_v52 = vor.u32 %v9153_v14, %v7722_v39  ;;  %v2665_v39 = vpop.f32.mrf.mxu0 }
 0x4ad   :  { %v7753_v51 = vor.u32 %v9161_v47, %v7752_v32  ;;  %v9150_v32 = vld [vmem:[%s14389_s14 + $0x1c] sm:$0xf]  ;;  %v2563_v47 = vpop.f32.mrf.mxu3  ;;  %v2536_v0 = vpop.f32.mrf.mxu2 }
 0x4ae   :  { %2948 = vmatpush.bf16.msra.mxu3 %v7725_v52 }
 0x4af   :  { %2975 = vmatpush.bf16.msra.mxu0 %v7753_v51  ;;  %2919 = vmatpush.bf16.msra.mxu2 %v7721_v29  ;;  %v7710_v51 = vld [vmem:[%s14389_s14 + $0x24] sm:$0xf0]  ;;  %v7705_v29 = vor.u32 %v9149_v7, %v7704_v31  ;;  %v2178_v7 = vadd.f32 %v11980_v23, %v11932_v62 }
 0x4b0   :  { %v7713_v42 = vor.u32 %v9150_v32, %v7710_v51 }
 0x4b1   :  { %v12193_v52 = vpop.f32.mrf.mxu1 }
 0x4b2   :  { %2949 = vmatpush.bf16.msra.mxu3 %v7713_v42  ;;  %v2564_v42 = vadd.f32 %v2563_v47, %v2534_v61 }
 0x4b3   :  { %2976 = vmatpush.bf16.msra.mxu0 %v7741_v13  ;;  %2920 = vmatpush.bf16.msra.mxu2 %v7709_v10  ;;  %v7698_v13 = vld [vmem:[%s14389_s14 + $0xc] sm:$0xf0] }
 0x4b4   :  { %v7701_v14 = vor.u32 %v9147_v6, %v7698_v13  ;;  %v2583_v40 = vadd.f32 %v2564_v42, %v12019_v18  ;;  %v2047_v18 = vadd.f32 %v11890_v16, %v11888_v4  ;;  %v2440_v4 = vadd.f32 %v12033_v48, %v12029_v60 }
 0x4b5   :  { %v2565_v24 = vpop.f32.mrf.mxu3  ;;  %v2539_v32 = vpop.f32.mrf.mxu2  ;;  %v2052_v60 = vadd.f32 %v11917_v54, %v11915_v26  ;;  %v2445_v26 = vadd.f32 %v12093_v63, %v12055_v57 }
 0x4b6   :  { %2950 = vmatpush.bf16.msra.mxu3 %v7701_v14  ;;  %v2566_v43 = vadd.f32 %v2565_v24, %v2536_v0  ;;  %v2062_v24 = vadd.f32 %v2047_v18, %v11750_v59  ;;  %v9239_v18 = vld [vmem:[%s14391_s2 + $0x220] sm:$0xf0] }
 0x4b7   :  { %2977 = vmatpush.bf16.msra.mxu0 %v7729_v21  ;;  %2921 = vmatpush.bf16.msra.mxu2 %v7697_v27  ;;  %v2667_v21 = vpop.f32.mrf.mxu0 }
 0x4bb   :  { %2978 = vmatpush.bf16.msra.mxu0 %v7717_v20  ;;  %v2191_v20 = vadd.f32 %v2173_v12, %v2060_v50 }
 0x4bd   :  { %v2568_v10 = vpop.f32.mrf.mxu3  ;;  %v2322_v6 = vadd.f32 %v2304_v25, %v2191_v20  ;;  %v2541_v34 = vpop.f32.mrf.mxu2 }
 0x4be   :  { %v2569_v46 = vadd.f32 %v2568_v10, %v2539_v32 }
 0x4bf   :  { %2979 = vmatpush.bf16.msra.mxu0 %v7705_v29  ;;  %v2670_v27 = vpop.f32.mrf.mxu0  ;;  %v2453_v37 = vadd.f32 %v2435_v22, %v2322_v6 }
 0x4c0   :  { %v2585_v25 = vadd.f32 %v2569_v46, %v12031_v8  ;;  %v2183_v8 = vadd.f32 %v11999_v33, %v11975_v15  ;;  %v8044_v15 = vld [vmem:[%s14391_s2 + $0x1f8] sm:$0xf]  ;;  %v9234_v33 = vld [vmem:[%s14391_s2 + $0x1fc] sm:$0xf]  ;;  %v9229_v46 = vld [vmem:[%s14391_s2 + $0x1d0] sm:$0xf0] }
 0x4c1   :  { %v2584_v1 = vadd.f32 %v2566_v43, %v2453_v37 }
 0x4c5   :  { %v2570_v47 = vpop.f32.mrf.mxu3  ;;  %v2544_v16 = vpop.f32.mrf.mxu2 }
 0x4c6   :  { %v2571_v42 = vadd.f32 %v2570_v47, %v2541_v34 }
 0x4c7   :  { %v2672_v0 = vpop.f32.mrf.mxu0 }
 0x4cd   :  { %v2573_v62 = vpop.f32.mrf.mxu3  ;;  %v2546_v48 = vpop.f32.mrf.mxu2 }
 0x4cf   :  { %v2675_v32 = vpop.f32.mrf.mxu0 }
 0x4d0   :  { %v2694_v51 = vpop.f32.mrf.mxu1 }
 0x4d1   :  { %v2695_v5 = vadd.f32 %v2694_v51, %v2665_v39  ;;  %v2193_v51 = vadd.f32 %v2178_v7, %v2062_v24 }
 0x4d3   :  { %v2714_v41 = vadd.f32 %v2695_v5, %v2583_v40 }
 0x4d5   :  { %v2726_v2 = vadd.f32 %v12208_v45, %v2714_v41  ;;  %v2575_v40 = vpop.f32.mrf.mxu3  ;;  %v2064_v41 = vadd.f32 %v2052_v60, %v11786_v55  ;;  %v9238_v55 = vld [vmem:[%s14391_s2 + $0x218] sm:$0xf0]  ;;  %v7974_v60 = vld [vmem:[%s14391_s2 + $0x18c] sm:$0xf0] }
 0x4d6   :  { %v2576_v57 = vadd.f32 %v2575_v40, %v2546_v48  ;;  %v8045_v63 = vor.u32 %v9238_v55, %v8044_v15 }
 0x4d7   :  { %v2734_v14 = vmax.f32 %v2726_v2, 0.0  ;;  %v2677_v47 = vpop.f32.mrf.mxu0  ;;  %v8046_v2 = vld [vmem:[%s14391_s2 + $0x21c] sm:$0xf0] }
 0x4d8   :  { %v2696_v13 = vpop.f32.mrf.mxu1  ;;  %3477 = vmatpush.bf16.msra.mxu1 %v8045_v63 }
 0x4d9   :  { %v2697_v61 = vadd.f32 %v2696_v13, %v2667_v21  ;;  %v2309_v21 = vadd.f32 %v11984_v3, %v11982_v56  ;;  %v2314_v13 = vadd.f32 %v12005_v44, %v12003_v58 }
 0x4db   :  { %v2715_v28 = vadd.f32 %v2697_v61, %v2584_v1  ;;  %v2324_v23 = vadd.f32 %v2309_v21, %v2193_v51  ;;  %v2574_v1 = vadd.f32 %v2573_v62, %v2544_v16  ;;  %v2195_v61 = vadd.f32 %v2183_v8, %v2064_v41  ;;  %v8016_v62 = vld [vmem:[%s14391_s2 + $0x1b8] sm:$0xf]  ;;  %v7980_v8 = vld [vmem:[%s14391_s2 + $0x170] sm:$0xf] }
 0x4dd   :  { %v2727_v31 = vadd.f32 %v12208_v45, %v2715_v28  ;;  %v2455_v59 = vadd.f32 %v2440_v4, %v2324_v23  ;;  %v2326_v58 = vadd.f32 %v2314_v13, %v2195_v61  ;;  %v2587_v44 = vadd.f32 %v2574_v1, %v12044_v30  ;;  %v8052_v28 = vld [vmem:[%s14391_s2 + $0x200] sm:$0xf]  ;;  %v9235_v30 = vld [vmem:[%s14391_s2 + $0x204] sm:$0xf]  ;;  %v2578_v51 = vpop.f32.mrf.mxu3  ;;  %v9230_v23 = vld [vmem:[%s14391_s2 + $0x1d8] sm:$0xf0] }
 0x4de   :  { %v8053_v7 = vor.u32 %v9239_v18, %v8052_v28  ;;  %v7982_v13 = vld [vmem:[%s14391_s2 + $0x194] sm:$0xf0]  ;;  %v2057_v1 = vadd.f32 %v11930_v19, %v11928_v36 }
 0x4df   :  { %v2735_v29 = vmax.f32 %v2727_v31, 0.0  ;;  %v2586_v56 = vadd.f32 %v2571_v42, %v2455_v59  ;;  %v8049_v31 = vor.u32 %v9234_v33, %v8046_v2 }
 0x4e0   :  { %v2699_v39 = vpop.f32.mrf.mxu1  ;;  %3535 = vmatpush.bf16.msrb.mxu3 %v8053_v7  ;;  %v2066_v33 = vadd.f32 %v2057_v1, %v11822_v38 }
 0x4e1   :  { %v2775_v12 = vpack.c.bf16 %v2735_v29, %v2734_v14  ;;  %v2700_v50 = vadd.f32 %v2699_v39, %v2670_v27  ;;  %v8054_v14 = vld [vmem:[%s14391_s2 + $0x224] sm:$0xf0]  ;;  %v8008_v29 = vld [vmem:[%s14391_s2 + $0x1b0] sm:$0xf]  ;;  %v2457_v39 = vadd.f32 %v2445_v26, %v2326_v58  ;;  %3506 = vmatpush.bf16.msrb.mxu2 %v8049_v31  ;;  %v2680_v26 = vpop.f32.mrf.mxu0  ;;  %v2319_v58 = vadd.f32 %v12117_v11, %v12115_v49 }
 0x4e2   :  { %v8057_v21 = vor.u32 %v9235_v30, %v8054_v14  ;;  %v8009_v16 = vor.u32 %v9229_v46, %v8008_v29 }
 0x4e3   :  { %2922 = vmatmul.bf16.vlgmr.msra.gmra.mxu2 %v2775_v12  ;;  %2951 = vmatmul.bf16.vlgmr.msra.gmra.mxu3 %v2775_v12  ;;  %v2716_v20 = vadd.f32 %v2700_v50, %v2585_v25  ;;  %v8010_v50 = vld [vmem:[%s14391_s2 + $0x1d4] sm:$0xf0]  ;;  %v2588_v25 = vadd.f32 %v2576_v57, %v2457_v39 }
 0x4e4   :  { %2980 = vmatmul.bf16.vlgmr.msra.gmra.mxu0 %v2775_v12  ;;  %v9225_v12 = vld [vmem:[%s14391_s2 + $0x1b4] sm:$0xf]  ;;  %3478 = vmatpush.bf16.msra.mxu1 %v8009_v16 }
 0x4e5   :  { %v2728_v10 = vadd.f32 %v12208_v45, %v2716_v20  ;;  %3564 = vmatpush.bf16.msrb.mxu0 %v8057_v21  ;;  %v8013_v59 = vor.u32 %v9225_v12, %v8010_v50  ;;  %v8017_v20 = vor.u32 %v9230_v23, %v8016_v62  ;;  %v2580_v57 = vpop.f32.mrf.mxu3  ;;  %v9207_v21 = vld [vmem:[%s14391_s2 + $0x124] sm:$0xf]  ;;  %v7944_v12 = vld [vmem:[%s14391_s2 + $0x128] sm:$0xf]  ;;  %v9208_v50 = vld [vmem:[%s14391_s2 + $0x12c] sm:$0xf] }
 0x4e6   :  { %v7946_v62 = vld [vmem:[%s14391_s2 + $0x14c] sm:$0xf0] }
 0x4e7   :  { %v2736_v43 = vmax.f32 %v2728_v10, 0.0  ;;  %v9220_v10 = vld [vmem:[%s14391_s2 + $0x188] sm:$0xf0]  ;;  %3507 = vmatpush.bf16.msrb.mxu2 %v8013_v59  ;;  %3536 = vmatpush.bf16.msrb.mxu3 %v8017_v20  ;;  %v7949_v23 = vor.u32 %v9208_v50, %v7946_v62  ;;  %v9198_v59 = vld [vmem:[%s14391_s2 + $0xdc] sm:$0xf] }
 0x4e8   :  { %v2701_v22 = vpop.f32.mrf.mxu1  ;;  %v8062_v62 = vld [vmem:[%s14391_s2 + $0x22c] sm:$0xf0] }
 0x4e9   :  { %v2702_v3 = vadd.f32 %v2701_v22, %v2672_v0  ;;  %v2549_v0 = vpop.f32.mrf.mxu2  ;;  %v9226_v22 = vld [vmem:[%s14391_s2 + $0x1bc] sm:$0xf]  ;;  %v2682_v49 = vpop.f32.mrf.mxu0 }
 0x4ea   :  { %v2579_v36 = vadd.f32 %v2578_v51, %v2549_v0  ;;  %v9212_v51 = vld [vmem:[%s14391_s2 + $0x148] sm:$0xf0] }
 0x4eb   :  { %v2717_v5 = vadd.f32 %v2702_v3, %v2586_v56  ;;  %v8018_v56 = vld [vmem:[%s14391_s2 + $0x1dc] sm:$0xf0]  ;;  %v7972_v3 = vld [vmem:[%s14391_s2 + $0x168] sm:$0xf]  ;;  %v7945_v16 = vor.u32 %v9212_v51, %v7944_v12  ;;  %v9240_v51 = vld [vmem:[%s14391_s2 + $0x228] sm:$0xf0] }
 0x4ec   :  { %v7973_v40 = vor.u32 %v9220_v10, %v7972_v3  ;;  %v2589_v28 = vadd.f32 %v2579_v36, %v12095_v17  ;;  %v7936_v17 = vld [vmem:[%s14391_s2 + $0x120] sm:$0xf]  ;;  %v9203_v3 = vld [vmem:[%s14391_s2 + $0x100] sm:$0xf0]  ;;  %v9185_v36 = vld [vmem:[%s14391_s2 + $0x70] sm:$0xf0] }
 0x4ed   :  { %v2729_v6 = vadd.f32 %v12208_v45, %v2717_v5  ;;  %v9216_v5 = vld [vmem:[%s14391_s2 + $0x16c] sm:$0xf]  ;;  %v8060_v12 = vld [vmem:[%s14391_s2 + $0x208] sm:$0xf] }
 0x4ee   :  { %3479 = vmatpush.bf16.msra.mxu1 %v7973_v40  ;;  %v9193_v40 = vld [vmem:[%s14391_s2 + $0xb0] sm:$0xf0]  ;;  %v8061_v50 = vor.u32 %v9240_v51, %v8060_v12  ;;  %v7924_v12 = vld [vmem:[%s14391_s2 + $0xf0] sm:$0xf] }
 0x4ef   :  { %v2737_v27 = vmax.f32 %v2729_v6, 0.0  ;;  %v9205_v51 = vld [vmem:[%s14391_s2 + $0x110] sm:$0xf0] }
 0x4f0   :  { %v2704_v37 = vpop.f32.mrf.mxu1 }
 0x4f1   :  { %v2776_v34 = vpack.c.bf16 %v2737_v27, %v2736_v43  ;;  %v2705_v54 = vadd.f32 %v2704_v37, %v2675_v32  ;;  %v8021_v32 = vor.u32 %v9226_v22, %v8018_v56  ;;  %v9221_v43 = vld [vmem:[%s14391_s2 + $0x190] sm:$0xf0]  ;;  %v7977_v37 = vor.u32 %v9216_v5, %v7974_v60  ;;  %v7902_v22 = vld [vmem:[%s14391_s2 + $0xfc] sm:$0xf0]  ;;  %v9199_v5 = vld [vmem:[%s14391_s2 + $0xe4] sm:$0xf] }
 0x4f2   :  { %v9217_v27 = vld [vmem:[%s14391_s2 + $0x174] sm:$0xf]  ;;  %v7981_v41 = vor.u32 %v9221_v43, %v7980_v8  ;;  %v7908_v56 = vld [vmem:[%s14391_s2 + $0xe0] sm:$0xf]  ;;  %v7910_v60 = vld [vmem:[%s14391_s2 + $0x104] sm:$0xf0] }
 0x4f3   :  { %2927 = vmatmul.bf16.gmra.mxu2 %v2776_v34  ;;  %2956 = vmatmul.bf16.gmra.mxu3 %v2776_v34  ;;  %v2718_v24 = vadd.f32 %v2705_v54, %v2587_v44  ;;  %v7985_v61 = vor.u32 %v9217_v27, %v7982_v13  ;;  %v2188_v54 = vadd.f32 %v12014_v53, %v12001_v9  ;;  %v2551_v44 = vpop.f32.mrf.mxu2  ;;  %v9189_v8 = vld [vmem:[%s14391_s2 + $0x94] sm:$0xf]  ;;  %v7866_v27 = vld [vmem:[%s14391_s2 + $0xb4] sm:$0xf0] }
 0x4f4   :  { %2985 = vmatmul.bf16.gmra.mxu0 %v2776_v34  ;;  %3508 = vmatpush.bf16.msrb.mxu2 %v7977_v37  ;;  %v2450_v9 = vadd.f32 %v12193_v52, %v12155_v35  ;;  %v2581_v38 = vadd.f32 %v2580_v57, %v2551_v44  ;;  %v7909_v10 = vor.u32 %v9203_v3, %v7908_v56  ;;  %v7872_v37 = vld [vmem:[%s14391_s2 + $0x98] sm:$0xf]  ;;  %v9181_v57 = vld [vmem:[%s14391_s2 + $0x54] sm:$0xf]  ;;  %v8024_v3 = vld [vmem:[%s14391_s2 + $0x1c0] sm:$0xf] }
 0x4f5   :  { %v2730_v48 = vadd.f32 %v12208_v45, %v2718_v24  ;;  %3565 = vmatpush.bf16.msrb.mxu0 %v8021_v32  ;;  %3537 = vmatpush.bf16.msrb.mxu3 %v7981_v41  ;;  %v2197_v63 = vadd.f32 %v2188_v54, %v2066_v33  ;;  %v9211_v24 = vld [vmem:[%s14391_s2 + $0x140] sm:$0xf0]  ;;  %v7905_v32 = vor.u32 %v9198_v59, %v7902_v22  ;;  %v9194_v41 = vld [vmem:[%s14391_s2 + $0xb8] sm:$0xf0]  ;;  %v7828_v54 = vld [vmem:[%s14391_s2 + $0x48] sm:$0xf] }
 0x4f6   :  { %v7937_v46 = vor.u32 %v9211_v24, %v7936_v17  ;;  %v7869_v13 = vor.u32 %v9189_v8, %v7866_v27  ;;  %v7873_v1 = vor.u32 %v9194_v41, %v7872_v37  ;;  %v7830_v33 = vld [vmem:[%s14391_s2 + $0x6c] sm:$0xf0]  ;;  %v8070_v22 = vld [vmem:[%s14391_s2 + $0x234] sm:$0xf0]  ;;  %v9228_v8 = vld [vmem:[%s14391_s2 + $0x1cc] sm:$0xf] }
 0x4f7   :  { %v2328_v2 = vadd.f32 %v2319_v58, %v2197_v63  ;;  %v7836_v58 = vld [vmem:[%s14391_s2 + $0x50] sm:$0xf]  ;;  %v7838_v63 = vld [vmem:[%s14391_s2 + $0x74] sm:$0xf0] }
 0x4f8   :  { %v2706_v4 = vpop.f32.mrf.mxu1  ;;  %3480 = vmatpush.bf16.msra.mxu1 %v7937_v46  ;;  %v7837_v44 = vor.u32 %v9185_v36, %v7836_v58  ;;  %v9219_v36 = vld [vmem:[%s14391_s2 + $0x184] sm:$0xf] }
 0x4f9   :  { %v2707_v42 = vadd.f32 %v2706_v4, %v2677_v47  ;;  %v2738_v47 = vmax.f32 %v2730_v48, 0.0  ;;  %3566 = vmatpush.bf16.msrb.mxu0 %v7985_v61  ;;  %v2459_v18 = vadd.f32 %v2450_v9, %v2328_v2  ;;  %3538 = vmatpush.bf16.msrb.mxu3 %v7945_v16  ;;  %v7913_v48 = vor.u32 %v9199_v5, %v7910_v60  ;;  %v7874_v61 = vld [vmem:[%s14391_s2 + $0xbc] sm:$0xf0]  ;;  %v9175_v2 = vld [vmem:[%s14391_s2 + $0x20] sm:$0xf0] }
 0x4fa   :  { %v7841_v9 = vor.u32 %v9181_v57, %v7838_v63  ;;  %v9227_v5 = vld [vmem:[%s14391_s2 + $0x1c4] sm:$0xf]  ;;  %v8026_v60 = vld [vmem:[%s14391_s2 + $0x1e4] sm:$0xf0] }
 0x4fb   :  { %v2719_v6 = vadd.f32 %v2707_v42, %v2588_v25  ;;  %v2590_v7 = vadd.f32 %v2581_v38, %v2459_v18  ;;  %v7900_v25 = vld [vmem:[%s14391_s2 + $0xd8] sm:$0xf]  ;;  %v9202_v42 = vld [vmem:[%s14391_s2 + $0xf8] sm:$0xf0]  ;;  %v7794_v18 = vld [vmem:[%s14391_s2 + $0x24] sm:$0xf0] }
 0x4fc   :  { %v7901_v20 = vor.u32 %v9202_v42, %v7900_v25  ;;  %v9241_v25 = vld [vmem:[%s14391_s2 + $0x230] sm:$0xf0] }
 0x4fd   :  { %v2731_v34 = vadd.f32 %v12208_v45, %v2719_v6  ;;  %3567 = vmatpush.bf16.msrb.mxu0 %v7949_v23  ;;  %3539 = vmatpush.bf16.msrb.mxu3 %v7909_v10  ;;  %v7864_v6 = vld [vmem:[%s14391_s2 + $0x90] sm:$0xf] }
 0x4fe   :  { %3481 = vmatpush.bf16.msra.mxu1 %v7901_v20  ;;  %v7865_v43 = vor.u32 %v9193_v40, %v7864_v6  ;;  %v8068_v23 = vld [vmem:[%s14391_s2 + $0x210] sm:$0xf]  ;;  %v9237_v20 = vld [vmem:[%s14391_s2 + $0x214] sm:$0xf]  ;;  %v8029_v6 = vor.u32 %v9227_v5, %v8026_v60  ;;  %v9232_v40 = vld [vmem:[%s14391_s2 + $0x1e8] sm:$0xf0] }
 0x4ff   :  { %v2739_v15 = vmax.f32 %v2731_v34, 0.0  ;;  %v9190_v34 = vld [vmem:[%s14391_s2 + $0x9c] sm:$0xf]  ;;  %v8069_v59 = vor.u32 %v9241_v25, %v8068_v23  ;;  %v8073_v56 = vor.u32 %v9237_v20, %v8070_v22  ;;  %v7925_v23 = vor.u32 %v9205_v51, %v7924_v12  ;;  %v7882_v20 = vld [vmem:[%s14391_s2 + $0xc4] sm:$0xf0] }
 0x500   :  { %v2709_v55 = vpop.f32.mrf.mxu1  ;;  %v7844_v5 = vld [vmem:[%s14391_s2 + $0x58] sm:$0xf]  ;;  %v9242_v12 = vld [vmem:[%s14391_s2 + $0x238] sm:$0xf0] }
 0x501   :  { %v2777_v19 = vpack.c.bf16 %v2739_v15, %v2738_v47  ;;  %v2710_v53 = vadd.f32 %v2709_v55, %v2680_v26  ;;  %3568 = vmatpush.bf16.msrb.mxu0 %v7913_v48  ;;  %v7877_v26 = vor.u32 %v9190_v34, %v7874_v61  ;;  %3540 = vmatpush.bf16.msrb.mxu3 %v7873_v1  ;;  %v9184_v47 = vld [vmem:[%s14391_s2 + $0x68] sm:$0xf0]  ;;  %v8032_v48 = vld [vmem:[%s14391_s2 + $0x1c8] sm:$0xf]  ;;  %v9222_v1 = vld [vmem:[%s14391_s2 + $0x198] sm:$0xf0] }
 0x502   :  { %3482 = vmatpush.bf16.msra.mxu1 %v7865_v43  ;;  %v9180_v15 = vld [vmem:[%s14391_s2 + $0x4c] sm:$0xf]  ;;  %v7829_v55 = vor.u32 %v9184_v47, %v7828_v54  ;;  %v8034_v43 = vld [vmem:[%s14391_s2 + $0x1ec] sm:$0xf0]  ;;  %v8033_v27 = vor.u32 %v9232_v40, %v8032_v48  ;;  %v9218_v34 = vld [vmem:[%s14391_s2 + $0x17c] sm:$0xf] }
 0x503   :  { %2932 = vmatmul.bf16.gmra.mxu2 %v2777_v19  ;;  %2961 = vmatmul.bf16.gmra.mxu3 %v2777_v19  ;;  %v2720_v31 = vadd.f32 %v2710_v53, %v2589_v28  ;;  %v7792_v53 = vld [vmem:[%s14391_s2] sm:$0xf]  ;;  %v9171_v28 = vld [vmem:[%s14391_s2 + $0x4] sm:$0xf]  ;;  %v8037_v37 = vor.u32 %v9228_v8, %v8034_v43  ;;  %v9182_v40 = vld [vmem:[%s14391_s2 + $0x5c] sm:$0xf] }
 0x504   :  { %2990 = vmatmul.bf16.gmra.mxu0 %v2777_v19  ;;  %v7833_v19 = vor.u32 %v9180_v15, %v7830_v33  ;;  %v7793_v38 = vor.u32 %v9175_v2, %v7792_v53  ;;  %v7990_v54 = vld [vmem:[%s14391_s2 + $0x19c] sm:$0xf0]  ;;  %v9223_v15 = vld [vmem:[%s14391_s2 + $0x1a0] sm:$0xf0]  ;;  %v9213_v53 = vld [vmem:[%s14391_s2 + $0x150] sm:$0xf0] }
 0x505   :  { %v2732_v14 = vadd.f32 %v12208_v45, %v2720_v31  ;;  %3569 = vmatpush.bf16.msrb.mxu0 %v7877_v26  ;;  %3541 = vmatpush.bf16.msrb.mxu3 %v7837_v44  ;;  %v7800_v31 = vld [vmem:[%s14391_s2 + $0x8] sm:$0xf]  ;;  %v7996_v47 = vld [vmem:[%s14391_s2 + $0x180] sm:$0xf]  ;;  %v7993_v33 = vor.u32 %v9218_v34, %v7990_v54  ;;  %v9177_v54 = vld [vmem:[%s14391_s2 + $0x30] sm:$0xf0] }
 0x506   :  { %3483 = vmatpush.bf16.msra.mxu1 %v7829_v55  ;;  %v7997_v58 = vor.u32 %v9223_v15, %v7996_v47  ;;  %v7854_v34 = vld [vmem:[%s14391_s2 + $0x84] sm:$0xf0] }
 0x507   :  { %v2740_v35 = vmax.f32 %v2732_v14, 0.0  ;;  %v7802_v14 = vld [vmem:[%s14391_s2 + $0x2c] sm:$0xf0] }
 0x508   :  { %v2711_v11 = vpop.f32.mrf.mxu1 }
 0x509   :  { %v2712_v30 = vadd.f32 %v2711_v11, %v2682_v49  ;;  %3570 = vmatpush.bf16.msrb.mxu0 %v7841_v9  ;;  %v9176_v49 = vld [vmem:[%s14391_s2 + $0x28] sm:$0xf0]  ;;  %v7797_v11 = vor.u32 %v9171_v28, %v7794_v18  ;;  %v7952_v9 = vld [vmem:[%s14391_s2 + $0x130] sm:$0xf]  ;;  %v9209_v28 = vld [vmem:[%s14391_s2 + $0x134] sm:$0xf] }
 0x50a   :  { %3484 = vmatpush.bf16.msra.mxu1 %v7793_v38  ;;  %v7953_v2 = vor.u32 %v9213_v53, %v7952_v9  ;;  %v7954_v38 = vld [vmem:[%s14391_s2 + $0x154] sm:$0xf0]  ;;  %v9174_v53 = vld [vmem:[%s14391_s2 + $0x1c] sm:$0xf] }
 0x50b   :  { %v2721_v29 = vadd.f32 %v2712_v30, %v2590_v7  ;;  %v7801_v7 = vor.u32 %v9176_v49, %v7800_v31  ;;  %v9172_v30 = vld [vmem:[%s14391_s2 + $0xc] sm:$0xf]  ;;  %v7960_v18 = vld [vmem:[%s14391_s2 + $0x138] sm:$0xf]  ;;  %v7957_v49 = vor.u32 %v9209_v28, %v7954_v38 }
 0x50d   :  { %v2733_v39 = vadd.f32 %v12208_v45, %v2721_v29  ;;  %v7938_v45 = vld [vmem:[%s14391_s2 + $0x144] sm:$0xf0]  ;;  %v7805_v29 = vor.u32 %v9172_v30, %v7802_v14  ;;  %3542 = vmatpush.bf16.msrb.mxu3 %v7801_v7  ;;  %v9210_v7 = vld [vmem:[%s14391_s2 + $0x13c] sm:$0xf]  ;;  %v7962_v30 = vld [vmem:[%s14391_s2 + $0x15c] sm:$0xf0] }
 0x50e   :  { %v7941_v4 = vor.u32 %v9207_v21, %v7938_v45  ;;  %3593 = vmatpush.bf16.msrb.mxu1 %v8061_v50  ;;  %v7926_v50 = vld [vmem:[%s14391_s2 + $0x114] sm:$0xf0] }
 0x50f   :  { %v2741_v52 = vmax.f32 %v2733_v39, 0.0  ;;  %3571 = vmatpush.bf16.msrb.mxu0 %v7805_v29  ;;  %v7965_v29 = vor.u32 %v9210_v7, %v7962_v30 }
 0x510   :  { %3509 = vmatpush.bf16.msrb.mxu2 %v7941_v4  ;;  %v9236_v4 = vld [vmem:[%s14391_s2 + $0x20c] sm:$0xf] }
 0x511   :  { %v2778_v0 = vpack.c.bf16 %v2741_v52, %v2740_v35  ;;  %v12443_v35 = vld [vmem:[%s14392_s3] sm:$0x7]  ;;  %v8065_v42 = vor.u32 %v9236_v4, %v8062_v62  ;;  %3651 = vmatpush.bf16.msra.mxu3 %v8069_v59  ;;  %v9191_v59 = vld [vmem:[%s14391_s2 + $0xa4] sm:$0xf] }
 0x512   :  { %v12446_v52 = vperm.slane %v12443_v35, 0  ;;  %v7880_v62 = vld [vmem:[%s14391_s2 + $0xa0] sm:$0xf]  ;;  %v7885_v60 = vor.u32 %v9191_v59, %v7882_v20  ;;  %v9215_v20 = vld [vmem:[%s14391_s2 + $0x160] sm:$0xf0] }
 0x513   :  { %2937 = vmatmul.bf16.gmra.mxu2 %v2778_v0  ;;  %2966 = vmatmul.bf16.gmra.mxu3 %v2778_v0  ;;  %v7968_v59 = vld [vmem:[%s14391_s2 + $0x140] sm:$0xf] }
 0x514   :  { %2995 = vmatmul.bf16.gmra.mxu0 %v2778_v0  ;;  %3510 = vmatpush.bf16.msrb.mxu2 %v7905_v32  ;;  %v9231_v32 = vld [vmem:[%s14391_s2 + $0x1e0] sm:$0xf0] }
 0x515   :  { %3680 = vmatpush.bf16.msra.mxu0 %v8073_v56  ;;  %v8025_v10 = vor.u32 %v9231_v32, %v8024_v3  ;;  %3652 = vmatpush.bf16.msra.mxu3 %v8033_v27  ;;  %v7888_v56 = vld [vmem:[%s14391_s2 + $0xa8] sm:$0xf]  ;;  %v9196_v3 = vld [vmem:[%s14391_s2 + $0xc8] sm:$0xf0]  ;;  %v7846_v27 = vld [vmem:[%s14391_s2 + $0x7c] sm:$0xf0] }
 0x516   :  { %v9192_v32 = vld [vmem:[%s14391_s2 + $0xac] sm:$0xf]  ;;  %v7889_v48 = vor.u32 %v9196_v3, %v7888_v56  ;;  %v7849_v15 = vor.u32 %v9182_v40, %v7846_v27  ;;  %v7969_v56 = vor.u32 %v9215_v20, %v7968_v59 }
 0x517   :  { %3594 = vmatpush.bf16.msrb.mxu1 %v8025_v10  ;;  %v7890_v10 = vld [vmem:[%s14391_s2 + $0xcc] sm:$0xf0] }
 0x518   :  { %3511 = vmatpush.bf16.msrb.mxu2 %v7869_v13  ;;  %v7988_v13 = vld [vmem:[%s14391_s2 + $0x178] sm:$0xf]  ;;  %v7893_v8 = vor.u32 %v9192_v32, %v7890_v10  ;;  %v9206_v10 = vld [vmem:[%s14391_s2 + $0x118] sm:$0xf0] }
 0x519   :  { %3681 = vmatpush.bf16.msra.mxu0 %v8037_v37  ;;  %v7989_v26 = vor.u32 %v9222_v1, %v7988_v13  ;;  %3653 = vmatpush.bf16.msra.mxu3 %v7997_v58  ;;  %v7852_v37 = vld [vmem:[%s14391_s2 + $0x60] sm:$0xf]  ;;  %v9183_v1 = vld [vmem:[%s14391_s2 + $0x64] sm:$0xf]  ;;  %v7932_v32 = vld [vmem:[%s14391_s2 + $0xf8] sm:$0xf] }
 0x51a   :  { %v7857_v58 = vor.u32 %v9183_v1, %v7854_v34 }
 0x51b   :  { %3595 = vmatpush.bf16.msrb.mxu1 %v7989_v26 }
 0x51c   :  { %3512 = vmatpush.bf16.msrb.mxu2 %v7833_v19  ;;  %v7998_v19 = vld [vmem:[%s14391_s2 + $0x1a4] sm:$0xf0] }
 0x51d   :  { %v8001_v44 = vor.u32 %v9219_v36, %v7998_v19  ;;  %v7810_v19 = vld [vmem:[%s14391_s2 + $0x34] sm:$0xf0] }
 0x51f   :  { %3682 = vmatpush.bf16.msra.mxu0 %v8001_v44  ;;  %3596 = vmatpush.bf16.msrb.mxu1 %v7953_v2  ;;  %v7816_v44 = vld [vmem:[%s14391_s2 + $0x18] sm:$0xf]  ;;  %v7818_v2 = vld [vmem:[%s14391_s2 + $0x3c] sm:$0xf0] }
 0x520   :  { %3513 = vmatpush.bf16.msrb.mxu2 %v7797_v11  ;;  %v9214_v11 = vld [vmem:[%s14391_s2 + $0x158] sm:$0xf0] }
 0x521   :  { %v7961_v14 = vor.u32 %v9214_v11, %v7960_v18 }
 0x523   :  { %3654 = vmatpush.bf16.msra.mxu3 %v7961_v14  ;;  %3683 = vmatpush.bf16.msra.mxu0 %v7965_v29 }
 0x524   :  { %3622 = vmatpush.bf16.msra.mxu2 %v8065_v42  ;;  %v9195_v42 = vld [vmem:[%s14391_s2 + $0xc0] sm:$0xf0] }
 0x525   :  { %v7881_v22 = vor.u32 %v9195_v42, %v7880_v62 }
 0x527   :  { %3655 = vmatpush.bf16.msra.mxu3 %v7925_v23  ;;  %v8004_v23 = vld [vmem:[%s14391_s2 + $0x188] sm:$0xf] }
 0x528   :  { %3623 = vmatpush.bf16.msra.mxu2 %v8029_v6  ;;  %v9186_v6 = vld [vmem:[%s14391_s2 + $0x78] sm:$0xf0] }
 0x529   :  { %v7845_v43 = vor.u32 %v9186_v6, %v7844_v5  ;;  %v7933_v5 = vor.u32 %v9206_v10, %v7932_v32  ;;  %v9265_v32 = vld [vmem:[%s14001_s12 + $0x68] sm:$0xf0] }
 0x52b   :  { %3656 = vmatpush.bf16.msra.mxu3 %v7889_v48  ;;  %v9197_v48 = vld [vmem:[%s14391_s2 + $0xd0] sm:$0xf0] }
 0x52c   :  { %3624 = vmatpush.bf16.msra.mxu2 %v7993_v33  ;;  %v9173_v33 = vld [vmem:[%s14391_s2 + $0x14] sm:$0xf] }
 0x52d   :  { %v7813_v38 = vor.u32 %v9173_v33, %v7810_v19  ;;  %v9319_v19 = vld [vmem:[%s14001_s12 + $0x218] sm:$0xf0] }
 0x530   :  { %3625 = vmatpush.bf16.msra.mxu2 %v7957_v49  ;;  %v7821_v49 = vor.u32 %v9174_v53, %v7818_v2 }
 0x566   :  { %v2923_v39 = vpop.f32.mrf.mxu2 }
 0x567   :  { %v2924_v0 = vadd.f32 %v2923_v39, %v12446_v52  ;;  %v7916_v39 = vld [vmem:[%s14391_s2 + $0xe8] sm:$0xf] }
 0x569   :  { %v3001_v21 = vmax.f32 %v2924_v0, 0.0  ;;  %v9204_v0 = vld [vmem:[%s14391_s2 + $0x108] sm:$0xf0] }
 0x56e   :  { %v2925_v17 = vpop.f32.mrf.mxu2 }
 0x56f   :  { %v2926_v24 = vadd.f32 %v2925_v17, %v12446_v52  ;;  %v9200_v17 = vld [vmem:[%s14391_s2 + $0xec] sm:$0xf] }
 0x571   :  { %v3004_v46 = vmax.f32 %v2926_v24, 0.0 }
 0x573   :  { %v12450_v45 = vpack.c.bf16 %v3004_v46, %v3001_v21  ;;  %v7917_v21 = vor.u32 %v9204_v0, %v7916_v39  ;;  %v7918_v46 = vld [vmem:[%s14391_s2 + $0x10c] sm:$0xf0] }
 0x574   :  { %v7921_v4 = vor.u32 %v9200_v17, %v7918_v46  ;;  %v12668_v17 = vpop.f32.mrf.mxu0 }
 0x575   :  { %3485 = vmatmul.bf16.vlgmr.msra.gmra.mxu1 %v12450_v45  ;;  %3514 = vmatmul.bf16.vlgmr.msrb.gmra.mxu2 %v12450_v45 }
 0x576   :  { %3543 = vmatmul.bf16.vlgmr.msrb.gmra.mxu3 %v12450_v45  ;;  %3572 = vmatmul.bf16.vlgmr.msrb.gmra.mxu0 %v12450_v45  ;;  %v2928_v16 = vpop.f32.mrf.mxu2 }
 0x577   :  { %v2929_v41 = vadd.f32 %v2928_v16, %v12446_v52  ;;  %v9201_v16 = vld [vmem:[%s14391_s2 + $0xf4] sm:$0xf]  ;;  %3597 = vmatpush.bf16.msrb.mxu1 %v7917_v21  ;;  %3626 = vmatpush.bf16.msra.mxu2 %v7921_v4  ;;  %v8040_v4 = vld [vmem:[%s14391_s2 + $0x1d0] sm:$0xf] }
 0x578   :  { %v7929_v25 = vor.u32 %v9201_v16, %v7926_v50  ;;  %v9233_v16 = vld [vmem:[%s14391_s2 + $0x1f0] sm:$0xf0] }
 0x579   :  { %v3007_v57 = vmax.f32 %v2929_v41, 0.0  ;;  %v9187_v41 = vld [vmem:[%s14391_s2 + $0x80] sm:$0xf0]  ;;  %v8041_v50 = vor.u32 %v9233_v16, %v8040_v4  ;;  %v9283_v4 = vld [vmem:[%s14001_s12 + $0xf8] sm:$0xf0] }
 0x57a   :  { %3684 = vmatpush.bf16.msra.mxu0 %v7929_v25  ;;  %v9224_v25 = vld [vmem:[%s14391_s2 + $0x1a8] sm:$0xf0] }
 0x57b   :  { %3598 = vmatpush.bf16.msrb.mxu1 %v7881_v22  ;;  %3627 = vmatpush.bf16.msra.mxu2 %v7885_v60  ;;  %v8005_v42 = vor.u32 %v9224_v25, %v8004_v23  ;;  %v7896_v60 = vld [vmem:[%s14391_s2 + $0xb0] sm:$0xf] }
 0x57c   :  { %v12676_v21 = vpop.f32.mrf.mxu0  ;;  %v7897_v6 = vor.u32 %v9197_v48, %v7896_v60  ;;  %v8213_v25 = vld [vmem:[%s14001_s12 + $0x90] sm:$0xf]  ;;  %v8141_v48 = vld [vmem:[%s14001_s12] sm:$0xf] }
 0x57e   :  { %v2930_v61 = vpop.f32.mrf.mxu2  ;;  %3685 = vmatpush.bf16.msra.mxu0 %v7893_v8  ;;  %v7860_v8 = vld [vmem:[%s14391_s2 + $0x68] sm:$0xf] }
 0x57f   :  { %v2931_v55 = vadd.f32 %v2930_v61, %v12446_v52  ;;  %v7808_v61 = vld [vmem:[%s14391_s2 + $0x10] sm:$0xf]  ;;  %3599 = vmatpush.bf16.msrb.mxu1 %v7845_v43  ;;  %3628 = vmatpush.bf16.msra.mxu2 %v7849_v15  ;;  %v9188_v43 = vld [vmem:[%s14391_s2 + $0x88] sm:$0xf0] }
 0x580   :  { %v7809_v36 = vor.u32 %v9177_v54, %v7808_v61  ;;  %v7861_v27 = vor.u32 %v9188_v43, %v7860_v8 }
 0x581   :  { %v3010_v63 = vmax.f32 %v2931_v55, 0.0  ;;  %v7853_v55 = vor.u32 %v9187_v41, %v7852_v37  ;;  %v7824_v41 = vld [vmem:[%s14391_s2 + $0x20] sm:$0xf] }
 0x582   :  { %3686 = vmatpush.bf16.msra.mxu0 %v7857_v58 }
 0x583   :  { %v12545_v31 = vpack.c.bf16 %v3010_v63, %v3007_v57  ;;  %v9178_v57 = vld [vmem:[%s14391_s2 + $0x38] sm:$0xf0]  ;;  %3657 = vmatpush.bf16.msra.mxu3 %v7853_v55  ;;  %3600 = vmatpush.bf16.msrb.mxu1 %v7809_v36  ;;  %v8393_v36 = vld [vmem:[%s14001_s12 + $0x1f8] sm:$0xf] }
 0x584   :  { %v7817_v18 = vor.u32 %v9178_v57, %v7816_v44  ;;  %3629 = vmatpush.bf16.msra.mxu2 %v7813_v38  ;;  %v12696_v62 = vpop.f32.mrf.mxu0  ;;  %v8394_v44 = vor.u32 %v9319_v19, %v8393_v36 }
 0x585   :  { %3490 = vmatmul.bf16.gmra.mxu1 %v12545_v31  ;;  %3519 = vmatmul.bf16.gmra.mxu2 %v12545_v31 }
 0x586   :  { %3548 = vmatmul.bf16.gmra.mxu3 %v12545_v31  ;;  %3577 = vmatmul.bf16.gmra.mxu0 %v12545_v31  ;;  %v2933_v24 = vpop.f32.mrf.mxu2 }
 0x587   :  { %v2934_v13 = vadd.f32 %v2933_v24, %v12446_v52  ;;  %3658 = vmatpush.bf16.msra.mxu3 %v7817_v18  ;;  %3687 = vmatpush.bf16.msra.mxu0 %v7821_v49  ;;  %v12674_v24 = vpop.f32.mrf.mxu3  ;;  %v8321_v18 = vld [vmem:[%s14001_s12 + $0x168] sm:$0xf]  ;;  %v9301_v49 = vld [vmem:[%s14001_s12 + $0x188] sm:$0xf0] }
 0x589   :  { %v3013_v63 = vmax.f32 %v2934_v13, 0.0  ;;  %v9179_v13 = vld [vmem:[%s14391_s2 + $0x40] sm:$0xf0] }
 0x58a   :  { %v7825_v1 = vor.u32 %v9179_v13, %v7824_v41 }
 0x58c   :  { %v12712_v3 = vpop.f32.mrf.mxu0 }
 0x58e   :  { %v2935_v26 = vpop.f32.mrf.mxu2 }
 0x58f   :  { %v2936_v47 = vadd.f32 %v2935_v26, %v12446_v52  ;;  %v12678_v46 = vpop.f32.mrf.mxu3 }
 0x591   :  { %v3016_v9 = vmax.f32 %v2936_v47, 0.0 }
 0x593   :  { %v12658_v28 = vpack.c.bf16 %v3016_v9, %v3013_v63  ;;  %v8357_v9 = vld [vmem:[%s14001_s12 + $0x1b0] sm:$0xf] }
 0x594   :  { %v12738_v37 = vpop.f32.mrf.mxu0 }
 0x595   :  { %3495 = vmatmul.bf16.gmra.mxu1 %v12658_v28  ;;  %3524 = vmatmul.bf16.gmra.mxu2 %v12658_v28 }
 0x596   :  { %3553 = vmatmul.bf16.gmra.mxu3 %v12658_v28  ;;  %3582 = vmatmul.bf16.gmra.mxu0 %v12658_v28  ;;  %v2938_v11 = vpop.f32.mrf.mxu2 }
 0x597   :  { %v2939_v7 = vadd.f32 %v2938_v11, %v12446_v52  ;;  %v12710_v22 = vpop.f32.mrf.mxu3  ;;  %v8322_v11 = vor.u32 %v9301_v49, %v8321_v18  ;;  %v12853_v18 = vperm.slane %v12443_v35, 1 }
 0x599   :  { %v3019_v29 = vmax.f32 %v2939_v7, 0.0 }
 0x59c   :  { %v12752_v61 = vpop.f32.mrf.mxu0 }
 0x59e   :  { %v2940_v30 = vpop.f32.mrf.mxu2 }
 0x59f   :  { %v2941_v14 = vadd.f32 %v2940_v30, %v12446_v52  ;;  %v8076_v52 = vld [vmem:[%s14391_s2 + $0x218] sm:$0xf]  ;;  %v12730_v40 = vpop.f32.mrf.mxu3 }
 0x5a0   :  { %v8077_v51 = vor.u32 %v9242_v12, %v8076_v52 }
 0x5a1   :  { %v3022_v39 = vmax.f32 %v2941_v14, 0.0  ;;  %v8285_v14 = vld [vmem:[%s14001_s12 + $0x120] sm:$0xf] }
 0x5a2   :  { %3709 = vmatpush.bf16.msra.mxu1 %v8077_v51  ;;  %v8249_v51 = vld [vmem:[%s14001_s12 + $0xd8] sm:$0xf] }
 0x5a3   :  { %v12666_v0 = vpack.c.bf16 %v3022_v39, %v3019_v29  ;;  %v9292_v29 = vld [vmem:[%s14001_s12 + $0x140] sm:$0xf0]  ;;  %v8250_v16 = vor.u32 %v9283_v4, %v8249_v51 }
 0x5a4   :  { %v12756_v54 = vpop.f32.mrf.mxu0  ;;  %v8286_v52 = vor.u32 %v9292_v29, %v8285_v14 }
 0x5a5   :  { %3500 = vmatmul.bf16.gmra.mxu1 %v12666_v0  ;;  %3529 = vmatmul.bf16.gmra.mxu2 %v12666_v0 }
 0x5a6   :  { %3558 = vmatmul.bf16.gmra.mxu3 %v12666_v0  ;;  %3587 = vmatmul.bf16.gmra.mxu0 %v12666_v0 }
 0x5a7   :  { %3710 = vmatpush.bf16.msra.mxu1 %v8041_v50  ;;  %v12746_v34 = vpop.f32.mrf.mxu3 }
 0x5ab   :  { %3711 = vmatpush.bf16.msra.mxu1 %v8005_v42 }
 0x5ac   :  { %v12764_v15 = vpop.f32.mrf.mxu0 }
 0x5af   :  { %3712 = vmatpush.bf16.msra.mxu1 %v7969_v56  ;;  %v12754_v26 = vpop.f32.mrf.mxu3  ;;  %v8177_v56 = vld [vmem:[%s14001_s12 + $0x48] sm:$0xf] }
 0x5b0   :  { %v8178_v10 = vor.u32 %v9265_v32, %v8177_v56 }
 0x5b3   :  { %3713 = vmatpush.bf16.msra.mxu1 %v7933_v5 }
 0x5b5   :  { %3601 = vmatmul.bf16.vlgmr.msrb.gmra.mxu1 %v12450_v45  ;;  %3630 = vmatmul.bf16.vlgmr.msra.gmra.mxu2 %v12450_v45 }
 0x5b6   :  { %3659 = vmatmul.bf16.vlgmr.msra.gmra.mxu3 %v12450_v45  ;;  %3688 = vmatmul.bf16.vlgmr.msra.gmra.mxu0 %v12450_v45 }
 0x5b7   :  { %3714 = vmatpush.bf16.msra.mxu1 %v7897_v6  ;;  %v12762_v47 = vpop.f32.mrf.mxu3  ;;  %v9256_v6 = vld [vmem:[%s14001_s12 + $0x20] sm:$0xf0] }
 0x5b8   :  { %v8142_v43 = vor.u32 %v9256_v6, %v8141_v48 }
 0x5bb   :  { %3715 = vmatpush.bf16.msra.mxu1 %v7861_v27 }
 0x5bf   :  { %3716 = vmatpush.bf16.msra.mxu1 %v7825_v1  ;;  %v12766_v55 = vpop.f32.mrf.mxu3 }
 0x5c3   :  { %4472 = vmatpush.bf16.msrb.mxu1 %v8394_v44 }
 0x5c5   :  { %3606 = vmatmul.bf16.gmra.mxu1 %v12545_v31  ;;  %3635 = vmatmul.bf16.gmra.mxu2 %v12545_v31 }
 0x5c6   :  { %3664 = vmatmul.bf16.gmra.mxu3 %v12545_v31  ;;  %3693 = vmatmul.bf16.gmra.mxu0 %v12545_v31 }
 0x5d5   :  { %3611 = vmatmul.bf16.gmra.mxu1 %v12658_v28  ;;  %3640 = vmatmul.bf16.gmra.mxu2 %v12658_v28 }
 0x5d6   :  { %3669 = vmatmul.bf16.gmra.mxu3 %v12658_v28  ;;  %3698 = vmatmul.bf16.gmra.mxu0 %v12658_v28 }
 0x5e5   :  { %3616 = vmatmul.bf16.gmra.mxu1 %v12666_v0  ;;  %3645 = vmatmul.bf16.gmra.mxu2 %v12666_v0 }
 0x5e6   :  { %3674 = vmatmul.bf16.gmra.mxu3 %v12666_v0  ;;  %3703 = vmatmul.bf16.gmra.mxu0 %v12666_v0 }
 0x5f2   :  { %v12768_v33 = vpop.f32.mrf.mxu1 }
 0x5f3   :  { %v12770_v58 = vpop.f32.mrf.mxu0 }
 0x5f5   :  { %3717 = vmatmul.bf16.vlgmr.msra.gmra.mxu1 %v12450_v45  ;;  %v9310_v45 = vld [vmem:[%s14001_s12 + $0x1d0] sm:$0xf0] }
 0x5f6   :  { %v8358_v2 = vor.u32 %v9310_v45, %v8357_v9 }
 0x5f8   :  { %v12779_v57 = vpop.f32.mrf.mxu2  ;;  %4473 = vmatpush.bf16.msrb.mxu1 %v8358_v2 }
 0x5f9   :  { %v12781_v63 = vpop.f32.mrf.mxu3 }
 0x5fa   :  { %v12789_v53 = vpop.f32.mrf.mxu1 }
 0x5fb   :  { %v12791_v38 = vpop.f32.mrf.mxu0  ;;  %v3738_v6 = vpack.c.bf16 %v12789_v53, %v12768_v33  ;;  %v9312_v33 = vld [vmem:[%s14001_s12 + $0x1e0] sm:$0xf0] }
 0x5fc   :  { %4474 = vmatpush.bf16.msrb.mxu1 %v8322_v11 }
 0x600   :  { %v12799_v7 = vpop.f32.mrf.mxu2  ;;  %4475 = vmatpush.bf16.msrb.mxu1 %v8286_v52  ;;  %v2953_v52 = vadd.f32 %v12674_v24, %v12853_v18  ;;  %v8409_v24 = vld [vmem:[%s14001_s12 + $0x208] sm:$0xf] }
 0x601   :  { %v12801_v30 = vpop.f32.mrf.mxu3 }
 0x602   :  { %v3491_v39 = vpop.f32.mrf.mxu1 }
 0x603   :  { %v12809_v12 = vpop.f32.mrf.mxu0 }
 0x604   :  { %4476 = vmatpush.bf16.msrb.mxu1 %v8250_v16 }
 0x605   :  { %3722 = vmatmul.bf16.gmra.mxu1 %v12545_v31  ;;  %v9274_v31 = vld [vmem:[%s14001_s12 + $0xb0] sm:$0xf0] }
 0x606   :  { %v8214_v59 = vor.u32 %v9274_v31, %v8213_v25  ;;  %v3002_v25 = vmax.f32 %v2953_v52, 0.0 }
 0x608   :  { %v12818_v50 = vpop.f32.mrf.mxu2  ;;  %4477 = vmatpush.bf16.msrb.mxu1 %v8214_v59 }
 0x609   :  { %v12820_v23 = vpop.f32.mrf.mxu3 }
 0x60a   :  { %v3493_v42 = vpop.f32.mrf.mxu1 }
 0x60b   :  { %v12828_v20 = vpop.f32.mrf.mxu0  ;;  %v3739_v56 = vpack.c.bf16 %v3493_v42, %v3491_v39 }
 0x60c   :  { %4478 = vmatpush.bf16.msrb.mxu1 %v8178_v10  ;;  %v9321_v10 = vld [vmem:[%s14001_s12 + $0x228] sm:$0xf0] }
 0x60d   :  { %v8410_v48 = vor.u32 %v9321_v10, %v8409_v24 }
 0x610   :  { %v3522_v5 = vpop.f32.mrf.mxu2  ;;  %4479 = vmatpush.bf16.msrb.mxu1 %v8142_v43 }
 0x611   :  { %v12836_v60 = vpop.f32.mrf.mxu3  ;;  %v3745_v43 = vpack.c.bf16 %v3522_v5, %v12818_v50  ;;  %v8337_v5 = vld [vmem:[%s14001_s12 + $0x178] sm:$0xf] }
 0x612   :  { %v3496_v8 = vpop.f32.mrf.mxu1 }
 0x613   :  { %v12844_v27 = vpop.f32.mrf.mxu0 }
 0x614   :  { %4588 = vmatpush.bf16.msra.mxu1 %v8410_v48  ;;  %v2965_v48 = vadd.f32 %v12754_v26, %v12853_v18 }
 0x615   :  { %3727 = vmatmul.bf16.gmra.mxu1 %v12658_v28  ;;  %v2955_v28 = vadd.f32 %v12678_v46, %v12853_v18 }
 0x617   :  { %v3005_v51 = vmax.f32 %v2955_v28, 0.0 }
 0x618   :  { %v3525_v41 = vpop.f32.mrf.mxu2 }
 0x619   :  { %v12847_v13 = vpop.f32.mrf.mxu3  ;;  %v12861_v59 = vpack.c.bf16 %v3005_v51, %v3002_v25  ;;  %v8265_v25 = vld [vmem:[%s14001_s12 + $0xe8] sm:$0xf] }
 0x61a   :  { %v3498_v1 = vpop.f32.mrf.mxu1 }
 0x61b   :  { %v3585_v36 = vpop.f32.mrf.mxu0  ;;  %v3740_v4 = vpack.c.bf16 %v3498_v1, %v3496_v8  ;;  %v9243_v8 = vld [vmem:[%s14393_s4] sm:$0xff] }
 0x61c   :  { %v8373_v1 = vld [vmem:[%s14001_s12 + $0x1c0] sm:$0xf]  ;;  %v3828_v50 = vpack.c.bf16 %v3585_v36, %v12844_v27  ;;  %v9244_v27 = vld [vmem:[%s14393_s4 + $0x8] sm:$0xff] }
 0x620   :  { %v3527_v19 = vpop.f32.mrf.mxu2 }
 0x621   :  { %v12849_v44 = vpop.f32.mrf.mxu3  ;;  %v3746_v46 = vpack.c.bf16 %v3527_v19, %v3525_v41  ;;  %v8374_v19 = vor.u32 %v9312_v33, %v8373_v1  ;;  %v8157_v33 = vld [vmem:[%s14001_s12 + $0x10] sm:$0xf] }
 0x622   :  { %v3501_v9 = vpop.f32.mrf.mxu1  ;;  %v3797_v51 = vpack.c.bf16 %v12849_v44, %v12847_v13  ;;  %v9285_v13 = vld [vmem:[%s14001_s12 + $0x108] sm:$0xf0]  ;;  %v3796_v44 = vpack.c.bf16 %v12836_v60, %v12820_v23  ;;  %v9246_v23 = vld [vmem:[%s14393_s4 + $0x18] sm:$0xff]  ;;  %v3795_v60 = vpack.c.bf16 %v12801_v30, %v12781_v63  ;;  %v9245_v63 = vld [vmem:[%s14393_s4 + $0x10] sm:$0xff]  ;;  %v3017_v30 = vmax.f32 %v2965_v48, 0.0 }
 0x623   :  { %v3588_v45 = vpop.f32.mrf.mxu0  ;;  %4589 = vmatpush.bf16.msra.mxu1 %v8374_v19  ;;  %v9258_v19 = vld [vmem:[%s14001_s12 + $0x30] sm:$0xf0]  ;;  %v8425_v48 = vld [vmem:[%s14001_s12 + $0x218] sm:$0xf] }
 0x625   :  { %3732 = vmatmul.bf16.gmra.mxu1 %v12666_v0 }
 0x628   :  { %v3530_v2 = vpop.f32.mrf.mxu2 }
 0x629   :  { %v3559_v49 = vpop.f32.mrf.mxu3 }
 0x62a   :  { %v3503_v11 = vpop.f32.mrf.mxu1 }
 0x62b   :  { %v3741_v14 = vpack.c.bf16 %v3503_v11, %v3501_v9  ;;  %v3590_v29 = vpop.f32.mrf.mxu0  ;;  %v2960_v9 = vadd.f32 %v12730_v40, %v12853_v18  ;;  %v3744_v40 = vpack.c.bf16 %v12799_v7, %v12779_v57  ;;  %v8301_v7 = vld [vmem:[%s14001_s12 + $0x130] sm:$0xf] }
 0x62c   :  { %v3829_v39 = vpack.c.bf16 %v3590_v29, %v3588_v45  ;;  %v9303_v45 = vld [vmem:[%s14001_s12 + $0x198] sm:$0xf0]  ;;  %v3827_v29 = vpack.c.bf16 %v12828_v20, %v12809_v12 }
 0x62d   :  { %3785 = vmatpush.bf16.msrb.mxu3 %v3741_v14  ;;  %v8338_v11 = vor.u32 %v9303_v45, %v8337_v5  ;;  %v3011_v36 = vmax.f32 %v2960_v9, 0.0 }
 0x62f   :  { %4590 = vmatpush.bf16.msra.mxu1 %v8338_v11 }
 0x630   :  { %v3532_v16 = vpop.f32.mrf.mxu2 }
 0x631   :  { %v3747_v0 = vpack.c.bf16 %v3532_v16, %v3530_v2  ;;  %v3561_v31 = vpop.f32.mrf.mxu3  ;;  %3786 = vmatpush.bf16.msrb.mxu3 %v3740_v4  ;;  %v2958_v2 = vadd.f32 %v12710_v22, %v12853_v18  ;;  %v3826_v16 = vpack.c.bf16 %v12791_v38, %v12770_v58 }
 0x632   :  { %v12859_v35 = vpop.f32.mrf.mxu1  ;;  %v3798_v28 = vpack.c.bf16 %v3561_v31, %v3559_v49  ;;  %v9294_v49 = vld [vmem:[%s14001_s12 + $0x150] sm:$0xf0] }
 0x633   :  { %3763 = vmatpush.bf16.msrb.mxu2 %v3747_v0  ;;  %v12863_v32 = vpop.f32.mrf.mxu0  ;;  %v3008_v22 = vmax.f32 %v2958_v2, 0.0  ;;  %v8302_v12 = vor.u32 %v9294_v49, %v8301_v7  ;;  %v8266_v0 = vor.u32 %v9285_v13, %v8265_v25 }
 0x635   :  { %3787 = vmatpush.bf16.msrb.mxu3 %v3739_v56  ;;  %4480 = vmatmul.bf16.vlgmr.msrb.gmra.mxu1 %v12861_v59  ;;  %v12926_v20 = vpack.c.bf16 %v3011_v36, %v3008_v22  ;;  %v8229_v56 = vld [vmem:[%s14001_s12 + $0xa0] sm:$0xf] }
 0x636   :  { %4591 = vmatpush.bf16.msra.mxu1 %v8302_v12 }
 0x637   :  { %3764 = vmatpush.bf16.msrb.mxu2 %v3746_v46  ;;  %v9276_v46 = vld [vmem:[%s14001_s12 + $0xc0] sm:$0xf0] }
 0x638   :  { %v12874_v42 = vpop.f32.mrf.mxu2  ;;  %v8230_v10 = vor.u32 %v9276_v46, %v8229_v56 }
 0x639   :  { %v12880_v41 = vpop.f32.mrf.mxu3  ;;  %3788 = vmatpush.bf16.msrb.mxu3 %v3738_v6  ;;  %v2963_v6 = vadd.f32 %v12746_v34, %v12853_v18 }
 0x63a   :  { %v12888_v53 = vpop.f32.mrf.mxu1  ;;  %4592 = vmatpush.bf16.msra.mxu1 %v8266_v0 }
 0x63b   :  { %3765 = vmatpush.bf16.msrb.mxu2 %v3745_v43  ;;  %v12907_v14 = vpop.f32.mrf.mxu0  ;;  %v3014_v1 = vmax.f32 %v2963_v6, 0.0  ;;  %v9323_v6 = vld [vmem:[%s14001_s12 + $0x238] sm:$0xf0] }
 0x63c   :  { %8089 = vmatmul.msk.bf16.vlgmr.msrb.gmra.mxu3 %vm710_vm3, %v9243_v8  ;;  %v9267_v8 = vld [vmem:[%s14001_s12 + $0x78] sm:$0xf0] }
 0x63d   :  { %3845 = vmatpush.bf16.msra.mxu3 %v3829_v39  ;;  %v8193_v39 = vld [vmem:[%s14001_s12 + $0x58] sm:$0xf]  ;;  %v12979_v5 = vpack.c.bf16 %v3017_v30, %v3014_v1  ;;  %v9314_v30 = vld [vmem:[%s14001_s12 + $0x1f0] sm:$0xf0] }
 0x63e   :  { %4593 = vmatpush.bf16.msra.mxu1 %v8230_v10  ;;  %v8194_v26 = vor.u32 %v9267_v8, %v8193_v39  ;;  %v8426_v39 = vor.u32 %v9323_v6, %v8425_v48  ;;  %v3857_v8 = vpack.c.bf16 %v12888_v53, %v12859_v35 }
 0x63f   :  { %3766 = vmatpush.bf16.msrb.mxu2 %v3744_v40 }
 0x640   :  { %v12911_v52 = vpop.f32.mrf.mxu2 }
 0x641   :  { %3846 = vmatpush.bf16.msra.mxu3 %v3828_v50  ;;  %v12913_v57 = vpop.f32.mrf.mxu3  ;;  %v8158_v50 = vor.u32 %v9258_v19, %v8157_v33  ;;  %v9305_v19 = vld [vmem:[%s14001_s12 + $0x1a8] sm:$0xf0] }
 0x642   :  { %v12923_v4 = vpop.f32.mrf.mxu1  ;;  %8084 = vmatmul.msk.bf16.vlgmr.msrb.gmra.mxu2 %vm710_vm3, %v9244_v27  ;;  %4594 = vmatpush.bf16.msra.mxu1 %v8194_v26  ;;  %v2968_v27 = vadd.f32 %v12762_v47, %v12853_v18  ;;  %v8389_v26 = vld [vmem:[%s14001_s12 + $0x1d0] sm:$0xf] }
 0x643   :  { %3814 = vmatpush.bf16.msra.mxu2 %v3798_v28  ;;  %v12941_v58 = vpop.f32.mrf.mxu0  ;;  %v2970_v28 = vadd.f32 %v12766_v55, %v12853_v18  ;;  %v8390_v35 = vor.u32 %v9314_v30, %v8389_v26 }
 0x644   :  { %v3020_v7 = vmax.f32 %v2968_v27, 0.0 }
 0x645   :  { %3847 = vmatpush.bf16.msra.mxu3 %v3827_v29  ;;  %4485 = vmatmul.bf16.gmra.mxu1 %v12926_v20  ;;  %v3023_v29 = vmax.f32 %v2970_v28, 0.0  ;;  %v9296_v28 = vld [vmem:[%s14001_s12 + $0x160] sm:$0xf0] }
 0x646   :  { %4595 = vmatpush.bf16.msra.mxu1 %v8158_v50  ;;  %v9248_v50 = vld [vmem:[%s14393_s4 + $0x28] sm:$0xff] }
 0x647   :  { %3815 = vmatpush.bf16.msra.mxu2 %v3797_v51  ;;  %v12990_v12 = vpack.c.bf16 %v3023_v29, %v3020_v7  ;;  %v9306_v7 = vld [vmem:[%s14001_s12 + $0x1b4] sm:$0xf] }
 0x648   :  { %v12939_v31 = vpop.f32.mrf.mxu2 }
 0x649   :  { %3848 = vmatpush.bf16.msra.mxu3 %v3826_v16  ;;  %v12943_v38 = vpop.f32.mrf.mxu3 }
 0x64a   :  { %v3609_v24 = vpop.f32.mrf.mxu1  ;;  %4704 = vmatpush.bf16.msrb.mxu1 %v8426_v39  ;;  %v8209_v39 = vld [vmem:[%s14001_s12 + $0x68] sm:$0xf] }
 0x64b   :  { %3816 = vmatpush.bf16.msra.mxu2 %v3796_v44  ;;  %v12981_v45 = vpop.f32.mrf.mxu0 }
 0x64c   :  { %8103 = vmatmul.msk.bf16.vlgmr.msra.gmra.mxu3 %vm710_vm3, %v9246_v23  ;;  %v3858_v23 = vpack.c.bf16 %v3609_v24, %v12923_v4  ;;  %v9247_v24 = vld [vmem:[%s14393_s4 + $0x20] sm:$0xff] }
 0x64e   :  { %4705 = vmatpush.bf16.msrb.mxu1 %v8390_v35  ;;  %v9279_v35 = vld [vmem:[%s14001_s12 + $0xdc] sm:$0xf] }
 0x64f   :  { %3817 = vmatpush.bf16.msra.mxu2 %v3795_v60 }
 0x650   :  { %v3638_v43 = vpop.f32.mrf.mxu2 }
 0x651   :  { %v12970_v34 = vpop.f32.mrf.mxu3 }
 0x652   :  { %v3612_v9 = vpop.f32.mrf.mxu1  ;;  %8096 = vmatmul.msk.bf16.vlgmr.msra.gmra.mxu2 %vm710_vm3, %v9245_v63  ;;  %v3889_v63 = vpack.c.bf16 %v3638_v43, %v12939_v31  ;;  %v3888_v31 = vpack.c.bf16 %v12911_v52, %v12874_v42  ;;  %v8353_v43 = vld [vmem:[%s14001_s12 + $0x188] sm:$0xf]  ;;  %v9315_v42 = vld [vmem:[%s14001_s12 + $0x1fc] sm:$0xf]  ;;  %v8395_v52 = vld [vmem:[%s14001_s12 + $0x21c] sm:$0xf0] }
 0x653   :  { %v12988_v36 = vpop.f32.mrf.mxu0  ;;  %v8398_v29 = vor.u32 %v9315_v42, %v8395_v52  ;;  %v9270_v42 = vld [vmem:[%s14001_s12 + $0x94] sm:$0xf]  ;;  %v8215_v52 = vld [vmem:[%s14001_s12 + $0xb4] sm:$0xf0] }
 0x655   :  { %4490 = vmatmul.bf16.gmra.mxu1 %v12979_v5 }
 0x658   :  { %v3641_v2 = vpop.f32.mrf.mxu2 }
 0x659   :  { %v3670_v40 = vpop.f32.mrf.mxu3 }
 0x65a   :  { %v3614_v11 = vpop.f32.mrf.mxu1 }
 0x65b   :  { %v3701_v16 = vpop.f32.mrf.mxu0  ;;  %v3859_v55 = vpack.c.bf16 %v3614_v11, %v3612_v9  ;;  %v8317_v11 = vld [vmem:[%s14001_s12 + $0x140] sm:$0xf] }
 0x65c   :  { %v8318_v27 = vor.u32 %v9296_v28, %v8317_v11  ;;  %v8257_v28 = vld [vmem:[%s14001_s12 + $0xe0] sm:$0xf] }
 0x660   :  { %v3643_v22 = vpop.f32.mrf.mxu2 }
 0x661   :  { %v3672_v49 = vpop.f32.mrf.mxu3  ;;  %v3890_v60 = vpack.c.bf16 %v3643_v22, %v3641_v2  ;;  %v8354_v2 = vor.u32 %v9305_v19, %v8353_v43  ;;  %v3919_v22 = vpack.c.bf16 %v12913_v57, %v12880_v41  ;;  %v9287_v41 = vld [vmem:[%s14001_s12 + $0x118] sm:$0xf0]  ;;  %v3951_v57 = vpack.c.bf16 %v12981_v45, %v12941_v58  ;;  %v9297_v58 = vld [vmem:[%s14001_s12 + $0x16c] sm:$0xf]  ;;  %v8323_v45 = vld [vmem:[%s14001_s12 + $0x18c] sm:$0xf0] }
 0x662   :  { %v3617_v51 = vpop.f32.mrf.mxu1  ;;  %v3921_v33 = vpack.c.bf16 %v3672_v49, %v3670_v40  ;;  %v3920_v40 = vpack.c.bf16 %v12970_v34, %v12943_v38  ;;  %v3952_v38 = vpack.c.bf16 %v3701_v16, %v12988_v36  ;;  %v8359_v49 = vld [vmem:[%s14001_s12 + $0x1d4] sm:$0xf0]  ;;  %v9320_v16 = vld [vmem:[%s14001_s12 + $0x220] sm:$0xf0]  ;;  %v8326_v48 = vor.u32 %v9297_v58, %v8323_v45 }
 0x663   :  { %v3704_v47 = vpop.f32.mrf.mxu0  ;;  %4706 = vmatpush.bf16.msrb.mxu1 %v8354_v2  ;;  %v8281_v36 = vld [vmem:[%s14001_s12 + $0xf8] sm:$0xf]  ;;  %v9260_v43 = vld [vmem:[%s14001_s12 + $0x40] sm:$0xf0] }
 0x665   :  { %4495 = vmatmul.bf16.gmra.mxu1 %v12990_v12 }
 0x667   :  { %4707 = vmatpush.bf16.msrb.mxu1 %v8318_v27  ;;  %v8218_v27 = vor.u32 %v9270_v42, %v8215_v52  ;;  %v8403_v42 = vld [vmem:[%s14001_s12 + $0x224] sm:$0xf0] }
 0x668   :  { %v3646_v25 = vpop.f32.mrf.mxu2 }
 0x669   :  { %v3675_v44 = vpop.f32.mrf.mxu3 }
 0x66a   :  { %v3619_v13 = vpop.f32.mrf.mxu1 }
 0x66b   :  { %v3860_v0 = vpack.c.bf16 %v3619_v13, %v3617_v51  ;;  %v3706_v53 = vpop.f32.mrf.mxu0  ;;  %v8401_v51 = vld [vmem:[%s14001_s12 + $0x200] sm:$0xf]  ;;  %v8362_v13 = vor.u32 %v9306_v7, %v8359_v49 }
 0x66c   :  { %v3953_v9 = vpack.c.bf16 %v3706_v53, %v3704_v47  ;;  %v3950_v47 = vpack.c.bf16 %v12907_v14, %v12863_v32  ;;  %v9288_v32 = vld [vmem:[%s14001_s12 + $0x124] sm:$0xf]  ;;  %v8287_v14 = vld [vmem:[%s14001_s12 + $0x144] sm:$0xf0]  ;;  %v8251_v53 = vld [vmem:[%s14001_s12 + $0xfc] sm:$0xf0] }
 0x66d   :  { %3876 = vmatpush.bf16.msrb.mxu2 %v3860_v0  ;;  %v8402_v0 = vor.u32 %v9320_v16, %v8401_v51  ;;  %v8290_v30 = vor.u32 %v9288_v32, %v8287_v14  ;;  %v9252_v51 = vld [vmem:[%s14001_s12 + $0x4] sm:$0xf]  ;;  %v8143_v16 = vld [vmem:[%s14001_s12 + $0x24] sm:$0xf0] }
 0x66e   :  { %v8146_v58 = vor.u32 %v9252_v51, %v8143_v16  ;;  %v9308_v32 = vld [vmem:[%s14001_s12 + $0x1c4] sm:$0xf]  ;;  %v8375_v14 = vld [vmem:[%s14001_s12 + $0x1e4] sm:$0xf0] }
 0x66f   :  { %v9272_v51 = vld [vmem:[%s14001_s12 + $0xa4] sm:$0xf]  ;;  %v8231_v16 = vld [vmem:[%s14001_s12 + $0xc4] sm:$0xf0] }
 0x670   :  { %v3648_v56 = vpop.f32.mrf.mxu2 }
 0x671   :  { %v3891_v18 = vpack.c.bf16 %v3648_v56, %v3646_v25  ;;  %3877 = vmatpush.bf16.msrb.mxu2 %v3859_v55  ;;  %v3677_v10 = vpop.f32.mrf.mxu3  ;;  %v8282_v25 = vor.u32 %v9287_v41, %v8281_v36  ;;  %v8245_v55 = vld [vmem:[%s14001_s12 + $0xb0] sm:$0xf]  ;;  %v9278_v56 = vld [vmem:[%s14001_s12 + $0xd0] sm:$0xf0]  ;;  %v8221_v36 = vld [vmem:[%s14001_s12 + $0x98] sm:$0xf] }
 0x672   :  { %v12993_v46 = vpop.f32.mrf.mxu1  ;;  %v3922_v4 = vpack.c.bf16 %v3677_v10, %v3675_v44  ;;  %v9249_v44 = vld [vmem:[%s14393_s4 + $0x30] sm:$0xff]  ;;  %v8246_v10 = vor.u32 %v9278_v56, %v8245_v55  ;;  %v9275_v41 = vld [vmem:[%s14001_s12 + $0xb8] sm:$0xf0]  ;;  %v8149_v55 = vld [vmem:[%s14001_s12 + $0x8] sm:$0xf] }
 0x673   :  { %3907 = vmatpush.bf16.msrb.mxu3 %v3891_v18  ;;  %4708 = vmatpush.bf16.msrb.mxu1 %v8282_v25  ;;  %v8222_v25 = vor.u32 %v9275_v41, %v8221_v36  ;;  %v9257_v56 = vld [vmem:[%s14001_s12 + $0x28] sm:$0xf0]  ;;  %v8309_v36 = vld [vmem:[%s14001_s12 + $0x138] sm:$0xf] }
 0x675   :  { %3878 = vmatpush.bf16.msrb.mxu2 %v3858_v23  ;;  %4596 = vmatmul.bf16.vlgmr.msra.gmra.mxu1 %v12861_v59  ;;  %v8365_v23 = vld [vmem:[%s14001_s12 + $0x1b8] sm:$0xf] }
 0x677   :  { %3908 = vmatpush.bf16.msrb.mxu3 %v3890_v60  ;;  %v9311_v60 = vld [vmem:[%s14001_s12 + $0x1d8] sm:$0xf0]  ;;  %4709 = vmatpush.bf16.msrb.mxu1 %v8246_v10 }
 0x678   :  { %v8366_v6 = vor.u32 %v9311_v60, %v8365_v23  ;;  %v9317_v23 = vld [vmem:[%s14001_s12 + $0x20c] sm:$0xf]  ;;  %v8411_v60 = vld [vmem:[%s14001_s12 + $0x22c] sm:$0xf0] }
 0x679   :  { %3879 = vmatpush.bf16.msrb.mxu2 %v3857_v8  ;;  %v9269_v8 = vld [vmem:[%s14001_s12 + $0x88] sm:$0xf0]  ;;  %v8414_v10 = vor.u32 %v9317_v23, %v8411_v60 }
 0x67a   :  { %v13015_v1 = vpop.f32.mrf.mxu1  ;;  %v8210_v26 = vor.u32 %v9269_v8, %v8209_v39  ;;  %v8378_v39 = vor.u32 %v9308_v32, %v8375_v14  ;;  %v8417_v8 = vld [vmem:[%s14001_s12 + $0x210] sm:$0xf]  ;;  %v9277_v23 = vld [vmem:[%s14001_s12 + $0xc8] sm:$0xf0] }
 0x67b   :  { %3909 = vmatpush.bf16.msrb.mxu3 %v3889_v63  ;;  %v9302_v63 = vld [vmem:[%s14001_s12 + $0x190] sm:$0xf0] }
 0x67c   :  { %8110 = vmatmul.msk.bf16.vlgmr.msrb.gmra.mxu2 %vm710_vm3, %v9247_v24  ;;  %v8329_v24 = vld [vmem:[%s14001_s12 + $0x170] sm:$0xf]  ;;  %4710 = vmatpush.bf16.msrb.mxu1 %v8210_v26  ;;  %v8339_v26 = vld [vmem:[%s14001_s12 + $0x19c] sm:$0xf0] }
 0x67d   :  { %3938 = vmatpush.bf16.msra.mxu2 %v3922_v4  ;;  %v9250_v4 = vld [vmem:[%s14393_s4 + $0x38] sm:$0xff] }
 0x67f   :  { %3910 = vmatpush.bf16.msrb.mxu3 %v3888_v31  ;;  %v8173_v31 = vld [vmem:[%s14001_s12 + $0x20] sm:$0xf] }
 0x680   :  { %v8174_v2 = vor.u32 %v9260_v43, %v8173_v31 }
 0x681   :  { %3939 = vmatpush.bf16.msra.mxu2 %v3921_v33  ;;  %v8330_v33 = vor.u32 %v9302_v63, %v8329_v24  ;;  %v9299_v63 = vld [vmem:[%s14001_s12 + $0x17c] sm:$0xf] }
 0x682   :  { %v13044_v34 = vpop.f32.mrf.mxu1  ;;  %8117 = vmatmul.msk.bf16.vlgmr.msrb.gmra.mxu3 %vm710_vm3, %v9248_v50  ;;  %v9293_v50 = vld [vmem:[%s14001_s12 + $0x148] sm:$0xf0]  ;;  %4711 = vmatpush.bf16.msrb.mxu1 %v8174_v2 }
 0x683   :  { %3969 = vmatpush.bf16.msra.mxu3 %v3953_v9  ;;  %v8293_v9 = vld [vmem:[%s14001_s12 + $0x128] sm:$0xf] }
 0x684   :  { %v8294_v11 = vor.u32 %v9293_v50, %v8293_v9  ;;  %v9290_v9 = vld [vmem:[%s14001_s12 + $0x134] sm:$0xf]  ;;  %v8303_v50 = vld [vmem:[%s14001_s12 + $0x154] sm:$0xf0] }
 0x685   :  { %3940 = vmatpush.bf16.msra.mxu2 %v3920_v40  ;;  %4601 = vmatmul.bf16.gmra.mxu1 %v12926_v20  ;;  %v8254_v40 = vor.u32 %v9279_v35, %v8251_v53  ;;  %v8342_v53 = vor.u32 %v9299_v63, %v8339_v26  ;;  %v8306_v52 = vor.u32 %v9290_v9, %v8303_v50  ;;  %v9280_v63 = vld [vmem:[%s14001_s12 + $0xe4] sm:$0xf]  ;;  %v8259_v26 = vld [vmem:[%s14001_s12 + $0x104] sm:$0xf0] }
 0x686   :  { %v8262_v9 = vor.u32 %v9280_v63, %v8259_v26  ;;  %v8239_v63 = vld [vmem:[%s14001_s12 + $0xcc] sm:$0xf0] }
 0x687   :  { %3970 = vmatpush.bf16.msra.mxu3 %v3952_v38  ;;  %v9284_v38 = vld [vmem:[%s14001_s12 + $0x100] sm:$0xf0] }
 0x688   :  { %v8258_v7 = vor.u32 %v9284_v38, %v8257_v28  ;;  %v8267_v38 = vld [vmem:[%s14001_s12 + $0x10c] sm:$0xf0] }
 0x689   :  { %3941 = vmatpush.bf16.msra.mxu2 %v3919_v22  ;;  %v8179_v22 = vld [vmem:[%s14001_s12 + $0x6c] sm:$0xf0] }
 0x68a   :  { %v13087_v18 = vpop.f32.mrf.mxu1 }
 0x68b   :  { %3971 = vmatpush.bf16.msra.mxu3 %v3951_v57  ;;  %v3982_v2 = vpack.c.bf16 %v13087_v18, %v13044_v34  ;;  %v9281_v18 = vld [vmem:[%s14001_s12 + $0xec] sm:$0xf] }
 0x68c   :  { %8124 = vmatmul.msk.bf16.vlgmr.msra.gmra.mxu2 %vm710_vm3, %v9249_v44  ;;  %v9266_v44 = vld [vmem:[%s14001_s12 + $0x70] sm:$0xf0] }
 0x68d   :  { %4501 = vmatpush.bf16.msrb.mxu2 %v8398_v29  ;;  %v9261_v29 = vld [vmem:[%s14001_s12 + $0x4c] sm:$0xf] }
 0x68e   :  { %v8182_v57 = vor.u32 %v9261_v29, %v8179_v22  ;;  %v9307_v29 = vld [vmem:[%s14001_s12 + $0x1bc] sm:$0xf]  ;;  %v8367_v22 = vld [vmem:[%s14001_s12 + $0x1dc] sm:$0xf0] }
 0x68f   :  { %3972 = vmatpush.bf16.msra.mxu3 %v3950_v47  ;;  %v8150_v47 = vor.u32 %v9257_v56, %v8149_v55  ;;  %v8195_v56 = vld [vmem:[%s14001_s12 + $0x7c] sm:$0xf0] }
 0x691   :  { %4502 = vmatpush.bf16.msrb.mxu2 %v8362_v13  ;;  %v8185_v13 = vld [vmem:[%s14001_s12 + $0x50] sm:$0xf] }
 0x692   :  { %v13129_v19 = vpop.f32.mrf.mxu1  ;;  %8131 = vmatmul.msk.bf16.vlgmr.msra.gmra.mxu3 %vm710_vm3, %v9250_v4  ;;  %v8186_v45 = vor.u32 %v9266_v44, %v8185_v13  ;;  %v9322_v4 = vld [vmem:[%s14001_s12 + $0x230] sm:$0xf0]  ;;  %v8331_v13 = vld [vmem:[%s14001_s12 + $0x194] sm:$0xf0]  ;;  %v8234_v44 = vor.u32 %v9272_v51, %v8231_v16 }
 0x693   :  { %4530 = vmatpush.bf16.msrb.mxu3 %v8402_v0  ;;  %v8418_v24 = vor.u32 %v9322_v4, %v8417_v8  ;;  %v9254_v8 = vld [vmem:[%s14001_s12 + $0x14] sm:$0xf]  ;;  %v8159_v4 = vld [vmem:[%s14001_s12 + $0x34] sm:$0xf0] }
 0x694   :  { %v9318_v16 = vld [vmem:[%s14001_s12 + $0x214] sm:$0xf] }
 0x695   :  { %4503 = vmatpush.bf16.msrb.mxu2 %v8326_v48  ;;  %4606 = vmatmul.bf16.gmra.mxu1 %v12979_v5 }
 0x697   :  { %4531 = vmatpush.bf16.msrb.mxu3 %v8366_v6 }
 0x699   :  { %4504 = vmatpush.bf16.msrb.mxu2 %v8290_v30  ;;  %v8381_v30 = vld [vmem:[%s14001_s12 + $0x1c8] sm:$0xf] }
 0x69a   :  { %v3730_v49 = vpop.f32.mrf.mxu1 }
 0x69b   :  { %4532 = vmatpush.bf16.msrb.mxu3 %v8330_v33  ;;  %v3983_v35 = vpack.c.bf16 %v3730_v49, %v13129_v19  ;;  %v9313_v33 = vld [vmem:[%s14001_s12 + $0x1e8] sm:$0xf0]  ;;  %v8345_v19 = vld [vmem:[%s14001_s12 + $0x180] sm:$0xf] }
 0x69c   :  { %v8382_v31 = vor.u32 %v9313_v33, %v8381_v30  ;;  %v9251_v49 = vld [vmem:[%s14393_s4 + $0x40] sm:$0xff]  ;;  %v8162_v30 = vor.u32 %v9254_v8, %v8159_v4 }
 0x69d   :  { %4505 = vmatpush.bf16.msrb.mxu2 %v8254_v40  ;;  %v9316_v40 = vld [vmem:[%s14001_s12 + $0x204] sm:$0xf] }
 0x69e   :  { %v8406_v34 = vor.u32 %v9316_v40, %v8403_v42  ;;  %v8165_v40 = vld [vmem:[%s14001_s12 + $0x18] sm:$0xf]  ;;  %v9259_v42 = vld [vmem:[%s14001_s12 + $0x38] sm:$0xf0] }
 0x69f   :  { %4533 = vmatpush.bf16.msrb.mxu3 %v8294_v11  ;;  %v9304_v11 = vld [vmem:[%s14001_s12 + $0x1a0] sm:$0xf0] }
 0x6a0   :  { %v8346_v28 = vor.u32 %v9304_v11, %v8345_v19  ;;  %v9271_v19 = vld [vmem:[%s14001_s12 + $0x9c] sm:$0xf] }
 0x6a1   :  { %4506 = vmatpush.bf16.msrb.mxu2 %v8218_v27  ;;  %v3981_v27 = vpack.c.bf16 %v13015_v1, %v12993_v46  ;;  %v9295_v46 = vld [vmem:[%s14001_s12 + $0x158] sm:$0xf0] }
 0x6a2   :  { %v3733_v0 = vpop.f32.mrf.mxu1  ;;  %v8310_v1 = vor.u32 %v9295_v46, %v8309_v36 }
 0x6a3   :  { %4534 = vmatpush.bf16.msrb.mxu3 %v8258_v7  ;;  %v8270_v7 = vor.u32 %v9281_v18, %v8267_v38  ;;  %v8187_v18 = vld [vmem:[%s14001_s12 + $0x74] sm:$0xf0] }
 0x6a5   :  { %4507 = vmatpush.bf16.msrb.mxu2 %v8182_v57  ;;  %4611 = vmatmul.bf16.gmra.mxu1 %v12990_v12  ;;  %v8370_v57 = vor.u32 %v9307_v29, %v8367_v22  ;;  %v9253_v22 = vld [vmem:[%s14001_s12 + $0xc] sm:$0xf] }
 0x6a7   :  { %4535 = vmatpush.bf16.msrb.mxu3 %v8222_v25  ;;  %v9298_v25 = vld [vmem:[%s14001_s12 + $0x174] sm:$0xf] }
 0x6a8   :  { %v8334_v60 = vor.u32 %v9298_v25, %v8331_v13  ;;  %v8419_v25 = vld [vmem:[%s14001_s12 + $0x234] sm:$0xf0] }
 0x6a9   :  { %4508 = vmatpush.bf16.msrb.mxu2 %v8146_v58  ;;  %v8273_v58 = vld [vmem:[%s14001_s12 + $0xf0] sm:$0xf] }
 0x6aa   :  { %v3735_v48 = vpop.f32.mrf.mxu1 }
 0x6ab   :  { %4536 = vmatpush.bf16.msrb.mxu3 %v8186_v45  ;;  %v3984_v6 = vpack.c.bf16 %v3735_v48, %v3733_v0  ;;  %v9286_v45 = vld [vmem:[%s14001_s12 + $0x110] sm:$0xf0]  ;;  %v9263_v0 = vld [vmem:[%s14001_s12 + $0x5c] sm:$0xf]  ;;  %v8295_v48 = vld [vmem:[%s14001_s12 + $0x14c] sm:$0xf0] }
 0x6ac   :  { %4509 = vmatmul.bf16.vlgmr.msrb.gmra.mxu2 %v12861_v59  ;;  %v8274_v55 = vor.u32 %v9286_v45, %v8273_v58  ;;  %v8198_v32 = vor.u32 %v9263_v0, %v8195_v56  ;;  %v9309_v58 = vld [vmem:[%s14001_s12 + $0x1cc] sm:$0xf]  ;;  %v8383_v45 = vld [vmem:[%s14001_s12 + $0x1ec] sm:$0xf0]  ;;  %v8347_v56 = vld [vmem:[%s14001_s12 + $0x1a4] sm:$0xf0] }
 0x6ad   :  { %4617 = vmatpush.bf16.msra.mxu2 %v8414_v10  ;;  %4000 = vmatpush.bf16.msrb.mxu0 %v3984_v6  ;;  %v9289_v10 = vld [vmem:[%s14001_s12 + $0x12c] sm:$0xf]  ;;  %v8386_v0 = vor.u32 %v9309_v58, %v8383_v45 }
 0x6af   :  { %4537 = vmatpush.bf16.msrb.mxu3 %v8150_v47  ;;  %v8237_v47 = vld [vmem:[%s14001_s12 + $0xa8] sm:$0xf] }
 0x6b0   :  { %v8238_v14 = vor.u32 %v9277_v23, %v8237_v47 }
 0x6b1   :  { %4618 = vmatpush.bf16.msra.mxu2 %v8378_v39  ;;  %4001 = vmatpush.bf16.msrb.mxu0 %v3983_v35  ;;  %v8298_v39 = vor.u32 %v9289_v10, %v8295_v48  ;;  %v8311_v10 = vld [vmem:[%s14001_s12 + $0x15c] sm:$0xf0] }
 0x6b2   :  { %4538 = vmatmul.bf16.vlgmr.msrb.gmra.mxu3 %v12861_v59  ;;  %v13215_v43 = vpop.f32.mrf.mxu1 }
 0x6b3   :  { %4646 = vmatpush.bf16.msra.mxu3 %v8418_v24  ;;  %v8201_v24 = vld [vmem:[%s14001_s12 + $0x60] sm:$0xf] }
 0x6b5   :  { %4619 = vmatpush.bf16.msra.mxu2 %v8342_v53  ;;  %4002 = vmatpush.bf16.msrb.mxu0 %v3982_v2  ;;  %v9268_v53 = vld [vmem:[%s14001_s12 + $0x80] sm:$0xf0]  ;;  %v8223_v2 = vld [vmem:[%s14001_s12 + $0xbc] sm:$0xf0] }
 0x6b6   :  { %4712 = vmatmul.bf16.vlgmr.msrb.gmra.mxu1 %v12861_v59  ;;  %v8202_v33 = vor.u32 %v9268_v53, %v8201_v24  ;;  %v9273_v24 = vld [vmem:[%s14001_s12 + $0xac] sm:$0xf]  ;;  %v8203_v53 = vld [vmem:[%s14001_s12 + $0x84] sm:$0xf0] }
 0x6b7   :  { %4647 = vmatpush.bf16.msra.mxu3 %v8382_v31  ;;  %v8242_v26 = vor.u32 %v9273_v24, %v8239_v63  ;;  %v9324_v24 = vld [vmem:[#allocation4] sm:$0xff] }
 0x6b9   :  { %4620 = vmatpush.bf16.msra.mxu2 %v8306_v52  ;;  %4003 = vmatpush.bf16.msrb.mxu0 %v3981_v27  ;;  %v8166_v52 = vor.u32 %v9259_v42, %v8165_v40 }
 0x6ba   :  { %v13262_v41 = vpop.f32.mrf.mxu1 }
 0x6bb   :  { %4648 = vmatpush.bf16.msra.mxu3 %v8346_v28  ;;  %v8226_v28 = vor.u32 %v9271_v19, %v8223_v2  ;;  %v8167_v19 = vld [vmem:[%s14001_s12 + $0x3c] sm:$0xf0]  ;;  %v4733_v40 = vpack.c.bf16 %v13262_v41, %v13215_v43 }
 0x6bc   :  { %4514 = vmatmul.bf16.gmra.mxu2 %v12926_v20  ;;  %8138 = vmatmul.msk.bf16.vlgmr.msrb.gmra.mxu0 %vm710_vm3, %v9251_v49 }
 0x6bd   :  { %4559 = vmatpush.bf16.msra.mxu0 %v8406_v34  ;;  %4621 = vmatpush.bf16.msra.mxu2 %v8270_v7  ;;  %v9262_v34 = vld [vmem:[%s14001_s12 + $0x54] sm:$0xf]  ;;  %v8151_v7 = vld [vmem:[%s14001_s12 + $0x2c] sm:$0xf0] }
 0x6be   :  { %v8190_v29 = vor.u32 %v9262_v34, %v8187_v18  ;;  %v8154_v36 = vor.u32 %v9253_v22, %v8151_v7 }
 0x6bf   :  { %4649 = vmatpush.bf16.msra.mxu3 %v8310_v1  ;;  %v3790_v35 = vpop.f32.mrf.mxu3 }
 0x6c1   :  { %4560 = vmatpush.bf16.msra.mxu0 %v8370_v57  ;;  %4622 = vmatpush.bf16.msra.mxu2 %v8234_v44  ;;  %v8422_v44 = vor.u32 %v9318_v16, %v8419_v25 }
 0x6c2   :  { %4543 = vmatmul.bf16.gmra.mxu3 %v12926_v20  ;;  %v13302_v6 = vpop.f32.mrf.mxu1 }
 0x6c3   :  { %4650 = vmatpush.bf16.msra.mxu3 %v8274_v55  ;;  %v9300_v55 = vld [vmem:[%s14001_s12 + $0x184] sm:$0xf] }
 0x6c4   :  { %v8350_v23 = vor.u32 %v9300_v55, %v8347_v56 }
 0x6c5   :  { %4561 = vmatpush.bf16.msra.mxu0 %v8334_v60  ;;  %4623 = vmatpush.bf16.msra.mxu2 %v8198_v32  ;;  %v3768_v31 = vpop.f32.mrf.mxu2  ;;  %v9291_v60 = vld [vmem:[%s14001_s12 + $0x13c] sm:$0xf]  ;;  %v9282_v32 = vld [vmem:[%s14001_s12 + $0xf4] sm:$0xf] }
 0x6c6   :  { %4717 = vmatmul.bf16.gmra.mxu1 %v12926_v20  ;;  %v3791_v50 = vadd.f32 %v3790_v35, %v3768_v31  ;;  %v8314_v48 = vor.u32 %v9291_v60, %v8311_v10  ;;  %v9264_v35 = vld [vmem:[%s14001_s12 + $0x64] sm:$0xf] }
 0x6c7   :  { %4651 = vmatpush.bf16.msra.mxu3 %v8238_v14  ;;  %v13347_v27 = vpop.f32.mrf.mxu3  ;;  %v8275_v14 = vld [vmem:[%s14001_s12 + $0x114] sm:$0xf0]  ;;  %v8206_v31 = vor.u32 %v9264_v35, %v8203_v53 }
 0x6c8   :  { %v8278_v8 = vor.u32 %v9282_v32, %v8275_v14 }
 0x6c9   :  { %4562 = vmatpush.bf16.msra.mxu0 %v8298_v39  ;;  %4624 = vmatpush.bf16.msra.mxu2 %v8162_v30 }
 0x6ca   :  { %v13336_v11 = vpop.f32.mrf.mxu1 }
 0x6cb   :  { %4652 = vmatpush.bf16.msra.mxu3 %v8202_v33 }
 0x6cc   :  { %4519 = vmatmul.bf16.gmra.mxu2 %v12979_v5 }
 0x6cd   :  { %4563 = vmatpush.bf16.msra.mxu0 %v8262_v9  ;;  %v13345_v38 = vpop.f32.mrf.mxu2  ;;  %v4734_v9 = vpack.c.bf16 %v13336_v11, %v13302_v6 }
 0x6cf   :  { %4653 = vmatpush.bf16.msra.mxu3 %v8166_v52  ;;  %v3850_v57 = vpop.f32.mrf.mxu3 }
 0x6d1   :  { %4564 = vmatpush.bf16.msra.mxu0 %v8226_v28 }
 0x6d2   :  { %4548 = vmatmul.bf16.gmra.mxu3 %v12979_v5  ;;  %v4491_v49 = vpop.f32.mrf.mxu1 }
 0x6d5   :  { %4565 = vmatpush.bf16.msra.mxu0 %v8190_v29  ;;  %v3819_v46 = vpop.f32.mrf.mxu2 }
 0x6d6   :  { %4722 = vmatmul.bf16.gmra.mxu1 %v12979_v5  ;;  %v3824_v1 = vadd.f32 %v3819_v46, %v3791_v50  ;;  %v9255_v50 = vld [vmem:[%s14001_s12 + $0x1c] sm:$0xf] }
 0x6d7   :  { %v8170_v2 = vor.u32 %v9255_v50, %v8167_v19  ;;  %v13424_v52 = vpop.f32.mrf.mxu3 }
 0x6d8   :  { %v3855_v51 = vadd.f32 %v3850_v57, %v3824_v1 }
 0x6d9   :  { %4566 = vmatpush.bf16.msra.mxu0 %v8154_v36 }
 0x6da   :  { %v4493_v13 = vpop.f32.mrf.mxu1 }
 0x6db   :  { %v4735_v30 = vpack.c.bf16 %v4493_v13, %v4491_v49 }
 0x6dc   :  { %4524 = vmatmul.bf16.gmra.mxu2 %v12990_v12  ;;  %4567 = vmatmul.bf16.vlgmr.msra.gmra.mxu0 %v12861_v59 }
 0x6dd   :  { %4675 = vmatpush.bf16.msrb.mxu0 %v8422_v44  ;;  %v13418_v42 = vpop.f32.mrf.mxu2 }
 0x6e1   :  { %4676 = vmatpush.bf16.msrb.mxu0 %v8386_v0 }
 0x6e2   :  { %4553 = vmatmul.bf16.gmra.mxu3 %v12990_v12  ;;  %v4496_v47 = vpop.f32.mrf.mxu1 }
 0x6e5   :  { %4677 = vmatpush.bf16.msrb.mxu0 %v8350_v23 }
 0x6e6   :  { %4727 = vmatmul.bf16.gmra.mxu1 %v12990_v12 }
 0x6e9   :  { %4678 = vmatpush.bf16.msrb.mxu0 %v8314_v48 }
 0x6ea   :  { %v4498_v39 = vpop.f32.mrf.mxu1 }
 0x6eb   :  { %v4736_v4 = vpack.c.bf16 %v4498_v39, %v4496_v47 }
 0x6ec   :  { %4625 = vmatmul.bf16.vlgmr.msra.gmra.mxu2 %v12861_v59  ;;  %4572 = vmatmul.bf16.gmra.mxu0 %v12926_v20 }
 0x6ed   :  { %4679 = vmatpush.bf16.msrb.mxu0 %v8278_v8  ;;  %4855 = vmatpush.bf16.msrb.mxu3 %v4736_v4 }
 0x6f1   :  { %4680 = vmatpush.bf16.msrb.mxu0 %v8242_v26  ;;  %4856 = vmatpush.bf16.msrb.mxu3 %v4735_v30 }
 0x6f2   :  { %4654 = vmatmul.bf16.vlgmr.msra.gmra.mxu3 %v12861_v59  ;;  %v13405_v33 = vpop.f32.mrf.mxu1 }
 0x6f5   :  { %4681 = vmatpush.bf16.msrb.mxu0 %v8206_v31  ;;  %4857 = vmatpush.bf16.msrb.mxu3 %v4734_v9 }
 0x6f9   :  { %4682 = vmatpush.bf16.msrb.mxu0 %v8170_v2  ;;  %4858 = vmatpush.bf16.msrb.mxu3 %v4733_v40 }
 0x6fa   :  { %v13421_v6 = vpop.f32.mrf.mxu1 }
 0x6fc   :  { %4630 = vmatmul.bf16.gmra.mxu2 %v12926_v20  ;;  %4577 = vmatmul.bf16.gmra.mxu0 %v12979_v5 }
 0x6ff   :  { %v3881_v11 = vpop.f32.mrf.mxu2 }
 0x700   :  { %v3886_v28 = vadd.f32 %v3881_v11, %v3855_v51 }
 0x702   :  { %4659 = vmatmul.bf16.gmra.mxu3 %v12926_v20  ;;  %v13426_v34 = vpop.f32.mrf.mxu1 }
 0x705   :  { %v3912_v18 = vpop.f32.mrf.mxu3 }
 0x706   :  { %v3917_v29 = vadd.f32 %v3912_v18, %v3886_v28 }
 0x707   :  { %v13429_v43 = vpop.f32.mrf.mxu2 }
 0x70a   :  { %v13432_v41 = vpop.f32.mrf.mxu1 }
 0x70c   :  { %4635 = vmatmul.bf16.gmra.mxu2 %v12979_v5  ;;  %4582 = vmatmul.bf16.gmra.mxu0 %v12990_v12 }
 0x70d   :  { %v13435_v22 = vpop.f32.mrf.mxu3 }
 0x70f   :  { %v3943_v7 = vpop.f32.mrf.mxu2 }
 0x710   :  { %v3948_v49 = vadd.f32 %v3943_v7, %v3917_v29 }
 0x712   :  { %4664 = vmatmul.bf16.gmra.mxu3 %v12979_v5  ;;  %v13437_v36 = vpop.f32.mrf.mxu1 }
 0x715   :  { %v3974_v46 = vpop.f32.mrf.mxu3 }
 0x716   :  { %v3979_v1 = vadd.f32 %v3974_v46, %v3948_v49 }
 0x717   :  { %v13444_v51 = vpop.f32.mrf.mxu2 }
 0x71a   :  { %v13441_v57 = vpop.f32.mrf.mxu1 }
 0x71c   :  { %4640 = vmatmul.bf16.gmra.mxu2 %v12990_v12  ;;  %4683 = vmatmul.bf16.vlgmr.msrb.gmra.mxu0 %v12861_v59 }
 0x71d   :  { %v13446_v25 = vpop.f32.mrf.mxu3 }
 0x722   :  { %4669 = vmatmul.bf16.gmra.mxu3 %v12990_v12  ;;  %v4612_v16 = vpop.f32.mrf.mxu1 }
 0x72a   :  { %v4614_v44 = vpop.f32.mrf.mxu1 }
 0x72b   :  { %v5047_v46 = vpack.c.bf16 %v4614_v44, %v4612_v16  ;;  %v9332_v16 = vld [vmem:[#allocation4 + $0x40] sm:$0xff] }
 0x72c   :  { %4688 = vmatmul.bf16.gmra.mxu0 %v12926_v20 }
 0x72f   :  { %v4510_v13 = vpop.f32.mrf.mxu2 }
 0x732   :  { %8463 = vmatmul.msk.bf16.vlgmr.msrb.gmra.mxu3 %vm710_vm3, %v9324_v24 }
 0x733   :  { %v13451_v0 = vpop.f32.mrf.mxu1 }
 0x735   :  { %v13449_v58 = vpop.f32.mrf.mxu3 }
 0x737   :  { %v4512_v45 = vpop.f32.mrf.mxu2 }
 0x738   :  { %v4745_v7 = vpack.c.bf16 %v4512_v45, %v4510_v13  ;;  %v9326_v13 = vld [vmem:[#allocation4 + $0x10] sm:$0xff] }
 0x739   :  { %v4005_v59 = vpop.f32.mrf.mxu0 }
 0x73a   :  { %v13454_v47 = vadd.f32 %v4005_v59, %v3979_v1 }
 0x73b   :  { %v13456_v23 = vpop.f32.mrf.mxu1 }
 0x73c   :  { %4693 = vmatmul.bf16.gmra.mxu0 %v12979_v5 }
 0x73d   :  { %v4541_v55 = vpop.f32.mrf.mxu3 }
 0x73e   :  { %v4880_v45 = vpack.c.bf16 %v4541_v55, %v13449_v58 }
 0x73f   :  { %v4515_v56 = vpop.f32.mrf.mxu2 }
 0x741   :  { %v13461_v14 = vpop.f32.mrf.mxu0 }
 0x743   :  { %v13458_v48 = vpop.f32.mrf.mxu1 }
 0x745   :  { %v4544_v60 = vpop.f32.mrf.mxu3 }
 0x747   :  { %v4517_v10 = vpop.f32.mrf.mxu2 }
 0x748   :  { %v4746_v18 = vpack.c.bf16 %v4517_v10, %v4515_v56  ;;  %v5046_v56 = vpack.c.bf16 %v13441_v57, %v13437_v36  ;;  %v5044_v36 = vpack.c.bf16 %v13421_v6, %v13405_v33 }
 0x74b   :  { %v13463_v8 = vpop.f32.mrf.mxu1 }
 0x74c   :  { %4698 = vmatmul.bf16.gmra.mxu0 %v12990_v12  ;;  %v9325_v12 = vld [vmem:[#allocation4 + $0x8] sm:$0xff] }
 0x74d   :  { %v4546_v20 = vpop.f32.mrf.mxu3  ;;  %8464 = vmatmul.msk.bf16.gmra.mxu3 %vm710_vm3, %v9325_v12 }
 0x74f   :  { %v4520_v32 = vpop.f32.mrf.mxu2 }
 0x753   :  { %v4723_v30 = vpop.f32.mrf.mxu1 }
 0x755   :  { %v4549_v39 = vpop.f32.mrf.mxu3 }
 0x757   :  { %v4522_v4 = vpop.f32.mrf.mxu2 }
 0x758   :  { %v4747_v19 = vpack.c.bf16 %v4522_v4, %v4520_v32  ;;  %v9328_v32 = vld [vmem:[#allocation4 + $0x20] sm:$0xff]  ;;  %v4881_v4 = vpack.c.bf16 %v4546_v20, %v4544_v60  ;;  %v5045_v60 = vpack.c.bf16 %v13432_v41, %v13426_v34  ;;  %v9327_v34 = vld [vmem:[#allocation4 + $0x18] sm:$0xff]  ;;  %v5373_v41 = vpack.c.bf16 %v13463_v8, %v13458_v48  ;;  %v9334_v8 = vld [vmem:[#allocation4 + $0x50] sm:$0xff] }
 0x759   :  { %v13466_v5 = vpop.f32.mrf.mxu0 }
 0x75b   :  { %v4725_v50 = vpop.f32.mrf.mxu1 }
 0x75d   :  { %v4551_v63 = vpop.f32.mrf.mxu3  ;;  %8465 = vmatmul.msk.bf16.gmra.mxu3 %vm710_vm3, %v9326_v13 }
 0x75e   :  { %v4882_v29 = vpack.c.bf16 %v4551_v63, %v4549_v39  ;;  %v9329_v63 = vld [vmem:[#allocation4 + $0x28] sm:$0xff] }
 0x75f   :  { %v4525_v26 = vpop.f32.mrf.mxu2 }
 0x761   :  { %v13468_v35 = vpop.f32.mrf.mxu0 }
 0x763   :  { %v4728_v1 = vpop.f32.mrf.mxu1 }
 0x765   :  { %v4554_v53 = vpop.f32.mrf.mxu3 }
 0x767   :  { %v4527_v31 = vpop.f32.mrf.mxu2 }
 0x768   :  { %v4748_v9 = vpack.c.bf16 %v4527_v31, %v4525_v26  ;;  %v5374_v26 = vpack.c.bf16 %v4725_v50, %v4723_v30  ;;  %v9333_v31 = vld [vmem:[#allocation4 + $0x48] sm:$0xff] }
 0x769   :  { %v13471_v2 = vpop.f32.mrf.mxu0 }
 0x76a   :  { %4794 = vmatpush.bf16.msrb.mxu2 %v4748_v9  ;;  %v5372_v9 = vpack.c.bf16 %v13456_v23, %v13451_v0 }
 0x76b   :  { %v4730_v20 = vpop.f32.mrf.mxu1 }
 0x76c   :  { %v5375_v57 = vpack.c.bf16 %v4730_v20, %v4728_v1 }
 0x76d   :  { %v4556_v40 = vpop.f32.mrf.mxu3  ;;  %8466 = vmatmul.msk.bf16.gmra.mxu3 %vm710_vm3, %v9327_v34  ;;  %v8825_v34 = vld [vmem:[#allocation6 + $0x1b0] sm:$0xf] }
 0x76e   :  { %v4883_v11 = vpack.c.bf16 %v4556_v40, %v4554_v53  ;;  %4795 = vmatpush.bf16.msrb.mxu2 %v4747_v19  ;;  %v9330_v40 = vld [vmem:[#allocation4 + $0x30] sm:$0xff] }
 0x76f   :  { %v13473_v28 = vpop.f32.mrf.mxu2 }
 0x770   :  { %4929 = vmatpush.bf16.msra.mxu0 %v4883_v11 }
 0x771   :  { %v13475_v49 = vpop.f32.mrf.mxu0 }
 0x772   :  { %4796 = vmatpush.bf16.msrb.mxu2 %v4746_v18  ;;  %v4963_v0 = vpack.c.bf16 %v13475_v49, %v13471_v2  ;;  %v9335_v2 = vld [vmem:[#allocation4 + $0x58] sm:$0xff] }
 0x774   :  { %4930 = vmatpush.bf16.msra.mxu0 %v4882_v29 }
 0x775   :  { %v13477_v59 = vpop.f32.mrf.mxu3 }
 0x776   :  { %4797 = vmatpush.bf16.msrb.mxu2 %v4745_v7  ;;  %v4962_v7 = vpack.c.bf16 %v13468_v35, %v13466_v5 }
 0x777   :  { %v13479_v24 = vpop.f32.mrf.mxu2 }
 0x778   :  { %4931 = vmatpush.bf16.msra.mxu0 %v4881_v4  ;;  %v9331_v4 = vld [vmem:[#allocation4 + $0x38] sm:$0xff]  ;;  %v5126_v20 = vpack.c.bf16 %v13479_v24, %v13473_v28 }
 0x779   :  { %8443 = vmatmul.msk.bf16.vlgmr.msrb.gmra.mxu2 %vm710_vm3, %v9328_v32  ;;  %v4578_v44 = vpop.f32.mrf.mxu0 }
 0x77a   :  { %5093 = vmatpush.bf16.msra.mxu2 %v5047_v46  ;;  %v9336_v46 = vld [vmem:[#allocation4 + $0x60] sm:$0xff] }
 0x77c   :  { %4932 = vmatpush.bf16.msra.mxu0 %v4880_v45 }
 0x77d   :  { %v13488_v10 = vpop.f32.mrf.mxu3 }
 0x77e   :  { %5094 = vmatpush.bf16.msra.mxu2 %v5046_v56  ;;  %v5208_v28 = vpack.c.bf16 %v13488_v10, %v13477_v59  ;;  %v9414_v59 = vld [vmem:[#allocation6 + $0x1b4] sm:$0xf]  ;;  %v8827_v10 = vld [vmem:[#allocation6 + $0x1d4] sm:$0xf0] }
 0x77f   :  { %v4631_v39 = vpop.f32.mrf.mxu2  ;;  %8483 = vmatmul.msk.bf16.vlgmr.msra.gmra.mxu0 %vm710_vm3, %v9332_v16 }
 0x781   :  { %v4580_v58 = vpop.f32.mrf.mxu0 }
 0x782   :  { %5095 = vmatpush.bf16.msra.mxu2 %v5045_v60  ;;  %v4964_v48 = vpack.c.bf16 %v4580_v58, %v4578_v44  ;;  %v9337_v60 = vld [vmem:[#allocation4 + $0x68] sm:$0xff]  ;;  %v9344_v58 = vld [vmem:[#allocation4 + $0xa0] sm:$0xff] }
 0x785   :  { %v13493_v55 = vpop.f32.mrf.mxu3 }
 0x786   :  { %5096 = vmatpush.bf16.msra.mxu2 %v5044_v36 }
 0x787   :  { %v4633_v53 = vpop.f32.mrf.mxu2 }
 0x788   :  { %v5127_v5 = vpack.c.bf16 %v4633_v53, %v4631_v39  ;;  %v8861_v39 = vld [vmem:[#allocation6 + $0x1f8] sm:$0xf]  ;;  %v9348_v53 = vld [vmem:[#allocation4 + $0xc0] sm:$0xff] }
 0x789   :  { %8444 = vmatmul.msk.bf16.gmra.mxu2 %vm710_vm3, %v9329_v63  ;;  %v4583_v33 = vpop.f32.mrf.mxu0 }
 0x78a   :  { %5421 = vmatpush.bf16.msrb.mxu2 %v5375_v57  ;;  %v9340_v57 = vld [vmem:[#allocation4 + $0x80] sm:$0xff] }
 0x78d   :  { %v4662_v6 = vpop.f32.mrf.mxu3 }
 0x78e   :  { %5422 = vmatpush.bf16.msrb.mxu2 %v5374_v26  ;;  %v5209_v63 = vpack.c.bf16 %v4662_v6, %v13493_v55  ;;  %v9427_v26 = vld [vmem:[#allocation6 + $0x218] sm:$0xf0]  ;;  %v8863_v6 = vld [vmem:[#allocation6 + $0x21c] sm:$0xf0] }
 0x78f   :  { %v4636_v12 = vpop.f32.mrf.mxu2  ;;  %8484 = vmatmul.msk.bf16.gmra.mxu0 %vm710_vm3, %v9333_v31  ;;  %v8862_v24 = vor.u32 %v9427_v26, %v8861_v39  ;;  %v9373_v26 = vld [vmem:[#allocation6 + $0x68] sm:$0xf0] }
 0x791   :  { %v4585_v30 = vpop.f32.mrf.mxu0 }
 0x792   :  { %5423 = vmatpush.bf16.msrb.mxu2 %v5373_v41  ;;  %v4965_v50 = vpack.c.bf16 %v4585_v30, %v4583_v33  ;;  %v9418_v41 = vld [vmem:[#allocation6 + $0x1d0] sm:$0xf0]  ;;  %v9423_v33 = vld [vmem:[#allocation6 + $0x1fc] sm:$0xf]  ;;  %v9409_v30 = vld [vmem:[#allocation6 + $0x188] sm:$0xf0] }
 0x793   :  { %v8826_v55 = vor.u32 %v9418_v41, %v8825_v34  ;;  %v9339_v34 = vld [vmem:[#allocation4 + $0x78] sm:$0xff] }
 0x794   :  { %5011 = vmatpush.bf16.msra.mxu1 %v4965_v50 }
 0x795   :  { %v4665_v19 = vpop.f32.mrf.mxu3 }
 0x796   :  { %5424 = vmatpush.bf16.msrb.mxu2 %v5372_v9  ;;  %v8789_v9 = vld [vmem:[#allocation6 + $0x168] sm:$0xf] }
 0x797   :  { %v4638_v11 = vpop.f32.mrf.mxu2  ;;  %v8790_v50 = vor.u32 %v9409_v30, %v8789_v9  ;;  %v9346_v9 = vld [vmem:[#allocation4 + $0xb0] sm:$0xff]  ;;  %v9364_v30 = vld [vmem:[#allocation6 + $0x20] sm:$0xf0] }
 0x798   :  { %5012 = vmatpush.bf16.msra.mxu1 %v4964_v48  ;;  %v5128_v49 = vpack.c.bf16 %v4638_v11, %v4636_v12  ;;  %v8866_v12 = vor.u32 %v9423_v33, %v8863_v6  ;;  %v9341_v11 = vld [vmem:[#allocation4 + $0x88] sm:$0xff]  ;;  %v8830_v48 = vor.u32 %v9414_v59, %v8827_v10  ;;  %v9342_v33 = vld [vmem:[#allocation4 + $0x90] sm:$0xff] }
 0x799   :  { %8445 = vmatmul.msk.bf16.gmra.mxu2 %vm710_vm3, %v9330_v40  ;;  %v13503_v18 = vpop.f32.mrf.mxu0  ;;  %v8647_v59 = vld [vmem:[#allocation6 + $0x6c] sm:$0xf0] }
 0x79c   :  { %5013 = vmatpush.bf16.msra.mxu1 %v4963_v0  ;;  %v8753_v0 = vld [vmem:[#allocation6 + $0x120] sm:$0xf] }
 0x79d   :  { %v4667_v23 = vpop.f32.mrf.mxu3 }
 0x79e   :  { %v5210_v35 = vpack.c.bf16 %v4667_v23, %v4665_v19  ;;  %v9338_v19 = vld [vmem:[#allocation4 + $0x70] sm:$0xff]  ;;  %v9400_v23 = vld [vmem:[#allocation6 + $0x140] sm:$0xf0] }
 0x79f   :  { %v4641_v29 = vpop.f32.mrf.mxu2  ;;  %8485 = vmatmul.msk.bf16.gmra.mxu0 %vm710_vm3, %v9334_v8  ;;  %v9345_v8 = vld [vmem:[#allocation4 + $0xa8] sm:$0xff] }
 0x7a0   :  { %5014 = vmatpush.bf16.msra.mxu1 %v4962_v7  ;;  %v9405_v7 = vld [vmem:[#allocation6 + $0x16c] sm:$0xf] }
 0x7a1   :  { %v13510_v1 = vpop.f32.mrf.mxu0 }
 0x7a3   :  { %8503 = vmatmul.msk.bf16.vlgmr.msra.gmra.mxu1 %vm710_vm3, %v9336_v46  ;;  %v8791_v46 = vld [vmem:[#allocation6 + $0x18c] sm:$0xf0] }
 0x7a5   :  { %v4670_v32 = vpop.f32.mrf.mxu3 }
 0x7a7   :  { %v4643_v56 = vpop.f32.mrf.mxu2 }
 0x7a8   :  { %v5129_v13 = vpack.c.bf16 %v4643_v56, %v4641_v29  ;;  %v8754_v29 = vor.u32 %v9400_v23, %v8753_v0  ;;  %v9391_v56 = vld [vmem:[#allocation6 + $0xf8] sm:$0xf0]  ;;  %v8611_v0 = vld [vmem:[#allocation6 + $0x24] sm:$0xf0] }
 0x7a9   :  { %8446 = vmatmul.msk.bf16.gmra.mxu2 %vm710_vm3, %v9331_v4  ;;  %v13514_v45 = vpop.f32.mrf.mxu0  ;;  %v8717_v4 = vld [vmem:[#allocation6 + $0xd8] sm:$0xf] }
 0x7aa   :  { %5175 = vmatpush.bf16.msra.mxu3 %v5129_v13  ;;  %v8718_v13 = vor.u32 %v9391_v56, %v8717_v4  ;;  %v9428_v4 = vld [vmem:[#allocation6 + $0x220] sm:$0xf0] }
 0x7ad   :  { %v4672_v16 = vpop.f32.mrf.mxu3 }
 0x7ae   :  { %v5211_v44 = vpack.c.bf16 %v4672_v16, %v4670_v32  ;;  %5176 = vmatpush.bf16.msra.mxu3 %v5128_v49  ;;  %v8794_v32 = vor.u32 %v9405_v7, %v8791_v46  ;;  %v8755_v49 = vld [vmem:[#allocation6 + $0x144] sm:$0xf0]  ;;  %v8681_v16 = vld [vmem:[#allocation6 + $0x90] sm:$0xf]  ;;  %v9343_v7 = vld [vmem:[#allocation4 + $0x98] sm:$0xff] }
 0x7af   :  { %8486 = vmatmul.msk.bf16.gmra.mxu0 %vm710_vm3, %v9335_v2  ;;  %v9396_v2 = vld [vmem:[#allocation6 + $0x124] sm:$0xf]  ;;  %v9347_v46 = vld [vmem:[#allocation4 + $0xb8] sm:$0xff] }
 0x7b0   :  { %5257 = vmatpush.bf16.msrb.mxu0 %v5211_v44  ;;  %v9349_v44 = vld [vmem:[#allocation4 + $0xc8] sm:$0xff] }
 0x7b1   :  { %v13519_v36 = vpop.f32.mrf.mxu0 }
 0x7b2   :  { %5177 = vmatpush.bf16.msra.mxu3 %v5127_v5  ;;  %v8758_v5 = vor.u32 %v9396_v2, %v8755_v49  ;;  %v9351_v2 = vld [vmem:[#allocation4 + $0xd8] sm:$0xff] }
 0x7b3   :  { %8504 = vmatmul.msk.bf16.gmra.mxu1 %vm710_vm3, %v9337_v60 }
 0x7b4   :  { %5258 = vmatpush.bf16.msrb.mxu0 %v5210_v35  ;;  %v9382_v35 = vld [vmem:[#allocation6 + $0xb0] sm:$0xf0] }
 0x7b5   :  { %v4860_v49 = vpop.f32.mrf.mxu3 }
 0x7b6   :  { %5178 = vmatpush.bf16.msra.mxu3 %v5126_v20  ;;  %v8682_v20 = vor.u32 %v9382_v35, %v8681_v16  ;;  %v8797_v16 = vld [vmem:[#allocation6 + $0x170] sm:$0xf] }
 0x7b8   :  { %5259 = vmatpush.bf16.msrb.mxu0 %v5209_v63  ;;  %v8645_v63 = vld [vmem:[#allocation6 + $0x48] sm:$0xf] }
 0x7b9   :  { %8523 = vmatmul.msk.bf16.vlgmr.msra.gmra.mxu2 %vm710_vm3, %v9340_v57  ;;  %8543 = vmatmul.msk.bf16.vlgmr.msra.gmra.mxu3 %vm710_vm3, %v9344_v58  ;;  %v13527_v31 = vpop.f32.mrf.mxu0  ;;  %v9387_v57 = vld [vmem:[#allocation6 + $0xdc] sm:$0xf]  ;;  %v8719_v58 = vld [vmem:[#allocation6 + $0xfc] sm:$0xf0] }
 0x7ba   :  { %5926 = vmatpush.bf16.msrb.mxu3 %v8862_v24  ;;  %v8722_v39 = vor.u32 %v9387_v57, %v8719_v58  ;;  %v8683_v24 = vld [vmem:[#allocation6 + $0xb4] sm:$0xf0]  ;;  %v9353_v58 = vld [vmem:[#allocation4 + $0xe8] sm:$0xff] }
 0x7bc   :  { %5260 = vmatpush.bf16.msrb.mxu0 %v5208_v28  ;;  %v9378_v28 = vld [vmem:[#allocation6 + $0x94] sm:$0xf] }
 0x7bd   :  { %v8686_v41 = vor.u32 %v9378_v28, %v8683_v24  ;;  %v9356_v28 = vld [vmem:[#allocation4 + $0x100] sm:$0xff]  ;;  %v13556_v24 = vpop.f32.mrf.mxu3 }
 0x7be   :  { %5927 = vmatpush.bf16.msrb.mxu3 %v8826_v55 }
 0x7bf   :  { %8563 = vmatmul.msk.bf16.vlgmr.msrb.gmra.mxu0 %vm710_vm3, %v9348_v53  ;;  %v8646_v53 = vor.u32 %v9373_v26, %v8645_v63 }
 0x7c0   :  { %5955 = vmatpush.bf16.msra.mxu0 %v8866_v12  ;;  %v8609_v12 = vld [vmem:[#allocation6] sm:$0xf] }
 0x7c1   :  { %v4696_v40 = vpop.f32.mrf.mxu0 }
 0x7c2   :  { %5928 = vmatpush.bf16.msrb.mxu3 %v8790_v50  ;;  %v8610_v50 = vor.u32 %v9364_v30, %v8609_v12  ;;  %v8689_v12 = vld [vmem:[#allocation6 + $0x98] sm:$0xf]  ;;  %v9383_v30 = vld [vmem:[#allocation6 + $0xb8] sm:$0xf0] }
 0x7c3   :  { %8505 = vmatmul.msk.bf16.gmra.mxu1 %vm710_vm3, %v9338_v19  ;;  %v9369_v19 = vld [vmem:[#allocation6 + $0x4c] sm:$0xf] }
 0x7c4   :  { %5956 = vmatpush.bf16.msra.mxu0 %v8830_v48  ;;  %v8650_v10 = vor.u32 %v9369_v19, %v8647_v59  ;;  %v9350_v48 = vld [vmem:[#allocation4 + $0xd0] sm:$0xff]  ;;  %v8690_v19 = vor.u32 %v9383_v30, %v8689_v12 }
 0x7c6   :  { %5929 = vmatpush.bf16.msrb.mxu3 %v8754_v29  ;;  %v5291_v29 = vpack.c.bf16 %v13519_v36, %v13514_v45  ;;  %v8833_v45 = vld [vmem:[#allocation6 + $0x1b8] sm:$0xf]  ;;  %v9419_v36 = vld [vmem:[#allocation6 + $0x1d8] sm:$0xf0] }
 0x7c8   :  { %5957 = vmatpush.bf16.msra.mxu0 %v8794_v32  ;;  %v8869_v32 = vld [vmem:[#allocation6 + $0x200] sm:$0xf] }
 0x7c9   :  { %8524 = vmatmul.msk.bf16.gmra.mxu2 %vm710_vm3, %v9341_v11  ;;  %8544 = vmatmul.msk.bf16.gmra.mxu3 %vm710_vm3, %v9345_v8  ;;  %v4699_v60 = vpop.f32.mrf.mxu0  ;;  %v5292_v11 = vpack.c.bf16 %v4696_v40, %v13527_v31  ;;  %v9360_v8 = vld [vmem:[#allocation6 + $0x4] sm:$0xf]  ;;  %v5290_v31 = vpack.c.bf16 %v13510_v1, %v13503_v18  ;;  %v8870_v56 = vor.u32 %v9428_v4, %v8869_v32  ;;  %v9476_v18 = vld [vmem:[%s14392_s3] sm:$0x7] }
 0x7ca   :  { %5930 = vmatpush.bf16.msrb.mxu3 %v8718_v13  ;;  %v8614_v23 = vor.u32 %v9360_v8, %v8611_v0  ;;  %v9352_v40 = vld [vmem:[#allocation4 + $0xe0] sm:$0xff]  ;;  %v8834_v13 = vor.u32 %v9419_v36, %v8833_v45  ;;  %v13549_v1 = vperm.slane %v9476_v18, 2  ;;  %v9425_v45 = vld [vmem:[#allocation6 + $0x20c] sm:$0xf]  ;;  %v8879_v36 = vld [vmem:[#allocation6 + $0x22c] sm:$0xf0] }
 0x7cb   :  { %v8835_v8 = vld [vmem:[#allocation6 + $0x1dc] sm:$0xf0]  ;;  %v8805_v18 = vld [vmem:[#allocation6 + $0x178] sm:$0xf] }
 0x7cc   :  { %5958 = vmatpush.bf16.msra.mxu0 %v8758_v5  ;;  %v2984_v5 = vadd.f32 %v12676_v21, %v13549_v1  ;;  %v2982_v57 = vadd.f32 %v12668_v17, %v13549_v1  ;;  %v9392_v21 = vld [vmem:[#allocation6 + $0x100] sm:$0xf0]  ;;  %v8841_v0 = vld [vmem:[#allocation6 + $0x1c0] sm:$0xf] }
 0x7cd   :  { %v9424_v17 = vld [vmem:[#allocation6 + $0x204] sm:$0xf] }
 0x7ce   :  { %5931 = vmatpush.bf16.msrb.mxu3 %v8682_v20  ;;  %v9401_v20 = vld [vmem:[#allocation6 + $0x148] sm:$0xf0]  ;;  %v3006_v63 = vmax.f32 %v2984_v5, 0.0  ;;  %v3003_v26 = vmax.f32 %v2982_v57, 0.0 }
 0x7cf   :  { %8564 = vmatmul.msk.bf16.gmra.mxu0 %vm710_vm3, %v9349_v44  ;;  %v9410_v44 = vld [vmem:[#allocation6 + $0x190] sm:$0xf0] }
 0x7d0   :  { %5959 = vmatpush.bf16.msra.mxu0 %v8722_v39  ;;  %v8798_v35 = vor.u32 %v9410_v44, %v8797_v16  ;;  %v13568_v32 = vpop.f32.mrf.mxu3  ;;  %v9411_v16 = vld [vmem:[#allocation6 + $0x198] sm:$0xf0] }
 0x7d1   :  { %v4701_v55 = vpop.f32.mrf.mxu0  ;;  %v8806_v5 = vor.u32 %v9411_v16, %v8805_v18  ;;  %v2994_v18 = vadd.f32 %v12752_v61, %v13549_v1 }
 0x7d2   :  { %5932 = vmatpush.bf16.msrb.mxu3 %v8646_v53  ;;  %v5293_v6 = vpack.c.bf16 %v4701_v55, %v4699_v60  ;;  %v8761_v60 = vld [vmem:[#allocation6 + $0x128] sm:$0xf]  ;;  %v8725_v53 = vld [vmem:[#allocation6 + $0xe0] sm:$0xf] }
 0x7d3   :  { %8506 = vmatmul.msk.bf16.gmra.mxu1 %vm710_vm3, %v9339_v34  ;;  %v8762_v39 = vor.u32 %v9401_v20, %v8761_v60  ;;  %v13559_v34 = vpack.c.bf16 %v3006_v63, %v3003_v26  ;;  %v8871_v55 = vld [vmem:[#allocation6 + $0x224] sm:$0xf0]  ;;  %v9365_v20 = vld [vmem:[#allocation6 + $0x28] sm:$0xf0]  ;;  %v9416_v63 = vld [vmem:[#allocation6 + $0x1c4] sm:$0xf] }
 0x7d4   :  { %5960 = vmatpush.bf16.msra.mxu0 %v8686_v41  ;;  %5339 = vmatpush.bf16.msrb.mxu1 %v5293_v6  ;;  %v8726_v41 = vor.u32 %v9392_v21, %v8725_v53  ;;  %v8874_v6 = vor.u32 %v9424_v17, %v8871_v55  ;;  %v8617_v60 = vld [vmem:[#allocation6 + $0x8] sm:$0xf]  ;;  %v9397_v17 = vld [vmem:[#allocation6 + $0x12c] sm:$0xf]  ;;  %v8763_v55 = vld [vmem:[#allocation6 + $0x14c] sm:$0xf0] }
 0x7d5   :  { %v9357_v53 = vld [vmem:[#allocation4 + $0x108] sm:$0xff] }
 0x7d6   :  { %5933 = vmatpush.bf16.msrb.mxu3 %v8610_v50  ;;  %6013 = vmatpush.bf16.msra.mxu2 %v8874_v6  ;;  %v8766_v6 = vor.u32 %v9397_v17, %v8763_v55 }
 0x7d8   :  { %5961 = vmatpush.bf16.msra.mxu0 %v8650_v10  ;;  %5340 = vmatpush.bf16.msrb.mxu1 %v5292_v11 }
 0x7d9   :  { %8525 = vmatmul.msk.bf16.gmra.mxu2 %vm710_vm3, %v9342_v33  ;;  %8545 = vmatmul.msk.bf16.gmra.mxu3 %vm710_vm3, %v9346_v9  ;;  %v8877_v33 = vld [vmem:[#allocation6 + $0x208] sm:$0xf]  ;;  %v9429_v9 = vld [vmem:[#allocation6 + $0x228] sm:$0xf0] }
 0x7da   :  { %v8878_v50 = vor.u32 %v9429_v9, %v8877_v33  ;;  %v8769_v33 = vld [vmem:[#allocation6 + $0x130] sm:$0xf]  ;;  %v9402_v9 = vld [vmem:[#allocation6 + $0x150] sm:$0xf0] }
 0x7dc   :  { %5962 = vmatpush.bf16.msra.mxu0 %v8614_v23  ;;  %5341 = vmatpush.bf16.msrb.mxu1 %v5291_v29  ;;  %v2989_v23 = vadd.f32 %v12712_v3, %v13549_v1  ;;  %v8882_v3 = vor.u32 %v9425_v45, %v8879_v36  ;;  %v9379_v36 = vld [vmem:[#allocation6 + $0x9c] sm:$0xf] }
 0x7dd   :  { %6042 = vmatpush.bf16.msra.mxu3 %v8878_v50  ;;  %v8770_v50 = vor.u32 %v9402_v9, %v8769_v33  ;;  %v9358_v33 = vld [vmem:[#allocation4 + $0x110] sm:$0xff]  ;;  %v9361_v9 = vld [vmem:[#allocation6 + $0xc] sm:$0xf] }
 0x7de   :  { %v3012_v57 = vmax.f32 %v2989_v23, 0.0  ;;  %v9393_v23 = vld [vmem:[#allocation6 + $0x108] sm:$0xf0] }
 0x7df   :  { %8565 = vmatmul.msk.bf16.gmra.mxu0 %vm710_vm3, %v9350_v48  ;;  %v9415_v48 = vld [vmem:[#allocation6 + $0x1bc] sm:$0xf] }
 0x7e0   :  { %5342 = vmatpush.bf16.msrb.mxu1 %v5290_v31  ;;  %v8838_v29 = vor.u32 %v9415_v48, %v8835_v8  ;;  %v9420_v31 = vld [vmem:[#allocation6 + $0x1e0] sm:$0xf0]  ;;  %6071 = vmatpush.bf16.msrb.mxu0 %v8882_v3  ;;  %v8727_v48 = vld [vmem:[#allocation6 + $0x104] sm:$0xf0] }
 0x7e1   :  { %v8842_v4 = vor.u32 %v9420_v31, %v8841_v0  ;;  %v8733_v8 = vld [vmem:[#allocation6 + $0xe8] sm:$0xf]  ;;  %v9398_v31 = vld [vmem:[#allocation6 + $0x134] sm:$0xf] }
 0x7e2   :  { %6014 = vmatpush.bf16.msra.mxu2 %v8838_v29  ;;  %v8734_v29 = vor.u32 %v9393_v23, %v8733_v8  ;;  %v8663_v23 = vld [vmem:[#allocation6 + $0x7c] sm:$0xf0] }
 0x7e3   :  { %8583 = vmatmul.msk.bf16.vlgmr.msrb.gmra.mxu1 %vm710_vm3, %v9352_v40  ;;  %v8653_v40 = vld [vmem:[#allocation6 + $0x50] sm:$0xf]  ;;  %6043 = vmatpush.bf16.msra.mxu3 %v8842_v4 }
 0x7e4   :  { %5984 = vmatpush.bf16.msra.mxu1 %v8870_v56 }
 0x7e7   :  { %6044 = vmatpush.bf16.msra.mxu3 %v8806_v5  ;;  %v9389_v5 = vld [vmem:[#allocation6 + $0xec] sm:$0xf] }
 0x7e8   :  { %5985 = vmatpush.bf16.msra.mxu1 %v8834_v13  ;;  %v9406_v13 = vld [vmem:[#allocation6 + $0x174] sm:$0xf] }
 0x7e9   :  { %8526 = vmatmul.msk.bf16.gmra.mxu2 %vm710_vm3, %v9343_v7  ;;  %8546 = vmatmul.msk.bf16.gmra.mxu3 %vm710_vm3, %v9347_v46  ;;  %v9374_v7 = vld [vmem:[#allocation6 + $0x70] sm:$0xf0] }
 0x7ea   :  { %v8654_v56 = vor.u32 %v9374_v7, %v8653_v40  ;;  %v8771_v40 = vld [vmem:[#allocation6 + $0x154] sm:$0xf0] }
 0x7eb   :  { %6045 = vmatpush.bf16.msra.mxu3 %v8770_v50  ;;  %v8619_v50 = vld [vmem:[#allocation6 + $0x2c] sm:$0xf0] }
 0x7ec   :  { %5986 = vmatpush.bf16.msra.mxu1 %v8798_v35  ;;  %v9354_v35 = vld [vmem:[#allocation4 + $0xf0] sm:$0xff] }
 0x7ef   :  { %8566 = vmatmul.msk.bf16.gmra.mxu0 %vm710_vm3, %v9351_v2  ;;  %v2987_v2 = vadd.f32 %v12696_v62, %v13549_v1  ;;  %6046 = vmatpush.bf16.msra.mxu3 %v8734_v29 }
 0x7f0   :  { %5987 = vmatpush.bf16.msra.mxu1 %v8762_v39  ;;  %v8843_v39 = vld [vmem:[#allocation6 + $0x1e4] sm:$0xf0] }
 0x7f1   :  { %v3009_v26 = vmax.f32 %v2987_v2, 0.0  ;;  %v8846_v21 = vor.u32 %v9416_v63, %v8843_v39  ;;  %v8697_v2 = vld [vmem:[#allocation6 + $0xa0] sm:$0xf]  ;;  %v9375_v63 = vld [vmem:[#allocation6 + $0x78] sm:$0xf0] }
 0x7f3   :  { %8584 = vmatmul.msk.bf16.gmra.mxu1 %vm710_vm3, %v9353_v58  ;;  %v8618_v58 = vor.u32 %v9365_v20, %v8617_v60  ;;  %6072 = vmatpush.bf16.msrb.mxu0 %v8846_v21  ;;  %v13574_v12 = vpack.c.bf16 %v3012_v57, %v3009_v26  ;;  %v9370_v60 = vld [vmem:[#allocation6 + $0x54] sm:$0xf]  ;;  %v8655_v57 = vld [vmem:[#allocation6 + $0x74] sm:$0xf0]  ;;  %v8699_v21 = vld [vmem:[#allocation6 + $0xc4] sm:$0xf0] }
 0x7f4   :  { %5988 = vmatpush.bf16.msra.mxu1 %v8726_v41  ;;  %v8658_v39 = vor.u32 %v9370_v60, %v8655_v57  ;;  %v9355_v26 = vld [vmem:[#allocation4 + $0xf8] sm:$0xff] }
 0x7f8   :  { %5989 = vmatpush.bf16.msra.mxu1 %v8690_v19  ;;  %v9407_v19 = vld [vmem:[#allocation6 + $0x17c] sm:$0xf] }
 0x7f9   :  { %8603 = vmatmul.msk.bf16.vlgmr.msrb.gmra.mxu2 %vm710_vm3, %v9356_v28  ;;  %5934 = vmatmul.bf16.vlgmr.msrb.gmra.mxu3 %v13559_v34 }
 0x7fc   :  { %v4799_v59 = vpop.f32.mrf.mxu2  ;;  %v4934_v10 = vpop.f32.mrf.mxu0  ;;  %5990 = vmatpush.bf16.msra.mxu1 %v8654_v56  ;;  %v8774_v56 = vor.u32 %v9398_v31, %v8771_v40  ;;  %v8627_v31 = vld [vmem:[#allocation6 + $0x34] sm:$0xf0] }
 0x7fd   :  { %v4861_v11 = vadd.f32 %v4860_v49, %v4799_v59  ;;  %v8799_v49 = vld [vmem:[#allocation6 + $0x194] sm:$0xf0]  ;;  %v8807_v59 = vld [vmem:[#allocation6 + $0x19c] sm:$0xf0] }
 0x7fe   :  { %v8802_v44 = vor.u32 %v9406_v13, %v8799_v49  ;;  %v8691_v13 = vld [vmem:[#allocation6 + $0xbc] sm:$0xf0]  ;;  %v9384_v49 = vld [vmem:[#allocation6 + $0xc0] sm:$0xf0] }
 0x7ff   :  { %v13565_v46 = vadd.f32 %v4934_v10, %v4861_v11  ;;  %5963 = vmatmul.bf16.vlgmr.msra.gmra.mxu0 %v13559_v34  ;;  %v8810_v10 = vor.u32 %v9407_v19, %v8807_v59  ;;  %v9388_v11 = vld [vmem:[#allocation6 + $0xe4] sm:$0xf]  ;;  %v8694_v3 = vor.u32 %v9379_v36, %v8691_v13  ;;  %v8625_v19 = vld [vmem:[#allocation6 + $0x10] sm:$0xf]  ;;  %v8622_v59 = vor.u32 %v9361_v9, %v8619_v50 }
 0x800   :  { %6015 = vmatpush.bf16.msra.mxu2 %v8802_v44  ;;  %5991 = vmatpush.bf16.msra.mxu1 %v8618_v58  ;;  %v8730_v0 = vor.u32 %v9388_v11, %v8727_v48  ;;  %v8698_v44 = vor.u32 %v9384_v49, %v8697_v2  ;;  %v8661_v58 = vld [vmem:[#allocation6 + $0x58] sm:$0xf]  ;;  %v2999_v36 = vadd.f32 %v12764_v15, %v13549_v1  ;;  %v8885_v15 = vld [vmem:[#allocation6 + $0x210] sm:$0xf] }
 0x801   :  { %6073 = vmatpush.bf16.msrb.mxu0 %v8810_v10  ;;  %v8662_v61 = vor.u32 %v9375_v63, %v8661_v58  ;;  %v9366_v10 = vld [vmem:[#allocation6 + $0x30] sm:$0xf0]  ;;  %v2997_v2 = vadd.f32 %v12756_v54, %v13549_v1 }
 0x802   :  { %6047 = vmatpush.bf16.msra.mxu3 %v8698_v44  ;;  %v8626_v8 = vor.u32 %v9366_v10, %v8625_v19 }
 0x803   :  { %8585 = vmatmul.msk.bf16.gmra.mxu1 %vm710_vm3, %v9354_v35  ;;  %v8735_v35 = vld [vmem:[#allocation6 + $0x10c] sm:$0xf0] }
 0x804   :  { %v4801_v28 = vpop.f32.mrf.mxu2  ;;  %v4936_v62 = vpop.f32.mrf.mxu0  ;;  %6016 = vmatpush.bf16.msra.mxu2 %v8766_v6  ;;  %v8738_v20 = vor.u32 %v9389_v5, %v8735_v35  ;;  %v3021_v35 = vmax.f32 %v2997_v2, 0.0 }
 0x805   :  { %v4863_v41 = vadd.f32 %v13556_v24, %v4801_v28  ;;  %v4867_v24 = vpop.f32.mrf.mxu3  ;;  %6074 = vmatpush.bf16.msrb.mxu0 %v8774_v56  ;;  %v3018_v28 = vmax.f32 %v2994_v18, 0.0 }
 0x806   :  { %6048 = vmatpush.bf16.msra.mxu3 %v8662_v61 }
 0x807   :  { %v13576_v30 = vadd.f32 %v4936_v62, %v4863_v41 }
 0x808   :  { %6017 = vmatpush.bf16.msra.mxu2 %v8730_v0  ;;  %v9371_v0 = vld [vmem:[#allocation6 + $0x5c] sm:$0xf] }
 0x809   :  { %8604 = vmatmul.msk.bf16.gmra.mxu2 %vm710_vm3, %v9357_v53  ;;  %5939 = vmatmul.bf16.gmra.mxu3 %v13574_v12  ;;  %v9380_v53 = vld [vmem:[#allocation6 + $0xa4] sm:$0xf]  ;;  %v8666_v29 = vor.u32 %v9371_v0, %v8663_v23  ;;  %v9394_v0 = vld [vmem:[#allocation6 + $0x110] sm:$0xf0] }
 0x80a   :  { %6075 = vmatpush.bf16.msrb.mxu0 %v8738_v20  ;;  %6049 = vmatpush.bf16.msra.mxu3 %v8626_v8  ;;  %v9430_v20 = vld [vmem:[#allocation6 + $0x230] sm:$0xf0]  ;;  %v8741_v8 = vld [vmem:[#allocation6 + $0xf0] sm:$0xf] }
 0x80b   :  { %v8886_v63 = vor.u32 %v9430_v20, %v8885_v15  ;;  %v8857_v15 = vld [vmem:[#allocation6 + $0x1d0] sm:$0xf] }
 0x80c   :  { %v4804_v7 = vpop.f32.mrf.mxu2  ;;  %v4939_v4 = vpop.f32.mrf.mxu0  ;;  %6018 = vmatpush.bf16.msra.mxu2 %v8694_v3  ;;  %v3024_v3 = vmax.f32 %v2999_v36, 0.0 }
 0x80d   :  { %v4866_v45 = vadd.f32 %v13568_v32, %v4804_v7  ;;  %v2992_v32 = vadd.f32 %v12738_v37, %v13549_v1  ;;  %v4870_v62 = vpop.f32.mrf.mxu3  ;;  %v8702_v37 = vor.u32 %v9380_v53, %v8699_v21  ;;  %6100 = vmatpush.bf16.msrb.mxu1 %v8886_v63  ;;  %v8849_v1 = vld [vmem:[#allocation6 + $0x1c8] sm:$0xf]  ;;  %v8813_v21 = vld [vmem:[#allocation6 + $0x180] sm:$0xf]  ;;  %v9422_v63 = vld [vmem:[#allocation6 + $0x1f0] sm:$0xf0] }
 0x80e   :  { %v13606_v57 = vpack.c.bf16 %v3024_v3, %v3021_v35 }
 0x80f   :  { %v13583_v16 = vadd.f32 %v4939_v4, %v4866_v45  ;;  %5968 = vmatmul.bf16.gmra.mxu0 %v13574_v12  ;;  %v3015_v41 = vmax.f32 %v2992_v32, 0.0  ;;  %v9359_v32 = vld [vmem:[#allocation4 + $0x118] sm:$0xff] }
 0x810   :  { %6019 = vmatpush.bf16.msra.mxu2 %v8658_v39  ;;  %6076 = vmatpush.bf16.msrb.mxu0 %v8702_v37  ;;  %v8777_v37 = vld [vmem:[#allocation6 + $0x138] sm:$0xf] }
 0x811   :  { %v13589_v11 = vpack.c.bf16 %v3018_v28, %v3015_v41  ;;  %v9412_v41 = vld [vmem:[#allocation6 + $0x1a0] sm:$0xf0] }
 0x813   :  { %8586 = vmatmul.msk.bf16.gmra.mxu1 %vm710_vm3, %v9355_v26 }
 0x814   :  { %v4806_v17 = vpop.f32.mrf.mxu2  ;;  %v4941_v55 = vpop.f32.mrf.mxu0  ;;  %6020 = vmatpush.bf16.msra.mxu2 %v8622_v59  ;;  %6077 = vmatpush.bf16.msrb.mxu0 %v8666_v29  ;;  %v8742_v29 = vor.u32 %v9394_v0, %v8741_v8  ;;  %v9399_v8 = vld [vmem:[#allocation6 + $0x13c] sm:$0xf]  ;;  %v8779_v0 = vld [vmem:[#allocation6 + $0x15c] sm:$0xf0] }
 0x815   :  { %v4868_v6 = vadd.f32 %v4867_v24, %v4806_v17  ;;  %v9362_v24 = vld [vmem:[#allocation6 + $0x14] sm:$0xf]  ;;  %v4872_v45 = vpop.f32.mrf.mxu3 }
 0x816   :  { %v8630_v4 = vor.u32 %v9362_v24, %v8627_v31  ;;  %v9426_v24 = vld [vmem:[#allocation6 + $0x214] sm:$0xf]  ;;  %v8887_v31 = vld [vmem:[#allocation6 + $0x234] sm:$0xf0] }
 0x817   :  { %v13591_v48 = vadd.f32 %v4941_v55, %v4868_v6  ;;  %v8814_v55 = vor.u32 %v9412_v41, %v8813_v21  ;;  %v9403_v6 = vld [vmem:[#allocation6 + $0x158] sm:$0xf0]  ;;  %v9413_v21 = vld [vmem:[#allocation6 + $0x1a8] sm:$0xf0]  ;;  %v8633_v41 = vld [vmem:[#allocation6 + $0x18] sm:$0xf] }
 0x818   :  { %6078 = vmatpush.bf16.msrb.mxu0 %v8630_v4  ;;  %v8778_v50 = vor.u32 %v9403_v6, %v8777_v37  ;;  %v8705_v4 = vld [vmem:[#allocation6 + $0xa8] sm:$0xf] }
 0x819   :  { %8605 = vmatmul.msk.bf16.gmra.mxu2 %vm710_vm3, %v9358_v33  ;;  %5944 = vmatmul.bf16.gmra.mxu3 %v13589_v11 }
 0x81c   :  { %v4809_v40 = vpop.f32.mrf.mxu2  ;;  %v4944_v7 = vpop.f32.mrf.mxu0 }
 0x81d   :  { %v4871_v56 = vadd.f32 %v4870_v62, %v4809_v40  ;;  %v4875_v54 = vpop.f32.mrf.mxu3  ;;  %v8893_v40 = vld [vmem:[#allocation6 + $0x218] sm:$0xf] }
 0x81f   :  { %v13597_v13 = vadd.f32 %v4944_v7, %v4871_v56  ;;  %5973 = vmatmul.bf16.gmra.mxu0 %v13589_v11  ;;  %v9431_v7 = vld [vmem:[#allocation6 + $0x238] sm:$0xf0]  ;;  %v9385_v56 = vld [vmem:[#allocation6 + $0xc8] sm:$0xf0] }
 0x820   :  { %v5016_v49 = vpop.f32.mrf.mxu1  ;;  %v8894_v36 = vor.u32 %v9431_v7, %v8893_v40  ;;  %v8706_v2 = vor.u32 %v9385_v56, %v8705_v4  ;;  %v8749_v7 = vld [vmem:[#allocation6 + $0xf8] sm:$0xf]  ;;  %v9395_v56 = vld [vmem:[#allocation6 + $0x118] sm:$0xf0] }
 0x821   :  { %v13603_v18 = vadd.f32 %v5016_v49, %v13565_v46  ;;  %v9421_v46 = vld [vmem:[#allocation6 + $0x1e8] sm:$0xf0] }
 0x822   :  { %v8850_v26 = vor.u32 %v9421_v46, %v8849_v1  ;;  %6158 = vmatpush.bf16.msrb.mxu3 %v8894_v36  ;;  %v9376_v1 = vld [vmem:[#allocation6 + $0x80] sm:$0xf0]  ;;  %v8750_v36 = vor.u32 %v9395_v56, %v8749_v7 }
 0x823   :  { %5992 = vmatmul.bf16.vlgmr.msra.gmra.mxu1 %v13559_v34 }
 0x824   :  { %v4811_v44 = vpop.f32.mrf.mxu2  ;;  %v4946_v5 = vpop.f32.mrf.mxu0  ;;  %6101 = vmatpush.bf16.msrb.mxu1 %v8850_v26 }
 0x825   :  { %v4873_v60 = vadd.f32 %v4872_v45, %v4811_v44  ;;  %v4877_v33 = vpop.f32.mrf.mxu3 }
 0x827   :  { %v13608_v58 = vadd.f32 %v4946_v5, %v4873_v60  ;;  %v9417_v60 = vld [vmem:[#allocation6 + $0x1cc] sm:$0xf] }
 0x828   :  { %v5018_v39 = vpop.f32.mrf.mxu1  ;;  %6102 = vmatpush.bf16.msrb.mxu1 %v8814_v55  ;;  %v9367_v55 = vld [vmem:[#allocation6 + $0x38] sm:$0xf0] }
 0x829   :  { %8606 = vmatmul.msk.bf16.gmra.mxu2 %vm710_vm3, %v9359_v32  ;;  %5949 = vmatmul.bf16.gmra.mxu3 %v13606_v57  ;;  %v13613_v61 = vadd.f32 %v5018_v39, %v13576_v30  ;;  %v8851_v32 = vld [vmem:[#allocation6 + $0x1ec] sm:$0xf0]  ;;  %v8634_v6 = vor.u32 %v9367_v55, %v8633_v41 }
 0x82a   :  { %v8854_v20 = vor.u32 %v9417_v60, %v8851_v32  ;;  %v9381_v60 = vld [vmem:[#allocation6 + $0xac] sm:$0xf]  ;;  %v8707_v32 = vld [vmem:[#allocation6 + $0xcc] sm:$0xf0] }
 0x82c   :  { %v4814_v28 = vpop.f32.mrf.mxu2  ;;  %v4949_v62 = vpop.f32.mrf.mxu0  ;;  %6103 = vmatpush.bf16.msrb.mxu1 %v8778_v50 }
 0x82d   :  { %v4876_v53 = vadd.f32 %v4875_v54, %v4814_v28  ;;  %v8669_v54 = vld [vmem:[#allocation6 + $0x60] sm:$0xf]  ;;  %v8815_v28 = vld [vmem:[#allocation6 + $0x1a4] sm:$0xf0] }
 0x82e   :  { %v8670_v39 = vor.u32 %v9376_v1, %v8669_v54 }
 0x82f   :  { %v13615_v17 = vadd.f32 %v4949_v62, %v4876_v53  ;;  %5978 = vmatmul.bf16.gmra.mxu0 %v13606_v57  ;;  %v8821_v62 = vld [vmem:[#allocation6 + $0x188] sm:$0xf] }
 0x830   :  { %v5021_v9 = vpop.f32.mrf.mxu1  ;;  %6104 = vmatpush.bf16.msrb.mxu1 %v8742_v29  ;;  %v8822_v37 = vor.u32 %v9413_v21, %v8821_v62  ;;  %v8785_v29 = vld [vmem:[#allocation6 + $0x140] sm:$0xf] }
 0x831   :  { %v13619_v30 = vadd.f32 %v5021_v9, %v13583_v16  ;;  %v8890_v16 = vor.u32 %v9426_v24, %v8887_v31  ;;  %v8782_v24 = vor.u32 %v9399_v8, %v8779_v0  ;;  %v9404_v31 = vld [vmem:[#allocation6 + $0x160] sm:$0xf0] }
 0x833   :  { %5997 = vmatmul.bf16.gmra.mxu1 %v13574_v12  ;;  %6129 = vmatpush.bf16.msrb.mxu2 %v8890_v16  ;;  %v8743_v16 = vld [vmem:[#allocation6 + $0x114] sm:$0xf0] }
 0x834   :  { %v4816_v19 = vpop.f32.mrf.mxu2  ;;  %v4951_v59 = vpop.f32.mrf.mxu0  ;;  %6105 = vmatpush.bf16.msrb.mxu1 %v8706_v2 }
 0x835   :  { %v4878_v10 = vadd.f32 %v4877_v33, %v4816_v19 }
 0x837   :  { %v13622_v23 = vadd.f32 %v4951_v59, %v4878_v10  ;;  %6130 = vmatpush.bf16.msrb.mxu2 %v8854_v20  ;;  %v8710_v20 = vor.u32 %v9381_v60, %v8707_v32 }
 0x838   :  { %v5023_v45 = vpop.f32.mrf.mxu1  ;;  %6106 = vmatpush.bf16.msrb.mxu1 %v8670_v39  ;;  %v8677_v39 = vld [vmem:[#allocation6 + $0x68] sm:$0xf] }
 0x839   :  { %6021 = vmatmul.bf16.vlgmr.msra.gmra.mxu2 %v13559_v34  ;;  %6050 = vmatmul.bf16.vlgmr.msra.gmra.mxu3 %v13559_v34  ;;  %v13627_v3 = vadd.f32 %v5023_v45, %v13591_v48  ;;  %v8858_v48 = vor.u32 %v9422_v63, %v8857_v15  ;;  %v8713_v15 = vld [vmem:[#allocation6 + $0xb0] sm:$0xf]  ;;  %v9386_v63 = vld [vmem:[#allocation6 + $0xd0] sm:$0xf0] }
 0x83a   :  { %v8714_v1 = vor.u32 %v9386_v63, %v8713_v15 }
 0x83b   :  { %6159 = vmatpush.bf16.msrb.mxu3 %v8858_v48  ;;  %v9372_v48 = vld [vmem:[#allocation6 + $0x64] sm:$0xf] }
 0x83c   :  { %v5098_v49 = vpop.f32.mrf.mxu2  ;;  %v5180_v44 = vpop.f32.mrf.mxu3  ;;  %6107 = vmatpush.bf16.msrb.mxu1 %v8634_v6  ;;  %v8635_v6 = vld [vmem:[#allocation6 + $0x3c] sm:$0xf0] }
 0x83d   :  { %v5118_v5 = vadd.f32 %v5098_v49, %v13603_v18  ;;  %v5262_v35 = vpop.f32.mrf.mxu0  ;;  %v9408_v18 = vld [vmem:[#allocation6 + $0x184] sm:$0xf] }
 0x83e   :  { %v8818_v53 = vor.u32 %v9408_v18, %v8815_v28  ;;  %v9377_v28 = vld [vmem:[#allocation6 + $0x88] sm:$0xf0] }
 0x83f   :  { %v5200_v46 = vadd.f32 %v5180_v44, %v5118_v5  ;;  %6079 = vmatmul.bf16.vlgmr.msrb.gmra.mxu0 %v13559_v34  ;;  %6160 = vmatpush.bf16.msrb.mxu3 %v8822_v37  ;;  %v8678_v62 = vor.u32 %v9377_v28, %v8677_v39  ;;  %v9363_v37 = vld [vmem:[#allocation6 + $0x1c] sm:$0xf] }
 0x840   :  { %v5026_v33 = vpop.f32.mrf.mxu1  ;;  %6131 = vmatpush.bf16.msrb.mxu2 %v8818_v53 }
 0x841   :  { %v13631_v26 = vadd.f32 %v5262_v35, %v5200_v46  ;;  %v13634_v9 = vadd.f32 %v5026_v33, %v13597_v13  ;;  %v8786_v13 = vor.u32 %v9404_v31, %v8785_v29 }
 0x843   :  { %6002 = vmatmul.bf16.gmra.mxu1 %v13589_v11  ;;  %6161 = vmatpush.bf16.msrb.mxu3 %v8786_v13 }
 0x844   :  { %v5100_v50 = vpop.f32.mrf.mxu2  ;;  %v5182_v19 = vpop.f32.mrf.mxu3  ;;  %6132 = vmatpush.bf16.msrb.mxu2 %v8782_v24 }
 0x845   :  { %v5119_v59 = vadd.f32 %v5100_v50, %v13613_v61  ;;  %v13637_v10 = vpop.f32.mrf.mxu0  ;;  %v9390_v61 = vld [vmem:[#allocation6 + $0xf4] sm:$0xf]  ;;  %v8641_v50 = vld [vmem:[#allocation6 + $0x20] sm:$0xf] }
 0x846   :  { %v8746_v4 = vor.u32 %v9390_v61, %v8743_v16 }
 0x847   :  { %v13640_v40 = vadd.f32 %v5182_v19, %v5119_v59  ;;  %6162 = vmatpush.bf16.msrb.mxu3 %v8750_v36  ;;  %v8638_v19 = vor.u32 %v9363_v37, %v8635_v6  ;;  %v9368_v59 = vld [vmem:[#allocation6 + $0x40] sm:$0xf0] }
 0x848   :  { %v5028_v45 = vpop.f32.mrf.mxu1  ;;  %6133 = vmatpush.bf16.msrb.mxu2 %v8746_v4  ;;  %v8642_v0 = vor.u32 %v9368_v59, %v8641_v50 }
 0x849   :  { %6026 = vmatmul.bf16.gmra.mxu2 %v13574_v12  ;;  %6055 = vmatmul.bf16.gmra.mxu3 %v13574_v12  ;;  %v5041_v2 = vadd.f32 %v5028_v45, %v13608_v58  ;;  %v8671_v58 = vld [vmem:[#allocation6 + $0x84] sm:$0xf0] }
 0x84a   :  { %v8674_v18 = vor.u32 %v9372_v48, %v8671_v58 }
 0x84b   :  { %6163 = vmatpush.bf16.msrb.mxu3 %v8714_v1 }
 0x84c   :  { %v5103_v49 = vpop.f32.mrf.mxu2  ;;  %v5185_v44 = vpop.f32.mrf.mxu3  ;;  %6134 = vmatpush.bf16.msrb.mxu2 %v8710_v20 }
 0x84d   :  { %v5120_v5 = vadd.f32 %v5103_v49, %v13619_v30  ;;  %v5267_v35 = vpop.f32.mrf.mxu0 }
 0x84f   :  { %v5202_v54 = vadd.f32 %v5185_v44, %v5120_v5  ;;  %6084 = vmatmul.bf16.gmra.mxu0 %v13574_v12  ;;  %6164 = vmatpush.bf16.msrb.mxu3 %v8678_v62  ;;  %v13684_v62 = vld [vmem:[%s14002_s13] ss:$0 sm:$0xff] }
 0x850   :  { %v5031_v30 = vpop.f32.mrf.mxu1  ;;  %6135 = vmatpush.bf16.msrb.mxu2 %v8674_v18 }
 0x851   :  { %v5284_v46 = vadd.f32 %v5267_v35, %v5202_v54  ;;  %v5042_v53 = vadd.f32 %v5031_v30, %v13615_v17 }
 0x853   :  { %6007 = vmatmul.bf16.gmra.mxu1 %v13606_v57  ;;  %6165 = vmatpush.bf16.msrb.mxu3 %v8642_v0 }
 0x854   :  { %v5105_v21 = vpop.f32.mrf.mxu2  ;;  %v5187_v41 = vpop.f32.mrf.mxu3  ;;  %6136 = vmatpush.bf16.msrb.mxu2 %v8638_v19 }
 0x855   :  { %v5121_v55 = vadd.f32 %v5105_v21, %v13627_v3  ;;  %v13649_v33 = vpop.f32.mrf.mxu0 }
 0x857   :  { %v13652_v8 = vadd.f32 %v5187_v41, %v5121_v55 }
 0x858   :  { %v5033_v17 = vpop.f32.mrf.mxu1 }
 0x859   :  { %6031 = vmatmul.bf16.gmra.mxu2 %v13589_v11  ;;  %6060 = vmatmul.bf16.gmra.mxu3 %v13589_v11  ;;  %v5043_v3 = vadd.f32 %v5033_v17, %v13622_v23 }
 0x85c   :  { %v5108_v29 = vpop.f32.mrf.mxu2  ;;  %v5190_v24 = vpop.f32.mrf.mxu3 }
 0x85d   :  { %v5122_v31 = vadd.f32 %v5108_v29, %v13634_v9  ;;  %v5272_v13 = vpop.f32.mrf.mxu0 }
 0x85f   :  { %v5204_v61 = vadd.f32 %v5190_v24, %v5122_v31  ;;  %6089 = vmatmul.bf16.gmra.mxu0 %v13589_v11 }
 0x860   :  { %v5344_v7 = vpop.f32.mrf.mxu1 }
 0x861   :  { %v5286_v16 = vadd.f32 %v5272_v13, %v5204_v61  ;;  %v5364_v4 = vadd.f32 %v5344_v7, %v13631_v26  ;;  %v5285_v13 = vadd.f32 %v13649_v33, %v13652_v8  ;;  %v9649_v33 = vmov 16.0  }
 0x862   :  { %9474 = vrcp.f32 %v9649_v33 }
 0x863   :  { %6108 = vmatmul.bf16.vlgmr.msrb.gmra.mxu1 %v13559_v34 }
 0x864   :  { %v5110_v56 = vpop.f32.mrf.mxu2  ;;  %v5192_v45 = vpop.f32.mrf.mxu3 }
 0x865   :  { %v5123_v36 = vadd.f32 %v5110_v56, %v5041_v2  ;;  %v13660_v49 = vpop.f32.mrf.mxu0 }
 0x867   :  { %v13663_v23 = vadd.f32 %v5192_v45, %v5123_v36 }
 0x868   :  { %v5346_v9 = vpop.f32.mrf.mxu1 }
 0x869   :  { %6036 = vmatmul.bf16.gmra.mxu2 %v13606_v57  ;;  %6065 = vmatmul.bf16.gmra.mxu3 %v13606_v57 }
 0x86c   :  { %v5113_v44 = vpop.f32.mrf.mxu2  ;;  %v5195_v5 = vpop.f32.mrf.mxu3 }
 0x86d   :  { %v5124_v35 = vadd.f32 %v5113_v44, %v5042_v53  ;;  %v5277_v60 = vpop.f32.mrf.mxu0 }
 0x86f   :  { %v5206_v32 = vadd.f32 %v5195_v5, %v5124_v35  ;;  %6094 = vmatmul.bf16.gmra.mxu0 %v13606_v57 }
 0x870   :  { %v5349_v2 = vpop.f32.mrf.mxu1 }
 0x871   :  { %v5288_v26 = vadd.f32 %v5277_v60, %v5206_v32  ;;  %v5366_v15 = vadd.f32 %v5349_v2, %v5284_v46  ;;  %v5283_v46 = vadd.f32 %v13637_v10, %v13640_v40 }
 0x873   :  { %6113 = vmatmul.bf16.gmra.mxu1 %v13574_v12  ;;  %v5365_v53 = vadd.f32 %v5346_v9, %v5283_v46 }
 0x874   :  { %v5115_v20 = vpop.f32.mrf.mxu2  ;;  %v5197_v63 = vpop.f32.mrf.mxu3 }
 0x875   :  { %v5125_v54 = vadd.f32 %v5115_v20, %v5043_v3  ;;  %v13668_v1 = vpop.f32.mrf.mxu0 }
 0x877   :  { %v13671_v48 = vadd.f32 %v5197_v63, %v5125_v54  ;;  %v9475_v54 = vpop.eup %9474 }
 0x878   :  { %v5351_v58 = vpop.f32.mrf.mxu1  ;;  %v6733_v46 = vmul.f32 16.0, %v9475_v54  ;;  %vm6737_vm4 = vweird.f32 %v9475_v54 }
 0x879   :  { %6137 = vmatmul.bf16.vlgmr.msrb.gmra.mxu2 %v13559_v34  ;;  %6166 = vmatmul.bf16.vlgmr.msrb.gmra.mxu3 %v13559_v34 }
 0x87c   :  { %v5426_v39 = vpop.f32.mrf.mxu2  ;;  %v13675_v18 = vpop.f32.mrf.mxu3 }
 0x87d   :  { %v5446_v28 = vadd.f32 %v5426_v39, %v5364_v4  ;;  %v13677_v30 = vpop.f32.mrf.mxu0 }
 0x87f   :  { %v5458_v37 = vadd.f32 %v13684_v62, %v5446_v28 }
 0x880   :  { %v5354_v21 = vpop.f32.mrf.mxu1 }
 0x881   :  { %v5368_v41 = vadd.f32 %v5354_v21, %v5286_v16  ;;  %v5466_v40 = vmax.f32 %v5458_v37, 0.0  ;;  %v5367_v16 = vadd.f32 %v5351_v58, %v5285_v13  ;;  %v5287_v58 = vadd.f32 %v13660_v49, %v13663_v23 }
 0x883   :  { %6118 = vmatmul.bf16.gmra.mxu1 %v13589_v11 }
 0x884   :  { %v5428_v55 = vpop.f32.mrf.mxu2  ;;  %v13686_v34 = vpop.f32.mrf.mxu3 }
 0x885   :  { %v5447_v6 = vadd.f32 %v5428_v55, %v5365_v53  ;;  %v13689_v50 = vpop.f32.mrf.mxu0 }
 0x887   :  { %v5459_v10 = vadd.f32 %v13684_v62, %v5447_v6 }
 0x888   :  { %v5356_v0 = vpop.f32.mrf.mxu1 }
 0x889   :  { %v5467_v19 = vmax.f32 %v5459_v10, 0.0  ;;  %6142 = vmatmul.bf16.gmra.mxu2 %v13574_v12  ;;  %6171 = vmatmul.bf16.gmra.mxu3 %v13574_v12  ;;  %v5369_v39 = vadd.f32 %v5356_v0, %v5287_v58 }
 0x88b   :  { %v6718_v59 = vadd.f32 %v5467_v19, %v5466_v40 }
 0x88c   :  { %v5431_v17 = vpop.f32.mrf.mxu2  ;;  %v13695_v3 = vpop.f32.mrf.mxu3 }
 0x88d   :  { %v5448_v29 = vadd.f32 %v5431_v17, %v5366_v15  ;;  %v13697_v24 = vpop.f32.mrf.mxu0  ;;  %v6719_v63 = vrot.slane %v6718_v59, 4 }
 0x88f   :  { %v5460_v31 = vadd.f32 %v13684_v62, %v5448_v29 }
 0x890   :  { %v5359_v4 = vpop.f32.mrf.mxu1 }
 0x891   :  { %v5468_v61 = vmax.f32 %v5460_v31, 0.0  ;;  %v5370_v56 = vadd.f32 %v5359_v4, %v5288_v26 }
 0x893   :  { %v6700_v7 = vmax.f32 %v5466_v40, %v5468_v61  ;;  %6123 = vmatmul.bf16.gmra.mxu1 %v13606_v57  ;;  %v6734_v40 = vsub.f32 1.0, %v6733_v46 }
 0x894   :  { %v5433_v45 = vpop.f32.mrf.mxu2  ;;  %v13702_v12 = vpop.f32.mrf.mxu3 }
 0x895   :  { %v5449_v36 = vadd.f32 %v5433_v45, %v5367_v16  ;;  %v13704_v9 = vpop.f32.mrf.mxu0  ;;  %v6735_v0 = vmul.f32 %v9475_v54, %v6734_v40 }
 0x897   :  { %v5461_v44 = vadd.f32 %v13684_v62, %v5449_v36  ;;  %v6736_v36 = vadd.f32 %v9475_v54, %v6735_v0 }
 0x898   :  { %v5361_v60 = vpop.f32.mrf.mxu1 }
 0x899   :  { %v5469_v5 = vmax.f32 %v5461_v44, 0.0  ;;  %6147 = vmatmul.bf16.gmra.mxu2 %v13589_v11  ;;  %6176 = vmatmul.bf16.gmra.mxu3 %v13589_v11  ;;  %v6720_v11 = vadd.f32 %v6719_v63, %v6718_v59  ;;  %v5289_v44 = vadd.f32 %v13668_v1, %v13671_v48 }
 0x89b   :  { %v6701_v8 = vmax.f32 %v5467_v19, %v5469_v5  ;;  %v6741_v35 = vadd.f32 %v5469_v5, %v5468_v61  ;;  %v6721_v10 = vrot.slane %v6720_v11, 2 }
 0x89c   :  { %v5436_v32 = vpop.f32.mrf.mxu2  ;;  %v13710_v26 = vpop.f32.mrf.mxu3 }
 0x89d   :  { %v6702_v2 = vmax.f32 %v6700_v7, %v6701_v8  ;;  %v5450_v15 = vadd.f32 %v5436_v32, %v5368_v41  ;;  %v13712_v20 = vpop.f32.mrf.mxu0  ;;  %v6722_v59 = vadd.f32 %v6721_v10, %v6720_v11  ;;  %v5371_v8 = vadd.f32 %v5361_v60, %v5289_v44 }
 0x89f   :  { %v5462_v55 = vadd.f32 %v13684_v62, %v5450_v15  ;;  %v6723_v45 = vrot.slane %v6722_v59, 1 }
 0x8a0   :  { %v13716_v28 = vpop.f32.mrf.mxu1 }
 0x8a1   :  { %v5470_v19 = vmax.f32 %v5462_v55, 0.0  ;;  %v6724_v58 = vadd.f32 %v6723_v45, %v6722_v59 }
 0x8a4   :  { %v5438_v53 = vpop.f32.mrf.mxu2  ;;  %v5947_v21 = vpop.f32.mrf.mxu3 }
 0x8a5   :  { %v5451_v37 = vadd.f32 %v5438_v53, %v5369_v39  ;;  %v5976_v6 = vpop.f32.mrf.mxu0  ;;  %v6703_v39 = vrot.slane %v6702_v2, 4  ;;  %v6189_v59 = vpack.c.bf16 %v5947_v21, %v13710_v26 }
 0x8a6   :  { %v6193_v0 = vpack.c.bf16 %v5976_v6, %v13712_v20  ;;  %v6192_v6 = vpack.c.bf16 %v13704_v9, %v13697_v24 }
 0x8a7   :  { %v5463_v41 = vadd.f32 %v13684_v62, %v5451_v37 }
 0x8a8   :  { %v13722_v23 = vpop.f32.mrf.mxu1 }
 0x8a9   :  { %v5471_v17 = vmax.f32 %v5463_v41, 0.0  ;;  %6152 = vmatmul.bf16.gmra.mxu2 %v13606_v57  ;;  %6181 = vmatmul.bf16.gmra.mxu3 %v13606_v57  ;;  %v6742_v57 = vrot.slane %v6741_v35, 4 }
 0x8ab   :  { %v6725_v49 = vadd.f32 %v5471_v17, %v5470_v19  ;;  %v6743_v53 = vadd.f32 %v6742_v57, %v6741_v35 }
 0x8ac   :  { %v5441_v29 = vpop.f32.mrf.mxu2  ;;  %v5950_v31 = vpop.f32.mrf.mxu3 }
 0x8ad   :  { %v6726_v13 = vrot.slane %v6725_v49, 4  ;;  %v5452_v61 = vadd.f32 %v5441_v29, %v5370_v56  ;;  %v5979_v16 = vpop.f32.mrf.mxu0  ;;  %v13729_v56 = vsel %vm6737_vm4, %v9475_v54, %v6736_v36  ;;  %v6744_v54 = vrot.slane %v6743_v53, 2 }
 0x8ae   :  { %v6739_v60 = vmul.f32 %v13729_v56, %v6724_v58 }
 0x8af   :  { %v6727_v7 = vadd.f32 %v6726_v13, %v6725_v49  ;;  %v5464_v4 = vadd.f32 %v13684_v62, %v5452_v61  ;;  %v6745_v26 = vadd.f32 %v6744_v54, %v6743_v53 }
 0x8b0   :  { %v13727_v63 = vpop.f32.mrf.mxu1 }
 0x8b1   :  { %v6728_v5 = vrot.slane %v6727_v7, 2  ;;  %v5472_v33 = vmax.f32 %v5464_v4, 0.0  ;;  %v6746_v36 = vrot.slane %v6745_v26, 1 }
 0x8b3   :  { %v6729_v32 = vadd.f32 %v6728_v5, %v6727_v7  ;;  %v6709_v15 = vmax.f32 %v5470_v19, %v5472_v33  ;;  %v6704_v19 = vmax.f32 %v6702_v2, %v6703_v39  ;;  %v6188_v2 = vpack.c.bf16 %v13702_v12, %v13695_v3 }
 0x8b4   :  { %v5443_v11 = vpop.f32.mrf.mxu2  ;;  %v5952_v46 = vpop.f32.mrf.mxu3  ;;  %v6187_v3 = vpack.c.bf16 %v13686_v34, %v13675_v18  ;;  %v6191_v5 = vpack.c.bf16 %v13689_v50, %v13677_v30  ;;  %v6747_v58 = vadd.f32 %v6746_v36, %v6745_v26  ;;  %v9478_v50 = vld [vmem:[#allocation4 + $0x20] sm:$0xff]  ;;  %v9482_v36 = vld [vmem:[#allocation4 + $0x30] sm:$0xff] }
 0x8b5   :  { %v6730_v55 = vrot.slane %v6729_v32, 1  ;;  %v5453_v37 = vadd.f32 %v5443_v11, %v5371_v8  ;;  %v6190_v41 = vpack.c.bf16 %v5952_v46, %v5950_v31  ;;  %v5981_v10 = vpop.f32.mrf.mxu0  ;;  %v6705_v7 = vrot.slane %v6704_v19, 2  ;;  %v9477_v11 = vld [vmem:[#allocation4] sm:$0xff] }
 0x8b6   :  { %v6194_v1 = vpack.c.bf16 %v5981_v10, %v5979_v16 }
 0x8b7   :  { %v6731_v48 = vadd.f32 %v6730_v55, %v6729_v32  ;;  %v5465_v40 = vadd.f32 %v13684_v62, %v5453_v37  ;;  %6228 = vmatpush.bf16.msra.mxu1 %v6190_v41  ;;  %v6706_v12 = vmax.f32 %v6704_v19, %v6705_v7  ;;  %v6755_v55 = vmul.f32 %v6747_v58, %v13729_v56 }
 0x8b8   :  { %6199 = vmatpush.bf16.msra.mxu0 %v6194_v1  ;;  %v13736_v13 = vpop.f32.mrf.mxu1 }
 0x8b9   :  { %v6740_v49 = vmul.f32 %v13729_v56, %v6731_v48  ;;  %v5473_v35 = vmax.f32 %v5465_v40, 0.0 }
 0x8bb   :  { %v6710_v29 = vmax.f32 %v5471_v17, %v5473_v35  ;;  %v6748_v31 = vadd.f32 %v5473_v35, %v5472_v33  ;;  %6229 = vmatpush.bf16.msra.mxu1 %v6189_v59  ;;  %v13738_v62 = vsel %vm6790_vm5, %v6740_v49, %v6739_v60 }
 0x8bc   :  { %6200 = vmatpush.bf16.msra.mxu0 %v6193_v0  ;;  %v13742_v61 = vpop.f32.mrf.mxu2  ;;  %v13744_v16 = vpop.f32.mrf.mxu3  ;;  %v9479_v0 = vld [vmem:[#allocation4 + $0x8] sm:$0xff] }
 0x8bd   :  { %v6711_v21 = vmax.f32 %v6709_v15, %v6710_v29  ;;  %v6749_v4 = vrot.slane %v6748_v31, 4  ;;  %v13746_v20 = vpop.f32.mrf.mxu0  ;;  %v6707_v15 = vrot.slane %v6706_v12, 1 }
 0x8bf   :  { %v6712_v17 = vrot.slane %v6711_v21, 4  ;;  %v6750_v45 = vadd.f32 %v6749_v4, %v6748_v31  ;;  %6230 = vmatpush.bf16.msra.mxu1 %v6188_v2  ;;  %v6708_v53 = vmax.f32 %v6706_v12, %v6707_v15  ;;  %v9481_v12 = vld [vmem:[#allocation4 + $0x10] sm:$0xff] }
 0x8c0   :  { %6201 = vmatpush.bf16.msra.mxu0 %v6192_v6  ;;  %v6003_v32 = vpop.f32.mrf.mxu1  ;;  %v6254_v6 = vpack.c.bf16 %v13736_v13, %v13727_v63  ;;  %v9483_v63 = vld [vmem:[#allocation4 + $0x40] sm:$0xff] }
 0x8c1   :  { %v6713_v44 = vmax.f32 %v6711_v21, %v6712_v17  ;;  %v6751_v57 = vrot.slane %v6750_v45, 2 }
 0x8c3   :  { %v6714_v33 = vrot.slane %v6713_v44, 2  ;;  %v6752_v8 = vadd.f32 %v6751_v57, %v6750_v45  ;;  %6231 = vmatpush.bf16.msra.mxu1 %v6187_v3 }
 0x8c4   :  { %6202 = vmatpush.bf16.msra.mxu0 %v6191_v5  ;;  %v13754_v24 = vpop.f32.mrf.mxu2  ;;  %v13756_v9 = vpop.f32.mrf.mxu3 }
 0x8c5   :  { %v6715_v18 = vmax.f32 %v6713_v44, %v6714_v33  ;;  %v6753_v34 = vrot.slane %v6752_v8, 1  ;;  %v13758_v39 = vpop.f32.mrf.mxu0  ;;  %v6253_v44 = vpack.c.bf16 %v13722_v23, %v13716_v28  ;;  %v9485_v28 = vld [vmem:[#allocation4 + $0x38] sm:$0xff] }
 0x8c6   :  { %8899 = vmatmul.msk.bf16.vlgmr.msra.gmra.mxu1 %vm710_vm3, %v9477_v11 }
 0x8c7   :  { %v6716_v46 = vrot.slane %v6715_v18, 1  ;;  %v6754_v30 = vadd.f32 %v6753_v34, %v6752_v8  ;;  %8895 = vmatmul.msk.bf16.vlgmr.msra.gmra.mxu0 %vm710_vm3, %v9478_v50 }
 0x8c8   :  { %v6005_v10 = vpop.f32.mrf.mxu1 }
 0x8c9   :  { %v6717_v37 = vmax.f32 %v6715_v18, %v6716_v46  ;;  %v6756_v41 = vmul.f32 %v6754_v30, %v13729_v56  ;;  %v9480_v56 = vld [vmem:[#allocation4 + $0x28] sm:$0xff]  ;;  %v6255_v21 = vpack.c.bf16 %v6005_v10, %v6003_v32  ;;  %v9484_v46 = vld [vmem:[#allocation4 + $0x18] sm:$0xff] }
 0x8cb   :  { %v13764_v1 = vsel %vm6785_vm7, %v6717_v37, %v6708_v53  ;;  %v13767_v48 = vsel %vm6777_vm6, %v6756_v41, %v6755_v55 }
 0x8cc   :  { %v13769_v40 = vpop.f32.mrf.mxu2  ;;  %v13771_v60 = vpop.f32.mrf.mxu3 }
 0x8cd   :  { %v13773_v19 = vpop.f32.mrf.mxu0 }
 0x8d0   :  { %v6008_v54 = vpop.f32.mrf.mxu1 }
 0x8d4   :  { %v6029_v49 = vpop.f32.mrf.mxu2  ;;  %v6058_v59 = vpop.f32.mrf.mxu3 }
 0x8d5   :  { %v6087_v35 = vpop.f32.mrf.mxu0  ;;  %v6295_v41 = vpack.c.bf16 %v6029_v49, %v13769_v40  ;;  %v6336_v10 = vpack.c.bf16 %v6058_v59, %v13771_v60  ;;  %v9488_v59 = vld [vmem:[#allocation4 + $0xa0] sm:$0xff] }
 0x8d6   :  { %8900 = vmatmul.msk.bf16.gmra.mxu1 %vm710_vm3, %v9479_v0  ;;  %v6377_v0 = vpack.c.bf16 %v6087_v35, %v13773_v19  ;;  %v9487_v19 = vld [vmem:[#allocation4 + $0x60] sm:$0xff]  ;;  %v9490_v35 = vld [vmem:[#allocation4 + $0x50] sm:$0xff] }
 0x8d7   :  { %8896 = vmatmul.msk.bf16.gmra.mxu0 %vm710_vm3, %v9480_v56  ;;  %v6294_v56 = vpack.c.bf16 %v13754_v24, %v13742_v61  ;;  %v9439_v61 = vld [vmem:[%s14005_s16 + $0x38] sm:$0xff] }
 0x8d8   :  { %v6010_v29 = vpop.f32.mrf.mxu1 }
 0x8d9   :  { %v6256_v31 = vpack.c.bf16 %v6010_v29, %v6008_v54  ;;  %v9486_v54 = vld [vmem:[#allocation4 + $0x48] sm:$0xff]  ;;  %v6335_v29 = vpack.c.bf16 %v13756_v9, %v13744_v16  ;;  %v9489_v16 = vld [vmem:[#allocation4 + $0x80] sm:$0xff] }
 0x8db   :  { %6261 = vmatpush.bf16.msra.mxu2 %v6256_v31  ;;  %v6376_v31 = vpack.c.bf16 %v13758_v39, %v13746_v20  ;;  %v9438_v20 = vld [vmem:[%s14005_s16 + $0x30] sm:$0xff] }
 0x8dc   :  { %v6032_v2 = vpop.f32.mrf.mxu2  ;;  %v6061_v7 = vpop.f32.mrf.mxu3 }
 0x8dd   :  { %v6090_v26 = vpop.f32.mrf.mxu0 }
 0x8df   :  { %6262 = vmatpush.bf16.msra.mxu2 %v6255_v21 }
 0x8e0   :  { %v13777_v4 = vpop.f32.mrf.mxu1 }
 0x8e3   :  { %6263 = vmatpush.bf16.msra.mxu2 %v6254_v6 }
 0x8e4   :  { %v6034_v17 = vpop.f32.mrf.mxu2  ;;  %v6063_v45 = vpop.f32.mrf.mxu3 }
 0x8e5   :  { %v6092_v3 = vpop.f32.mrf.mxu0  ;;  %v6296_v23 = vpack.c.bf16 %v6034_v17, %v6032_v2  ;;  %v6337_v30 = vpack.c.bf16 %v6063_v45, %v6061_v7  ;;  %v9437_v2 = vld [vmem:[%s14005_s16 + $0x28] sm:$0xff]  ;;  %v9436_v7 = vld [vmem:[%s14005_s16 + $0x20] sm:$0xff]  ;;  %v9491_v17 = vld [vmem:[#allocation4 + $0x68] sm:$0xff] }
 0x8e6   :  { %8901 = vmatmul.msk.bf16.gmra.mxu1 %vm710_vm3, %v9481_v12  ;;  %v6378_v50 = vpack.c.bf16 %v6092_v3, %v6090_v26  ;;  %v9492_v45 = vld [vmem:[#allocation4 + $0xa8] sm:$0xff] }
 0x8e7   :  { %8897 = vmatmul.msk.bf16.gmra.mxu0 %vm710_vm3, %v9482_v36  ;;  %6264 = vmatpush.bf16.msra.mxu2 %v6253_v44  ;;  %v9435_v3 = vld [vmem:[%s14005_s16 + $0x18] sm:$0xff]  ;;  %v9434_v44 = vld [vmem:[%s14005_s16 + $0x10] sm:$0xff] }
 0x8e8   :  { %v13785_v57 = vpop.f32.mrf.mxu1  ;;  %v9493_v12 = vld [vmem:[#allocation4 + $0x88] sm:$0xff] }
 0x8ea   :  { %8903 = vmatmul.msk.bf16.vlgmr.msra.gmra.mxu2 %vm710_vm3, %v9483_v63  ;;  %v9494_v63 = vld [vmem:[#allocation4 + $0x58] sm:$0xff] }
 0x8ec   :  { %v6037_v5 = vpop.f32.mrf.mxu2  ;;  %v6066_v33 = vpop.f32.mrf.mxu3 }
 0x8ed   :  { %v6095_v8 = vpop.f32.mrf.mxu0 }
 0x8f0   :  { %v13788_v13 = vpop.f32.mrf.mxu1 }
 0x8f4   :  { %v6039_v32 = vpop.f32.mrf.mxu2  ;;  %v6068_v15 = vpop.f32.mrf.mxu3 }
 0x8f5   :  { %v6297_v58 = vpack.c.bf16 %v6039_v32, %v6037_v5  ;;  %v6338_v18 = vpack.c.bf16 %v6068_v15, %v6066_v33  ;;  %v6097_v34 = vpop.f32.mrf.mxu0  ;;  %v9433_v15 = vld [vmem:[%s14005_s16 + $0x8] sm:$0xff] }
 0x8f6   :  { %v6379_v11 = vpack.c.bf16 %v6097_v34, %v6095_v8  ;;  %8902 = vmatmul.msk.bf16.gmra.mxu1 %vm710_vm3, %v9484_v46  ;;  %v9495_v46 = vld [vmem:[#allocation4 + $0x70] sm:$0xff] }
 0x8f7   :  { %6302 = vmatpush.bf16.msra.mxu3 %v6297_v58  ;;  %6343 = vmatpush.bf16.msrb.mxu0 %v6338_v18 }
 0x8f8   :  { %6384 = vmatpush.bf16.msrb.mxu1 %v6379_v11  ;;  %8898 = vmatmul.msk.bf16.gmra.mxu0 %vm710_vm3, %v9485_v28  ;;  %v13792_v53 = vpop.f32.mrf.mxu1  ;;  %v9432_v11 = vld [vmem:[%s14005_s16] sm:$0xff]  ;;  %v3793_v28 = vadd.f32 %v13347_v27, %v13345_v38 }
 0x8f9   :  { %v6418_v58 = vpack.c.bf16 %v13792_v53, %v13788_v13  ;;  %v9497_v13 = vld [vmem:[#allocation4 + $0x90] sm:$0xff] }
 0x8fa   :  { %8904 = vmatmul.msk.bf16.gmra.mxu2 %vm710_vm3, %v9486_v54 }
 0x8fb   :  { %6303 = vmatpush.bf16.msra.mxu3 %v6296_v23  ;;  %6344 = vmatpush.bf16.msrb.mxu0 %v6337_v30  ;;  %v9496_v23 = vld [vmem:[#allocation4 + $0xb0] sm:$0xff]  ;;  %v6417_v30 = vpack.c.bf16 %v13785_v57, %v13777_v4 }
 0x8fc   :  { %6385 = vmatpush.bf16.msrb.mxu1 %v6378_v50  ;;  %v13794_v55 = vpop.f32.mrf.mxu2  ;;  %v13796_v37 = vpop.f32.mrf.mxu3  ;;  %v3825_v50 = vadd.f32 %v13418_v42, %v3793_v28 }
 0x8fe   :  { %v3856_v38 = vadd.f32 %v13424_v52, %v3825_v50 }
 0x8ff   :  { %6304 = vmatpush.bf16.msra.mxu3 %v6295_v41  ;;  %6345 = vmatpush.bf16.msrb.mxu0 %v6336_v10  ;;  %v9498_v10 = vld [vmem:[#allocation4 + $0xc0] sm:$0xff] }
 0x900   :  { %6386 = vmatpush.bf16.msrb.mxu1 %v6377_v0  ;;  %v6119_v40 = vpop.f32.mrf.mxu1  ;;  %v3887_v27 = vadd.f32 %v13429_v43, %v3856_v38 }
 0x902   :  { %v3918_v54 = vadd.f32 %v13435_v22, %v3887_v27  ;;  %v9501_v22 = vld [vmem:[#allocation4 + $0x98] sm:$0xff] }
 0x903   :  { %6305 = vmatpush.bf16.msra.mxu3 %v6294_v56  ;;  %6346 = vmatpush.bf16.msrb.mxu0 %v6335_v29 }
 0x904   :  { %6387 = vmatpush.bf16.msrb.mxu1 %v6376_v31  ;;  %v13808_v60 = vpop.f32.mrf.mxu2  ;;  %v13810_v49 = vpop.f32.mrf.mxu3  ;;  %v3949_v57 = vadd.f32 %v13444_v51, %v3918_v54  ;;  %v9499_v31 = vld [vmem:[#allocation4 + $0x78] sm:$0xff]  ;;  %v9467_v51 = vld [vmem:[%s14394_s22] ss:$0 sm:$0xff] }
 0x906   :  { %8907 = vmatmul.msk.bf16.vlgmr.msra.gmra.mxu3 %vm710_vm3, %v9487_v19  ;;  %v3980_v42 = vadd.f32 %v13446_v25, %v3949_v57 }
 0x907   :  { %8915 = vmatmul.msk.bf16.vlgmr.msrb.gmra.mxu1 %vm710_vm3, %v9488_v59 }
 0x908   :  { %8911 = vmatmul.msk.bf16.vlgmr.msrb.gmra.mxu0 %vm710_vm3, %v9489_v16  ;;  %6629 = vmatpush.bf16.msra.mxu1 %v9439_v61  ;;  %v6121_v24 = vpop.f32.mrf.mxu1  ;;  %v4011_v52 = vadd.f32 %v13461_v14, %v3980_v42  ;;  %v9502_v61 = vld [vmem:[#allocation4 + $0xc8] sm:$0xff]  ;;  %v13883_v16 = vadd.f32 %v9467_v51, %v13454_v47 }
 0x909   :  { %v6419_v32 = vpack.c.bf16 %v6121_v24, %v6119_v40  ;;  %v9500_v40 = vld [vmem:[#allocation4 + $0xb8] sm:$0xff]  ;;  %v6458_v24 = vpack.c.bf16 %v13808_v60, %v13794_v55  ;;  %v9504_v55 = vld [vmem:[#allocation4 + $0x100] sm:$0xff] }
 0x90a   :  { %8905 = vmatmul.msk.bf16.gmra.mxu2 %vm710_vm3, %v9490_v35  ;;  %v13875_v59 = vadd.f32 %v9467_v51, %v4011_v52  ;;  %v6499_v35 = vpack.c.bf16 %v13810_v49, %v13796_v37  ;;  %v9505_v49 = vld [vmem:[#allocation4 + $0xd0] sm:$0xff] }
 0x90c   :  { %v13821_v9 = vpop.f32.mrf.mxu2  ;;  %v13823_v39 = vpop.f32.mrf.mxu3  ;;  %6630 = vmatpush.bf16.msra.mxu1 %v9438_v20  ;;  %v4019_v20 = vmax.f32 %v13875_v59, 0.0 }
 0x910   :  { %6631 = vmatpush.bf16.msra.mxu1 %v9437_v2  ;;  %v6124_v26 = vpop.f32.mrf.mxu1 }
 0x914   :  { %v13832_v21 = vpop.f32.mrf.mxu2  ;;  %v13834_v6 = vpop.f32.mrf.mxu3  ;;  %6632 = vmatpush.bf16.msra.mxu1 %v9436_v7 }
 0x915   :  { %v6459_v25 = vpack.c.bf16 %v13832_v21, %v13821_v9  ;;  %v6500_v14 = vpack.c.bf16 %v13834_v6, %v13823_v39  ;;  %v4018_v9 = vmax.f32 %v13883_v16, 0.0 }
 0x916   :  { %8908 = vmatmul.msk.bf16.gmra.mxu3 %vm710_vm3, %v9491_v17 }
 0x917   :  { %8916 = vmatmul.msk.bf16.gmra.mxu1 %vm710_vm3, %v9492_v45  ;;  %v6577_v47 = vpack.c.bf16 %v4019_v20, %v4018_v9 }
 0x918   :  { %8912 = vmatmul.msk.bf16.gmra.mxu0 %vm710_vm3, %v9493_v12  ;;  %6633 = vmatpush.bf16.msra.mxu1 %v9435_v3  ;;  %v6126_v36 = vpop.f32.mrf.mxu1  ;;  %v9506_v3 = vld [vmem:[#allocation4 + $0xe8] sm:$0xff] }
 0x919   :  { %v6420_v5 = vpack.c.bf16 %v6126_v36, %v6124_v26  ;;  %v9503_v26 = vld [vmem:[#allocation4 + $0xe0] sm:$0xff]  ;;  %v9507_v12 = vld [vmem:[#allocation4 + $0x108] sm:$0xff] }
 0x91a   :  { %8906 = vmatmul.msk.bf16.gmra.mxu2 %vm710_vm3, %v9494_v63 }
 0x91b   :  { %6425 = vmatpush.bf16.msrb.mxu2 %v6420_v5  ;;  %v9508_v5 = vld [vmem:[#allocation4 + $0xd8] sm:$0xff] }
 0x91c   :  { %v6148_v33 = vpop.f32.mrf.mxu2  ;;  %v6177_v8 = vpop.f32.mrf.mxu3  ;;  %6634 = vmatpush.bf16.msra.mxu1 %v9434_v44 }
 0x91f   :  { %6426 = vmatpush.bf16.msrb.mxu2 %v6419_v32 }
 0x920   :  { %6635 = vmatpush.bf16.msra.mxu1 %v9433_v15  ;;  %v9509_v15 = vld [vmem:[#allocation4 + $0xf0] sm:$0xff] }
 0x923   :  { %6427 = vmatpush.bf16.msrb.mxu2 %v6418_v58  ;;  %v9510_v58 = vld [vmem:[#allocation4 + $0x110] sm:$0xff] }
 0x924   :  { %v6150_v18 = vpop.f32.mrf.mxu2  ;;  %v6179_v34 = vpop.f32.mrf.mxu3  ;;  %6636 = vmatpush.bf16.msra.mxu1 %v9432_v11 }
 0x925   :  { %v6460_v43 = vpack.c.bf16 %v6150_v18, %v6148_v33  ;;  %v6501_v19 = vpack.c.bf16 %v6179_v34, %v6177_v8 }
 0x926   :  { %8909 = vmatmul.msk.bf16.gmra.mxu3 %vm710_vm3, %v9495_v46 }
 0x927   :  { %8917 = vmatmul.msk.bf16.gmra.mxu1 %vm710_vm3, %v9496_v23  ;;  %6428 = vmatpush.bf16.msrb.mxu2 %v6417_v30 }
 0x928   :  { %8913 = vmatmul.msk.bf16.gmra.mxu0 %vm710_vm3, %v9497_v13  ;;  %v9511_v13 = vld [vmem:[#allocation4 + $0xf8] sm:$0xff] }
 0x92a   :  { %8919 = vmatmul.msk.bf16.vlgmr.msrb.gmra.mxu2 %vm710_vm3, %v9498_v10  ;;  %v9512_v10 = vld [vmem:[#allocation4 + $0x118] sm:$0xff] }
 0x92c   :  { %v6153_v53 = vpop.f32.mrf.mxu2  ;;  %v6182_v41 = vpop.f32.mrf.mxu3 }
 0x934   :  { %v6155_v0 = vpop.f32.mrf.mxu2  ;;  %v6184_v4 = vpop.f32.mrf.mxu3 }
 0x935   :  { %v6461_v56 = vpack.c.bf16 %v6155_v0, %v6153_v53  ;;  %v6502_v29 = vpack.c.bf16 %v6184_v4, %v6182_v41 }
 0x936   :  { %8910 = vmatmul.msk.bf16.gmra.mxu3 %vm710_vm3, %v9499_v31 }
 0x937   :  { %8918 = vmatmul.msk.bf16.gmra.mxu1 %vm710_vm3, %v9500_v40  ;;  %6466 = vmatpush.bf16.msrb.mxu3 %v6461_v56 }
 0x938   :  { %6507 = vmatpush.bf16.msra.mxu0 %v6502_v29 }
 0x939   :  { %8914 = vmatmul.msk.bf16.gmra.mxu0 %vm710_vm3, %v9501_v22 }
 0x93a   :  { %8920 = vmatmul.msk.bf16.gmra.mxu2 %vm710_vm3, %v9502_v61 }
 0x93b   :  { %6467 = vmatpush.bf16.msrb.mxu3 %v6460_v43 }
 0x93c   :  { %6508 = vmatpush.bf16.msra.mxu0 %v6501_v19 }
 0x93f   :  { %6468 = vmatpush.bf16.msrb.mxu3 %v6459_v25 }
 0x940   :  { %6509 = vmatpush.bf16.msra.mxu0 %v6500_v14 }
 0x943   :  { %v6233_v2 = vpop.f32.mrf.mxu1  ;;  %6469 = vmatpush.bf16.msrb.mxu3 %v6458_v24 }
 0x944   :  { %6510 = vmatpush.bf16.msra.mxu0 %v6499_v35  ;;  %v6204_v7 = vpop.f32.mrf.mxu0 }
 0x945   :  { %v6234_v39 = vadd.f32 %v6233_v2, %v6204_v7 }
 0x946   :  { %8923 = vmatmul.msk.bf16.vlgmr.msrb.gmra.mxu3 %vm710_vm3, %v9503_v26 }
 0x947   :  { %6637 = vmatmul.bf16.vlgmr.msra.gmra.mxu1 %v6577_v47 }
 0x949   :  { %8927 = vmatmul.msk.bf16.vlgmr.msra.gmra.mxu0 %vm710_vm3, %v9504_v55 }
 0x94a   :  { %8921 = vmatmul.msk.bf16.gmra.mxu2 %vm710_vm3, %v9505_v49 }
 0x94b   :  { %v6235_v37 = vpop.f32.mrf.mxu1 }
 0x94c   :  { %v6206_v60 = vpop.f32.mrf.mxu0 }
 0x94d   :  { %v6236_v21 = vadd.f32 %v6235_v37, %v6206_v60 }
 0x953   :  { %v6238_v6 = vpop.f32.mrf.mxu1 }
 0x954   :  { %v6209_v17 = vpop.f32.mrf.mxu0 }
 0x955   :  { %v6239_v45 = vadd.f32 %v6238_v6, %v6209_v17 }
 0x956   :  { %8924 = vmatmul.msk.bf16.gmra.mxu3 %vm710_vm3, %v9506_v3 }
 0x959   :  { %8928 = vmatmul.msk.bf16.gmra.mxu0 %vm710_vm3, %v9507_v12 }
 0x95a   :  { %8922 = vmatmul.msk.bf16.gmra.mxu2 %vm710_vm3, %v9508_v5 }
 0x95b   :  { %v6240_v36 = vpop.f32.mrf.mxu1 }
 0x95c   :  { %v6211_v44 = vpop.f32.mrf.mxu0 }
 0x95d   :  { %v6241_v33 = vadd.f32 %v6240_v36, %v6211_v44 }
 0x963   :  { %v6243_v8 = vpop.f32.mrf.mxu1 }
 0x964   :  { %v6214_v63 = vpop.f32.mrf.mxu0 }
 0x965   :  { %v6244_v32 = vadd.f32 %v6243_v8, %v6214_v63 }
 0x966   :  { %8925 = vmatmul.msk.bf16.gmra.mxu3 %vm710_vm3, %v9509_v15  ;;  %v9441_v15 = vld [vmem:[#allocation7 + $0x8] sm:$0xff] }
 0x967   :  { %6676 = vmatpush.bf16.msrb.mxu1 %v9441_v15 }
 0x969   :  { %8929 = vmatmul.msk.bf16.gmra.mxu0 %vm710_vm3, %v9510_v58 }
 0x96b   :  { %v6245_v18 = vpop.f32.mrf.mxu1 }
 0x96c   :  { %v6216_v34 = vpop.f32.mrf.mxu0 }
 0x96d   :  { %v6246_v11 = vadd.f32 %v6245_v18, %v6216_v34  ;;  %v6266_v46 = vpop.f32.mrf.mxu2 }
 0x96e   :  { %v6286_v28 = vadd.f32 %v6266_v46, %v6234_v39 }
 0x973   :  { %v6248_v23 = vpop.f32.mrf.mxu1 }
 0x975   :  { %v6219_v30 = vpop.f32.mrf.mxu0  ;;  %v6268_v53 = vpop.f32.mrf.mxu2 }
 0x976   :  { %8926 = vmatmul.msk.bf16.gmra.mxu3 %vm710_vm3, %v9511_v13  ;;  %v6249_v50 = vadd.f32 %v6248_v23, %v6219_v30  ;;  %v6287_v41 = vadd.f32 %v6268_v53, %v6236_v21 }
 0x979   :  { %8930 = vmatmul.msk.bf16.gmra.mxu0 %vm710_vm3, %v9512_v10 }
 0x97b   :  { %v6250_v38 = vpop.f32.mrf.mxu1 }
 0x97d   :  { %v6221_v27 = vpop.f32.mrf.mxu0  ;;  %v6271_v0 = vpop.f32.mrf.mxu2 }
 0x97e   :  { %v6251_v54 = vadd.f32 %v6250_v38, %v6221_v27  ;;  %v6288_v4 = vadd.f32 %v6271_v0, %v6239_v45 }
 0x984   :  { %v6389_v57 = vpop.f32.mrf.mxu1 }
 0x985   :  { %v6348_v56 = vpop.f32.mrf.mxu0  ;;  %v6273_v29 = vpop.f32.mrf.mxu2 }
 0x986   :  { %v6289_v31 = vadd.f32 %v6273_v29, %v6241_v33 }
 0x989   :  { %v6307_v42 = vpop.f32.mrf.mxu3 }
 0x98a   :  { %v6327_v40 = vadd.f32 %v6307_v42, %v6286_v28 }
 0x98c   :  { %v6368_v52 = vadd.f32 %v6348_v56, %v6327_v40  ;;  %v6391_v43 = vpop.f32.mrf.mxu1 }
 0x98d   :  { %v6350_v22 = vpop.f32.mrf.mxu0  ;;  %v6276_v51 = vpop.f32.mrf.mxu2 }
 0x98e   :  { %v13905_v19 = vadd.f32 %v6389_v57, %v6368_v52  ;;  %v6290_v25 = vadd.f32 %v6276_v51, %v6244_v32 }
 0x991   :  { %v6309_v61 = vpop.f32.mrf.mxu3 }
 0x992   :  { %v6328_v14 = vadd.f32 %v6309_v61, %v6287_v41 }
 0x994   :  { %v6369_v24 = vadd.f32 %v6350_v22, %v6328_v14  ;;  %v6394_v35 = vpop.f32.mrf.mxu1  ;;  %v9469_v22 = vld [vmem:[%s14006_s17] ss:$0 sm:$0xff] }
 0x995   :  { %v6353_v2 = vpop.f32.mrf.mxu0  ;;  %v6278_v47 = vpop.f32.mrf.mxu2 }
 0x996   :  { %v13907_v7 = vadd.f32 %v6391_v43, %v6369_v24  ;;  %v6291_v39 = vadd.f32 %v6278_v47, %v6246_v11  ;;  %v9440_v11 = vld [vmem:[#allocation7] sm:$0xff] }
 0x997   :  { %6677 = vmatpush.bf16.msrb.mxu1 %v9440_v11 }
 0x999   :  { %v6312_v26 = vpop.f32.mrf.mxu3 }
 0x99a   :  { %v6329_v55 = vadd.f32 %v6312_v26, %v6288_v4 }
 0x99c   :  { %v6370_v37 = vadd.f32 %v6353_v2, %v6329_v55  ;;  %v6396_v60 = vpop.f32.mrf.mxu1 }
 0x99d   :  { %v6355_v49 = vpop.f32.mrf.mxu0  ;;  %v6281_v6 = vpop.f32.mrf.mxu2 }
 0x99e   :  { %v6411_v21 = vadd.f32 %v6394_v35, %v6370_v37  ;;  %v6292_v17 = vadd.f32 %v6281_v6, %v6249_v50 }
 0x9a1   :  { %v6314_v45 = vpop.f32.mrf.mxu3 }
 0x9a2   :  { %v6330_v3 = vadd.f32 %v6314_v45, %v6289_v31 }
 0x9a4   :  { %v6371_v12 = vadd.f32 %v6355_v49, %v6330_v3  ;;  %v6399_v36 = vpop.f32.mrf.mxu1 }
 0x9a5   :  { %v6358_v44 = vpop.f32.mrf.mxu0  ;;  %v6283_v58 = vpop.f32.mrf.mxu2 }
 0x9a6   :  { %v6412_v5 = vadd.f32 %v6396_v60, %v6371_v12  ;;  %v6293_v57 = vadd.f32 %v6283_v58, %v6251_v54 }
 0x9a9   :  { %v6317_v33 = vpop.f32.mrf.mxu3 }
 0x9aa   :  { %v6331_v8 = vadd.f32 %v6317_v33, %v6290_v25 }
 0x9ac   :  { %v6372_v63 = vadd.f32 %v6358_v44, %v6331_v8  ;;  %v6401_v32 = vpop.f32.mrf.mxu1 }
 0x9ad   :  { %v6360_v18 = vpop.f32.mrf.mxu0  ;;  %v6430_v53 = vpop.f32.mrf.mxu2 }
 0x9ae   :  { %v13909_v34 = vadd.f32 %v6399_v36, %v6372_v63  ;;  %v6450_v26 = vadd.f32 %v6430_v53, %v13905_v19 }
 0x9b1   :  { %v6319_v46 = vpop.f32.mrf.mxu3 }
 0x9b2   :  { %v6332_v28 = vadd.f32 %v6319_v46, %v6291_v39 }
 0x9b4   :  { %v6373_v23 = vadd.f32 %v6360_v18, %v6332_v28  ;;  %v6404_v30 = vpop.f32.mrf.mxu1 }
 0x9b5   :  { %v6432_v56 = vpop.f32.mrf.mxu2 }
 0x9b6   :  { %v6363_v13 = vpop.f32.mrf.mxu0  ;;  %v13911_v50 = vadd.f32 %v6401_v32, %v6373_v23  ;;  %v6451_v3 = vadd.f32 %v6432_v56, %v13907_v7 }
 0x9b9   :  { %v6322_v41 = vpop.f32.mrf.mxu3 }
 0x9ba   :  { %v6333_v10 = vadd.f32 %v6322_v41, %v6292_v17  ;;  %v9470_v17 = vld [vmem:[%s14004_s15] ss:$0 sm:$0xff] }
 0x9bc   :  { %v6374_v38 = vadd.f32 %v6363_v13, %v6333_v10  ;;  %v6406_v27 = vpop.f32.mrf.mxu1 }
 0x9bd   :  { %v6435_v25 = vpop.f32.mrf.mxu2 }
 0x9be   :  { %v6365_v0 = vpop.f32.mrf.mxu0  ;;  %v6415_v4 = vadd.f32 %v6404_v30, %v6374_v38  ;;  %v6452_v49 = vadd.f32 %v6435_v25, %v6411_v21 }
 0x9c1   :  { %v6324_v29 = vpop.f32.mrf.mxu3 }
 0x9c2   :  { %v6334_v31 = vadd.f32 %v6324_v29, %v6293_v57 }
 0x9c4   :  { %v6375_v42 = vadd.f32 %v6365_v0, %v6334_v31  ;;  %v6638_v40 = vpop.f32.mrf.mxu1 }
 0x9c5   :  { %v6639_v61 = vadd.f32 %v9469_v22, %v6638_v40  ;;  %v6437_v37 = vpop.f32.mrf.mxu2 }
 0x9c6   :  { %v6512_v52 = vpop.f32.mrf.mxu0  ;;  %v13913_v43 = vadd.f32 %v6406_v27, %v6375_v42  ;;  %v6453_v32 = vadd.f32 %v6437_v37, %v6412_v5 }
 0x9c7   :  { %v6643_v2 = vmax.f32 %v6639_v61, 0.0 }
 0x9c9   :  { %v6471_v51 = vpop.f32.mrf.mxu3 }
 0x9ca   :  { %v6491_v55 = vadd.f32 %v6471_v51, %v6450_v26 }
 0x9cc   :  { %v6640_v14 = vpop.f32.mrf.mxu1  ;;  %v6532_v6 = vadd.f32 %v6512_v52, %v6491_v55 }
 0x9cd   :  { %v6641_v24 = vadd.f32 %v9469_v22, %v6640_v14  ;;  %v6440_v19 = vpop.f32.mrf.mxu2 }
 0x9ce   :  { %v6514_v35 = vpop.f32.mrf.mxu0  ;;  %v6544_v36 = vadd.f32 %v9470_v17, %v6532_v6  ;;  %v6454_v5 = vadd.f32 %v6440_v19, %v13909_v34 }
 0x9cf   :  { %v6644_v54 = vmax.f32 %v6641_v24, 0.0 }
 0x9d0   :  { %v6552_v15 = vmax.f32 %v6544_v36, 0.0 }
 0x9d1   :  { %v6650_v47 = vpack.c.bf16 %v6644_v54, %v6643_v2  ;;  %v6473_v39 = vpop.f32.mrf.mxu3 }
 0x9d2   :  { %v6492_v44 = vadd.f32 %v6473_v39, %v6451_v3 }
 0x9d3   :  { %8971 = vmatmul.msk.bf16.vlgmr.msrb.gmra.mxu1 %vm6666_vm8, %v6650_v47 }
 0x9d4   :  { %v6533_v58 = vadd.f32 %v6514_v35, %v6492_v44 }
 0x9d5   :  { %v6442_v41 = vpop.f32.mrf.mxu2 }
 0x9d6   :  { %v6517_v60 = vpop.f32.mrf.mxu0  ;;  %v6545_v28 = vadd.f32 %v9470_v17, %v6533_v58  ;;  %v6455_v22 = vadd.f32 %v6442_v41, %v13911_v50  ;;  %v9471_v41 = vld [vmem:[%s14008_s19] ss:$0 sm:$0xff] }
 0x9d8   :  { %v6553_v53 = vmax.f32 %v6545_v28, 0.0  ;;  %v9447_v28 = vld [vmem:[%s14009_s20 + $0x28] sm:$0xff] }
 0x9d9   :  { %v6476_v45 = vpop.f32.mrf.mxu3 }
 0x9da   :  { %v6493_v12 = vadd.f32 %v6476_v45, %v6452_v49 }
 0x9dc   :  { %v6534_v33 = vadd.f32 %v6517_v60, %v6493_v12 }
 0x9dd   :  { %v6445_v56 = vpop.f32.mrf.mxu2 }
 0x9de   :  { %v6546_v8 = vadd.f32 %v9470_v17, %v6534_v33  ;;  %v6519_v63 = vpop.f32.mrf.mxu0  ;;  %v6456_v31 = vadd.f32 %v6445_v56, %v6415_v4 }
 0x9e0   :  { %v6554_v18 = vmax.f32 %v6546_v8, 0.0 }
 0x9e1   :  { %v6478_v21 = vpop.f32.mrf.mxu3 }
 0x9e2   :  { %v6757_v11 = vmax.f32 %v6552_v15, %v6554_v18  ;;  %v6494_v46 = vadd.f32 %v6478_v21, %v6453_v32 }
 0x9e4   :  { %v6535_v23 = vadd.f32 %v6519_v63, %v6494_v46  ;;  %v9448_v46 = vld [vmem:[%s14009_s20 + $0x30] sm:$0xff] }
 0x9e5   :  { %v6447_v24 = vpop.f32.mrf.mxu2 }
 0x9e6   :  { %v6547_v30 = vadd.f32 %v9470_v17, %v6535_v23  ;;  %v6522_v13 = vpop.f32.mrf.mxu0  ;;  %v6457_v2 = vadd.f32 %v6447_v24, %v13913_v43  ;;  %v9446_v23 = vld [vmem:[%s14009_s20 + $0x20] sm:$0xff] }
 0x9e8   :  { %v6555_v7 = vmax.f32 %v6547_v30, 0.0  ;;  %v9445_v30 = vld [vmem:[%s14009_s20 + $0x18] sm:$0xff] }
 0x9e9   :  { %v6481_v10 = vpop.f32.mrf.mxu3 }
 0x9ea   :  { %v6758_v38 = vmax.f32 %v6553_v53, %v6555_v7  ;;  %v6495_v29 = vadd.f32 %v6481_v10, %v6454_v5  ;;  %v9443_v53 = vld [vmem:[%s14009_s20 + $0x8] sm:$0xff]  ;;  %v9442_v7 = vld [vmem:[%s14009_s20] sm:$0xff] }
 0x9ec   :  { %v6759_v27 = vmax.f32 %v6757_v11, %v6758_v38  ;;  %v6536_v42 = vadd.f32 %v6522_v13, %v6495_v29  ;;  %v9449_v11 = vld [vmem:[%s14009_s20 + $0x38] sm:$0xff]  ;;  %v9444_v13 = vld [vmem:[%s14009_s20 + $0x10] sm:$0xff]  ;;  %v9451_v29 = vld [vmem:[#allocation9 + $0x8] sm:$0xff] }
 0x9ed   :  { %6871 = vmatpush.bf16.msra.mxu2 %v9449_v11 }
 0x9ee   :  { %v6524_v0 = vpop.f32.mrf.mxu0  ;;  %v6548_v25 = vadd.f32 %v9470_v17, %v6536_v42  ;;  %v6760_v37 = vrot.slane %v6759_v27, 4 }
 0x9f0   :  { %v6556_v54 = vmax.f32 %v6548_v25, 0.0  ;;  %v6761_v3 = vmax.f32 %v6759_v27, %v6760_v37  ;;  %v9453_v27 = vld [vmem:[#allocation9 + $0x18] sm:$0xff] }
 0x9f1   :  { %v6483_v57 = vpop.f32.mrf.mxu3  ;;  %6872 = vmatpush.bf16.msra.mxu2 %v9448_v46  ;;  %6938 = vmatpush.bf16.msra.mxu3 %v9453_v27 }
 0x9f2   :  { %v6496_v61 = vadd.f32 %v6483_v57, %v6455_v22  ;;  %v6762_v44 = vrot.slane %v6761_v3, 2  ;;  %v9452_v57 = vld [vmem:[#allocation9 + $0x10] sm:$0xff] }
 0x9f4   :  { %v6537_v47 = vadd.f32 %v6524_v0, %v6496_v61  ;;  %v6763_v8 = vmax.f32 %v6761_v3, %v6762_v44 }
 0x9f5   :  { %6873 = vmatpush.bf16.msra.mxu2 %v9447_v28  ;;  %6939 = vmatpush.bf16.msra.mxu3 %v9452_v57 }
 0x9f6   :  { %v6527_v52 = vpop.f32.mrf.mxu0  ;;  %v6549_v60 = vadd.f32 %v9470_v17, %v6537_v47  ;;  %v6764_v19 = vrot.slane %v6763_v8, 1 }
 0x9f8   :  { %v6557_v50 = vmax.f32 %v6549_v60, 0.0  ;;  %v6765_v58 = vmax.f32 %v6763_v8, %v6764_v19 }
 0x9f9   :  { %v6486_v40 = vpop.f32.mrf.mxu3  ;;  %6874 = vmatpush.bf16.msra.mxu2 %v9446_v23  ;;  %6940 = vmatpush.bf16.msra.mxu3 %v9451_v29 }
 0x9fa   :  { %v6497_v51 = vadd.f32 %v6486_v40, %v6456_v31 }
 0x9fc   :  { %v6538_v14 = vadd.f32 %v6527_v52, %v6497_v51 }
 0x9fd   :  { %6875 = vmatpush.bf16.msra.mxu2 %v9445_v30 }
 0x9fe   :  { %v6550_v35 = vadd.f32 %v9470_v17, %v6538_v14  ;;  %v6529_v4 = vpop.f32.mrf.mxu0 }
 0xa00   :  { %v6558_v39 = vmax.f32 %v6550_v35, 0.0 }
 0xa01   :  { %v6488_v34 = vpop.f32.mrf.mxu3  ;;  %6876 = vmatpush.bf16.msra.mxu2 %v9444_v13 }
 0xa02   :  { %v6766_v26 = vmax.f32 %v6556_v54, %v6558_v39  ;;  %v6498_v55 = vadd.f32 %v6488_v34, %v6457_v2 }
 0xa04   :  { %v6539_v49 = vadd.f32 %v6529_v4, %v6498_v55  ;;  %v9450_v55 = vld [vmem:[#allocation9] sm:$0xff] }
 0xa05   :  { %6877 = vmatpush.bf16.msra.mxu2 %v9443_v53  ;;  %6941 = vmatpush.bf16.msra.mxu3 %v9450_v55 }
 0xa06   :  { %v6551_v6 = vadd.f32 %v9470_v17, %v6539_v49  ;;  %v9472_v49 = vld [vmem:[%s14010_s21] ss:$0 sm:$0xff] }
 0xa08   :  { %v6559_v45 = vmax.f32 %v6551_v6, 0.0 }
 0xa09   :  { %6878 = vmatpush.bf16.msra.mxu2 %v9442_v7 }
 0xa0a   :  { %v6767_v12 = vmax.f32 %v6557_v50, %v6559_v45  ;;  %v6948_v45 = vld [vmem:[%s14013_s24] sm:$0xf] }
 0xa0c   :  { %v6768_v36 = vmax.f32 %v6766_v26, %v6767_v12  ;;  %v6950_v12 = vld [vmem:[%s14014_s25] sm:$0xf] }
 0xa0e   :  { %v6769_v33 = vrot.slane %v6768_v36, 4 }
 0xa10   :  { %v6770_v43 = vmax.f32 %v6768_v36, %v6769_v33 }
 0xa12   :  { %v6771_v63 = vrot.slane %v6770_v43, 2 }
 0xa14   :  { %v6772_v32 = vmax.f32 %v6770_v43, %v6771_v63 }
 0xa16   :  { %v6773_v15 = vrot.slane %v6772_v32, 1 }
 0xa18   :  { %v6774_v18 = vmax.f32 %v6772_v32, %v6773_v15 }
 0xa1a   :  { %v6889_v21 = vsel %vm6780_vm9, %v6774_v18, %v6765_v58  ;;  %v6887_v17 = vsel %vm6777_vm6, %v6774_v18, %v6765_v58 }
 0xa1b   :  { %6890 = vrot.lane.b32.xlu0 %v6889_v21, %s9640_s9 }
 0xa50   :  { %v6679_v10 = vpop.f32.mrf.mxu1 }
 0xa51   :  { %v6680_v38 = vadd.f32 %v9471_v41, %v6679_v10 }
 0xa53   :  { %v6684_v0 = vadd.f32 %v6680_v38, %v4018_v9 }
 0xa55   :  { %v6686_v5 = vmax.f32 %v6684_v0, 0.0 }
 0xa57   :  { %v6688_v56 = vrot.slane %v6686_v5, 4 }
 0xa58   :  { %v6681_v31 = vpop.f32.mrf.mxu1 }
 0xa59   :  { %v6689_v42 = vmax.f32 %v6686_v5, %v6688_v56  ;;  %v6682_v40 = vadd.f32 %v9471_v41, %v6681_v31 }
 0xa5b   :  { %v6685_v52 = vadd.f32 %v6682_v40, %v4019_v20  ;;  %v6690_v22 = vrot.slane %v6689_v42, 2 }
 0xa5d   :  { %v6687_v51 = vmax.f32 %v6685_v52, 0.0  ;;  %v6691_v61 = vmax.f32 %v6689_v42, %v6690_v22 }
 0xa5f   :  { %v6694_v25 = vrot.slane %v6687_v51, 4  ;;  %v6692_v9 = vrot.slane %v6691_v61, 1 }
 0xa61   :  { %v6695_v14 = vmax.f32 %v6687_v51, %v6694_v25  ;;  %v6693_v2 = vmax.f32 %v6691_v61, %v6692_v9 }
 0xa63   :  { %v6696_v16 = vrot.slane %v6695_v14, 2 }
 0xa65   :  { %v6697_v24 = vmax.f32 %v6695_v14, %v6696_v16 }
 0xa67   :  { %v6698_v35 = vrot.slane %v6697_v24, 1 }
 0xa69   :  { %v6699_v54 = vmax.f32 %v6697_v24, %v6698_v35 }
 0xa6b   :  { %v6778_v47 = vsel %vm6777_vm6, %v6699_v54, %v6693_v2  ;;  %v6781_v39 = vsel %vm6780_vm9, %v6699_v54, %v6693_v2 }
 0xa6c   :  { %v6798_v59 = vsel %vm6797_vm10, %v6778_v47, %v6781_v39 }
 0xa6d   :  { %v6800_v20 = vsel %vm6799_vm11, %v6798_v59, %v13764_v1 }
 0xa6e   :  { %v6801_v34 = vsel %vm343_vm1, %v6800_v20, %v13738_v62  ;;  %v9473_v62 = vld [vmem:[%s14012_s23] ss:$0 sm:$0xff] }
 0xa6f   :  { %v6819_v26 = vpack.c.bf16 %v13767_v48, %v6801_v34 }
 0xa71   :  { %6879 = vmatmul.bf16.vlgmr.msra.gmra.mxu2 %v6819_v26 }
 0xa8d   :  { %v6891_v4 = vpop.permute.xlu0 %6890 }
 0xa8e   :  { %v6893_v37 = vsel %vm6797_vm10, %v6887_v17, %v6891_v4 }
 0xa8f   :  { %v6903_v60 = vpack.c.bf16 %v6893_v37, %v6893_v37 }
 0xa91   :  { %9020 = vmatmul.msk.bf16.vlgmr.msra.gmra.mxu3 %vm710_vm3, %v6903_v60 }
 0xaf4   :  { %v6880_v6 = vpop.f32.mrf.mxu2 }
 0xaf5   :  { %v6881_v1 = vadd.f32 %v9472_v49, %v6880_v6 }
 0xaf7   :  { %6957 = vst [vmem:[%s14015_s26] sm:$0xff] %v6881_v1 }
 0xafc   :  { %v6882_v44 = vpop.f32.mrf.mxu2 }
 0xafd   :  { %v6883_v43 = vadd.f32 %v9472_v49, %v6882_v44 }
 0xb14   :  { %v6943_v48 = vpop.f32.mrf.mxu3 }
 0xb15   :  { %v6944_v50 = vadd.f32 %v9473_v62, %v6943_v48 }
 0xb17   :  { %v6947_v3 = vmax.f32 %v6944_v50, 0.0 }
 0xb19   :  { %v6949_v36 = vmul.f32 %v6948_v45, %v6947_v3 }
 0xb1b   :  { %v6951_v33 = vadd.f32 %v6950_v12, %v6949_v36 }
 0xb1c   :  { %v6945_v8 = vpop.f32.mrf.mxu3 }
 0xb1d   :  { %v6953_v63 = vrot.slane %v6951_v33, 6 }
 0xb1f   :  { %v6955_v19 = vsel %vm6797_vm10, %v6883_v43, %v6953_v63 }
 0xb20   :  { %v6956_v32 = vsel %vm343_vm1, %v6955_v19, 0.0 }
 0xb21   :  { %6958 = vst [vmem:[%s14015_s26 + $0x8] sm:$0xff] %v6956_v32 }
 0xb22   :  { %6963 = vsyncpa [#allocation3], 1 }
 0xb23   :  { %6964 = vsyncpa [#allocation5], 1 }
 0xb24   :  { %6965 = vsyncpa [#allocation8], 1 }

</bundles_post_ra>
